<compile_context>
chip_gen: v7x
topology: tpu7x:2x2x1
jax: 0.10.0
libtpu: 0.0.40
codegen_flags: <defaults>
</compile_context>

<pallas_src>
import jax
import jax.numpy as jnp
from jax.experimental import pallas as pl


# ------------------------------ fused kernel ------------------------------

def _fused_autoencoder_kernel(x_ref, w1_ref, b1_ref, w2_ref, b2_ref,
                              w3_ref, b3_ref, w4_ref, b4_ref, o_ref):
    f32 = jnp.float32
    N, H, W, _ = x_ref.shape            # (2, 16, 16, 1)
    H2, W2 = H // 2, W // 2             # 8, 8
    Hq, Wq = H // 4, W // 4             # 4, 4
    C1 = b1_ref.shape[-1]               # 16
    C2 = b2_ref.shape[-1]               # 4

    # ---- encoder stage 1: Conv2d(1->16, k3, pad 1) + ReLU + MaxPool2 -------
    # In-kernel zero padding: concatenate along the (non-lane) H and W axes.
    x = x_ref[...]                                          # (N, H, W, 1)
    zrow = jnp.zeros((N, 1, W, 1), f32)
    xp = jnp.concatenate([zrow, x, zrow], axis=1)           # (N, H+2, W, 1)
    zcol = jnp.zeros((N, H + 2, 1, 1), f32)
    xp = jnp.concatenate([zcol, xp, zcol], axis=2)          # (N, H+2, W+2, 1)

    # Cin == 1: nine shifted broadcast multiply-adds on the VPU (a K=1 MXU dot
    # per tap would use <1% of the MXU contraction depth).
    w1 = w1_ref[...]                                        # (9, C1)
    acc = jnp.zeros((N, H, W, C1), f32)
    for kh in range(3):
        for kw in range(3):
            k = kh * 3 + kw
            patch = xp[:, kh:kh + H, kw:kw + W, :]          # (N, H, W, 1)
            acc = acc + patch * w1[k:k + 1, :]              # broadcast over lanes
    z1 = jnp.maximum(acc + b1_ref[...], 0.0)                # bias + ReLU

    # 2x2 max-pool: reshapes only touch sublane-and-above dims (C stays lanes).
    z1 = z1.reshape(N * H2, 2, W, C1).max(axis=1)           # pool H
    z1 = z1.reshape(N * H2 * W2, 2, C1).max(axis=1)         # pool W -> (N*H2*W2, C1)
    z1 = z1.reshape(N, H2, W2, C1)                          # (N, 8, 8, 16)

    # ---- encoder stage 2: Conv2d(16->4, k3, pad 1) + ReLU + MaxPool2 -------
    zrow2 = jnp.zeros((N, 1, W2, C1), f32)
    zp = jnp.concatenate([zrow2, z1, zrow2], axis=1)        # (N, H2+2, W2, C1)
    zcol2 = jnp.zeros((N, H2 + 2, 1, C1), f32)
    zp = jnp.concatenate([zcol2, zp, zcol2], axis=2)        # (N, H2+2, W2+2, C1)

    # im2col: one (N*H2*W2, 9*C1) @ (9*C1, C2) MXU matmul instead of 9 dots.
    cols = [zp[:, kh:kh + H2, kw:kw + W2, :].reshape(N * H2 * W2, C1)
            for kh in range(3) for kw in range(3)]
    p2 = jnp.concatenate(cols, axis=-1)                     # (128, 144)
    z2 = jnp.dot(p2, w2_ref[...], preferred_element_type=f32)
    z2 = jnp.maximum(z2 + b2_ref[...], 0.0)                 # (128, C2)

    z2 = z2.reshape(N * H2, W2, C2)
    z2 = z2.reshape(N * Hq, 2, W2, C2).max(axis=1)          # pool H
    z2 = z2.reshape(N * Hq * Wq, 2, C2).max(axis=1)         # pool W -> (32, C2)

    # ---- decoder: ConvTranspose(k2,s2) stages are spatially pointwise, so the
    # whole decoder is two matmuls on the (N*Hq*Wq, C2) latent code. ----------
    h = jnp.dot(z2, w3_ref[...], preferred_element_type=f32)    # (32, 64)  dec1
    h = jnp.maximum(h + b3_ref[...], 0.0)                       # ReLU
    p = jnp.dot(h, w4_ref[...], preferred_element_type=f32)     # (32, 16)  dec2
    p = p + b4_ref[...]
    p = 1.0 / (1.0 + jnp.exp(-p))                               # sigmoid (exp -> EUP)
    o_ref[...] = p.astype(o_ref.dtype)                          # rows=(n,i,j), cols=(a,b)


# ------------------------------ weight packing -----------------------------

def _pack_params(p):
    f32 = jnp.float32
    # encoder convs: rows ordered (kh, kw, cin), cols = cout
    w1 = jnp.transpose(p["enc1_w"], (2, 3, 1, 0)).reshape(9 * 1, 16).astype(f32)
    b1 = p["enc1_b"].reshape(1, 16).astype(f32)
    w2 = jnp.transpose(p["enc2_w"], (2, 3, 1, 0)).reshape(9 * 16, 4).astype(f32)
    b2 = p["enc2_b"].reshape(1, 4).astype(f32)
    # dec1 (ConvTranspose 4->16): cols ordered (kh, kw, cout)
    w3 = jnp.transpose(p["dec1_w"], (0, 2, 3, 1)).reshape(4, 4 * 16).astype(f32)
    b3 = jnp.tile(p["dec1_b"], 4).reshape(1, 64).astype(f32)
    # dec2 (ConvTranspose 16->1) folded onto dec1's (kh,kw,c) columns as a
    # block-diagonal matrix; output columns ordered (a, b) with
    # a = 2*kh + kh', b = 2*kw + kw'  (the final 4x4 sub-pixel patch).
    core = p["dec2_w"][:, 0, :, :].astype(f32)               # (16, kh', kw')
    eye2 = jnp.eye(2, dtype=f32)
    w4 = jnp.einsum("ckl,xh,yw->xychkwl", core, eye2, eye2).reshape(4 * 16, 16)
    b4 = jnp.full((1, 16), p["dec2_b"][0], f32)
    return (w1, b1, w2, b2, w3, b3, w4, b4)


# ------------------------------ public forward -----------------------------

def conv_autoencoder_forward(x_nchw, params):
    N, C, H, W = x_nchw.shape
    assert C == 1 and H % 4 == 0 and W % 4 == 0
    packed = _pack_params(params)
    x_nhwc = x_nchw.reshape(N, H, W, C)      # C == 1: pure bitcast, no copy

    patches = pl.pallas_call(
        _fused_autoencoder_kernel,
        out_shape=jax.ShapeDtypeStruct((N * (H // 4) * (W // 4), 16), jnp.float32),
    )(x_nhwc, *packed)

    # Sub-pixel assembly of the tiny (2 KB) result:
    #   out[n, 4*i + a, 4*j + b] = patches[(n, i, j), 4*a + b]
    y = patches.reshape(N, H // 4, W // 4, 4, 4)    # (n, i, j, a, b)
    y = jnp.transpose(y, (0, 1, 3, 2, 4))           # (n, i, a, j, b)
    return y.reshape(N, 1, H, W)                    # NCHW


# --------------------------- params / reference ----------------------------

def init_params(key):
    keys = jax.random.split(key, 8)

    def u(k, shape, fan_in):
        bound = 1.0 / (fan_in ** 0.5)
        return jax.random.uniform(k, shape, jnp.float32, -bound, bound)

    return {
        "enc1_w": u(keys[0], (16, 1, 3, 3), 1 * 9),
        "enc1_b": u(keys[1], (16,), 1 * 9),
        "enc2_w": u(keys[2], (4, 16, 3, 3), 16 * 9),
        "enc2_b": u(keys[3], (4,), 16 * 9),
        "dec1_w": u(keys[4], (4, 16, 2, 2), 4 * 4),
        "dec1_b": u(keys[5], (16,), 4 * 4),
        "dec2_w": u(keys[6], (16, 1, 2, 2), 16 * 4),
        "dec2_b": u(keys[7], (1,), 16 * 4),
    }


def _ref_forward(x_nchw, p):
    """Pure-JAX (XLA) reference for the correctness check."""
    x = jnp.transpose(x_nchw, (0, 2, 3, 1))

    def conv(x, w, b):
        wh = jnp.transpose(w, (2, 3, 1, 0))  # OIHW -> HWIO
        y = jax.lax.conv_general_dilated(
            x, wh, (1, 1), "SAME", dimension_numbers=("NHWC", "HWIO", "NHWC"))
        y = jax.nn.relu(y + b)
        return jax.lax.reduce_window(y, -jnp.inf, jax.lax.max,
                                     (1, 2, 2, 1), (1, 2, 2, 1), "VALID")

    def deconv(x, w, b):
        N, H, W, _ = x.shape
        Co = w.shape[1]
        y = jnp.einsum("nhwi,iokl->nhwklo", x, w)
        y = jnp.transpose(y, (0, 1, 3, 2, 4, 5)).reshape(N, 2 * H, 2 * W, Co)
        return y + b

    x = conv(x, p["enc1_w"], p["enc1_b"])
    x = conv(x, p["enc2_w"], p["enc2_b"])
    x = jax.nn.relu(deconv(x, p["dec1_w"], p["dec1_b"]))
    x = jax.nn.sigmoid(deconv(x, p["dec2_w"], p["dec2_b"]))
    return jnp.transpose(x, (0, 3, 1, 2))


if __name__ == "__main__":
    key = jax.random.PRNGKey(0)
    pkey, xkey = jax.random.split(key)
    params = init_params(pkey)
    x = jax.random.uniform(xkey, (2, 1, 16, 16), dtype=jnp.float32)  # NCHW

    out = jax.jit(conv_autoencoder_forward)(x, params)
    out = jax.block_until_ready(out)
    assert out.shape == (2, 1, 16, 16), out.shape

    ref = _ref_forward(x, params)
    max_err = float(jnp.max(jnp.abs(out - ref)))
    assert max_err < 1e-4, f"mismatch vs reference: {max_err}"

    print("KERNEL_OK")
</pallas_src>

<mosaic_0001>
module attributes {stable_mosaic.version = 11 : i64} {
  func.func @_fused_autoencoder_kernel(%arg0: memref<2x16x16x1xf32, #tpu.memory_space<vmem>>, %arg1: memref<9x16xf32, #tpu.memory_space<vmem>>, %arg2: memref<1x16xf32, #tpu.memory_space<vmem>>, %arg3: memref<144x4xf32, #tpu.memory_space<vmem>>, %arg4: memref<1x4xf32, #tpu.memory_space<vmem>>, %arg5: memref<4x64xf32, #tpu.memory_space<vmem>>, %arg6: memref<1x64xf32, #tpu.memory_space<vmem>>, %arg7: memref<64x16xf32, #tpu.memory_space<vmem>>, %arg8: memref<1x16xf32, #tpu.memory_space<vmem>>, %arg9: memref<32x16xf32, #tpu.memory_space<vmem>>) attributes {dimension_semantics = [], scalar_prefetch = 0 : i64, scratch_operands = 0 : i64, tpu.core_type = #tpu.core_type<tc>} {
    %c0 = arith.constant 0 : index
    %c0_0 = arith.constant 0 : index
    %c0_1 = arith.constant 0 : index
    %c0_2 = arith.constant 0 : index
    %0 = vector.load %arg0[%c0, %c0_0, %c0_1, %c0_2] : memref<2x16x16x1xf32, #tpu.memory_space<vmem>>, vector<2x16x16x1xf32>
    %cst = arith.constant 0.000000e+00 : f32
    %1 = vector.broadcast %cst : f32 to vector<2x1x16x1xf32>
    %2 = tpu.concatenate %1, %0, %1 in 1 : vector<2x1x16x1xf32>, vector<2x16x16x1xf32>, vector<2x1x16x1xf32> -> vector<2x18x16x1xf32>
    %cst_3 = arith.constant 0.000000e+00 : f32
    %3 = vector.broadcast %cst_3 : f32 to vector<2x18x1x1xf32>
    %4 = tpu.concatenate %3, %2, %3 in 2 : vector<2x18x1x1xf32>, vector<2x18x16x1xf32>, vector<2x18x1x1xf32> -> vector<2x18x18x1xf32>
    %c0_4 = arith.constant 0 : index
    %c0_5 = arith.constant 0 : index
    %5 = vector.load %arg1[%c0_4, %c0_5] : memref<9x16xf32, #tpu.memory_space<vmem>>, vector<9x16xf32>
    %cst_6 = arith.constant 0.000000e+00 : f32
    %6 = vector.broadcast %cst_6 : f32 to vector<2x16x16x16xf32>
    %7 = vector.extract_strided_slice %4 {offsets = [0, 0, 0, 0], sizes = [2, 16, 16, 1], strides = [1, 1, 1, 1]} : vector<2x18x18x1xf32> to vector<2x16x16x1xf32>
    %8 = vector.extract_strided_slice %5 {offsets = [0, 0], sizes = [1, 16], strides = [1, 1]} : vector<9x16xf32> to vector<1x16xf32>
    %9 = vector.shape_cast %8 : vector<1x16xf32> to vector<1x1x1x16xf32>
    %10 = vector.broadcast %7 : vector<2x16x16x1xf32> to vector<2x16x16x16xf32>
    %11 = vector.broadcast %9 : vector<1x1x1x16xf32> to vector<2x16x16x16xf32>
    %12 = arith.mulf %10, %11 : vector<2x16x16x16xf32>
    %13 = arith.addf %6, %12 : vector<2x16x16x16xf32>
    %14 = vector.extract_strided_slice %4 {offsets = [0, 0, 1, 0], sizes = [2, 16, 16, 1], strides = [1, 1, 1, 1]} : vector<2x18x18x1xf32> to vector<2x16x16x1xf32>
    %15 = vector.extract_strided_slice %5 {offsets = [1, 0], sizes = [1, 16], strides = [1, 1]} : vector<9x16xf32> to vector<1x16xf32>
    %16 = vector.shape_cast %15 : vector<1x16xf32> to vector<1x1x1x16xf32>
    %17 = vector.broadcast %14 : vector<2x16x16x1xf32> to vector<2x16x16x16xf32>
    %18 = vector.broadcast %16 : vector<1x1x1x16xf32> to vector<2x16x16x16xf32>
    %19 = arith.mulf %17, %18 : vector<2x16x16x16xf32>
    %20 = arith.addf %13, %19 : vector<2x16x16x16xf32>
    %21 = vector.extract_strided_slice %4 {offsets = [0, 0, 2, 0], sizes = [2, 16, 16, 1], strides = [1, 1, 1, 1]} : vector<2x18x18x1xf32> to vector<2x16x16x1xf32>
    %22 = vector.extract_strided_slice %5 {offsets = [2, 0], sizes = [1, 16], strides = [1, 1]} : vector<9x16xf32> to vector<1x16xf32>
    %23 = vector.shape_cast %22 : vector<1x16xf32> to vector<1x1x1x16xf32>
    %24 = vector.broadcast %21 : vector<2x16x16x1xf32> to vector<2x16x16x16xf32>
    %25 = vector.broadcast %23 : vector<1x1x1x16xf32> to vector<2x16x16x16xf32>
    %26 = arith.mulf %24, %25 : vector<2x16x16x16xf32>
    %27 = arith.addf %20, %26 : vector<2x16x16x16xf32>
    %28 = vector.extract_strided_slice %4 {offsets = [0, 1, 0, 0], sizes = [2, 16, 16, 1], strides = [1, 1, 1, 1]} : vector<2x18x18x1xf32> to vector<2x16x16x1xf32>
    %29 = vector.extract_strided_slice %5 {offsets = [3, 0], sizes = [1, 16], strides = [1, 1]} : vector<9x16xf32> to vector<1x16xf32>
    %30 = vector.shape_cast %29 : vector<1x16xf32> to vector<1x1x1x16xf32>
    %31 = vector.broadcast %28 : vector<2x16x16x1xf32> to vector<2x16x16x16xf32>
    %32 = vector.broadcast %30 : vector<1x1x1x16xf32> to vector<2x16x16x16xf32>
    %33 = arith.mulf %31, %32 : vector<2x16x16x16xf32>
    %34 = arith.addf %27, %33 : vector<2x16x16x16xf32>
    %35 = vector.extract_strided_slice %4 {offsets = [0, 1, 1, 0], sizes = [2, 16, 16, 1], strides = [1, 1, 1, 1]} : vector<2x18x18x1xf32> to vector<2x16x16x1xf32>
    %36 = vector.extract_strided_slice %5 {offsets = [4, 0], sizes = [1, 16], strides = [1, 1]} : vector<9x16xf32> to vector<1x16xf32>
    %37 = vector.shape_cast %36 : vector<1x16xf32> to vector<1x1x1x16xf32>
    %38 = vector.broadcast %35 : vector<2x16x16x1xf32> to vector<2x16x16x16xf32>
    %39 = vector.broadcast %37 : vector<1x1x1x16xf32> to vector<2x16x16x16xf32>
    %40 = arith.mulf %38, %39 : vector<2x16x16x16xf32>
    %41 = arith.addf %34, %40 : vector<2x16x16x16xf32>
    %42 = vector.extract_strided_slice %4 {offsets = [0, 1, 2, 0], sizes = [2, 16, 16, 1], strides = [1, 1, 1, 1]} : vector<2x18x18x1xf32> to vector<2x16x16x1xf32>
    %43 = vector.extract_strided_slice %5 {offsets = [5, 0], sizes = [1, 16], strides = [1, 1]} : vector<9x16xf32> to vector<1x16xf32>
    %44 = vector.shape_cast %43 : vector<1x16xf32> to vector<1x1x1x16xf32>
    %45 = vector.broadcast %42 : vector<2x16x16x1xf32> to vector<2x16x16x16xf32>
    %46 = vector.broadcast %44 : vector<1x1x1x16xf32> to vector<2x16x16x16xf32>
    %47 = arith.mulf %45, %46 : vector<2x16x16x16xf32>
    %48 = arith.addf %41, %47 : vector<2x16x16x16xf32>
    %49 = vector.extract_strided_slice %4 {offsets = [0, 2, 0, 0], sizes = [2, 16, 16, 1], strides = [1, 1, 1, 1]} : vector<2x18x18x1xf32> to vector<2x16x16x1xf32>
    %50 = vector.extract_strided_slice %5 {offsets = [6, 0], sizes = [1, 16], strides = [1, 1]} : vector<9x16xf32> to vector<1x16xf32>
    %51 = vector.shape_cast %50 : vector<1x16xf32> to vector<1x1x1x16xf32>
    %52 = vector.broadcast %49 : vector<2x16x16x1xf32> to vector<2x16x16x16xf32>
    %53 = vector.broadcast %51 : vector<1x1x1x16xf32> to vector<2x16x16x16xf32>
    %54 = arith.mulf %52, %53 : vector<2x16x16x16xf32>
    %55 = arith.addf %48, %54 : vector<2x16x16x16xf32>
    %56 = vector.extract_strided_slice %4 {offsets = [0, 2, 1, 0], sizes = [2, 16, 16, 1], strides = [1, 1, 1, 1]} : vector<2x18x18x1xf32> to vector<2x16x16x1xf32>
    %57 = vector.extract_strided_slice %5 {offsets = [7, 0], sizes = [1, 16], strides = [1, 1]} : vector<9x16xf32> to vector<1x16xf32>
    %58 = vector.shape_cast %57 : vector<1x16xf32> to vector<1x1x1x16xf32>
    %59 = vector.broadcast %56 : vector<2x16x16x1xf32> to vector<2x16x16x16xf32>
    %60 = vector.broadcast %58 : vector<1x1x1x16xf32> to vector<2x16x16x16xf32>
    %61 = arith.mulf %59, %60 : vector<2x16x16x16xf32>
    %62 = arith.addf %55, %61 : vector<2x16x16x16xf32>
    %63 = vector.extract_strided_slice %4 {offsets = [0, 2, 2, 0], sizes = [2, 16, 16, 1], strides = [1, 1, 1, 1]} : vector<2x18x18x1xf32> to vector<2x16x16x1xf32>
    %64 = vector.extract_strided_slice %5 {offsets = [8, 0], sizes = [1, 16], strides = [1, 1]} : vector<9x16xf32> to vector<1x16xf32>
    %65 = vector.shape_cast %64 : vector<1x16xf32> to vector<1x1x1x16xf32>
    %66 = vector.broadcast %63 : vector<2x16x16x1xf32> to vector<2x16x16x16xf32>
    %67 = vector.broadcast %65 : vector<1x1x1x16xf32> to vector<2x16x16x16xf32>
    %68 = arith.mulf %66, %67 : vector<2x16x16x16xf32>
    %69 = arith.addf %62, %68 : vector<2x16x16x16xf32>
    %c0_7 = arith.constant 0 : index
    %c0_8 = arith.constant 0 : index
    %70 = vector.load %arg2[%c0_7, %c0_8] : memref<1x16xf32, #tpu.memory_space<vmem>>, vector<1x16xf32>
    %71 = vector.shape_cast %70 : vector<1x16xf32> to vector<1x1x1x16xf32>
    %72 = vector.broadcast %71 : vector<1x1x1x16xf32> to vector<2x16x16x16xf32>
    %73 = arith.addf %69, %72 : vector<2x16x16x16xf32>
    %cst_9 = arith.constant 0.000000e+00 : f32
    %74 = vector.broadcast %cst_9 : f32 to vector<2x16x16x16xf32>
    %75 = arith.maximumf %73, %74 : vector<2x16x16x16xf32>
    %76 = vector.shape_cast %75 : vector<2x16x16x16xf32> to vector<16x2x16x16xf32>
    %cst_10 = arith.constant dense<0xFF800000> : vector<16x16x16xf32>
    %77 = vector.multi_reduction <maximumf>, %76, %cst_10 [1] : vector<16x2x16x16xf32> to vector<16x16x16xf32>
    %78 = vector.shape_cast %77 : vector<16x16x16xf32> to vector<128x2x16xf32>
    %cst_11 = arith.constant dense<0xFF800000> : vector<128x16xf32>
    %79 = vector.multi_reduction <maximumf>, %78, %cst_11 [1] : vector<128x2x16xf32> to vector<128x16xf32>
    %80 = vector.shape_cast %79 : vector<128x16xf32> to vector<2x8x8x16xf32>
    %cst_12 = arith.constant 0.000000e+00 : f32
    %81 = vector.broadcast %cst_12 : f32 to vector<2x1x8x16xf32>
    %82 = tpu.concatenate %81, %80, %81 in 1 : vector<2x1x8x16xf32>, vector<2x8x8x16xf32>, vector<2x1x8x16xf32> -> vector<2x10x8x16xf32>
    %cst_13 = arith.constant 0.000000e+00 : f32
    %83 = vector.broadcast %cst_13 : f32 to vector<2x10x1x16xf32>
    %84 = tpu.concatenate %83, %82, %83 in 2 : vector<2x10x1x16xf32>, vector<2x10x8x16xf32>, vector<2x10x1x16xf32> -> vector<2x10x10x16xf32>
    %85 = vector.extract_strided_slice %84 {offsets = [0, 0, 0, 0], sizes = [2, 8, 8, 16], strides = [1, 1, 1, 1]} : vector<2x10x10x16xf32> to vector<2x8x8x16xf32>
    %86 = vector.shape_cast %85 : vector<2x8x8x16xf32> to vector<128x16xf32>
    %87 = vector.extract_strided_slice %84 {offsets = [0, 0, 1, 0], sizes = [2, 8, 8, 16], strides = [1, 1, 1, 1]} : vector<2x10x10x16xf32> to vector<2x8x8x16xf32>
    %88 = vector.shape_cast %87 : vector<2x8x8x16xf32> to vector<128x16xf32>
    %89 = vector.extract_strided_slice %84 {offsets = [0, 0, 2, 0], sizes = [2, 8, 8, 16], strides = [1, 1, 1, 1]} : vector<2x10x10x16xf32> to vector<2x8x8x16xf32>
    %90 = vector.shape_cast %89 : vector<2x8x8x16xf32> to vector<128x16xf32>
    %91 = vector.extract_strided_slice %84 {offsets = [0, 1, 0, 0], sizes = [2, 8, 8, 16], strides = [1, 1, 1, 1]} : vector<2x10x10x16xf32> to vector<2x8x8x16xf32>
    %92 = vector.shape_cast %91 : vector<2x8x8x16xf32> to vector<128x16xf32>
    %93 = vector.extract_strided_slice %84 {offsets = [0, 1, 1, 0], sizes = [2, 8, 8, 16], strides = [1, 1, 1, 1]} : vector<2x10x10x16xf32> to vector<2x8x8x16xf32>
    %94 = vector.shape_cast %93 : vector<2x8x8x16xf32> to vector<128x16xf32>
    %95 = vector.extract_strided_slice %84 {offsets = [0, 1, 2, 0], sizes = [2, 8, 8, 16], strides = [1, 1, 1, 1]} : vector<2x10x10x16xf32> to vector<2x8x8x16xf32>
    %96 = vector.shape_cast %95 : vector<2x8x8x16xf32> to vector<128x16xf32>
    %97 = vector.extract_strided_slice %84 {offsets = [0, 2, 0, 0], sizes = [2, 8, 8, 16], strides = [1, 1, 1, 1]} : vector<2x10x10x16xf32> to vector<2x8x8x16xf32>
    %98 = vector.shape_cast %97 : vector<2x8x8x16xf32> to vector<128x16xf32>
    %99 = vector.extract_strided_slice %84 {offsets = [0, 2, 1, 0], sizes = [2, 8, 8, 16], strides = [1, 1, 1, 1]} : vector<2x10x10x16xf32> to vector<2x8x8x16xf32>
    %100 = vector.shape_cast %99 : vector<2x8x8x16xf32> to vector<128x16xf32>
    %101 = vector.extract_strided_slice %84 {offsets = [0, 2, 2, 0], sizes = [2, 8, 8, 16], strides = [1, 1, 1, 1]} : vector<2x10x10x16xf32> to vector<2x8x8x16xf32>
    %102 = vector.shape_cast %101 : vector<2x8x8x16xf32> to vector<128x16xf32>
    %103 = tpu.concatenate %86, %88, %90, %92, %94, %96, %98, %100, %102 in 1 : vector<128x16xf32>, vector<128x16xf32>, vector<128x16xf32>, vector<128x16xf32>, vector<128x16xf32>, vector<128x16xf32>, vector<128x16xf32>, vector<128x16xf32>, vector<128x16xf32> -> vector<128x144xf32>
    %c0_14 = arith.constant 0 : index
    %c0_15 = arith.constant 0 : index
    %104 = vector.load %arg3[%c0_14, %c0_15] : memref<144x4xf32, #tpu.memory_space<vmem>>, vector<144x4xf32>
    %cst_16 = arith.constant dense<0.000000e+00> : vector<128x4xf32>
    %105 = tpu.matmul %103, %104, %cst_16 {dimension_numbers = #tpu.dot_dimension_numbers<[1], [0], [0], [1], [0, 0, 1, 1], [], []>} : vector<128x144xf32>, vector<144x4xf32>, vector<128x4xf32> -> vector<128x4xf32>
    %c0_17 = arith.constant 0 : index
    %c0_18 = arith.constant 0 : index
    %106 = vector.load %arg4[%c0_17, %c0_18] : memref<1x4xf32, #tpu.memory_space<vmem>>, vector<1x4xf32>
    %107 = vector.broadcast %106 : vector<1x4xf32> to vector<128x4xf32>
    %108 = arith.addf %105, %107 : vector<128x4xf32>
    %cst_19 = arith.constant 0.000000e+00 : f32
    %109 = vector.broadcast %cst_19 : f32 to vector<128x4xf32>
    %110 = arith.maximumf %108, %109 : vector<128x4xf32>
    %111 = vector.shape_cast %110 : vector<128x4xf32> to vector<16x8x4xf32>
    %112 = vector.shape_cast %111 : vector<16x8x4xf32> to vector<8x2x8x4xf32>
    %cst_20 = arith.constant dense<0xFF800000> : vector<8x8x4xf32>
    %113 = vector.multi_reduction <maximumf>, %112, %cst_20 [1] : vector<8x2x8x4xf32> to vector<8x8x4xf32>
    %114 = vector.shape_cast %113 : vector<8x8x4xf32> to vector<32x2x4xf32>
    %cst_21 = arith.constant dense<0xFF800000> : vector<32x4xf32>
    %115 = vector.multi_reduction <maximumf>, %114, %cst_21 [1] : vector<32x2x4xf32> to vector<32x4xf32>
    %c0_22 = arith.constant 0 : index
    %c0_23 = arith.constant 0 : index
    %116 = vector.load %arg5[%c0_22, %c0_23] : memref<4x64xf32, #tpu.memory_space<vmem>>, vector<4x64xf32>
    %cst_24 = arith.constant dense<0.000000e+00> : vector<32x64xf32>
    %117 = tpu.matmul %115, %116, %cst_24 {dimension_numbers = #tpu.dot_dimension_numbers<[1], [0], [0], [1], [0, 0, 1, 1], [], []>} : vector<32x4xf32>, vector<4x64xf32>, vector<32x64xf32> -> vector<32x64xf32>
    %c0_25 = arith.constant 0 : index
    %c0_26 = arith.constant 0 : index
    %118 = vector.load %arg6[%c0_25, %c0_26] : memref<1x64xf32, #tpu.memory_space<vmem>>, vector<1x64xf32>
    %119 = vector.broadcast %118 : vector<1x64xf32> to vector<32x64xf32>
    %120 = arith.addf %117, %119 : vector<32x64xf32>
    %cst_27 = arith.constant 0.000000e+00 : f32
    %121 = vector.broadcast %cst_27 : f32 to vector<32x64xf32>
    %122 = arith.maximumf %120, %121 : vector<32x64xf32>
    %c0_28 = arith.constant 0 : index
    %c0_29 = arith.constant 0 : index
    %123 = vector.load %arg7[%c0_28, %c0_29] : memref<64x16xf32, #tpu.memory_space<vmem>>, vector<64x16xf32>
    %cst_30 = arith.constant dense<0.000000e+00> : vector<32x16xf32>
    %124 = tpu.matmul %122, %123, %cst_30 {dimension_numbers = #tpu.dot_dimension_numbers<[1], [0], [0], [1], [0, 0, 1, 1], [], []>} : vector<32x64xf32>, vector<64x16xf32>, vector<32x16xf32> -> vector<32x16xf32>
    %c0_31 = arith.constant 0 : index
    %c0_32 = arith.constant 0 : index
    %125 = vector.load %arg8[%c0_31, %c0_32] : memref<1x16xf32, #tpu.memory_space<vmem>>, vector<1x16xf32>
    %126 = vector.broadcast %125 : vector<1x16xf32> to vector<32x16xf32>
    %127 = arith.addf %124, %126 : vector<32x16xf32>
    %cst_33 = arith.constant 0.000000e+00 : f32
    %128 = vector.broadcast %cst_33 : f32 to vector<32x16xf32>
    %129 = arith.subf %128, %127 : vector<32x16xf32>
    %130 = math.exp %129 : vector<32x16xf32>
    %cst_34 = arith.constant 1.000000e+00 : f32
    %131 = vector.broadcast %cst_34 : f32 to vector<32x16xf32>
    %132 = arith.addf %131, %130 : vector<32x16xf32>
    %cst_35 = arith.constant 1.000000e+00 : f32
    %133 = vector.broadcast %cst_35 : f32 to vector<32x16xf32>
    %134 = arith.divf %133, %132 : vector<32x16xf32>
    %c0_36 = arith.constant 0 : index
    %c0_37 = arith.constant 0 : index
    %135 = vector.load %arg9[%c0_36, %c0_37] : memref<32x16xf32, #tpu.memory_space<vmem>>, vector<32x16xf32>
    tpu.vector_store %arg9[%c0_36, %c0_37], %134 {strides = array<i32>} : memref<32x16xf32, #tpu.memory_space<vmem>>, vector<32x16xf32>,
    return
  }
}

</mosaic_0001>

<bundles_post_ra>
// kernel: tile.8
= control target key start
LH: loop header
LB: loop body
LE: loop exit
PB: predicated region body
PF: predicated region fallthrough
CT: control target
= control target key end

     0   :  { %s22_s0 = inlined_call_operand.vmem [shape: f32[16], index: 0, kind: input, shape index: {}]   ;;  %s23_s1 = inlined_call_operand.vmem [shape: f32[4,16], index: 1, kind: output, shape index: {}]  }
   0x1   :  { %v4_v0 = vld [vmem:[%s22_s0] ss:$0 sm:$0xff] }
   0x2   :  { %5 = vst [vmem:[%s23_s1] sm:$0xf] %v4_v0 }

// kernel: tile.9
= control target key start
LH: loop header
LB: loop body
LE: loop exit
PB: predicated region body
PF: predicated region fallthrough
CT: control target
= control target key end

     0   :  { %vm7_vm0 = vcmask 130048   ;;  %s37_s8 = smov 16   ;;  %s38_s9 = smov 32   ;;  %vm13_vm1 = vcmask 523648   ;;  %vm19_vm2 = vcmask 392448   ;;  %vm25_vm3 = vcmask 261248   ;;  %s55_s0 = inlined_call_operand.vmem [shape: f32[4,16], index: 0, kind: input, shape index: {}]   ;;  %s56_s1 = inlined_call_operand.vmem [shape: f32[1,64], index: 1, kind: output, shape index: {}]  }
   0x1   :  { %v4_v0 = vld [vmem:[%s55_s0] sm:$0xf]  ;;  %s36_s0 = smov 48  }
   0x2   :  { %5 = vst [vmem:[#allocation1] sm:$0xf] %v4_v0 }
   0x9   :  { %v10_v1 = vld [vmem:[#allocation1 + $0x3] sm:$0x1]   ;;  %v22_v2 = vld [vmem:[#allocation1 + $0x1] sm:$0x1]   ;;  %v6_v3 = vld [vmem:[#allocation1] sm:$0x1]  }
   0xa   :  { %11 = vrot.lane.b32.xlu0 %v10_v1, %s36_s0  ;;  %23 = vrot.lane.b32.xlu1 %v22_v2, %s37_s8  ;;  %v16_v4 = vld [vmem:[#allocation1 + $0x2] sm:$0x1]   ;;  %8 = vst.msk [vmem:[#allocation0] sm:$0x1] %vm7_vm0, %v6_v3  }
   0xe   :  { %17 = vrot.lane.b32.xlu0 %v16_v4, %s38_s9 }
  0x7c   :  { %v12_v5 = vpop.permute.xlu0 %11   ;;  %v24_v6 = vpop.permute.xlu1 %23  }
  0x7d   :  { %14 = vst.msk [vmem:[#allocation0] sm:$0x1] %vm13_vm1, %v12_v5  }
  0x80   :  { %v18_v7 = vpop.permute.xlu0 %17  }
  0x81   :  { %20 = vst.msk [vmem:[#allocation0] sm:$0x1] %vm19_vm2, %v18_v7  }
  0x82   :  { %26 = vst.msk [vmem:[#allocation0] sm:$0x1] %vm25_vm3, %v24_v6  }
  0x89   :  { %v30_v8 = vld [vmem:[#allocation0] sm:$0x1] }
  0x8a   :  { %32 = vst [vmem:[%s56_s1] sm:$0x1] %v30_v8 }

// kernel: conv_autoencoder_forward.1
= control target key start
LH: loop header
LB: loop body
LE: loop exit
PB: predicated region body
PF: predicated region fallthrough
CT: control target
= control target key end

     0   :  { %vm161_vm0 = vcmask 1040384   ;;  %v8211_v0 = vmov 0   ;;  %v8212_v3 = vmov 0.0   ;;  %vm1615_vm1 = vcmask 1045504   ;;  %s8215_s21 = smov 16   ;;  %s8216_s24 = smov 48   ;;  %s14092_s0 = inlined_call_operand.vmem [shape: f32[2,16,16,1], index: 0, kind: input, shape index: {}]   ;;  %s14093_s1 = inlined_call_operand.vmem [shape: f32[9,16], index: 1, kind: input, shape index: {}]   ;;  %s14094_s2 = inlined_call_operand.vmem [shape: f32[1,16], index: 2, kind: input, shape index: {}]   ;;  %s14095_s3 = inlined_call_operand.vmem [shape: f32[144,4], index: 3, kind: input, shape index: {}]   ;;  %s14096_s4 = inlined_call_operand.vmem [shape: f32[1,4], index: 4, kind: input, shape index: {}]   ;;  %s14097_s5 = inlined_call_operand.vmem [shape: f32[4,64], index: 5, kind: input, shape index: {}]   ;;  %s14098_s7 = inlined_call_operand.vmem [shape: f32[64,16], index: 7, kind: input, shape index: {}]   ;;  %s14099_s6 = inlined_call_operand.vmem [shape: f32[1,64], index: 6, kind: input, shape index: {}]   ;;  %s14100_s8 = inlined_call_operand.vmem [shape: f32[1,16], index: 8, kind: input, shape index: {}]   ;;  %s14101_s9 = inlined_call_operand.vmem [shape: f32[32,16], index: 9, kind: output, shape index: {}]  }
   0x1   :  { %7923 = vset.pattern.permute.xlu1 %v8211_v0  ;;  %7917 = vset.pattern.permute.xlu0 %v8211_v0  ;;  %v32_v1 = vld [vmem:[%s14092_s0] sm:$0xff]  ;;  %v33_v2 = vld [vmem:[%s14092_s0 + $0x8] sm:$0xff]  ;;  %v162_v4 = vrot.slane %v8212_v3, 7  ;;  %v34_v5 = vld [vmem:[%s14092_s0 + $0x10] sm:$0xff]  ;;  %vm1145_vm2 = vcmask 1046528   ;;  %vm4230_vm3 = vcmask 130048  }
   0x2   :  { %v164_v6 = vrot.slane %v32_v1, 7  ;;  %v165_v7 = vrot.slane %v33_v2, 7  ;;  %v167_v8 = vrot.slane %v34_v5, 7  ;;  %v36_v10 = vld [vmem:[%s14092_s0 + $0x20] sm:$0xff]  ;;  %v35_v13 = vld [vmem:[%s14092_s0 + $0x18] sm:$0xff]  ;;  %v37_v18 = vld [vmem:[%s14092_s0 + $0x28] sm:$0xff] }
   0x3   :  { %v8282_v9 = vsel %vm161_vm0, 0.0, %v162_v4  ;;  %v170_v15 = vrot.slane %v36_v10, 7  ;;  %v168_v17 = vrot.slane %v35_v13, 7  ;;  %v171_v21 = vrot.slane %v37_v18, 7  ;;  %v38_v22 = vld [vmem:[%s14092_s0 + $0x30] sm:$0xff]  ;;  %v40_v26 = vld [vmem:[%s14092_s0 + $0x40] sm:$0xff] }
   0x4   :  { %14441 = vst [vmem:[#allocation2_spill] sm:$0xff] %v8282_v9  ;;  %v166_v11 = vsel %vm161_vm0, %v164_v6, %v165_v7  ;;  %v7918_v12 = vpack.i.bf16 %v162_v4, %v8282_v9  ;;  %v327_v14 = vsel %vm161_vm0, 0.0, %v167_v8  ;;  %v326_v16 = vsel %vm161_vm0, 0.0, %v164_v6  ;;  %v39_v27 = vld [vmem:[%s14092_s0 + $0x38] sm:$0xff]  ;;  %v41_v32 = vld [vmem:[%s14092_s0 + $0x48] sm:$0xff]  ;;  %v42_v36 = vld [vmem:[%s14092_s0 + $0x50] sm:$0xff] }
   0x5   :  { %408 = vperm.xlu1 %7923, %v166_v11   ;;  %v328_v19 = vsel %vm161_vm0, 0.0, %v170_v15  ;;  %v169_v20 = vsel %vm161_vm0, %v167_v8, %v168_v17  ;;  %v8303_v23 = vsel %vm161_vm0, %v162_v4, 0.0  ;;  %v173_v24 = vrot.slane %v38_v22, 7  ;;  %v44_v40 = vld [vmem:[%s14092_s0 + $0x60] sm:$0xff]  ;;  %v43_v41 = vld [vmem:[%s14092_s0 + $0x58] sm:$0xff]  ;;  %v45_v46 = vld [vmem:[%s14092_s0 + $0x68] sm:$0xff] }
   0x6   :  { %7919 = vperm.xlu0 %7917, %v7918_v12   ;;  %14442 = vst [vmem:[#allocation3_spill] sm:$0xff] %v8303_v23  ;;  %v172_v25 = vsel %vm161_vm0, %v170_v15, %v171_v21  ;;  %v176_v29 = vrot.slane %v40_v26, 7  ;;  %v359_v30 = vsel %vm161_vm0, %v165_v7, 0.0  ;;  %v174_v31 = vrot.slane %v39_v27, 7  ;;  %v46_v50 = vld [vmem:[%s14092_s0 + $0x70] sm:$0xff]  ;;  %v48_v54 = vld [vmem:[%s14092_s0 + $0x80] sm:$0xff] }
   0x7   :  { %v329_v28 = vsel %vm161_vm0, 0.0, %v173_v24  ;;  %v177_v35 = vrot.slane %v41_v32, 7  ;;  %v360_v37 = vsel %vm161_vm0, %v168_v17, 0.0  ;;  %v179_v38 = vrot.slane %v42_v36, 7  ;;  %v47_v55 = vld [vmem:[%s14092_s0 + $0x78] sm:$0xff]  ;;  %v49_v60 = vld [vmem:[%s14092_s0 + $0x88] sm:$0xff] }
   0x8   :  { %v330_v33 = vsel %vm161_vm0, 0.0, %v176_v29  ;;  %v175_v34 = vsel %vm161_vm0, %v173_v24, %v174_v31  ;;  %v182_v43 = vrot.slane %v44_v40, 7  ;;  %v361_v44 = vsel %vm161_vm0, %v171_v21, 0.0  ;;  %v50_v0 = vld [vmem:[%s14092_s0 + $0x90] sm:$0xff]  ;;  %v52_v4 = vld [vmem:[%s14092_s0 + $0xa0] sm:$0xff]  ;;  %v51_v5 = vld [vmem:[%s14092_s0 + $0x98] sm:$0xff] }
   0x9   :  { %413 = vperm.xlu1 %7923, %v327_v14   ;;  %v178_v39 = vsel %vm161_vm0, %v176_v29, %v177_v35  ;;  %v331_v42 = vsel %vm161_vm0, 0.0, %v179_v38  ;;  %v180_v45 = vrot.slane %v43_v41, 7  ;;  %v183_v49 = vrot.slane %v45_v46, 7  ;;  %v53_v11 = vld [vmem:[%s14092_s0 + $0xa8] sm:$0xff]  ;;  %v70_v15 = vld [vmem:[%s14092_s0 + $0x130] sm:$0xff]  ;;  %v56_v32 = vld [vmem:[%s14092_s0 + $0xc0] sm:$0xff] }
   0xa   :  { %404 = vperm.xlu0 %7917, %v326_v16   ;;  %v332_v47 = vsel %vm161_vm0, 0.0, %v182_v43  ;;  %v362_v51 = vsel %vm161_vm0, %v174_v31, 0.0  ;;  %v185_v52 = vrot.slane %v46_v50, 7  ;;  %v188_v57 = vrot.slane %v48_v54, 7  ;;  %v54_v26 = vld [vmem:[%s14092_s0 + $0xb0] sm:$0xff]  ;;  %v73_v27 = vld [vmem:[%s14092_s0 + $0x148] sm:$0xff] }
   0xb   :  { %v181_v48 = vsel %vm161_vm0, %v179_v38, %v180_v45  ;;  %v184_v53 = vsel %vm161_vm0, %v182_v43, %v183_v49  ;;  %v363_v58 = vsel %vm161_vm0, %v177_v35, 0.0  ;;  %v186_v59 = vrot.slane %v47_v55, 7  ;;  %v57_v38 = vld [vmem:[%s14092_s0 + $0xc8] sm:$0xff]  ;;  %v76_v46 = vld [vmem:[%s14092_s0 + $0x160] sm:$0xff]  ;;  %s8217_s25 = smov 80   ;;  %s8218_s26 = smov 64  }
   0xc   :  { %v333_v56 = vsel %vm161_vm0, 0.0, %v185_v52  ;;  %v334_v61 = vsel %vm161_vm0, 0.0, %v188_v57  ;;  %v189_v63 = vrot.slane %v49_v60, 7  ;;  %v364_v1 = vsel %vm161_vm0, %v180_v45, 0.0  ;;  %v60_v60 = vld [vmem:[%s14092_s0 + $0xe0] sm:$0xff]  ;;  %s8219_s27 = smov 96  }
   0xd   :  { %422 = vperm.xlu1 %7923, %v328_v19   ;;  %v187_v62 = vsel %vm161_vm0, %v185_v52, %v186_v59  ;;  %v191_v2 = vrot.slane %v50_v0, 7  ;;  %v194_v7 = vrot.slane %v52_v4, 7  ;;  %v365_v8 = vsel %vm161_vm0, %v183_v49, 0.0  ;;  %v72_v19 = vld [vmem:[%s14092_s0 + $0x140] sm:$0xff]  ;;  %v8427_v52 = vld [vmem:[%s14092_s0 + $0x168] sm:$0xff]  ;;  %s8220_s28 = smov 112  }
   0xe   :  { %417 = vperm.xlu0 %7917, %v169_v20   ;;  %v190_v3 = vsel %vm161_vm0, %v188_v57, %v189_v63  ;;  %v192_v10 = vrot.slane %v51_v5, 7  ;;  %v195_v14 = vrot.slane %v53_v11, 7  ;;  %v366_v16 = vsel %vm161_vm0, %v186_v59, 0.0  ;;  %v71_v20 = vld [vmem:[%s14092_s0 + $0x138] sm:$0xff]  ;;  %v80_v11 = vld [vmem:[%s14092_s0 + $0x180] sm:$0xff] }
   0xf   :  { %v335_v6 = vsel %vm161_vm0, 0.0, %v191_v2  ;;  %v336_v12 = vsel %vm161_vm0, 0.0, %v194_v7  ;;  %v221_v17 = vrot.slane %v70_v15, 7  ;;  %v224_v22 = vrot.slane %v72_v19, 7 }
  0x10   :  { %v193_v13 = vsel %vm161_vm0, %v191_v2, %v192_v10  ;;  %v196_v18 = vsel %vm161_vm0, %v194_v7, %v195_v14  ;;  %v367_v24 = vsel %vm161_vm0, %v189_v63, 0.0  ;;  %v197_v29 = vrot.slane %v54_v26, 7  ;;  %v61_v2 = vld [vmem:[%s14092_s0 + $0xe8] sm:$0xff] }
  0x11   :  { %802 = vperm.xlu1 %7923, %v8303_v23   ;;  %v345_v21 = vsel %vm161_vm0, 0.0, %v221_v17  ;;  %v225_v31 = vrot.slane %v73_v27, 7  ;;  %v200_v35 = vrot.slane %v56_v32, 7  ;;  %v201_v41 = vrot.slane %v57_v38, 7  ;;  %v8494_v32 = vld [vmem:[%s14092_s0 + $0x190] sm:$0xff] }
  0x12   :  { %426 = vperm.xlu0 %7917, %v172_v25   ;;  %v222_v25 = vrot.slane %v71_v20, 7  ;;  %v368_v43 = vsel %vm161_vm0, %v192_v10, 0.0  ;;  %v230_v49 = vrot.slane %v76_v46, 7  ;;  %v369_v50 = vsel %vm161_vm0, %v195_v14, 0.0 }
  0x13   :  { %v226_v36 = vsel %vm161_vm0, %v224_v22, %v225_v31  ;;  %v202_v45 = vsel %vm161_vm0, %v200_v35, %v201_v41  ;;  %v231_v55 = vrot.slane %v8427_v52, 7  ;;  %v206_v63 = vrot.slane %v60_v60, 7  ;;  %v8535_v52 = vld [vmem:[%s14092_s0 + $0x1a8] sm:$0xff] }
  0x14   :  { %v378_v57 = vsel %vm161_vm0, %v222_v25, 0.0  ;;  %v379_v0 = vsel %vm161_vm0, %v225_v31, 0.0  ;;  %v207_v5 = vrot.slane %v61_v2, 7  ;;  %v236_v14 = vrot.slane %v80_v11, 7  ;;  %v8585_v11 = vld [vmem:[%s14092_s0 + $0x1b8] sm:$0xff] }
  0x15   :  { %431 = vperm.xlu1 %7923, %v329_v28   ;;  %v346_v28 = vsel %vm161_vm0, 0.0, %v224_v22  ;;  %v232_v59 = vsel %vm161_vm0, %v230_v49, %v231_v55  ;;  %v672_v15 = vlaneseq  ;;  %v6313_v26 = vrot.slane %v8303_v23, 2  ;;  %14444 = vst [vmem:[#allocation5_spill] sm:$0xff] %v8585_v11 }
  0x16   :  { %807 = vperm.xlu0 %7917, %v359_v30   ;;  %v223_v30 = vsel %vm161_vm0, %v221_v17, %v222_v25  ;;  %v208_v10 = vsel %vm161_vm0, %v206_v63, %v207_v5  ;;  %v350_v19 = vsel %vm161_vm0, 0.0, %v236_v14  ;;  %v6312_v25 = vrot.slane %v8282_v9, 2 }
  0x17   :  { %v381_v46 = vsel %vm161_vm0, %v231_v55, 0.0  ;;  %v8213_v2 = vmov 1983009808   ;;  %vm5031_vm4 = vcmask 123904   ;;  %vm6056_vm5 = vcmask 1041409  }
  0x18   :  { %vm6058_vm6 = vcmask 1042434   ;;  %vm6060_vm7 = vcmask 1043459   ;;  %vm14440_vm8 = vcmask 1044484   ;;  %vm14437_vm9 = vcmask 1045509  }
  0x19   :  { %440 = vperm.xlu1 %7923, %v330_v33   ;;  %v55_v33 = vld [vmem:[%s14092_s0 + $0xb8] sm:$0xff]  ;;  %vm6066_vm10 = vcmask 1046534   ;;  %vm6068_vm11 = vcmask 1047559   ;;  %vm14438_vm12 = vcmask 261120   ;;  %vm14439_vm13 = vcmask 392192  }
  0x1a   :  { %435 = vperm.xlu0 %7917, %v175_v34   ;;  %v337_v34 = vsel %vm161_vm0, 0.0, %v197_v29  ;;  %vm14436_vm14 = vcmask 523264   ;;  %vm6762_vm15 = vcmask 654336  }
  0x1d   :  { %812 = vperm.xlu1 %7923, %v360_v37   ;;  %v198_v37 = vrot.slane %v55_v33, 7  ;;  %v8499_v33 = vld [vmem:[%s14092_s0 + $0x108] sm:$0xff] }
  0x1e   :  { %444 = vperm.xlu0 %7917, %v178_v39   ;;  %v338_v39 = vsel %vm161_vm0, 0.0, %v200_v35 }
  0x1f   :  { %v199_v40 = vsel %vm161_vm0, %v197_v29, %v198_v37  ;;  %v370_v7 = vsel %vm161_vm0, %v198_v37, 0.0 }
  0x21   :  { %449 = vperm.xlu1 %7923, %v331_v42   ;;  %v74_v42 = vld [vmem:[%s14092_s0 + $0x150] sm:$0xff] }
  0x22   :  { %817 = vperm.xlu0 %7917, %v361_v44   ;;  %v227_v44 = vrot.slane %v74_v42, 7 }
  0x25   :  { %458 = vperm.xlu1 %7923, %v332_v47   ;;  %v8419_v47 = vld [vmem:[%s14092_s0 + $0x158] sm:$0xff] }
  0x26   :  { %453 = vperm.xlu0 %7917, %v181_v48   ;;  %v347_v48 = vsel %vm161_vm0, 0.0, %v227_v44 }
  0x29   :  { %822 = vperm.xlu1 %7923, %v362_v51   ;;  %v228_v51 = vrot.slane %v8419_v47, 7 }
  0x2a   :  { %462 = vperm.xlu0 %7917, %v184_v53   ;;  %v348_v53 = vsel %vm161_vm0, 0.0, %v230_v49 }
  0x2b   :  { %v229_v54 = vsel %vm161_vm0, %v227_v44, %v228_v51  ;;  %v239_v44 = vrot.slane %v8494_v32, 7  ;;  %v8603_v32 = vld [vmem:[%s14092_s0 + $0x1d0] sm:$0xff] }
  0x2c   :  { %14446 = vst [vmem:[#allocation7_spill] sm:$0xff] %v8603_v32 }
  0x2d   :  { %467 = vperm.xlu1 %7923, %v333_v56   ;;  %v58_v56 = vld [vmem:[%s14092_s0 + $0xd0] sm:$0xff] }
  0x2e   :  { %827 = vperm.xlu0 %7917, %v363_v58   ;;  %v203_v58 = vrot.slane %v58_v56, 7 }
  0x31   :  { %476 = vperm.xlu1 %7923, %v334_v61   ;;  %v59_v61 = vld [vmem:[%s14092_s0 + $0xd8] sm:$0xff] }
  0x32   :  { %471 = vperm.xlu0 %7917, %v187_v62   ;;  %v339_v62 = vsel %vm161_vm0, 0.0, %v203_v58 }
  0x35   :  { %832 = vperm.xlu1 %7923, %v364_v1   ;;  %v204_v1 = vrot.slane %v59_v61, 7 }
  0x36   :  { %480 = vperm.xlu0 %7917, %v190_v3   ;;  %v340_v3 = vsel %vm161_vm0, 0.0, %v206_v63  ;;  %v68_v63 = vld [vmem:[%s14092_s0 + $0x120] sm:$0xff] }
  0x37   :  { %v205_v4 = vsel %vm161_vm0, %v203_v58, %v204_v1  ;;  %v66_v58 = vld [vmem:[%s14092_s0 + $0x110] sm:$0xff] }
  0x39   :  { %485 = vperm.xlu1 %7923, %v335_v6   ;;  %v78_v6 = vld [vmem:[%s14092_s0 + $0x170] sm:$0xff] }
  0x3a   :  { %837 = vperm.xlu0 %7917, %v365_v8   ;;  %v233_v8 = vrot.slane %v78_v6, 7 }
  0x3d   :  { %494 = vperm.xlu1 %7923, %v336_v12   ;;  %v8463_v12 = vld [vmem:[%s14092_s0 + $0x178] sm:$0xff] }
  0x3e   :  { %489 = vperm.xlu0 %7917, %v193_v13   ;;  %v349_v13 = vsel %vm161_vm0, 0.0, %v233_v8  ;;  %v234_v17 = vrot.slane %v8463_v12, 7 }
  0x40   :  { %v235_v22 = vsel %vm161_vm0, %v233_v8, %v234_v17  ;;  %v69_v8 = vld [vmem:[%s14092_s0 + $0x128] sm:$0xff] }
  0x41   :  { %842 = vperm.xlu1 %7923, %v366_v16   ;;  %v371_v16 = vsel %vm161_vm0, %v201_v41, 0.0 }
  0x42   :  { %498 = vperm.xlu0 %7917, %v196_v18   ;;  %v8471_v18 = vld [vmem:[%s14092_s0 + $0x188] sm:$0xff] }
  0x43   :  { %v237_v20 = vrot.slane %v8471_v18, 7 }
  0x45   :  { %566 = vperm.xlu1 %7923, %v345_v21   ;;  %v8475_v21 = vshrl.u32 %v672_v15, 7  ;;  %v238_v29 = vsel %vm161_vm0, %v236_v14, %v237_v20  ;;  %v215_v15 = vrot.slane %v66_v58, 7 }
  0x46   :  { %847 = vperm.xlu0 %7917, %v367_v24   ;;  %v64_v24 = vld [vmem:[%s14092_s0 + $0x100] sm:$0xff] }
  0x47   :  { %v674_v31 = vsub.s32 0, %v8475_v21  ;;  %v957_v35 = vsub.s32 1, %v8475_v21  ;;  %v1915_v37 = vsub.s32 3, %v8475_v21  ;;  %v2057_v38 = vsub.s32 4, %v8475_v21 }
  0x48   :  { %v3025_v41 = vsub.s32 6, %v8475_v21  ;;  %v3155_v42 = vsub.s32 7, %v8475_v21 }
  0x49   :  { %575 = vperm.xlu1 %7923, %v346_v28   ;;  %v380_v28 = vsel %vm161_vm0, %v228_v51, 0.0  ;;  %v8530_v51 = vld [vmem:[%s14092_s0 + $0x198] sm:$0xff] }
  0x4a   :  { %570 = vperm.xlu0 %7917, %v223_v30   ;;  %v212_v30 = vrot.slane %v64_v24, 7  ;;  %v218_v24 = vrot.slane %v68_v63, 7 }
  0x4c   :  { %v342_v47 = vsel %vm161_vm0, 0.0, %v212_v30  ;;  %v8626_v18 = vsel %vm161_vm0, 0.0, %v218_v24 }
  0x4d   :  { %503 = vperm.xlu1 %7923, %v337_v34   ;;  %v391_v34 = vld [vmem:[%s14093_s1] sm:$0xff] }
  0x4e   :  { %579 = vperm.xlu0 %7917, %v226_v36   ;;  %v1427_v36 = vsub.s32 2, %v8475_v21  ;;  %v8522_v49 = vrot.slane %v391_v34, %v674_v31  ;;  %v8541_v55 = vrot.slane %v391_v34, %v1915_v37  ;;  %v8543_v56 = vrot.slane %v391_v34, %v2057_v38 }
  0x4f   :  { %v8558_v61 = vrot.slane %v391_v34, %v3025_v41  ;;  %v14103_v31 = vrot.slane %v8585_v11, 7  ;;  %v8620_v38 = vsel %vm161_vm0, 0.0, %v215_v15 }
  0x51   :  { %512 = vperm.xlu1 %7923, %v338_v39   ;;  %v8509_v39 = vsel %vm1615_vm1, %v6312_v25, %v6313_v26 }
  0x52   :  { %507 = vperm.xlu0 %7917, %v199_v40   ;;  %14443 = vst [vmem:[#allocation4_spill] sm:$0xff] %v8509_v39  ;;  %v2541_v40 = vsub.s32 5, %v8475_v21 }
  0x54   :  { %v8556_v60 = vrot.slane %v391_v34, %v2541_v40 }
  0x55   :  { %852 = vperm.xlu1 %7923, %v368_v43   ;;  %v372_v43 = vsel %vm161_vm0, %v204_v1, 0.0  ;;  %v86_v1 = vld [vmem:[%s14092_s0 + $0x1b0] sm:$0xff] }
  0x56   :  { %516 = vperm.xlu0 %7917, %v202_v45   ;;  %v213_v45 = vrot.slane %v8499_v33, 7  ;;  %v245_v26 = vrot.slane %v86_v1, 7  ;;  %v8682_v1 = vld [vmem:[%s14093_s1 + $0x8] ss:$0 sm:$0xff] }
  0x58   :  { %v8632_v41 = vsel %vm161_vm0, 0.0, %v245_v26 }
  0x59   :  { %584 = vperm.xlu1 %7923, %v347_v48   ;;  %v373_v48 = vsel %vm161_vm0, %v207_v5, 0.0  ;;  %v214_v5 = vsel %vm161_vm0, %v212_v30, %v213_v45 }
  0x5a   :  { %857 = vperm.xlu0 %7917, %v369_v50   ;;  %v84_v50 = vld [vmem:[%s14092_s0 + $0x1a0] sm:$0xff] }
  0x5b   :  { %v242_v6 = vrot.slane %v84_v50, 7 }
  0x5d   :  { %593 = vperm.xlu1 %7923, %v348_v53   ;;  %v8537_v53 = vrot.slane %v391_v34, %v957_v35 }
  0x5e   :  { %588 = vperm.xlu0 %7917, %v229_v54   ;;  %v8539_v54 = vrot.slane %v391_v34, %v1427_v36 }
  0x61   :  { %897 = vperm.xlu1 %7923, %v378_v57   ;;  %v62_v57 = vld [vmem:[%s14092_s0 + $0xf0] sm:$0xff] }
  0x62   :  { %597 = vperm.xlu0 %7917, %v232_v59   ;;  %v8554_v59 = vld [vmem:[%s14092_s0 + $0xf8] sm:$0xff]  ;;  %v209_v14 = vrot.slane %v62_v57, 7 }
  0x64   :  { %v8617_v37 = vsel %vm161_vm0, 0.0, %v209_v14 }
  0x65   :  { %521 = vperm.xlu1 %7923, %v339_v62   ;;  %v8560_v62 = vrot.slane %v391_v34, %v3155_v42  ;;  %v352_v34 = vsel %vm161_vm0, 0.0, %v242_v6  ;;  %v14104_v42 = vrot.slane %v8603_v32, 7 }
  0x66   :  { %902 = vperm.xlu0 %7917, %v379_v0   ;;  %v67_v0 = vld [vmem:[%s14092_s0 + $0x118] sm:$0xff] }
  0x67   :  { %v216_v25 = vrot.slane %v67_v0, 7 }
  0x69   :  { %530 = vperm.xlu1 %7923, %v340_v3   ;;  %v4361_v3 = vunpack.c.l.s4 %v8213_v2 }
  0x6a   :  { %525 = vperm.xlu0 %7917, %v205_v4   ;;  %v351_v4 = vsel %vm161_vm0, 0.0, %v239_v44 }
  0x6d   :  { %862 = vperm.xlu1 %7923, %v370_v7   ;;  %v240_v7 = vrot.slane %v8530_v51, 7  ;;  %v8652_v51 = vsel %vm161_vm0, %v213_v45, 0.0  ;;  %v8671_v45 = vsel %vm161_vm0, %v216_v25, 0.0 }
  0x6e   :  { %534 = vperm.xlu0 %7917, %v208_v10   ;;  %v88_v10 = vld [vmem:[%s14092_s0 + $0x1c0] sm:$0xff] }
  0x6f   :  { %v248_v30 = vrot.slane %v88_v10, 7  ;;  %v241_v12 = vsel %vm161_vm0, %v239_v44, %v240_v7  ;;  %v8663_v57 = vsel %vm161_vm0, %v240_v7, 0.0 }
  0x71   :  { %602 = vperm.xlu1 %7923, %v349_v13   ;;  %v243_v13 = vrot.slane %v8535_v52, 7 }
  0x72   :  { %867 = vperm.xlu0 %7917, %v371_v16   ;;  %v210_v16 = vrot.slane %v8554_v59, 7 }
  0x73   :  { %v8614_v36 = vsel %vm161_vm0, %v242_v6, %v243_v13  ;;  %v8660_v52 = vsel %vm161_vm0, %v243_v13, 0.0 }
  0x74   :  { %v8623_v40 = vsel %vm161_vm0, %v209_v14, %v210_v16  ;;  %v8685_v2 = vsel %vm161_vm0, %v210_v16, 0.0 }
  0x75   :  { %611 = vperm.xlu1 %7923, %v350_v19   ;;  %v8592_v19 = vld [vmem:[%s14092_s0 + $0x1c8] sm:$0xff] }
  0x76   :  { %606 = vperm.xlu0 %7917, %v235_v22   ;;  %14445 = vst [vmem:[#allocation6_spill] sm:$0xff] %v8592_v19  ;;  %v8597_v22 = vsel %vm161_vm0, %v234_v17, 0.0  ;;  %v8610_v17 = vsel %vm161_vm0, %v237_v20, 0.0  ;;  %v14102_v35 = vrot.slane %v8592_v19, 7  ;;  %v8629_v20 = vsel %vm161_vm0, %v215_v15, %v216_v25 }
  0x79   :  { %907 = vperm.xlu1 %7923, %v380_v28   ;;  %v219_v28 = vrot.slane %v69_v8, 7 }
  0x7a   :  { %615 = vperm.xlu0 %7917, %v238_v29   ;;  %v4362_v29 = vunpack.c.0.s8 %v4361_v3  ;;  %v8690_v3 = vsel %vm161_vm0, 0.0, %v14104_v42 }
  0x7b   :  { %v8636_v44 = vsel %vm161_vm0, %v218_v24, %v219_v28  ;;  %v8702_v8 = vsel %vm161_vm0, %v219_v28, 0.0 }
  0x7d   :  { %872 = vperm.xlu1 %7923, %v372_v43  }
  0x7e   :  { %912 = vperm.xlu0 %7917, %v381_v46   ;;  %v8639_v46 = vsub.s32 %v4362_v29, %v8475_v21  ;;  %v8657_v21 = vsel %vm161_vm0, %v248_v30, %v14102_v35 }
  0x80   :  { %14447 = vst [vmem:[#allocation8_spill] sm:$0xff] %v8639_v46 }
  0x81   :  { %539 = vperm.xlu1 %7923, %v342_v47   ;;  %v8642_v47 = vsel %vm161_vm0, 0.0, %v248_v30 }
  0x82   :  { %877 = vperm.xlu0 %7917, %v373_v48   ;;  %v8647_v48 = vsel %vm161_vm0, %v245_v26, %v14103_v31 }
  0x84   :  { %v409_v43 = vpop.permute.xlu1 %408 }
  0x85   :  { %v7920_v50 = vpop.permute.xlu0 %7919  ;;  %620 = vperm.xlu1 %7923, %v351_v4   ;;  %v8666_v58 = vmul.f32 %v8537_v53, %v409_v43  ;;  %v8674_v63 = vmul.f32 %v8539_v54, %v409_v43  ;;  %v8677_v0 = vmul.f32 %v8543_v56, %v409_v43  ;;  %v8693_v4 = vmul.f32 %v8522_v49, %v409_v43 }
  0x86   :  { %v8668_v59 = vunpack.i.h.bf16 %v7920_v50  ;;  %v7921_v33 = vunpack.i.l.bf16 %v7920_v50  ;;  %543 = vperm.xlu0 %7917, %v214_v5   ;;  %v8696_v5 = vmul.f32 %v8556_v60, %v409_v43  ;;  %v8705_v10 = vmul.f32 %v8541_v55, %v409_v43 }
  0x88   :  { %14448 = vst [vmem:[#allocation9_spill] sm:$0xff] %v8668_v59  ;;  %v959_v6 = vmul.f32 %v7921_v33, %v8537_v53  ;;  %v8699_v7 = vpop.permute.xlu1 %413  ;;  %v8709_v13 = vmul.f32 %v8668_v59, %v8537_v53  ;;  %v1429_v14 = vmul.f32 %v7921_v33, %v8539_v54  ;;  %v8714_v15 = vmul.f32 %v8668_v59, %v8539_v54 }
  0x89   :  { %629 = vperm.xlu1 %7923, %v352_v34   ;;  %v8718_v25 = vmul.f32 %v7921_v33, %v8560_v62  ;;  %v8721_v26 = vmul.f32 %v7921_v33, %v8682_v1  ;;  %v8728_v43 = vmul.f32 %v8537_v53, %v8699_v7  ;;  %v8734_v27 = vmul.f32 %v8539_v54, %v8699_v7  ;;  %v405_v28 = vpop.permute.xlu0 %404 }
  0x8a   :  { %v1146_v24 = vrot.slane %v959_v6, 1  ;;  %624 = vperm.xlu0 %7917, %v241_v12   ;;  %v14108_v30 = vrot.slane %v8709_v13, 1  ;;  %v1616_v50 = vrot.slane %v1429_v14, 2  ;;  %v676_v12 = vmul.f32 %v7921_v33, %v8522_v49 }
  0x8b   :  { %14449 = vst [vmem:[#allocation10_spill] sm:$0xff] %v8734_v27  ;;  %v8738_v35 = vmul.f32 %v7921_v33, %v8558_v61  ;;  %v8743_v42 = vmul.f32 %v8522_v49, %v8699_v7  ;;  %v8749_v29 = vmul.f32 %v8543_v56, %v8699_v7  ;;  %v8753_v33 = vmul.f32 %v8556_v60, %v8699_v7 }
  0x8c   :  { %v423_v34 = vpop.permute.xlu1 %422  ;;  %v1148_v31 = vsel %vm1145_vm2, %v1146_v24, %v14108_v30  ;;  %v8766_v14 = vmul.f32 %v8682_v1, %v8699_v7  ;;  %v14451_v39 = vrot.slane %v8714_v15, 2  ;;  %v962_v24 = vmul.f32 %v8537_v53, %v405_v28 }
  0x8d   :  { %14450 = vst [vmem:[#allocation11_spill] sm:$0xff] %v8738_v35  ;;  %917 = vperm.xlu1 %7923, %v8597_v22   ;;  %v8762_v22 = vmul.f32 %v8560_v62, %v8699_v7  ;;  %v1363_v6 = vadd.f32 %v1148_v31, %v676_v12  ;;  %v1917_v30 = vmul.f32 %v8541_v55, %v405_v28  ;;  %v8785_v32 = vpop.permute.xlu0 %417 }
  0x8e   :  { %633 = vperm.xlu0 %7917, %v8614_v36   ;;  %v1618_v23 = vsel %vm1615_vm1, %v1616_v50, %v14451_v39  ;;  %v1432_v36 = vmul.f32 %v8539_v54, %v405_v28  ;;  %v2059_v9 = vmul.f32 %v8543_v56, %v405_v28  ;;  %v2543_v19 = vmul.f32 %v8556_v60, %v405_v28 }
  0x8f   :  { %v8774_v16 = vadd.f32 %v1618_v23, %v1363_v6  ;;  %v678_v39 = vmul.f32 %v8522_v49, %v405_v28  ;;  %v1151_v50 = vrot.slane %v962_v24, 1  ;;  %v8792_v12 = vmul.f32 %v8537_v53, %v423_v34 }
  0x90   :  { %v1621_v35 = vrot.slane %v1432_v36, 2  ;;  %v2251_v6 = vrot.slane %v2059_v9, 1  ;;  %v2735_v11 = vrot.slane %v2543_v19, 2  ;;  %v803_v46 = vpop.permute.xlu1 %802  ;;  %v8795_v28 = vmul.f32 %v8539_v54, %v423_v34 }
  0x91   :  { %14452 = vst [vmem:[#allocation12_spill] sm:$0xff] %v8774_v16  ;;  %1897 = vperm.xlu1 %7923, %v8617_v37   ;;  %v1981_v23 = vadd.f32 %v1917_v30, %v8774_v16  ;;  %v14453_v37 = vrot.slane %v8666_v58, 1  ;;  %14454 = vst [vmem:[#allocation13_spill] sm:$0xff] %v8792_v12  ;;  %v1919_v9 = vmul.f32 %v8541_v55, %v8699_v7  ;;  %v14456_v19 = vrot.slane %v8677_v0, 1 }
  0x92   :  { %922 = vperm.xlu0 %7917, %v8610_v17   ;;  %14455 = vst [vmem:[#allocation14_spill] sm:$0xff] %v8795_v28  ;;  %v8810_v27 = vmul.f32 %v8543_v56, %v423_v34  ;;  %v3674_v17 = vmul.f32 %v8668_v59, %v8682_v1  ;;  %v3675_v28 = vmul.f32 %v8682_v1, %v803_v46 }
  0x93   :  { %v1153_v31 = vsel %vm1145_vm2, %v1151_v50, %v14453_v37  ;;  %v2253_v24 = vsel %vm1145_vm2, %v2251_v6, %v14456_v19  ;;  %v3027_v50 = vmul.f32 %v8558_v61, %v8699_v7  ;;  %v8807_v37 = vmul.f32 %v8522_v49, %v423_v34 }
  0x94   :  { %v1365_v30 = vadd.f32 %v1153_v31, %v678_v39  ;;  %v2475_v36 = vadd.f32 %v2253_v24, %v1981_v23  ;;  %14458 = vst [vmem:[#allocation16_spill] sm:$0xff] %v8810_v27  ;;  %v14459_v31 = vrot.slane %v8674_v63, 2  ;;  %v14460_v6 = vrot.slane %v8696_v5, 2 }
  0x95   :  { %548 = vperm.xlu1 %7923, %v8620_v38   ;;  %14457 = vst [vmem:[#allocation15_spill] sm:$0xff] %v8807_v37  ;;  %v8820_v23 = vmul.f32 %v8541_v55, %v423_v34  ;;  %v8823_v7 = vmul.f32 %v8556_v60, %v423_v34  ;;  %v3890_v37 = vrot.slane %v3674_v17, 2  ;;  %v677_v27 = vmul.f32 %v8668_v59, %v8522_v49 }
  0x96   :  { %1901 = vperm.xlu0 %7917, %v8623_v40   ;;  %v1623_v39 = vsel %vm1615_vm1, %v1621_v35, %v14459_v31  ;;  %v2737_v38 = vsel %vm1615_vm1, %v2735_v11, %v14460_v6  ;;  %v8828_v40 = vmul.f32 %v8558_v61, %v423_v34  ;;  %v8831_v35 = vmul.f32 %v8560_v62, %v423_v34  ;;  %v8838_v6 = vpop.permute.xlu0 %426 }
  0x97   :  { %14461 = vst [vmem:[#allocation17_spill] sm:$0xff] %v8820_v23  ;;  %v1835_v19 = vadd.f32 %v1623_v39, %v1365_v30  ;;  %v2959_v16 = vadd.f32 %v2737_v38, %v2475_v36  ;;  %v8834_v11 = vmul.f32 %v8682_v1, %v423_v34  ;;  %v3203_v31 = vmul.f32 %v8668_v59, %v8560_v62  ;;  %v432_v30 = vpop.permute.xlu1 %431 }
  0x98   :  { %14462 = vst [vmem:[#allocation18_spill] sm:$0xff] %v8828_v40  ;;  %14463 = vst [vmem:[#allocation19_spill] sm:$0xff] %v8838_v6  ;;  %v961_v36 = vmul.f32 %v8537_v53, %v803_v46  ;;  %v1431_v38 = vmul.f32 %v8539_v54, %v803_v46  ;;  %v3204_v40 = vmul.f32 %v8560_v62, %v803_v46  ;;  %v3892_v6 = vrot.slane %v3675_v28, 2 }
  0x99   :  { %557 = vperm.xlu1 %7923, %v8626_v18   ;;  %v3419_v24 = vrot.slane %v3203_v31, 1  ;;  %v8851_v39 = vmul.f32 %v8537_v53, %v432_v30  ;;  %v8859_v31 = vadd.f32 %v1919_v9, %v1835_v19  ;;  %v8867_v34 = vadd.f32 %v3027_v50, %v2959_v16 }
  0x9a   :  { %552 = vperm.xlu0 %7917, %v8629_v20   ;;  %v1149_v18 = vrot.slane %v961_v36, 1  ;;  %v1619_v23 = vrot.slane %v1431_v38, 2  ;;  %v3421_v12 = vrot.slane %v3204_v40, 1  ;;  %v8856_v20 = vmul.f32 %v8539_v54, %v432_v30  ;;  %v808_v19 = vpop.permute.xlu0 %807 }
  0x9b   :  { %v14464_v36 = vrot.slane %v8709_v13, 1  ;;  %v14465_v28 = vrot.slane %v8718_v25, 1  ;;  %v8875_v9 = vmul.f32 %v8522_v49, %v432_v30  ;;  %v14467_v17 = vrot.slane %v8721_v26, 2 }
  0x9c   :  { %v8887_v25 = vmul.f32 %v8543_v56, %v432_v30  ;;  %v14474_v46 = vrot.slane %v8666_v58, 1 }
  0x9d   :  { %638 = vperm.xlu1 %7923, %v8632_v41   ;;  %v1150_v38 = vsel %vm1145_vm2, %v14464_v36, %v1149_v18  ;;  %v8872_v40 = vsel %vm1145_vm2, %v14465_v28, %v3419_v24  ;;  %v8880_v13 = vsel %vm1615_vm1, %v14467_v17, %v3890_v37  ;;  %v14469_v18 = vrot.slane %v8714_v15, 2 }
  0x9e   :  { %561 = vperm.xlu0 %7917, %v8636_v44   ;;  %14466 = vst [vmem:[#allocation20_spill] sm:$0xff] %v8872_v40  ;;  %v1364_v41 = vadd.f32 %v1150_v38, %v677_v27  ;;  %14468 = vst [vmem:[#allocation21_spill] sm:$0xff] %v8880_v13  ;;  %v8892_v27 = vsel %vm1145_vm2, %v3419_v24, %v3421_v12  ;;  %v8895_v36 = vsel %vm1615_vm1, %v3890_v37, %v3892_v6  ;;  %v441_v12 = vpop.permute.xlu1 %440 }
  0x9f   :  { %v1620_v44 = vsel %vm1615_vm1, %v14469_v18, %v1619_v23  ;;  %14471 = vst [vmem:[#allocation23_spill] sm:$0xff] %v8892_v27  ;;  %14472 = vst [vmem:[#allocation24_spill] sm:$0xff] %v8895_v36  ;;  %v8900_v15 = vmul.f32 %v8541_v55, %v432_v30  ;;  %v8903_v23 = vmul.f32 %v8556_v60, %v432_v30 }
  0xa0   :  { %v8889_v50 = vadd.f32 %v1620_v44, %v1364_v41  ;;  %v8906_v17 = vmul.f32 %v8558_v61, %v432_v30  ;;  %v964_v38 = vmul.f32 %v8537_v53, %v808_v19  ;;  %v8911_v37 = vmul.f32 %v8560_v62, %v432_v30 }
  0xa1   :  { %647 = vperm.xlu1 %7923, %v8642_v47   ;;  %v8914_v24 = vmul.f32 %v8682_v1, %v432_v30  ;;  %v1920_v47 = vmul.f32 %v8541_v55, %v8785_v32  ;;  %v1434_v6 = vmul.f32 %v8539_v54, %v808_v19  ;;  %v2061_v18 = vmul.f32 %v8543_v56, %v808_v19 }
  0xa2   :  { %14470 = vst [vmem:[#allocation22_spill] sm:$0xff] %v8889_v50  ;;  %642 = vperm.xlu0 %7917, %v8647_v48   ;;  %v1154_v41 = vrot.slane %v964_v38, 1  ;;  %v2545_v44 = vmul.f32 %v8556_v60, %v808_v19  ;;  %v1982_v48 = vadd.f32 %v8705_v10, %v8889_v50  ;;  %v8925_v16 = vmul.f32 %v8537_v53, %v441_v12 }
  0xa3   :  { %v1624_v26 = vrot.slane %v1434_v6, 2  ;;  %v8928_v30 = vmul.f32 %v8539_v54, %v441_v12  ;;  %v2254_v28 = vrot.slane %v2061_v18, 1  ;;  %v8935_v19 = vmul.f32 %v8543_v56, %v441_v12 }
  0xa4   :  { %v1155_v38 = vsel %vm1145_vm2, %v14474_v46, %v1154_v41  ;;  %v2738_v36 = vrot.slane %v2545_v44, 2  ;;  %v3028_v27 = vmul.f32 %v8558_v61, %v8785_v32  ;;  %v14476_v46 = vrot.slane %v8677_v0, 1 }
  0xa5   :  { %14473 = vst [vmem:[#allocation25_spill] sm:$0xff] %v8928_v30  ;;  %882 = vperm.xlu1 %7923, %v8652_v51   ;;  %14475 = vst [vmem:[#allocation26_spill] sm:$0xff] %v8935_v19  ;;  %v1366_v51 = vadd.f32 %v1155_v38, %v8693_v4  ;;  %v8948_v18 = vmul.f32 %v8522_v49, %v441_v12  ;;  %v14478_v44 = vrot.slane %v8674_v63, 2  ;;  %v14479_v0 = vrot.slane %v8696_v5, 2  ;;  %v813_v5 = vpop.permute.xlu1 %812 }
  0xa6   :  { %651 = vperm.xlu0 %7917, %v8657_v21   ;;  %v2255_v41 = vsel %vm1145_vm2, %v14476_v46, %v2254_v28  ;;  %v8951_v21 = vmul.f32 %v8556_v60, %v441_v12  ;;  %v8958_v4 = vmul.f32 %v8541_v55, %v441_v12  ;;  %v966_v63 = vmul.f32 %v8537_v53, %v8785_v32 }
  0xa7   :  { %v1625_v6 = vsel %vm1615_vm1, %v14478_v44, %v1624_v26  ;;  %v2476_v10 = vadd.f32 %v2255_v41, %v1982_v48  ;;  %v2739_v28 = vsel %vm1615_vm1, %v14479_v0, %v2738_v36  ;;  %v8971_v41 = vmul.f32 %v8558_v61, %v441_v12 }
  0xa8   :  { %14477 = vst [vmem:[#allocation27_spill] sm:$0xff] %v8951_v21  ;;  %v1836_v26 = vadd.f32 %v1625_v6, %v1366_v51  ;;  %v8977_v44 = vmul.f32 %v8682_v1, %v441_v12  ;;  %v1157_v0 = vrot.slane %v966_v63, 1  ;;  %v2063_v38 = vmul.f32 %v8543_v56, %v8785_v32 }
  0xa9   :  { %932 = vperm.xlu1 %7923, %v8660_v52   ;;  %14480 = vst [vmem:[#allocation28_spill] sm:$0xff] %v8971_v41  ;;  %v8974_v52 = vmul.f32 %v8560_v62, %v441_v12  ;;  %v2960_v36 = vadd.f32 %v2739_v28, %v2476_v10  ;;  %v8985_v6 = vmul.f32 %v8556_v60, %v8785_v32  ;;  %v14483_v28 = vrot.slane %v8728_v43, 1  ;;  %v9002_v41 = vpop.permute.xlu0 %435 }
  0xaa   :  { %927 = vperm.xlu0 %7917, %v8663_v57   ;;  %14482 = vst [vmem:[#allocation30_spill] sm:$0xff] %v8977_v44  ;;  %v1436_v57 = vmul.f32 %v8539_v54, %v8785_v32  ;;  %v3158_v51 = vmul.f32 %v8560_v62, %v8785_v32  ;;  %v3629_v10 = vmul.f32 %v8682_v1, %v8785_v32  ;;  %v2257_v48 = vrot.slane %v2063_v38, 1  ;;  %v14506_v44 = vld [vmem:[#allocation16_spill] sm:$0xff] }
  0xab   :  { %14481 = vst [vmem:[#allocation29_spill] sm:$0xff] %v8974_v52  ;;  %v681_v12 = vmul.f32 %v8522_v49, %v8785_v32  ;;  %v1158_v63 = vsel %vm1145_vm2, %v14483_v28, %v1157_v0  ;;  %v967_v46 = vmul.f32 %v8537_v53, %v813_v5  ;;  %v1984_v59 = vadd.f32 %v1920_v47, %v1836_v26 }
  0xac   :  { %v3344_v50 = vrot.slane %v3158_v51, 1  ;;  %v3815_v13 = vrot.slane %v3629_v10, 2  ;;  %v3090_v40 = vadd.f32 %v3028_v27, %v2960_v36  ;;  %v1437_v32 = vmul.f32 %v8539_v54, %v813_v5 }
  0xad   :  { %887 = vperm.xlu1 %7923, %v8671_v45   ;;  %v1159_v21 = vrot.slane %v967_v46, 1  ;;  %v1367_v43 = vadd.f32 %v1158_v63, %v8743_v42  ;;  %v1627_v38 = vrot.slane %v1436_v57, 2  ;;  %v2741_v28 = vrot.slane %v8985_v6, 2 }
  0xae   :  { %2047 = vperm.xlu0 %7917, %v8685_v2   ;;  %v14484_v2 = vrot.slane %v8762_v22, 1  ;;  %v14485_v27 = vrot.slane %v8749_v29, 1  ;;  %v2064_v42 = vmul.f32 %v8543_v56, %v813_v5  ;;  %v14486_v22 = vrot.slane %v8766_v14, 2 }
  0xaf   :  { %v1160_v36 = vsel %vm1145_vm2, %v1157_v0, %v1159_v21  ;;  %v2548_v29 = vmul.f32 %v8556_v60, %v813_v5  ;;  %v450_v21 = vpop.permute.xlu1 %449  ;;  %v1629_v51 = vrot.slane %v1437_v32, 2  ;;  %v14490_v32 = vrot.slane %v8753_v33, 2 }
  0xb0   :  { %v3345_v47 = vsel %vm1145_vm2, %v14484_v2, %v3344_v50  ;;  %v2258_v26 = vsel %vm1145_vm2, %v14485_v27, %v2257_v48  ;;  %v3816_v6 = vsel %vm1615_vm1, %v14486_v22, %v3815_v13  ;;  %v2259_v10 = vrot.slane %v2064_v42, 1 }
  0xb1   :  { %656 = vperm.xlu1 %7923, %v8690_v3   ;;  %v3560_v46 = vadd.f32 %v3345_v47, %v8867_v34  ;;  %v2477_v57 = vadd.f32 %v2258_v26, %v8859_v31  ;;  %v9024_v3 = vld [vmem:[%s14094_s2] ss:$0 sm:$0xff]  ;;  %v3159_v34 = vmul.f32 %v8560_v62, %v813_v5  ;;  %v1368_v2 = vadd.f32 %v1160_v36, %v681_v12 }
  0xb2   :  { %892 = vperm.xlu0 %7917, %v8702_v8   ;;  %v3630_v8 = vmul.f32 %v8682_v1, %v813_v5  ;;  %v14487_v31 = vld [vmem:[#allocation10_spill] sm:$0xff]  ;;  %v2743_v47 = vrot.slane %v2548_v29, 2  ;;  %v2260_v22 = vsel %vm1145_vm2, %v2257_v48, %v2259_v10  ;;  %v9035_v58 = vmul.f32 %v8537_v53, %v450_v21 }
  0xb3   :  { %v4031_v0 = vadd.f32 %v3816_v6, %v3560_v46  ;;  %v14488_v63 = vrot.slane %v14487_v31, 2  ;;  %v3346_v27 = vrot.slane %v3159_v34, 1  ;;  %v2742_v46 = vsel %vm1615_vm1, %v14490_v32, %v2741_v28  ;;  %v9041_v6 = vpop.permute.xlu0 %444 }
  0xb4   :  { %v3817_v45 = vrot.slane %v3630_v8, 2  ;;  %14489 = vst [vmem:[#allocation10_spill] sm:$0xff] %v9035_v58  ;;  %v2478_v5 = vadd.f32 %v2260_v22, %v1984_v59  ;;  %v9044_v12 = vmul.f32 %v8539_v54, %v450_v21  ;;  %v2961_v29 = vadd.f32 %v2742_v46, %v2477_v57  ;;  %v14500_v46 = vld [vmem:[#allocation13_spill] sm:$0xff] }
  0xb5   :  { %v1628_v14 = vsel %vm1615_vm1, %v14488_v63, %v1627_v38  ;;  %v4102_v26 = vadd.f32 %v9024_v3, %v4031_v0  ;;  %v3347_v42 = vsel %vm1145_vm2, %v3344_v50, %v3346_v27  ;;  %v1630_v48 = vsel %vm1615_vm1, %v1627_v38, %v1629_v51 }
  0xb6   :  { %14491 = vst [vmem:[#allocation31_spill] sm:$0xff] %v9044_v12  ;;  %v1837_v36 = vadd.f32 %v1628_v14, %v1367_v43  ;;  %v3561_v34 = vadd.f32 %v3347_v42, %v3090_v40  ;;  %v1838_v10 = vadd.f32 %v1630_v48, %v1368_v2  ;;  %v3818_v8 = vsel %vm1615_vm1, %v3815_v13, %v3817_v45 }
  0xb7   :  { %v4166_v0 = vmax.f32 %v4102_v26, 0.0  ;;  %v9049_v33 = vmul.f32 %v8522_v49, %v450_v21  ;;  %v2744_v59 = vsel %vm1615_vm1, %v2741_v28, %v2743_v47  ;;  %v9054_v63 = vmul.f32 %v8543_v56, %v450_v21  ;;  %v14497_v28 = vld [vmem:[#allocation19_spill] sm:$0xff]  ;;  %v818_v22 = vpop.permute.xlu0 %817 }
  0xb8   :  { %v4032_v50 = vadd.f32 %v3818_v8, %v3561_v34  ;;  %v2962_v43 = vadd.f32 %v2744_v59, %v2478_v5  ;;  %v9058_v40 = vmul.f32 %v8556_v60, %v450_v21  ;;  %v9061_v38 = vmul.f32 %v8560_v62, %v450_v21 }
  0xb9   :  { %14492 = vst [vmem:[#allocation32_spill] sm:$0xff] %v9049_v33  ;;  %14493 = vst [vmem:[#allocation33_spill] sm:$0xff] %v9054_v63  ;;  %v9065_v45 = vmul.f32 %v8682_v1, %v450_v21  ;;  %v969_v51 = vmul.f32 %v8537_v53, %v14497_v28  ;;  %v1439_v14 = vmul.f32 %v8539_v54, %v14497_v28  ;;  %v9072_v2 = vsel %vm4230_vm3, %v4166_v0, -inf }
  0xba   :  { %14494 = vst [vmem:[#allocation34_spill] sm:$0xff] %v9058_v40  ;;  %14495 = vst [vmem:[#allocation35_spill] sm:$0xff] %v9061_v38  ;;  %v4103_v13 = vadd.f32 %v9024_v3, %v4032_v50  ;;  %v9075_v47 = vmul.f32 %v8541_v55, %v450_v21  ;;  %v9078_v27 = vmul.f32 %v8558_v61, %v450_v21  ;;  %v14501_v31 = vrot.slane %v14500_v46, 1  ;;  %v14504_v46 = vld [vmem:[#allocation14_spill] sm:$0xff] }
  0xbb   :  { %14496 = vst [vmem:[#allocation36_spill] sm:$0xff] %v9065_v45  ;;  %v2066_v26 = vmul.f32 %v8543_v56, %v14497_v28  ;;  %v683_v5 = vmul.f32 %v8522_v49, %v14497_v28  ;;  %v1162_v42 = vrot.slane %v969_v51, 1  ;;  %v2550_v34 = vmul.f32 %v8556_v60, %v14497_v28 }
  0xbc   :  { %14498 = vst [vmem:[#allocation19_spill] sm:$0xff] %v9075_v47  ;;  %14499 = vst [vmem:[#allocation37_spill] sm:$0xff] %v9078_v27  ;;  %v4167_v32 = vmax.f32 %v4103_v13, 0.0  ;;  %v3161_v21 = vmul.f32 %v8560_v62, %v14497_v28  ;;  %v3632_v0 = vmul.f32 %v8682_v1, %v14497_v28  ;;  %v1632_v50 = vrot.slane %v1439_v14, 2  ;;  %v14502_v14 = vld [vmem:[#allocation17_spill] sm:$0xff] }
  0xbd   :  { %v970_v13 = vmul.f32 %v8537_v53, %v818_v22  ;;  %v1922_v51 = vmul.f32 %v8541_v55, %v14497_v28  ;;  %v2262_v48 = vrot.slane %v2066_v26, 1  ;;  %v3030_v57 = vmul.f32 %v8558_v61, %v14497_v28  ;;  %v14503_v28 = vld [vmem:[#allocation15_spill] sm:$0xff] }
  0xbe   :  { %v1163_v40 = vsel %vm1145_vm2, %v14501_v31, %v1162_v42  ;;  %v9103_v27 = vsel %vm4230_vm3, %v4167_v32, -inf  ;;  %v1440_v59 = vmul.f32 %v8539_v54, %v818_v22  ;;  %v1985_v45 = vadd.f32 %v14502_v14, %v1837_v36 }
  0xbf   :  { %v1164_v8 = vrot.slane %v970_v13, 1  ;;  %v2746_v38 = vrot.slane %v2550_v34, 2  ;;  %v3349_v12 = vrot.slane %v3161_v21, 1  ;;  %v3820_v63 = vrot.slane %v3632_v0, 2  ;;  %v14508_v21 = vld [vmem:[#allocation18_spill] sm:$0xff] }
  0xc0   :  { %v2067_v26 = vmul.f32 %v8543_v56, %v818_v22  ;;  %v1369_v33 = vadd.f32 %v1163_v40, %v14503_v28  ;;  %v14505_v58 = vrot.slane %v14504_v46, 2  ;;  %v2551_v32 = vmul.f32 %v8556_v60, %v818_v22  ;;  %v459_v40 = vpop.permute.xlu1 %458 }
  0xc1   :  { %v1165_v47 = vsel %vm1145_vm2, %v1162_v42, %v1164_v8  ;;  %v1986_v13 = vadd.f32 %v1922_v51, %v1838_v10  ;;  %v14507_v52 = vrot.slane %v14506_v44, 1  ;;  %v3091_v0 = vadd.f32 %v14508_v21, %v2961_v29 }
  0xc2   :  { %v1633_v31 = vsel %vm1615_vm1, %v14505_v58, %v1632_v50  ;;  %v2264_v34 = vrot.slane %v2067_v26, 1  ;;  %v1370_v14 = vadd.f32 %v1165_v47, %v683_v5  ;;  %v1634_v30 = vrot.slane %v1440_v59, 2 }
  0xc3   :  { %v2263_v36 = vsel %vm1145_vm2, %v14507_v52, %v2262_v48  ;;  %v3162_v42 = vmul.f32 %v8560_v62, %v818_v22  ;;  %v3092_v28 = vadd.f32 %v3030_v57, %v2962_v43  ;;  %v14509_v58 = vrot.slane %v8831_v35, 1 }
  0xc4   :  { %v2479_v19 = vadd.f32 %v2263_v36, %v1985_v45  ;;  %v2265_v8 = vsel %vm1145_vm2, %v2262_v48, %v2264_v34  ;;  %v3633_v44 = vmul.f32 %v8682_v1, %v818_v22  ;;  %v14510_v52 = vrot.slane %v8823_v7, 2 }
  0xc5   :  { %v3350_v10 = vsel %vm1145_vm2, %v14509_v58, %v3349_v12  ;;  %v2748_v29 = vrot.slane %v2551_v32, 2  ;;  %v3351_v47 = vrot.slane %v3162_v42, 1  ;;  %v2480_v45 = vadd.f32 %v2265_v8, %v1986_v13 }
  0xc6   :  { %v2747_v51 = vsel %vm1615_vm1, %v14510_v52, %v2746_v38  ;;  %v3562_v5 = vadd.f32 %v3350_v10, %v3091_v0  ;;  %v14511_v59 = vrot.slane %v8834_v11, 2  ;;  %v3822_v48 = vrot.slane %v3633_v44, 2 }
  0xc7   :  { %v9131_v43 = vmul.f32 %v8537_v53, %v459_v40  ;;  %v1635_v35 = vsel %vm1615_vm1, %v1632_v50, %v1634_v30  ;;  %v3352_v57 = vsel %vm1145_vm2, %v3349_v12, %v3351_v47  ;;  %v9136_v7 = vmul.f32 %v8539_v54, %v459_v40 }
  0xc8   :  { %v3821_v26 = vsel %vm1615_vm1, %v14511_v59, %v3820_v63  ;;  %v1839_v46 = vadd.f32 %v1633_v31, %v1369_v33  ;;  %v1840_v32 = vadd.f32 %v1635_v35, %v1370_v14  ;;  %v2963_v36 = vadd.f32 %v2747_v51, %v2479_v19 }
  0xc9   :  { %v4033_v22 = vadd.f32 %v3821_v26, %v3562_v5  ;;  %v3563_v13 = vadd.f32 %v3352_v57, %v3092_v28  ;;  %v2749_v11 = vsel %vm1615_vm1, %v2746_v38, %v2748_v29  ;;  %v3823_v34 = vsel %vm1615_vm1, %v3820_v63, %v3822_v48 }
  0xca   :  { %v9142_v0 = vmul.f32 %v8543_v56, %v459_v40  ;;  %v2964_v30 = vadd.f32 %v2749_v11, %v2480_v45  ;;  %v9145_v12 = vmul.f32 %v8522_v49, %v459_v40  ;;  %v9150_v31 = vmul.f32 %v8541_v55, %v459_v40 }
  0xcb   :  { %v4104_v21 = vadd.f32 %v9024_v3, %v4033_v22  ;;  %v4034_v50 = vadd.f32 %v3823_v34, %v3563_v13  ;;  %v9153_v63 = vmul.f32 %v8556_v60, %v459_v40  ;;  %v9157_v14 = vmul.f32 %v8558_v61, %v459_v40 }
  0xcc   :  { %v9160_v8 = vmul.f32 %v8560_v62, %v459_v40  ;;  %v972_v28 = vmul.f32 %v8537_v53, %v9002_v41  ;;  %v9167_v44 = vmul.f32 %v8682_v1, %v459_v40  ;;  %v9171_v52 = vmul.f32 %v8539_v54, %v9002_v41 }
  0xcd   :  { %v4168_v33 = vmax.f32 %v4104_v21, 0.0  ;;  %v4105_v38 = vadd.f32 %v9024_v3, %v4034_v50  ;;  %v2069_v5 = vmul.f32 %v8543_v56, %v9002_v41  ;;  %v685_v59 = vmul.f32 %v8522_v49, %v9002_v41 }
  0xce   :  { %v1167_v47 = vrot.slane %v972_v28, 1  ;;  %v14138_v40 = vrot.slane %v9171_v52, 2  ;;  %v9184_v26 = vmul.f32 %v8556_v60, %v9002_v41  ;;  %v14515_v57 = vrot.slane %v8851_v39, 1 }
  0xcf   :  { %v4232_v58 = vsel %vm4230_vm3, %v4168_v33, -inf  ;;  %v4169_v51 = vmax.f32 %v4105_v38, 0.0  ;;  %v1924_v13 = vmul.f32 %v8541_v55, %v9002_v41  ;;  %v2267_v50 = vrot.slane %v2069_v5, 1 }
  0xd0   :  { %v9174_v29 = vmax.f32 %v9072_v2, %v4232_v58  ;;  %v14513_v2 = vld [vmem:[#allocation8_spill] sm:$0xff]  ;;  %v1168_v22 = vsel %vm1145_vm2, %v14515_v57, %v1167_v47  ;;  %v1987_v38 = vadd.f32 %v8900_v15, %v1839_v46  ;;  %v3032_v39 = vmul.f32 %v8558_v61, %v9002_v41  ;;  %v823_v58 = vpop.permute.xlu1 %822 }
  0xd1   :  { %v4235_v48 = vsel %vm4230_vm3, %v4169_v51, -inf  ;;  %v1371_v33 = vadd.f32 %v1168_v22, %v8875_v9  ;;  %v1988_v28 = vadd.f32 %v1924_v13, %v1840_v32  ;;  %v2751_v9 = vrot.slane %v9184_v26, 2 }
  0xd2   :  { %14512 = vst [vmem:[#allocation13_spill] sm:$0xff] %v9174_v29  ;;  %v9189_v35 = vrot.slane %v9174_v29, %v14513_v2  ;;  %v9197_v11 = vmax.f32 %v9103_v27, %v4235_v48  ;;  %v14517_v48 = vrot.slane %v8856_v20, 2  ;;  %v14518_v15 = vrot.slane %v8887_v25, 1  ;;  %v9233_v27 = vpop.permute.xlu0 %453  ;;  %v14531_v29 = vld [vmem:[#allocation26_spill] sm:$0xff] }
  0xd3   :  { %v3093_v32 = vadd.f32 %v8906_v17, %v2963_v36  ;;  %v3164_v57 = vmul.f32 %v8560_v62, %v9002_v41  ;;  %v3635_v22 = vmul.f32 %v8682_v1, %v9002_v41  ;;  %v3094_v26 = vadd.f32 %v3032_v39, %v2964_v30 }
  0xd4   :  { %14514 = vst [vmem:[#allocation17_spill] sm:$0xff] %v9189_v35  ;;  %14516 = vst [vmem:[#allocation15_spill] sm:$0xff] %v9197_v11  ;;  %v1638_v5 = vsel %vm1615_vm1, %v14517_v48, %v14138_v40  ;;  %v2268_v46 = vsel %vm1145_vm2, %v14518_v15, %v2267_v50  ;;  %v9227_v20 = vrot.slane %v9197_v11, %v14513_v2  ;;  %v14520_v21 = vrot.slane %v8903_v23, 2  ;;  %v468_v34 = vpop.permute.xlu1 %467 }
  0xd5   :  { %v973_v25 = vmul.f32 %v8537_v53, %v823_v58  ;;  %v9230_v48 = vadd.f32 %v1638_v5, %v1371_v33  ;;  %v3354_v15 = vrot.slane %v3164_v57, 1  ;;  %v3825_v17 = vrot.slane %v3635_v22, 2 }
  0xd6   :  { %14519 = vst [vmem:[#allocation14_spill] sm:$0xff] %v9227_v20  ;;  %v1443_v36 = vmul.f32 %v8539_v54, %v823_v58  ;;  %v2481_v51 = vadd.f32 %v2268_v46, %v1987_v38  ;;  %v2070_v45 = vmul.f32 %v8543_v56, %v823_v58  ;;  %v2554_v13 = vmul.f32 %v8556_v60, %v823_v58 }
  0xd7   :  { %v1169_v41 = vrot.slane %v973_v25, 1  ;;  %v2752_v30 = vsel %vm1615_vm1, %v14520_v21, %v2751_v9  ;;  %v14521_v39 = vrot.slane %v8911_v37, 1  ;;  %v3165_v5 = vmul.f32 %v8560_v62, %v823_v58 }
  0xd8   :  { %v3636_v57 = vmul.f32 %v8682_v1, %v823_v58  ;;  %v9247_v38 = vsel %vm5031_vm4, %v9227_v20, -inf  ;;  %v2269_v25 = vrot.slane %v2070_v45, 1  ;;  %v14523_v23 = vrot.slane %v8914_v24, 2 }
  0xd9   :  { %v3355_v33 = vsel %vm1145_vm2, %v14521_v39, %v3354_v15  ;;  %14522 = vst [vmem:[#allocation16_spill] sm:$0xff] %v9247_v38  ;;  %v1170_v22 = vsel %vm1145_vm2, %v1167_v47, %v1169_v41  ;;  %v1639_v37 = vrot.slane %v1443_v36, 2  ;;  %v3356_v10 = vrot.slane %v3165_v5, 1  ;;  %v9262_v5 = vpop.permute.xlu0 %462 }
  0xda   :  { %v3564_v46 = vadd.f32 %v3355_v33, %v3093_v32  ;;  %v3826_v21 = vsel %vm1615_vm1, %v14523_v23, %v3825_v17  ;;  %v3827_v39 = vrot.slane %v3636_v57, 2  ;;  %v2270_v42 = vsel %vm1145_vm2, %v2267_v50, %v2269_v25 }
  0xdb   :  { %v2753_v40 = vrot.slane %v2554_v13, 2  ;;  %v1372_v35 = vadd.f32 %v1170_v22, %v685_v59  ;;  %v2482_v32 = vadd.f32 %v2270_v42, %v1988_v28  ;;  %v3357_v47 = vsel %vm1145_vm2, %v3354_v15, %v3356_v10 }
  0xdc   :  { %v4035_v58 = vadd.f32 %v3826_v21, %v3564_v46  ;;  %v9258_v45 = vmul.f32 %v8537_v53, %v468_v34  ;;  %v2965_v41 = vadd.f32 %v2752_v30, %v2481_v51  ;;  %v3565_v33 = vadd.f32 %v3357_v47, %v3094_v26 }
  0xdd   :  { %v14524_v57 = vrot.slane %v9171_v52, 2  ;;  %v3828_v59 = vsel %vm1615_vm1, %v3825_v17, %v3827_v39  ;;  %v9269_v42 = vmul.f32 %v8539_v54, %v468_v34  ;;  %v9272_v10 = vmul.f32 %v8543_v56, %v468_v34  ;;  %v828_v47 = vpop.permute.xlu0 %827 }
  0xde   :  { %v4106_v36 = vadd.f32 %v9024_v3, %v4035_v58  ;;  %v2754_v51 = vsel %vm1615_vm1, %v2751_v9, %v2753_v40  ;;  %v4036_v13 = vadd.f32 %v3828_v59, %v3565_v33  ;;  %v9276_v26 = vmul.f32 %v8556_v60, %v468_v34 }
  0xdf   :  { %v1640_v50 = vsel %vm1615_vm1, %v14524_v57, %v1639_v37  ;;  %14525 = vst [vmem:[#allocation18_spill] sm:$0xff] %v9272_v10  ;;  %v2966_v30 = vadd.f32 %v2754_v51, %v2482_v32  ;;  %v9279_v52 = vmul.f32 %v8522_v49, %v468_v34  ;;  %v9284_v22 = vmul.f32 %v8541_v55, %v468_v34 }
  0xe0   :  { %v4170_v28 = vmax.f32 %v4106_v36, 0.0  ;;  %14526 = vst [vmem:[#allocation38_spill] sm:$0xff] %v9276_v26  ;;  %v1842_v15 = vadd.f32 %v1640_v50, %v1372_v35  ;;  %v4107_v46 = vadd.f32 %v9024_v3, %v4036_v13  ;;  %v9287_v25 = vmul.f32 %v8560_v62, %v468_v34 }
  0xe1   :  { %v9290_v40 = vmul.f32 %v8682_v1, %v468_v34  ;;  %v9295_v23 = vmul.f32 %v8558_v61, %v468_v34  ;;  %v975_v21 = vmul.f32 %v8537_v53, %v9041_v6  ;;  %v1445_v58 = vmul.f32 %v8539_v54, %v9041_v6 }
  0xe2   :  { %14527 = vst [vmem:[#allocation39_spill] sm:$0xff] %v9287_v25  ;;  %v9300_v37 = vsel %vm4230_vm3, %v4170_v28, -inf  ;;  %v2072_v32 = vmul.f32 %v8543_v56, %v9041_v6  ;;  %v687_v36 = vmul.f32 %v8522_v49, %v9041_v6  ;;  %v2556_v33 = vmul.f32 %v8556_v60, %v9041_v6  ;;  %v14535_v25 = vld [vmem:[#allocation28_spill] sm:$0xff] }
  0xe3   :  { %14528 = vst [vmem:[#allocation40_spill] sm:$0xff] %v9290_v40  ;;  %14529 = vst [vmem:[#allocation41_spill] sm:$0xff] %v9295_v23  ;;  %v1172_v34 = vrot.slane %v975_v21, 1  ;;  %v3167_v57 = vmul.f32 %v8560_v62, %v9041_v6  ;;  %v4171_v50 = vmax.f32 %v4107_v46, 0.0  ;;  %v3638_v51 = vmul.f32 %v8682_v1, %v9041_v6 }
  0xe4   :  { %v1926_v13 = vmul.f32 %v8541_v55, %v9041_v6  ;;  %v2272_v19 = vrot.slane %v2072_v32, 1  ;;  %v976_v21 = vmul.f32 %v8537_v53, %v828_v47  ;;  %v14530_v24 = vrot.slane %v8925_v16, 1 }
  0xe5   :  { %v1642_v35 = vrot.slane %v1445_v58, 2  ;;  %v3034_v46 = vmul.f32 %v8558_v61, %v9041_v6  ;;  %v1446_v59 = vmul.f32 %v8539_v54, %v828_v47  ;;  %v1989_v28 = vadd.f32 %v8958_v4, %v9230_v48 }
  0xe6   :  { %v1173_v39 = vsel %vm1145_vm2, %v14530_v24, %v1172_v34  ;;  %v2756_v9 = vrot.slane %v2556_v33, 2  ;;  %v3359_v17 = vrot.slane %v3167_v57, 1  ;;  %v1174_v20 = vrot.slane %v976_v21, 1  ;;  %v14533_v33 = vld [vmem:[#allocation25_spill] sm:$0xff] }
  0xe7   :  { %v2073_v32 = vmul.f32 %v8543_v56, %v828_v47  ;;  %v9330_v38 = vsel %vm4230_vm3, %v4171_v50, -inf  ;;  %v3830_v16 = vrot.slane %v3638_v51, 2  ;;  %v1373_v24 = vadd.f32 %v1173_v39, %v8948_v18  ;;  %v14536_v39 = vld [vmem:[#allocation27_spill] sm:$0xff] }
  0xe8   :  { %v2557_v58 = vmul.f32 %v8556_v60, %v828_v47  ;;  %v1175_v6 = vsel %vm1145_vm2, %v1172_v34, %v1174_v20  ;;  %v1990_v11 = vadd.f32 %v1926_v13, %v1842_v15  ;;  %v14532_v26 = vrot.slane %v14531_v29, 1  ;;  %v14538_v29 = vld [vmem:[#allocation29_spill] sm:$0xff] }
  0xe9   :  { %v2274_v48 = vrot.slane %v2073_v32, 1  ;;  %v14534_v57 = vrot.slane %v14533_v33, 2  ;;  %v1644_v40 = vrot.slane %v1446_v59, 2  ;;  %v3095_v51 = vadd.f32 %v14535_v25, %v2965_v41  ;;  %v477_v59 = vpop.permute.xlu1 %476 }
  0xea   :  { %v2273_v4 = vsel %vm1145_vm2, %v14532_v26, %v2272_v19  ;;  %v14537_v23 = vrot.slane %v14536_v39, 2  ;;  %v3168_v15 = vmul.f32 %v8560_v62, %v828_v47  ;;  %v14539_v34 = vrot.slane %v14538_v29, 1 }
  0xeb   :  { %v1643_v21 = vsel %vm1615_vm1, %v14534_v57, %v1642_v35  ;;  %v2483_v50 = vadd.f32 %v2273_v4, %v1989_v28  ;;  %v2275_v18 = vsel %vm1145_vm2, %v2272_v19, %v2274_v48  ;;  %v1374_v13 = vadd.f32 %v1175_v6, %v687_v36  ;;  %v14540_v19 = vld [vmem:[#allocation30_spill] sm:$0xff] }
  0xec   :  { %v2757_v20 = vsel %vm1615_vm1, %v14537_v23, %v2756_v9  ;;  %v3360_v26 = vsel %vm1145_vm2, %v14539_v34, %v3359_v17  ;;  %v2758_v32 = vrot.slane %v2557_v58, 2  ;;  %v3096_v33 = vadd.f32 %v3034_v46, %v2966_v30 }
  0xed   :  { %v3566_v57 = vadd.f32 %v3360_v26, %v3095_v51  ;;  %v2484_v28 = vadd.f32 %v2275_v18, %v1990_v11  ;;  %v3361_v4 = vrot.slane %v3168_v15, 1  ;;  %v3639_v41 = vmul.f32 %v8682_v1, %v828_v47 }
  0xee   :  { %v14541_v25 = vrot.slane %v14540_v19, 2  ;;  %v1645_v23 = vsel %vm1615_vm1, %v1642_v35, %v1644_v40  ;;  %v1843_v39 = vadd.f32 %v1643_v21, %v1373_v24  ;;  %v2967_v10 = vadd.f32 %v2757_v20, %v2483_v50  ;;  %v9451_v20 = vld [vmem:[%s14093_s1 + $0x8] ss:$0 sm:$0xff] }
  0xef   :  { %v3362_v34 = vsel %vm1145_vm2, %v3359_v17, %v3361_v4  ;;  %v3832_v36 = vrot.slane %v3639_v41, 2  ;;  %v9357_v30 = vmul.f32 %v8537_v53, %v477_v59  ;;  %v9360_v11 = vmul.f32 %v8539_v54, %v477_v59 }
  0xf0   :  { %v3831_v48 = vsel %vm1615_vm1, %v14541_v25, %v3830_v16  ;;  %v1844_v46 = vadd.f32 %v1645_v23, %v1374_v13  ;;  %v2759_v47 = vsel %vm1615_vm1, %v2756_v9, %v2758_v32  ;;  %v3567_v58 = vadd.f32 %v3362_v34, %v3096_v33  ;;  %v14550_v23 = vld [vmem:[#allocation10_spill] sm:$0xff]  ;;  %v14559_v25 = vld [vmem:[#allocation37_spill] sm:$0xff] }
  0xf1   :  { %v4037_v29 = vadd.f32 %v3831_v48, %v3566_v57  ;;  %14542 = vst [vmem:[#allocation26_spill] sm:$0xff] %v9360_v11  ;;  %v2968_v51 = vadd.f32 %v2759_v47, %v2484_v28  ;;  %v3833_v40 = vsel %vm1615_vm1, %v3830_v16, %v3832_v36  ;;  %v9366_v35 = vmul.f32 %v8522_v49, %v477_v59 }
  0xf2   :  { %v9369_v17 = vmul.f32 %v8543_v56, %v477_v59  ;;  %v4038_v24 = vadd.f32 %v3833_v40, %v3567_v58  ;;  %v9372_v50 = vmul.f32 %v8541_v55, %v477_v59  ;;  %v9375_v18 = vmul.f32 %v8556_v60, %v477_v59 }
  0xf3   :  { %v4108_v6 = vadd.f32 %v9024_v3, %v4037_v29  ;;  %v9381_v16 = vmul.f32 %v8537_v53, %v9233_v27  ;;  %v9385_v15 = vmul.f32 %v8539_v54, %v9233_v27  ;;  %v9390_v32 = vmul.f32 %v8560_v62, %v477_v59 }
  0xf4   :  { %14543 = vst [vmem:[#allocation25_spill] sm:$0xff] %v9369_v17  ;;  %14544 = vst [vmem:[#allocation28_spill] sm:$0xff] %v9375_v18  ;;  %v4109_v26 = vadd.f32 %v9024_v3, %v4038_v24  ;;  %v9393_v33 = vmul.f32 %v8682_v1, %v477_v59  ;;  %v9400_v4 = vmul.f32 %v8558_v61, %v477_v59  ;;  %v14551_v29 = vrot.slane %v14550_v23, 1 }
  0xf5   :  { %v4172_v21 = vmax.f32 %v4108_v6, 0.0  ;;  %14545 = vst [vmem:[#allocation27_spill] sm:$0xff] %v9390_v32  ;;  %v1177_v41 = vrot.slane %v9381_v16, 1  ;;  %v2075_v48 = vmul.f32 %v8543_v56, %v9233_v27  ;;  %v9408_v1 = vmul.f32 %v8556_v60, %v9233_v27 }
  0xf6   :  { %14546 = vst [vmem:[#allocation29_spill] sm:$0xff] %v9393_v33  ;;  %14548 = vst [vmem:[#allocation42_spill] sm:$0xff] %v9400_v4  ;;  %v4173_v19 = vmax.f32 %v4109_v26, 0.0  ;;  %v689_v59 = vmul.f32 %v8522_v49, %v9233_v27  ;;  %v14153_v36 = vrot.slane %v9385_v15, 2  ;;  %v1928_v26 = vmul.f32 %v8541_v55, %v9233_v27 }
  0xf7   :  { %v4238_v13 = vsel %vm4230_vm3, %v4172_v21, -inf  ;;  %v1178_v34 = vsel %vm1145_vm2, %v14551_v29, %v1177_v41  ;;  %v2277_v40 = vrot.slane %v2075_v48, 1  ;;  %v14553_v21 = vld [vmem:[#allocation32_spill] sm:$0xff]  ;;  %v833_v29 = vpop.permute.xlu1 %832  ;;  %v14162_v48 = vrot.slane %v9408_v1, 2 }
  0xf8   :  { %v9396_v57 = vmax.f32 %v9300_v37, %v4238_v13  ;;  %v4241_v47 = vsel %vm4230_vm3, %v4173_v19, -inf  ;;  %v1375_v16 = vadd.f32 %v1178_v34, %v14553_v21  ;;  %v14554_v13 = vld [vmem:[#allocation19_spill] sm:$0xff]  ;;  %v14555_v19 = vld [vmem:[#allocation33_spill] sm:$0xff]  ;;  %v3097_v6 = vadd.f32 %v14559_v25, %v2967_v10 }
  0xf9   :  { %v9424_v24 = vmax.f32 %v9330_v38, %v4241_v47  ;;  %v1991_v23 = vadd.f32 %v14554_v13, %v1843_v39  ;;  %v14556_v28 = vrot.slane %v14555_v19, 1  ;;  %v3170_v38 = vmul.f32 %v8560_v62, %v9233_v27  ;;  %v14557_v47 = vld [vmem:[#allocation31_spill] sm:$0xff] }
  0xfa   :  { %14547 = vst [vmem:[#allocation30_spill] sm:$0xff] %v9396_v57  ;;  %v9412_v37 = vrot.slane %v9396_v57, %v14513_v2  ;;  %v14558_v39 = vrot.slane %v14557_v47, 2  ;;  %v1992_v13 = vadd.f32 %v1928_v26, %v1844_v46  ;;  %v3641_v34 = vmul.f32 %v9451_v20, %v9233_v27  ;;  %v14561_v26 = vld [vmem:[#allocation34_spill] sm:$0xff]  ;;  %v9472_v47 = vpop.permute.xlu0 %471 }
  0xfb   :  { %14552 = vst [vmem:[#allocation10_spill] sm:$0xff] %v9424_v24  ;;  %v2278_v58 = vsel %vm1145_vm2, %v14556_v28, %v2277_v40  ;;  %v3036_v28 = vmul.f32 %v8558_v61, %v9233_v27  ;;  %v3364_v19 = vrot.slane %v3170_v38, 1  ;;  %v979_v9 = vmul.f32 %v8537_v53, %v833_v29 }
  0xfc   :  { %14549 = vst [vmem:[#allocation43_spill] sm:$0xff] %v9412_v37  ;;  %v1648_v21 = vsel %vm1615_vm1, %v14558_v39, %v14153_v36  ;;  %v9460_v10 = vrot.slane %v9424_v24, %v14513_v2  ;;  %v2485_v25 = vadd.f32 %v2278_v58, %v1991_v23  ;;  %v14562_v38 = vrot.slane %v14561_v26, 2  ;;  %v14563_v36 = vld [vmem:[#allocation35_spill] sm:$0xff]  ;;  %v9479_v23 = vld [vmem:[%s14092_s0 + $0x1e0] sm:$0xff] }
  0xfd   :  { %v9462_v46 = vadd.f32 %v1648_v21, %v1375_v16  ;;  %v14564_v27 = vrot.slane %v14563_v36, 1  ;;  %v3835_v57 = vrot.slane %v3641_v34, 2  ;;  %v1179_v33 = vrot.slane %v979_v9, 1  ;;  %v14565_v21 = vld [vmem:[#allocation36_spill] sm:$0xff] }
  0xfe   :  { %14560 = vst [vmem:[#allocation32_spill] sm:$0xff] %v9460_v10  ;;  %v2762_v39 = vsel %vm1615_vm1, %v14562_v38, %v14162_v48  ;;  %v3098_v32 = vadd.f32 %v3036_v28, %v2968_v51  ;;  %v1449_v16 = vmul.f32 %v8539_v54, %v833_v29  ;;  %v2076_v58 = vmul.f32 %v8543_v56, %v833_v29 }
  0xff   :  { %v3365_v37 = vsel %vm1145_vm2, %v14564_v27, %v3364_v19  ;;  %v14566_v26 = vrot.slane %v14565_v21, 2  ;;  %v2560_v34 = vmul.f32 %v8556_v60, %v833_v29  ;;  %v3171_v9 = vmul.f32 %v8560_v62, %v833_v29 }
 0x100   :  { %v3568_v24 = vadd.f32 %v3365_v37, %v3097_v6  ;;  %v3642_v51 = vmul.f32 %v9451_v20, %v833_v29  ;;  %v9490_v37 = vld [vmem:[%s14092_s0 + $0x1d8] sm:$0xff]  ;;  %v1180_v38 = vsel %vm1145_vm2, %v1177_v41, %v1179_v33  ;;  %v2279_v27 = vrot.slane %v2076_v58, 1  ;;  %v486_v6 = vpop.permute.xlu1 %485 }
 0x101   :  { %v3836_v36 = vsel %vm1615_vm1, %v14566_v26, %v3835_v57  ;;  %v9497_v21 = vsel %vm5031_vm4, %v9460_v10, -inf  ;;  %v3366_v26 = vrot.slane %v3171_v9, 1  ;;  %v14169_v29 = vrot.slane %v9479_v23, 7  ;;  %v9506_v9 = vpop.permute.xlu0 %480 }
 0x102   :  { %v4039_v28 = vadd.f32 %v3836_v36, %v3568_v24  ;;  %14567 = vst [vmem:[#allocation19_spill] sm:$0xff] %v9497_v21  ;;  %v3837_v48 = vrot.slane %v3642_v51, 2  ;;  %v1649_v18 = vrot.slane %v1449_v16, 2  ;;  %v2280_v17 = vsel %vm1145_vm2, %v2277_v40, %v2279_v27  ;;  %v14568_v40 = vld [vmem:[#allocation7_spill] sm:$0xff] }
 0x103   :  { %v14168_v11 = vrot.slane %v9490_v37, 7  ;;  %v9503_v24 = vadd.f32 %v2762_v39, %v2485_v25  ;;  %v1376_v33 = vadd.f32 %v1180_v38, %v689_v59  ;;  %v2763_v41 = vrot.slane %v2560_v34, 2  ;;  %v14572_v38 = vld [vmem:[#allocation5_spill] sm:$0xff] }
 0x104   :  { %v4110_v4 = vadd.f32 %v9024_v3, %v4039_v28  ;;  %v3367_v58 = vsel %vm1145_vm2, %v3364_v19, %v3366_v26  ;;  %v2486_v36 = vadd.f32 %v2280_v17, %v1992_v13  ;;  %v356_v51 = vsel %vm161_vm0, 0.0, %v14169_v29 }
 0x105   :  { %v3569_v10 = vadd.f32 %v3367_v58, %v3098_v32  ;;  %v14569_v16 = vrot.slane %v14568_v40, 7  ;;  %v3838_v39 = vsel %vm1615_vm1, %v3835_v57, %v3837_v48  ;;  %665 = vperm.xlu1 %7923, %v356_v51   ;;  %v9519_v17 = vmul.f32 %v8537_v53, %v486_v6 }
 0x106   :  { %v4174_v59 = vmax.f32 %v4110_v4, 0.0  ;;  %v14570_v32 = vrot.slane %v9385_v15, 2  ;;  %v9525_v34 = vmul.f32 %v8539_v54, %v486_v6  ;;  %v14573_v27 = vrot.slane %v14572_v38, 7 }
 0x107   :  { %v253_v28 = vsel %vm161_vm0, %v14569_v16, %v14168_v11  ;;  %v4040_v19 = vadd.f32 %v3838_v39, %v3569_v10  ;;  %v14574_v57 = vrot.slane %v9408_v1, 2  ;;  %v9534_v58 = vmul.f32 %v8543_v56, %v486_v6 }
 0x108   :  { %660 = vperm.xlu0 %7917, %v253_v28   ;;  %v1650_v13 = vsel %vm1615_vm1, %v14570_v32, %v1649_v18  ;;  %14571 = vst [vmem:[#allocation33_spill] sm:$0xff] %v9525_v34  ;;  %v386_v26 = vsel %vm161_vm0, %v14573_v27, 0.0  ;;  %v9537_v15 = vmul.f32 %v8556_v60, %v486_v6  ;;  %v9541_v51 = vmul.f32 %v8522_v49, %v486_v6  ;;  %v838_v32 = vpop.permute.xlu0 %837 }
 0x109   :  { %v1846_v4 = vadd.f32 %v1650_v13, %v1376_v33  ;;  %v2764_v48 = vsel %vm1615_vm1, %v14574_v57, %v2763_v41  ;;  %v4111_v10 = vadd.f32 %v9024_v3, %v4040_v19  ;;  %v9544_v40 = vmul.f32 %v8560_v62, %v486_v6  ;;  %937 = vperm.xlu1 %7923, %v386_v26  }
 0x10a   :  { %14575 = vst [vmem:[#allocation31_spill] sm:$0xff] %v9537_v15  ;;  %v2970_v18 = vadd.f32 %v2764_v48, %v2486_v36  ;;  %14576 = vst [vmem:[#allocation37_spill] sm:$0xff] %v9541_v51  ;;  %v9547_v33 = vsel %vm4230_vm3, %v4174_v59, -inf  ;;  %v9551_v41 = vmul.f32 %v8541_v55, %v486_v6  ;;  %v981_v16 = vmul.f32 %v8537_v53, %v9262_v5 }
 0x10b   :  { %14577 = vst [vmem:[#allocation34_spill] sm:$0xff] %v9544_v40  ;;  %v9557_v28 = vmul.f32 %v8558_v61, %v486_v6  ;;  %v9560_v39 = vmul.f32 %v9451_v20, %v486_v6  ;;  %v1451_v59 = vmul.f32 %v8539_v54, %v9262_v5  ;;  %v2078_v27 = vmul.f32 %v8543_v56, %v9262_v5 }
 0x10c   :  { %v1182_v38 = vrot.slane %v981_v16, 1  ;;  %v4175_v26 = vmax.f32 %v4111_v10, 0.0  ;;  %v691_v48 = vmul.f32 %v8522_v49, %v9262_v5  ;;  %v3173_v6 = vmul.f32 %v8560_v62, %v9262_v5 }
 0x10d   :  { %14578 = vst [vmem:[#allocation35_spill] sm:$0xff] %v9557_v28  ;;  %14579 = vst [vmem:[#allocation36_spill] sm:$0xff] %v9560_v39  ;;  %v1652_v25 = vrot.slane %v1451_v59, 2  ;;  %v2562_v36 = vmul.f32 %v8556_v60, %v9262_v5  ;;  %v3644_v19 = vmul.f32 %v9451_v20, %v9262_v5  ;;  %v982_v16 = vmul.f32 %v8537_v53, %v838_v32 }
 0x10e   :  { %v1930_v10 = vmul.f32 %v8541_v55, %v9262_v5  ;;  %v2282_v57 = vrot.slane %v2078_v27, 1  ;;  %v14580_v1 = vrot.slane %v9131_v43, 1  ;;  %v1452_v21 = vmul.f32 %v8539_v54, %v838_v32 }
 0x10f   :  { %v1184_v29 = vrot.slane %v982_v16, 1  ;;  %v1993_v15 = vadd.f32 %v9150_v31, %v9462_v46  ;;  %v9589_v40 = vsel %vm4230_vm3, %v4175_v26, -inf  ;;  %v3038_v13 = vmul.f32 %v8558_v61, %v9262_v5 }
 0x110   :  { %v1183_v11 = vsel %vm1145_vm2, %v14580_v1, %v1182_v38  ;;  %v3369_v39 = vrot.slane %v3173_v6, 1  ;;  %v2079_v27 = vmul.f32 %v8543_v56, %v838_v32  ;;  %v2766_v43 = vrot.slane %v2562_v36, 2 }
 0x111   :  { %v1377_v59 = vadd.f32 %v1183_v11, %v9145_v12  ;;  %v3840_v34 = vrot.slane %v3644_v19, 2  ;;  %v14581_v1 = vrot.slane %v9136_v7, 2  ;;  %v2563_v11 = vmul.f32 %v8556_v60, %v838_v32  ;;  %v9609_v7 = vld [vmem:[%s14092_s0 + $0x1e8] sm:$0xff] }
 0x112   :  { %v1185_v16 = vsel %vm1145_vm2, %v1182_v38, %v1184_v29  ;;  %v1994_v31 = vadd.f32 %v1930_v10, %v1846_v4  ;;  %v14582_v46 = vrot.slane %v9142_v0, 1  ;;  %v2284_v51 = vrot.slane %v2079_v27, 1 }
 0x113   :  { %v1653_v12 = vsel %vm1615_vm1, %v14581_v1, %v1652_v25  ;;  %v1654_v5 = vrot.slane %v1452_v21, 2  ;;  %v3099_v36 = vadd.f32 %v9157_v14, %v9503_v24  ;;  %v2768_v4 = vrot.slane %v2563_v11, 2 }
 0x114   :  { %v2283_v26 = vsel %vm1145_vm2, %v14582_v46, %v2282_v57  ;;  %v9602_v6 = vadd.f32 %v1653_v12, %v1377_v59  ;;  %v2285_v29 = vsel %vm1145_vm2, %v2282_v57, %v2284_v51  ;;  %v3174_v0 = vmul.f32 %v8560_v62, %v838_v32  ;;  %v495_v57 = vpop.permute.xlu1 %494 }
 0x115   :  { %v2487_v28 = vadd.f32 %v2283_v26, %v1993_v15  ;;  %v14583_v19 = vrot.slane %v9160_v8, 1  ;;  %v1378_v38 = vadd.f32 %v1185_v16, %v691_v48  ;;  %v3100_v10 = vadd.f32 %v3038_v13, %v2970_v18 }
 0x116   :  { %v3645_v59 = vmul.f32 %v9451_v20, %v838_v32  ;;  %v2488_v14 = vadd.f32 %v2285_v29, %v1994_v31  ;;  %v3371_v24 = vrot.slane %v3174_v0, 1  ;;  %v14584_v27 = vrot.slane %v9167_v44, 2 }
 0x117   :  { %v3370_v21 = vsel %vm1145_vm2, %v14583_v19, %v3369_v39  ;;  %v14177_v51 = vrot.slane %v9609_v7, 7  ;;  %v1655_v12 = vsel %vm1615_vm1, %v1652_v25, %v1654_v5  ;;  %v14585_v8 = vrot.slane %v9153_v63, 2 }
 0x118   :  { %v3570_v15 = vadd.f32 %v3370_v21, %v3099_v36  ;;  %v3841_v1 = vsel %vm1615_vm1, %v14584_v27, %v3840_v34  ;;  %v3842_v48 = vrot.slane %v3645_v59, 2  ;;  %v2769_v13 = vsel %vm1615_vm1, %v2766_v43, %v2768_v4  ;;  %v14600_v27 = vld [vmem:[#allocation39_spill] sm:$0xff] }
 0x119   :  { %v2767_v11 = vsel %vm1615_vm1, %v14585_v8, %v2766_v43  ;;  %v3372_v16 = vsel %vm1145_vm2, %v3369_v39, %v3371_v24  ;;  %v14586_v44 = vrot.slane %v9479_v23, 7  ;;  %v9634_v63 = vmul.f32 %v8537_v53, %v495_v57 }
 0x11a   :  { %v4041_v18 = vadd.f32 %v3841_v1, %v3570_v15  ;;  %v2971_v32 = vadd.f32 %v2767_v11, %v2487_v28  ;;  %v3571_v46 = vadd.f32 %v3372_v16, %v3100_v10  ;;  %v9637_v26 = vmul.f32 %v8539_v54, %v495_v57 }
 0x11b   :  { %v256_v31 = vsel %vm161_vm0, %v14586_v44, %v14177_v51  ;;  %v1848_v43 = vadd.f32 %v1655_v12, %v1378_v38  ;;  %v2972_v28 = vadd.f32 %v2769_v13, %v2488_v14  ;;  %v3843_v39 = vsel %vm1615_vm1, %v3840_v34, %v3842_v48  ;;  %v14588_v38 = vld [vmem:[#allocation6_spill] sm:$0xff] }
 0x11c   :  { %v4112_v25 = vadd.f32 %v9024_v3, %v4041_v18  ;;  %669 = vperm.xlu0 %7917, %v256_v31   ;;  %v9641_v5 = vmul.f32 %v8522_v49, %v495_v57  ;;  %v4042_v23 = vadd.f32 %v3843_v39, %v3571_v46  ;;  %v9644_v29 = vmul.f32 %v8541_v55, %v495_v57 }
 0x11d   :  { %v9647_v4 = vmul.f32 %v8543_v56, %v495_v57  ;;  %v9650_v0 = vmul.f32 %v8556_v60, %v495_v57  ;;  %v9653_v19 = vmul.f32 %v8560_v62, %v495_v57  ;;  %v14587_v21 = vrot.slane %v9490_v37, 7 }
 0x11e   :  { %v4176_v36 = vmax.f32 %v4112_v25, 0.0  ;;  %v14589_v10 = vrot.slane %v14588_v38, 7  ;;  %v4113_v59 = vadd.f32 %v9024_v3, %v4042_v23  ;;  %v9666_v1 = vmul.f32 %v8558_v61, %v495_v57 }
 0x11f   :  { %v388_v34 = vsel %vm161_vm0, %v14587_v21, 0.0  ;;  %v9669_v37 = vmul.f32 %v9451_v20, %v495_v57  ;;  %v984_v12 = vmul.f32 %v8537_v53, %v9472_v47  ;;  %v9675_v3 = vmul.f32 %v8539_v54, %v9472_v47 }
 0x120   :  { %v387_v15 = vsel %vm161_vm0, %v14589_v10, 0.0  ;;  %v4244_v14 = vsel %vm4230_vm3, %v4176_v36, -inf  ;;  %947 = vperm.xlu1 %7923, %v388_v34   ;;  %v4177_v8 = vmax.f32 %v4113_v59, 0.0  ;;  %v2081_v18 = vmul.f32 %v8543_v56, %v9472_v47  ;;  %v843_v59 = vpop.permute.xlu1 %842 }
 0x121   :  { %942 = vperm.xlu0 %7917, %v387_v15   ;;  %14590 = vst [vmem:[#allocation7_spill] sm:$0xff] %v9669_v37  ;;  %v9678_v11 = vmax.f32 %v9547_v33, %v4244_v14  ;;  %v1187_v16 = vrot.slane %v984_v12, 1  ;;  %v14176_v44 = vrot.slane %v9675_v3, 2  ;;  %v1932_v46 = vmul.f32 %v8541_v55, %v9472_v47 }
 0x122   :  { %v4247_v31 = vsel %vm4230_vm3, %v4177_v8, -inf  ;;  %v2287_v25 = vrot.slane %v2081_v18, 1  ;;  %v9691_v33 = vmul.f32 %v8556_v60, %v9472_v47  ;;  %v693_v36 = vmul.f32 %v8522_v49, %v9472_v47  ;;  %v14596_v8 = vld [vmem:[#allocation18_spill] sm:$0xff] }
 0x123   :  { %14591 = vst [vmem:[#allocation5_spill] sm:$0xff] %v9678_v11  ;;  %v9694_v39 = vmax.f32 %v9589_v40, %v4247_v31  ;;  %v14593_v21 = vrot.slane %v9258_v45, 1  ;;  %v9706_v10 = vrot.slane %v9678_v11, %v14513_v2  ;;  %v1995_v40 = vadd.f32 %v9284_v22, %v9602_v6  ;;  %v14598_v22 = vld [vmem:[#allocation41_spill] sm:$0xff] }
 0x124   :  { %v1996_v15 = vadd.f32 %v1932_v46, %v1848_v43  ;;  %v14595_v45 = vrot.slane %v9269_v42, 2  ;;  %v14597_v18 = vrot.slane %v14596_v8, 1  ;;  %v2771_v23 = vrot.slane %v9691_v33, 2 }
 0x125   :  { %14592 = vst [vmem:[#allocation6_spill] sm:$0xff] %v9694_v39  ;;  %v1188_v34 = vsel %vm1145_vm2, %v14593_v21, %v1187_v16  ;;  %14594 = vst [vmem:[#allocation44_spill] sm:$0xff] %v9706_v10  ;;  %v3040_v21 = vmul.f32 %v8558_v61, %v9472_v47  ;;  %v3101_v6 = vadd.f32 %v14598_v22, %v2971_v32  ;;  %v9734_v22 = vpop.permute.xlu0 %489  ;;  %v14601_v24 = vrot.slane %v14600_v27, 1 }
 0x126   :  { %v1379_v14 = vadd.f32 %v1188_v34, %v9279_v52  ;;  %v1658_v12 = vsel %vm1615_vm1, %v14595_v45, %v14176_v44  ;;  %v2288_v31 = vsel %vm1145_vm2, %v14597_v18, %v2287_v25  ;;  %v3176_v52 = vmul.f32 %v8560_v62, %v9472_v47  ;;  %v9747_v44 = vld [vmem:[%s14092_s0 + $0x1f0] sm:$0xff] }
 0x127   :  { %v3647_v43 = vmul.f32 %v9451_v20, %v9472_v47  ;;  %v985_v46 = vmul.f32 %v8537_v53, %v843_v59  ;;  %v1455_v34 = vmul.f32 %v8539_v54, %v843_v59  ;;  %v2082_v45 = vmul.f32 %v8543_v56, %v843_v59 }
 0x128   :  { %v3374_v8 = vrot.slane %v3176_v52, 1  ;;  %v2566_v33 = vmul.f32 %v8556_v60, %v843_v59  ;;  %v3177_v32 = vmul.f32 %v8560_v62, %v843_v59  ;;  %v3102_v38 = vadd.f32 %v3040_v21, %v2972_v28 }
 0x129   :  { %v3845_v18 = vrot.slane %v3647_v43, 2  ;;  %v1189_v13 = vrot.slane %v985_v46, 1  ;;  %v2289_v47 = vrot.slane %v2082_v45, 1  ;;  %v3648_v57 = vmul.f32 %v9451_v20, %v843_v59  ;;  %v14602_v45 = vld [vmem:[#allocation40_spill] sm:$0xff] }
 0x12a   :  { %v9739_v42 = vrot.slane %v9694_v39, %v14513_v2  ;;  %v2489_v48 = vadd.f32 %v2288_v31, %v1995_v40  ;;  %v3375_v52 = vsel %vm1145_vm2, %v14601_v24, %v3374_v8  ;;  %v3376_v43 = vrot.slane %v3177_v32, 1  ;;  %v567_v32 = vpop.permute.xlu1 %566 }
 0x12b   :  { %v3572_v28 = vadd.f32 %v3375_v52, %v3101_v6  ;;  %v1190_v21 = vsel %vm1145_vm2, %v1187_v16, %v1189_v13  ;;  %v1659_v46 = vrot.slane %v1455_v34, 2  ;;  %v2290_v59 = vsel %vm1145_vm2, %v2287_v25, %v2289_v47  ;;  %v14604_v52 = vld [vmem:[#allocation38_spill] sm:$0xff] }
 0x12c   :  { %14599 = vst [vmem:[#allocation18_spill] sm:$0xff] %v9739_v42  ;;  %v14603_v51 = vrot.slane %v14602_v45, 2  ;;  %v1380_v31 = vadd.f32 %v1190_v21, %v693_v36  ;;  %v2773_v27 = vrot.slane %v2566_v33, 2  ;;  %v3377_v24 = vsel %vm1145_vm2, %v3374_v8, %v3376_v43  ;;  %v9765_v36 = vld [vmem:[%s14094_s2] ss:$0 sm:$0xff]  ;;  %v9769_v8 = vpop.permute.xlu0 %498 }
 0x12d   :  { %v3573_v39 = vadd.f32 %v3377_v24, %v3102_v38  ;;  %v3847_v10 = vrot.slane %v3648_v57, 2  ;;  %v14183_v37 = vrot.slane %v9747_v44, 7  ;;  %v1849_v6 = vadd.f32 %v1658_v12, %v1379_v14 }
 0x12e   :  { %v3846_v40 = vsel %vm1615_vm1, %v14603_v51, %v3845_v18  ;;  %v14605_v13 = vrot.slane %v14604_v52, 2  ;;  %v2490_v25 = vadd.f32 %v2290_v59, %v1996_v15  ;;  %v14606_v34 = vrot.slane %v9609_v7, 7 }
 0x12f   :  { %v4043_v42 = vadd.f32 %v3846_v40, %v3572_v28  ;;  %v3848_v57 = vsel %vm1615_vm1, %v3845_v18, %v3847_v10  ;;  %v357_v14 = vsel %vm161_vm0, 0.0, %v14183_v37  ;;  %v9775_v7 = vmul.f32 %v8537_v53, %v567_v32 }
 0x130   :  { %v2772_v16 = vsel %vm1615_vm1, %v14605_v13, %v2771_v23  ;;  %v389_v51 = vsel %vm161_vm0, %v14606_v34, 0.0  ;;  %v14608_v12 = vrot.slane %v9675_v3, 2  ;;  %v4044_v47 = vadd.f32 %v3848_v57, %v3573_v39  ;;  %1906 = vperm.xlu1 %7923, %v357_v14  }
 0x131   :  { %v4114_v38 = vadd.f32 %v9765_v36, %v4043_v42  ;;  %952 = vperm.xlu0 %7917, %v389_v51   ;;  %14607 = vst [vmem:[#allocation41_spill] sm:$0xff] %v9775_v7  ;;  %v2973_v15 = vadd.f32 %v2772_v16, %v2489_v48  ;;  %v9781_v42 = vmul.f32 %v8539_v54, %v567_v32 }
 0x132   :  { %v1660_v33 = vsel %vm1615_vm1, %v14608_v12, %v1659_v46  ;;  %v2774_v43 = vsel %vm1615_vm1, %v2771_v23, %v2773_v27  ;;  %v9785_v28 = vmul.f32 %v8543_v56, %v567_v32  ;;  %v9788_v59 = vadd.f32 %v9765_v36, %v4044_v47 }
 0x133   :  { %14609 = vst [vmem:[#allocation39_spill] sm:$0xff] %v9781_v42  ;;  %v4178_v10 = vmax.f32 %v4114_v38, 0.0  ;;  %v1850_v18 = vadd.f32 %v1660_v33, %v1380_v31  ;;  %v2974_v21 = vadd.f32 %v2774_v43, %v2490_v25  ;;  %v9791_v3 = vmul.f32 %v8522_v49, %v567_v32 }
 0x134   :  { %14610 = vst [vmem:[#allocation40_spill] sm:$0xff] %v9785_v28  ;;  %v9794_v48 = vmul.f32 %v8556_v60, %v567_v32  ;;  %v9798_v46 = vmul.f32 %v8541_v55, %v567_v32  ;;  %v9801_v23 = vmul.f32 %v8558_v61, %v567_v32  ;;  %v9804_v45 = vmul.f32 %v8560_v62, %v567_v32  ;;  %v14622_v28 = vld [vmem:[#allocation28_spill] sm:$0xff] }
 0x135   :  { %14611 = vst [vmem:[#allocation38_spill] sm:$0xff] %v9791_v3  ;;  %v9808_v31 = vmul.f32 %v9451_v20, %v567_v32  ;;  %v987_v27 = vmul.f32 %v8537_v53, %v9506_v9  ;;  %v1457_v24 = vmul.f32 %v8539_v54, %v9506_v9  ;;  %v9815_v52 = vsel %vm4230_vm3, %v4178_v10, -inf  ;;  %v848_v32 = vpop.permute.xlu0 %847 }
 0x136   :  { %14612 = vst [vmem:[#allocation45_spill] sm:$0xff] %v9794_v48  ;;  %14613 = vst [vmem:[#allocation46_spill] sm:$0xff] %v9798_v46  ;;  %v2084_v16 = vmul.f32 %v8543_v56, %v9506_v9  ;;  %v9822_v25 = vmul.f32 %v8556_v60, %v9506_v9  ;;  %v4179_v34 = vmax.f32 %v9788_v59, 0.0  ;;  %v695_v38 = vmul.f32 %v8522_v49, %v9506_v9  ;;  %v14618_v46 = vld [vmem:[#allocation26_spill] sm:$0xff] }
 0x137   :  { %14614 = vst [vmem:[#allocation47_spill] sm:$0xff] %v9801_v23  ;;  %14615 = vst [vmem:[#allocation48_spill] sm:$0xff] %v9804_v45  ;;  %v1192_v57 = vrot.slane %v987_v27, 1  ;;  %v1662_v12 = vrot.slane %v1457_v24, 2  ;;  %v3179_v33 = vmul.f32 %v8560_v62, %v9506_v9  ;;  %v3650_v47 = vmul.f32 %v9451_v20, %v9506_v9 }
 0x138   :  { %14616 = vst [vmem:[#allocation49_spill] sm:$0xff] %v9808_v31  ;;  %v988_v43 = vmul.f32 %v8537_v53, %v848_v32  ;;  %v14617_v59 = vrot.slane %v9357_v30, 1  ;;  %v1458_v13 = vmul.f32 %v8539_v54, %v848_v32  ;;  %v1934_v27 = vmul.f32 %v8541_v55, %v9506_v9 }
 0x139   :  { %v2292_v24 = vrot.slane %v2084_v16, 1  ;;  %v2776_v14 = vrot.slane %v9822_v25, 2  ;;  %v3379_v39 = vrot.slane %v3179_v33, 1  ;;  %v1997_v10 = vadd.f32 %v9372_v50, %v1849_v6  ;;  %v14620_v50 = vld [vmem:[#allocation25_spill] sm:$0xff] }
 0x13a   :  { %v1193_v51 = vsel %vm1145_vm2, %v14617_v59, %v1192_v57  ;;  %v1194_v37 = vrot.slane %v988_v43, 1  ;;  %v2085_v23 = vmul.f32 %v8543_v56, %v848_v32  ;;  %v3042_v30 = vmul.f32 %v8558_v61, %v9506_v9 }
 0x13b   :  { %v1381_v40 = vadd.f32 %v1193_v51, %v9366_v35  ;;  %v3850_v59 = vrot.slane %v3650_v47, 2  ;;  %v14619_v31 = vrot.slane %v14618_v46, 2  ;;  %v2569_v16 = vmul.f32 %v8556_v60, %v848_v32  ;;  %v14624_v46 = vld [vmem:[#allocation42_spill] sm:$0xff] }
 0x13c   :  { %v1195_v25 = vsel %vm1145_vm2, %v1192_v57, %v1194_v37  ;;  %v1664_v48 = vrot.slane %v1458_v13, 2  ;;  %v1998_v35 = vadd.f32 %v1934_v27, %v1850_v18  ;;  %v2294_v51 = vrot.slane %v2085_v23, 1  ;;  %v576_v57 = vpop.permute.xlu1 %575 }
 0x13d   :  { %v1663_v45 = vsel %vm1615_vm1, %v14619_v31, %v1662_v12  ;;  %v14621_v6 = vrot.slane %v14620_v50, 1  ;;  %v14623_v9 = vrot.slane %v14622_v28, 2  ;;  %v3103_v42 = vadd.f32 %v14624_v46, %v2973_v15  ;;  %v95_v31 = vld [vmem:[%s14092_s0 + $0x1f8] sm:$0xff]  ;;  %s8214_s0 = smov 32  }
 0x13e   :  { %v9852_v33 = vadd.f32 %v1663_v45, %v1381_v40  ;;  %v2295_v37 = vsel %vm1145_vm2, %v2292_v24, %v2294_v51  ;;  %v3180_v23 = vmul.f32 %v8560_v62, %v848_v32  ;;  %v14625_v45 = vld [vmem:[#allocation27_spill] sm:$0xff]  ;;  %v1382_v27 = vadd.f32 %v1195_v25, %v695_v38  ;;  %v14627_v46 = vld [vmem:[#allocation29_spill] sm:$0xff] }
 0x13f   :  { %v2293_v43 = vsel %vm1145_vm2, %v14621_v6, %v2292_v24  ;;  %v2777_v47 = vsel %vm1615_vm1, %v14623_v9, %v2776_v14  ;;  %v14626_v40 = vrot.slane %v14625_v45, 1  ;;  %v2778_v28 = vrot.slane %v2569_v16, 2 }
 0x140   :  { %v2491_v18 = vadd.f32 %v2293_v43, %v1997_v10  ;;  %v3104_v50 = vadd.f32 %v3042_v30, %v2974_v21  ;;  %v3381_v9 = vrot.slane %v3180_v23, 1  ;;  %v3651_v15 = vmul.f32 %v9451_v20, %v848_v32 }
 0x141   :  { %v3380_v13 = vsel %vm1145_vm2, %v14626_v40, %v3379_v39  ;;  %v14628_v3 = vrot.slane %v14627_v46, 2  ;;  %v258_v24 = vrot.slane %v95_v31, 7  ;;  %v1665_v10 = vsel %vm1615_vm1, %v1662_v12, %v1664_v48 }
 0x142   :  { %v3574_v6 = vadd.f32 %v3380_v13, %v3103_v42  ;;  %v2492_v51 = vadd.f32 %v2295_v37, %v1998_v35  ;;  %v9875_v45 = vmul.f32 %v8537_v53, %v576_v57  ;;  %v3382_v38 = vsel %vm1145_vm2, %v3379_v39, %v3381_v9 }
 0x143   :  { %v3851_v7 = vsel %vm1615_vm1, %v14628_v3, %v3850_v59  ;;  %v3852_v16 = vrot.slane %v3651_v15, 2  ;;  %v390_v42 = vsel %vm161_vm0, %v258_v24, 0.0  ;;  %v14630_v21 = vrot.slane %v9747_v44, 7  ;;  %v504_v44 = vpop.permute.xlu1 %503 }
 0x144   :  { %v4045_v43 = vadd.f32 %v3851_v7, %v3574_v6  ;;  %14629 = vst [vmem:[#allocation26_spill] sm:$0xff] %v9875_v45  ;;  %v4252_v30 = vsel %vm4230_vm3, %v4179_v34, -inf  ;;  %v9883_v3 = vadd.f32 %v2777_v47, %v2491_v18  ;;  %v3575_v25 = vadd.f32 %v3382_v38, %v3104_v50  ;;  %2052 = vperm.xlu1 %7923, %v390_v42  }
 0x145   :  { %v259_v32 = vsel %vm161_vm0, %v14630_v21, %v258_v24  ;;  %v9886_v7 = vadd.f32 %v1665_v10, %v1382_v27  ;;  %v2779_v39 = vsel %vm1615_vm1, %v2776_v14, %v2778_v28  ;;  %v3853_v12 = vsel %vm1615_vm1, %v3850_v59, %v3852_v16 }
 0x146   :  { %v4116_v48 = vadd.f32 %v9765_v36, %v4045_v43  ;;  %1910 = vperm.xlu0 %7917, %v259_v32   ;;  %v9891_v35 = vmul.f32 %v8539_v54, %v576_v57  ;;  %v9893_v31 = vadd.f32 %v2779_v39, %v2492_v51  ;;  %v4046_v34 = vadd.f32 %v3853_v12, %v3575_v25 }
 0x147   :  { %v9896_v37 = vmul.f32 %v8543_v56, %v576_v57  ;;  %v9899_v18 = vmul.f32 %v8522_v49, %v576_v57  ;;  %v9903_v14 = vmul.f32 %v8556_v60, %v576_v57  ;;  %v9906_v59 = vmul.f32 %v8560_v62, %v576_v57 }
 0x148   :  { %14631 = vst [vmem:[#allocation25_spill] sm:$0xff] %v9891_v35  ;;  %v4180_v47 = vmax.f32 %v4116_v48, 0.0  ;;  %v4117_v40 = vadd.f32 %v9765_v36, %v4046_v34  ;;  %v9911_v27 = vmul.f32 %v9451_v20, %v576_v57  ;;  %v9914_v28 = vmul.f32 %v8537_v53, %v504_v44 }
 0x149   :  { %14632 = vst [vmem:[#allocation28_spill] sm:$0xff] %v9896_v37  ;;  %14633 = vst [vmem:[#allocation42_spill] sm:$0xff] %v9899_v18  ;;  %v9921_v9 = vmul.f32 %v8541_v55, %v576_v57  ;;  %v9924_v15 = vmul.f32 %v8539_v54, %v504_v44  ;;  %v9928_v10 = vmul.f32 %v8558_v61, %v576_v57  ;;  %v14652_v57 = vld [vmem:[#allocation17_spill] sm:$0xff] }
 0x14a   :  { %14634 = vst [vmem:[#allocation27_spill] sm:$0xff] %v9903_v14  ;;  %14635 = vst [vmem:[#allocation29_spill] sm:$0xff] %v9906_v59  ;;  %v4250_v13 = vsel %vm4230_vm3, %v4180_v47, -inf  ;;  %v4181_v46 = vmax.f32 %v4117_v40, 0.0  ;;  %v9931_v51 = vmul.f32 %v8543_v56, %v504_v44  ;;  %v9940_v16 = vmul.f32 %v8522_v49, %v504_v44  ;;  %v14648_v47 = vld [vmem:[#allocation13_spill] sm:$0xff] }
 0x14b   :  { %14636 = vst [vmem:[#allocation50_spill] sm:$0xff] %v9911_v27  ;;  %14637 = vst [vmem:[#allocation51_spill] sm:$0xff] %v9914_v28  ;;  %v9917_v50 = vmax.f32 %v9815_v52, %v4250_v13  ;;  %v9946_v32 = vmul.f32 %v8556_v60, %v504_v44  ;;  %v9954_v12 = vmul.f32 %v8541_v55, %v504_v44  ;;  %v5032_v48 = vsel %vm5031_vm4, %v14652_v57, -inf }
 0x14c   :  { %14639 = vst [vmem:[#allocation53_spill] sm:$0xff] %v9921_v9  ;;  %14640 = vst [vmem:[#allocation54_spill] sm:$0xff] %v9924_v15  ;;  %v4253_v42 = vsel %vm4230_vm3, %v4181_v46, -inf  ;;  %v14649_v40 = vcombine.high %v14648_v47, %v14648_v47  ;;  %v14650_v46 = vld [vmem:[#allocation15_spill] sm:$0xff]  ;;  %v9970_v21 = vmul.f32 %v8558_v61, %v504_v44  ;;  %v9973_v34 = vmul.f32 %v8560_v62, %v504_v44 }
 0x14d   :  { %14638 = vst [vmem:[#allocation52_spill] sm:$0xff] %v9917_v50  ;;  %14641 = vst [vmem:[#allocation55_spill] sm:$0xff] %v9928_v10  ;;  %v9935_v52 = vrot.slane %v9917_v50, %v14513_v2  ;;  %v9948_v25 = vmax.f32 %v4252_v30, %v4253_v42  ;;  %v14651_v30 = vcombine.high %v14650_v46, %v14650_v46  ;;  %v5033_v38 = vrot.slane %v5032_v48, 4  ;;  %v14658_v50 = vld [vmem:[#allocation16_spill] sm:$0xff] }
 0x14e   :  { %14642 = vst [vmem:[#allocation56_spill] sm:$0xff] %v9931_v51  ;;  %14644 = vst [vmem:[#allocation58_spill] sm:$0xff] %v9940_v16  ;;  %v4373_v13 = vrot.slane %v14649_v40, %v14513_v2  ;;  %v14655_v46 = vcombine.high %v14652_v57, %v14652_v57  ;;  %v9986_v6 = vmul.f32 %v9451_v20, %v504_v44  ;;  %v14660_v16 = vld [vmem:[#allocation14_spill] sm:$0xff] }
 0x14f   :  { %14643 = vst [vmem:[#allocation57_spill] sm:$0xff] %v9935_v52  ;;  %14645 = vst [vmem:[#allocation59_spill] sm:$0xff] %v9946_v32  ;;  %v4390_v42 = vrot.slane %v14651_v30, %v14513_v2  ;;  %v9983_v39 = vrot.slane %v9948_v25, %v14513_v2  ;;  %v5034_v24 = vmax.f32 %v5032_v48, %v5033_v38  ;;  %v14659_v32 = vrot.slane %v14658_v50, 4 }
 0x150   :  { %14646 = vst [vmem:[#allocation60_spill] sm:$0xff] %v9948_v25  ;;  %14647 = vst [vmem:[#allocation61_spill] sm:$0xff] %v9954_v12  ;;  %v4375_v40 = vcombine.high %v4373_v13, %v4373_v13  ;;  %v5039_v30 = vsel %vm5031_vm4, %v14655_v46, -inf  ;;  %v5046_v43 = vsel %vm5031_vm4, %v4373_v13, -inf }
 0x151   :  { %14653 = vst [vmem:[#allocation13_spill] sm:$0xff] %v9970_v21  ;;  %14654 = vst [vmem:[#allocation15_spill] sm:$0xff] %v9973_v34  ;;  %v5040_v23 = vrot.slane %v5039_v30, 4  ;;  %v4392_v10 = vcombine.high %v4390_v42, %v4390_v42  ;;  %v5047_v52 = vrot.slane %v5046_v43, 4  ;;  %v5062_v57 = vmax.f32 %v14658_v50, %v14659_v32 }
 0x152   :  { %14656 = vst [vmem:[#allocation17_spill] sm:$0xff] %v9983_v39  ;;  %14657 = vst [vmem:[#allocation62_spill] sm:$0xff] %v9986_v6  ;;  %v5053_v47 = vsel %vm5031_vm4, %v4375_v40, -inf  ;;  %v5035_v46 = vrot.slane %v5034_v24, 2  ;;  %v14661_v21 = vcombine.high %v14660_v16, %v14660_v16  ;;  %v5074_v48 = vsel %vm5031_vm4, %v4390_v42, -inf }
 0x153   :  { %v5041_v15 = vmax.f32 %v5039_v30, %v5040_v23  ;;  %v5054_v13 = vrot.slane %v5053_v47, 4  ;;  %v5048_v44 = vmax.f32 %v5046_v43, %v5047_v52  ;;  %v5063_v28 = vrot.slane %v5062_v57, 2 }
 0x154   :  { %v5067_v51 = vsel %vm5031_vm4, %v14661_v21, -inf  ;;  %v5036_v12 = vmax.f32 %v5034_v24, %v5035_v46  ;;  %v5075_v59 = vrot.slane %v5074_v48, 4  ;;  %v5081_v23 = vsel %vm5031_vm4, %v4392_v10, -inf }
 0x155   :  { %v5068_v38 = vrot.slane %v5067_v51, 4  ;;  %v5042_v27 = vrot.slane %v5041_v15, 2  ;;  %v5055_v40 = vmax.f32 %v5053_v47, %v5054_v13  ;;  %v5049_v14 = vrot.slane %v5048_v44, 2 }
 0x156   :  { %v5064_v35 = vmax.f32 %v5062_v57, %v5063_v28  ;;  %v5037_v32 = vrot.slane %v5036_v12, 1  ;;  %v5076_v16 = vmax.f32 %v5074_v48, %v5075_v59  ;;  %v5082_v43 = vrot.slane %v5081_v23, 4 }
 0x157   :  { %v5069_v50 = vmax.f32 %v5067_v51, %v5068_v38  ;;  %v5043_v30 = vmax.f32 %v5041_v15, %v5042_v27  ;;  %v5056_v37 = vrot.slane %v5055_v40, 2  ;;  %v5050_v9 = vmax.f32 %v5048_v44, %v5049_v14 }
 0x158   :  { %v5065_v21 = vrot.slane %v5064_v35, 1  ;;  %v5038_v18 = vmax.f32 %v5036_v12, %v5037_v32  ;;  %v5077_v24 = vrot.slane %v5076_v16, 2  ;;  %v5083_v11 = vmax.f32 %v5081_v23, %v5082_v43 }
 0x159   :  { %v5070_v52 = vrot.slane %v5069_v50, 2  ;;  %v5044_v45 = vrot.slane %v5043_v30, 1  ;;  %v5057_v42 = vmax.f32 %v5055_v40, %v5056_v37  ;;  %v5051_v46 = vrot.slane %v5050_v9, 1 }
 0x15a   :  { %v5066_v47 = vmax.f32 %v5064_v35, %v5065_v21  ;;  %v5078_v57 = vmax.f32 %v5076_v16, %v5077_v24  ;;  %v5084_v15 = vrot.slane %v5083_v11, 2  ;;  %v513_v35 = vpop.permute.xlu1 %512  ;;  %v1999_v16 = vadd.f32 %v9551_v41, %v9852_v33 }
 0x15b   :  { %v5071_v13 = vmax.f32 %v5069_v50, %v5070_v52  ;;  %v5045_v28 = vmax.f32 %v5043_v30, %v5044_v45  ;;  %v5058_v51 = vrot.slane %v5057_v42, 1  ;;  %v5052_v10 = vmax.f32 %v5050_v9, %v5051_v46 }
 0x15c   :  { %v5079_v59 = vrot.slane %v5078_v57, 1  ;;  %v5085_v37 = vmax.f32 %v5083_v11, %v5084_v15  ;;  %v10003_v9 = vsel %vm5031_vm4, %v9983_v39, -inf  ;;  %v10009_v32 = vmul.f32 %v8537_v53, %v513_v35 }
 0x15d   :  { %v5072_v27 = vrot.slane %v5071_v13, 1  ;;  %v5059_v14 = vmax.f32 %v5057_v42, %v5058_v51  ;;  %v6057_v44 = vsel %vm6056_vm5, %v5045_v28, %v5038_v18  ;;  %14662 = vst [vmem:[#allocation16_spill] sm:$0xff] %v10003_v9  ;;  %v14663_v18 = vld [vmem:[#allocation2_spill] sm:$0xff]  ;;  %v10012_v30 = vmul.f32 %v8539_v54, %v513_v35  ;;  %v14668_v51 = vld [vmem:[#allocation3_spill] sm:$0xff] }
 0x15e   :  { %v6059_v38 = vsel %vm6058_vm6, %v5052_v10, %v6057_v44  ;;  %v5080_v48 = vmax.f32 %v5078_v57, %v5079_v59  ;;  %v5086_v40 = vrot.slane %v5085_v37, 1  ;;  %v6267_v23 = vrot.slane %v14663_v18, 1  ;;  %14664 = vst [vmem:[#allocation14_spill] sm:$0xff] %v10009_v32  ;;  %v14691_v32 = vld [vmem:[#allocation43_spill] sm:$0xff] }
 0x15f   :  { %v5073_v12 = vmax.f32 %v5071_v13, %v5072_v27  ;;  %v6061_v45 = vsel %vm6060_vm7, %v5059_v14, %v6059_v38  ;;  %14665 = vst [vmem:[#allocation63_spill] sm:$0xff] %v10012_v30  ;;  %v10022_v46 = vmul.f32 %v8543_v56, %v513_v35  ;;  %v14669_v57 = vrot.slane %v14668_v51, 1  ;;  %v14677_v14 = vld [vmem:[#allocation4_spill] sm:$0xff] }
 0x160   :  { %v6063_v50 = vsel %vm14440_vm8, %v5066_v47, %v6061_v45  ;;  %v5087_v52 = vmax.f32 %v5085_v37, %v5086_v40  ;;  %v10025_v47 = vmul.f32 %v8556_v60, %v513_v35  ;;  %v10035_v27 = vmul.f32 %v8522_v49, %v513_v35 }
 0x161   :  { %v6065_v11 = vsel %vm14437_vm9, %v5073_v12, %v6063_v50  ;;  %14666 = vst [vmem:[#allocation64_spill] sm:$0xff] %v10022_v46  ;;  %v10032_v10 = vsel %vm1145_vm2, %v6267_v23, %v14669_v57  ;;  %v10040_v44 = vmul.f32 %v8541_v55, %v513_v35  ;;  %v10043_v12 = vmul.f32 %v8558_v61, %v513_v35 }
 0x162   :  { %v6067_v43 = vsel %vm6066_vm10, %v5080_v48, %v6065_v11  ;;  %14667 = vst [vmem:[#allocation65_spill] sm:$0xff] %v10025_v47  ;;  %14670 = vst [vmem:[#allocation3_spill] sm:$0xff] %v10032_v10  ;;  %v10046_v37 = vmul.f32 %v8560_v62, %v513_v35  ;;  %v10049_v38 = vmul.f32 %v9451_v20, %v513_v35  ;;  %v14679_v41 = vrot.slane %v9534_v58, 1 }
 0x163   :  { %v6069_v28 = vsel %vm6068_vm11, %v5087_v52, %v6067_v43  ;;  %14671 = vst [vmem:[#allocation66_spill] sm:$0xff] %v10035_v27  ;;  %14672 = vst [vmem:[#allocation67_spill] sm:$0xff] %v10040_v44  ;;  %v990_v48 = vmul.f32 %v8537_v53, %v9734_v22  ;;  %v697_v35 = vmul.f32 %v8522_v49, %v9734_v22 }
 0x164   :  { %v6175_v15 = vrot.slane %v6069_v28, 7  ;;  %14673 = vst [vmem:[#allocation68_spill] sm:$0xff] %v10043_v12  ;;  %14674 = vst [vmem:[#allocation69_spill] sm:$0xff] %v10046_v37  ;;  %v1460_v57 = vmul.f32 %v8539_v54, %v9734_v22  ;;  %v1936_v59 = vmul.f32 %v8541_v55, %v9734_v22 }
 0x165   :  { %14675 = vst [vmem:[#allocation70_spill] sm:$0xff] %v10049_v38  ;;  %v1197_v51 = vrot.slane %v990_v48, 1 }
 0x166   :  { %v10054_v45 = vsel %vm161_vm0, 0.0, %v6175_v15  ;;  %v6223_v40 = vsel %vm161_vm0, %v6175_v15, 0.0  ;;  %v2087_v15 = vmul.f32 %v8543_v56, %v9734_v22  ;;  %v2000_v24 = vadd.f32 %v1936_v59, %v9886_v7  ;;  %v14680_v59 = vld [vmem:[#allocation35_spill] sm:$0xff] }
 0x167   :  { %14676 = vst [vmem:[#allocation71_spill] sm:$0xff] %v10054_v45  ;;  %v6315_v11 = vrot.slane %v10054_v45, 2  ;;  %v6316_v52 = vrot.slane %v6223_v40, 2  ;;  %v6270_v43 = vrot.slane %v10054_v45, 1  ;;  %v6271_v28 = vrot.slane %v6223_v40, 1 }
 0x168   :  { %v2571_v40 = vmul.f32 %v8556_v60, %v9734_v22  ;;  %v2297_v21 = vrot.slane %v2087_v15, 1  ;;  %v1667_v13 = vrot.slane %v1460_v57, 2  ;;  %v3105_v15 = vadd.f32 %v14680_v59, %v9883_v3  ;;  %v14681_v57 = vld [vmem:[#allocation37_spill] sm:$0xff]  ;;  %v14684_v59 = vld [vmem:[#allocation34_spill] sm:$0xff] }
 0x169   :  { %v10068_v50 = vsel %vm1615_vm1, %v6315_v11, %v6316_v52  ;;  %v10071_v23 = vsel %vm1145_vm2, %v6270_v43, %v6271_v28  ;;  %v853_v52 = vpop.permute.xlu1 %852  ;;  %v14678_v43 = vrot.slane %v9519_v17, 1  ;;  %v3044_v11 = vmul.f32 %v8558_v61, %v9734_v22 }
 0x16a   :  { %v7929_v48 = vpack.i.bf16 %v10068_v50, %v14677_v14  ;;  %v7924_v42 = vpack.i.bf16 %v10071_v23, %v10032_v10  ;;  %v3182_v17 = vmul.f32 %v8560_v62, %v9734_v22  ;;  %v2298_v33 = vsel %vm1145_vm2, %v14679_v41, %v2297_v21  ;;  %v14682_v41 = vld [vmem:[#allocation33_spill] sm:$0xff] }
 0x16b   :  { %v1198_v28 = vsel %vm1145_vm2, %v14678_v43, %v1197_v51  ;;  %v3653_v43 = vmul.f32 %v9451_v20, %v9734_v22  ;;  %v2781_v7 = vrot.slane %v2571_v40, 2  ;;  %v2493_v14 = vadd.f32 %v2298_v33, %v1999_v16  ;;  %v14687_v33 = vld [vmem:[#allocation31_spill] sm:$0xff] }
 0x16c   :  { %7930 = vrot.lane.b32.xlu1 %v7929_v48, %s8214_s0  ;;  %7925 = vrot.lane.b32.xlu0 %v7924_v42, %s8215_s21  ;;  %v991_v42 = vmul.f32 %v8537_v53, %v853_v52  ;;  %v1383_v48 = vadd.f32 %v1198_v28, %v14681_v57  ;;  %v3384_v10 = vrot.slane %v3182_v17, 1  ;;  %v1461_v18 = vmul.f32 %v8539_v54, %v853_v52  ;;  %v10115_v17 = vpop.permute.xlu0 %570 }
 0x16d   :  { %v2088_v38 = vmul.f32 %v8543_v56, %v853_v52  ;;  %v2572_v22 = vmul.f32 %v8556_v60, %v853_v52  ;;  %v3183_v58 = vmul.f32 %v8560_v62, %v853_v52  ;;  %v14683_v40 = vrot.slane %v14682_v41, 2  ;;  %14686 = vst [vmem:[#allocation35_spill] sm:$0xff] %v10115_v17 }
 0x16e   :  { %v1199_v47 = vrot.slane %v991_v42, 1  ;;  %v3106_v3 = vadd.f32 %v3044_v11, %v9893_v31  ;;  %v14685_v12 = vrot.slane %v14684_v59, 1  ;;  %v3855_v28 = vrot.slane %v3653_v43, 2 }
 0x16f   :  { %v1668_v37 = vsel %vm1615_vm1, %v14683_v40, %v1667_v13  ;;  %v14688_v42 = vrot.slane %v14687_v33, 2  ;;  %v1669_v44 = vrot.slane %v1461_v18, 2  ;;  %v2299_v30 = vrot.slane %v2088_v38, 1  ;;  %v14692_v18 = vld [vmem:[#allocation36_spill] sm:$0xff] }
 0x170   :  { %v3385_v16 = vsel %vm1145_vm2, %v14685_v12, %v3384_v10  ;;  %v1200_v41 = vsel %vm1145_vm2, %v1197_v51, %v1199_v47  ;;  %v2783_v27 = vrot.slane %v2572_v22, 2  ;;  %v3386_v40 = vrot.slane %v3183_v58, 1  ;;  %v14689_v12 = vld [vmem:[#allocation30_spill] sm:$0xff] }
 0x171   :  { %v2782_v57 = vsel %vm1615_vm1, %v14688_v42, %v2781_v7  ;;  %v3576_v46 = vadd.f32 %v3385_v16, %v3105_v15  ;;  %v3654_v31 = vmul.f32 %v9451_v20, %v853_v52  ;;  %v10122_v11 = vadd.f32 %v1668_v37, %v1383_v48 }
 0x172   :  { %v10124_v59 = vadd.f32 %v2782_v57, %v2493_v14  ;;  %v14690_v43 = vcombine.high %v14689_v12, %v14689_v12  ;;  %v5088_v15 = vsel %vm5031_vm4, %v14691_v32, -inf  ;;  %v14693_v38 = vrot.slane %v14692_v18, 2 }
 0x173   :  { %v2300_v51 = vsel %vm1145_vm2, %v2297_v21, %v2299_v30  ;;  %v3387_v20 = vsel %vm1145_vm2, %v3384_v10, %v3386_v40  ;;  %v3857_v37 = vrot.slane %v3654_v31, 2  ;;  %v10137_v14 = vadd.f32 %v1200_v41, %v697_v35 }
 0x174   :  { %v4407_v33 = vrot.slane %v14690_v43, %v14513_v2  ;;  %v3856_v47 = vsel %vm1615_vm1, %v14693_v38, %v3855_v28  ;;  %v3577_v48 = vadd.f32 %v3387_v20, %v3106_v3  ;;  %v1670_v58 = vsel %vm1615_vm1, %v1667_v13, %v1669_v44  ;;  %v10145_v43 = vpop.permute.xlu0 %579 }
 0x175   :  { %v4047_v52 = vadd.f32 %v3856_v47, %v3576_v46  ;;  %v2784_v16 = vsel %vm1615_vm1, %v2781_v7, %v2783_v27  ;;  %v5089_v42 = vrot.slane %v5088_v15, 4  ;;  %v14694_v57 = vcombine.high %v14691_v32, %v14691_v32  ;;  %14695 = vst [vmem:[#allocation37_spill] sm:$0xff] %v10145_v43  ;;  %v14696_v46 = vld [vmem:[#allocation10_spill] sm:$0xff]  ;;  %v14698_v7 = vld [vmem:[#allocation19_spill] sm:$0xff] }
 0x176   :  { %v4409_v22 = vcombine.high %v4407_v33, %v4407_v33  ;;  %v2494_v30 = vadd.f32 %v2300_v51, %v2000_v24  ;;  %v3858_v21 = vsel %vm1615_vm1, %v3855_v28, %v3857_v37  ;;  %v14697_v10 = vcombine.high %v14696_v46, %v14696_v46  ;;  %v14700_v51 = vld [vmem:[#allocation32_spill] sm:$0xff] }
 0x177   :  { %v5095_v12 = vsel %vm5031_vm4, %v14694_v57, -inf  ;;  %v5090_v13 = vmax.f32 %v5088_v15, %v5089_v42  ;;  %v5102_v27 = vsel %vm5031_vm4, %v4407_v33, -inf  ;;  %v14699_v32 = vrot.slane %v14698_v7, 4 }
 0x178   :  { %v4424_v35 = vrot.slane %v14697_v10, %v14513_v2  ;;  %v5096_v3 = vrot.slane %v5095_v12, 4  ;;  %v5109_v44 = vsel %vm5031_vm4, %v4409_v22, -inf  ;;  %v4118_v40 = vadd.f32 %v9765_v36, %v4047_v52 }
 0x179   :  { %v5118_v41 = vmax.f32 %v14698_v7, %v14699_v32  ;;  %v4048_v24 = vadd.f32 %v3858_v21, %v3577_v48  ;;  %v5103_v28 = vrot.slane %v5102_v27, 4  ;;  %v5091_v18 = vrot.slane %v5090_v13, 2  ;;  %v10163_v48 = vpop.permute.xlu0 %507 }
 0x17a   :  { %v5097_v31 = vmax.f32 %v5095_v12, %v5096_v3  ;;  %v5110_v38 = vrot.slane %v5109_v44, 4  ;;  %v14701_v20 = vcombine.high %v14700_v51, %v14700_v51  ;;  %v4426_v33 = vcombine.high %v4424_v35, %v4424_v35  ;;  %14702 = vst [vmem:[#allocation33_spill] sm:$0xff] %v10163_v48 }
 0x17b   :  { %v5119_v47 = vrot.slane %v5118_v41, 2  ;;  %v5104_v22 = vmax.f32 %v5102_v27, %v5103_v28  ;;  %v5092_v57 = vmax.f32 %v5090_v13, %v5091_v18  ;;  %v5130_v52 = vsel %vm5031_vm4, %v4424_v35, -inf }
 0x17c   :  { %v5123_v15 = vsel %vm5031_vm4, %v14701_v20, -inf  ;;  %v5098_v37 = vrot.slane %v5097_v31, 2  ;;  %v5111_v46 = vmax.f32 %v5109_v44, %v5110_v38  ;;  %v4119_v12 = vadd.f32 %v9765_v36, %v4048_v24 }
 0x17d   :  { %v5124_v42 = vrot.slane %v5123_v15, 4  ;;  %v5120_v10 = vmax.f32 %v5118_v41, %v5119_v47  ;;  %v5105_v3 = vrot.slane %v5104_v22, 2  ;;  %v5093_v32 = vrot.slane %v5092_v57, 1  ;;  %v10167_v6 = vpop.permute.xlu0 %516 }
 0x17e   :  { %v5099_v21 = vmax.f32 %v5097_v31, %v5098_v37  ;;  %v5112_v51 = vrot.slane %v5111_v46, 2  ;;  %v5131_v20 = vrot.slane %v5130_v52, 4  ;;  %v5137_v13 = vsel %vm5031_vm4, %v4426_v33, -inf  ;;  %v10170_v33 = vpop.permute.xlu1 %584 }
 0x17f   :  { %v5125_v7 = vmax.f32 %v5123_v15, %v5124_v42  ;;  %v5121_v39 = vrot.slane %v5120_v10, 1  ;;  %v5106_v25 = vmax.f32 %v5104_v22, %v5105_v3  ;;  %v4182_v44 = vmax.f32 %v4118_v40, 0.0 }
 0x180   :  { %v5100_v9 = vrot.slane %v5099_v21, 1  ;;  %v5094_v41 = vmax.f32 %v5092_v57, %v5093_v32  ;;  %v5113_v28 = vmax.f32 %v5111_v46, %v5112_v51  ;;  %v5132_v35 = vmax.f32 %v5130_v52, %v5131_v20 }
 0x181   :  { %v5126_v27 = vrot.slane %v5125_v7, 2  ;;  %v5107_v38 = vrot.slane %v5106_v25, 1  ;;  %v5138_v24 = vrot.slane %v5137_v13, 4  ;;  %v4183_v31 = vmax.f32 %v4119_v12, 0.0 }
 0x182   :  { %v5101_v18 = vmax.f32 %v5099_v21, %v5100_v9  ;;  %v5114_v37 = vrot.slane %v5113_v28, 1  ;;  %v5122_v15 = vmax.f32 %v5120_v10, %v5121_v39  ;;  %v5133_v42 = vrot.slane %v5132_v35, 2 }
 0x183   :  { %v5127_v47 = vmax.f32 %v5125_v7, %v5126_v27  ;;  %v5108_v34 = vmax.f32 %v5106_v25, %v5107_v38  ;;  %v5139_v22 = vmax.f32 %v5137_v13, %v5138_v24  ;;  %v1854_v40 = vadd.f32 %v1670_v58, %v10137_v14 }
 0x184   :  { %v6070_v3 = vsel %vm6056_vm5, %v5101_v18, %v5094_v41  ;;  %v10173_v57 = vadd.f32 %v2784_v16, %v2494_v30  ;;  %v5115_v9 = vmax.f32 %v5113_v28, %v5114_v37  ;;  %v5134_v46 = vmax.f32 %v5132_v35, %v5133_v42  ;;  %v858_v28 = vpop.permute.xlu0 %857 }
 0x185   :  { %v5128_v48 = vrot.slane %v5127_v47, 1  ;;  %v10176_v52 = vsel %vm4230_vm3, %v4182_v44, -inf  ;;  %v5140_v10 = vrot.slane %v5139_v22, 2  ;;  %v6071_v12 = vsel %vm6058_vm6, %v5108_v34, %v6070_v3 }
 0x186   :  { %v10180_v25 = vsel %vm4230_vm3, %v4183_v31, -inf  ;;  %v5135_v21 = vrot.slane %v5134_v46, 1  ;;  %v6072_v7 = vsel %vm6060_vm7, %v5115_v9, %v6071_v12  ;;  %v10185_v14 = vmul.f32 %v8537_v53, %v10170_v33  ;;  %v10223_v31 = vld [vmem:[%s14093_s1 + $0x8] ss:$0 sm:$0xff] }
 0x187   :  { %v5129_v39 = vmax.f32 %v5127_v47, %v5128_v48  ;;  %v5141_v58 = vmax.f32 %v5139_v22, %v5140_v10  ;;  %v6073_v16 = vsel %vm14440_vm8, %v5122_v15, %v6072_v7  ;;  %v10190_v30 = vmul.f32 %v8539_v54, %v10170_v33 }
 0x188   :  { %v10194_v34 = vmul.f32 %v8541_v55, %v10170_v33  ;;  %v5136_v48 = vmax.f32 %v5134_v46, %v5135_v21  ;;  %v993_v51 = vmul.f32 %v8537_v53, %v9769_v8  ;;  %v1463_v20 = vmul.f32 %v8539_v54, %v9769_v8 }
 0x189   :  { %v6074_v32 = vsel %vm14437_vm9, %v5129_v39, %v6073_v16  ;;  %v5142_v27 = vrot.slane %v5141_v58, 1  ;;  %v10203_v13 = vmul.f32 %v8543_v56, %v10170_v33  ;;  %v10207_v44 = vmul.f32 %v8556_v60, %v10170_v33 }
 0x18a   :  { %v10211_v41 = vmul.f32 %v8558_v61, %v10170_v33  ;;  %v6075_v35 = vsel %vm6066_vm10, %v5136_v48, %v6074_v32  ;;  %v10216_v18 = vmul.f32 %v8560_v62, %v10170_v33  ;;  %v1202_v38 = vrot.slane %v993_v51, 1 }
 0x18b   :  { %v2090_v47 = vmul.f32 %v8543_v56, %v9769_v8  ;;  %v5143_v24 = vmax.f32 %v5141_v58, %v5142_v27  ;;  %v10227_v37 = vmul.f32 %v10223_v31, %v10170_v33  ;;  %v699_v15 = vmul.f32 %v8522_v49, %v9769_v8 }
 0x18c   :  { %14703 = vst [vmem:[#allocation34_spill] sm:$0xff] %v10211_v41  ;;  %14704 = vst [vmem:[#allocation31_spill] sm:$0xff] %v10216_v18  ;;  %v1672_v42 = vrot.slane %v1463_v20, 2  ;;  %v3185_v22 = vmul.f32 %v8560_v62, %v9769_v8  ;;  %v994_v3 = vmul.f32 %v8537_v53, %v858_v28  ;;  %v14706_v9 = vrot.slane %v9634_v63, 1 }
 0x18d   :  { %14705 = vst [vmem:[#allocation30_spill] sm:$0xff] %v10227_v37  ;;  %v1464_v39 = vmul.f32 %v8539_v54, %v858_v28  ;;  %v6076_v10 = vsel %vm6068_vm11, %v5143_v24, %v6075_v35  ;;  %v10241_v12 = vmul.f32 %v8556_v60, %v9769_v8  ;;  %v3656_v21 = vmul.f32 %v10223_v31, %v9769_v8 }
 0x18e   :  { %v1203_v46 = vsel %vm1145_vm2, %v14706_v9, %v1202_v38  ;;  %v6176_v58 = vrot.slane %v6076_v10, 7  ;;  %v2302_v16 = vrot.slane %v2090_v47, 1  ;;  %v1204_v48 = vrot.slane %v994_v3, 1 }
 0x18f   :  { %v1385_v7 = vadd.f32 %v1203_v46, %v9641_v5  ;;  %v1674_v32 = vrot.slane %v1464_v39, 2  ;;  %v1938_v63 = vmul.f32 %v8541_v55, %v9769_v8  ;;  %v3046_v51 = vmul.f32 %v8558_v61, %v9769_v8 }
 0x190   :  { %v2001_v20 = vadd.f32 %v9644_v29, %v10122_v11  ;;  %v2091_v27 = vmul.f32 %v8543_v56, %v858_v28  ;;  %v10254_v35 = vsel %vm161_vm0, 0.0, %v6176_v58  ;;  %v3389_v24 = vrot.slane %v3185_v22, 1 }
 0x191   :  { %14707 = vst [vmem:[#allocation43_spill] sm:$0xff] %v10254_v35  ;;  %v1205_v5 = vsel %vm1145_vm2, %v1202_v38, %v1204_v48  ;;  %v14708_v47 = vrot.slane %v9637_v26, 2  ;;  %v7934_v9 = vpack.i.bf16 %v10254_v35, %v10054_v45  ;;  %v14222_v8 = vrot.slane %v10241_v12, 2 }
 0x192   :  { %v3860_v46 = vrot.slane %v3656_v21, 2  ;;  %v1675_v29 = vsel %vm1615_vm1, %v1672_v42, %v1674_v32  ;;  %v2002_v11 = vadd.f32 %v1938_v63, %v1854_v40  ;;  %v14709_v10 = vrot.slane %v9647_v4, 1 }
 0x193   :  { %v1673_v3 = vsel %vm1615_vm1, %v14708_v47, %v1672_v42  ;;  %v3107_v26 = vadd.f32 %v9666_v1, %v10124_v59  ;;  %7935 = vrot.lane.b32.xlu0 %v7934_v9, %s8216_s24  ;;  %v1386_v38 = vadd.f32 %v1205_v5, %v699_v15  ;;  %v2304_v48 = vrot.slane %v2091_v27, 1  ;;  %v14716_v9 = vld [vmem:[#allocation44_spill] sm:$0xff] }
 0x194   :  { %v10263_v39 = vadd.f32 %v1673_v3, %v1385_v7  ;;  %v2303_v22 = vsel %vm1145_vm2, %v14709_v10, %v2302_v16  ;;  %v3186_v21 = vmul.f32 %v8560_v62, %v858_v28  ;;  %v2575_v7 = vmul.f32 %v8556_v60, %v858_v28 }
 0x195   :  { %v2495_v47 = vadd.f32 %v2303_v22, %v2001_v20  ;;  %v3108_v42 = vadd.f32 %v3046_v51, %v10173_v57  ;;  %v14710_v40 = vrot.slane %v9653_v19, 1  ;;  %v3657_v32 = vmul.f32 %v10223_v31, %v858_v28  ;;  %v14712_v20 = vld [vmem:[#allocation5_spill] sm:$0xff]  ;;  %v14714_v57 = vld [vmem:[#allocation7_spill] sm:$0xff] }
 0x196   :  { %v14711_v1 = vrot.slane %v9650_v0, 2  ;;  %v3391_v15 = vrot.slane %v3186_v21, 1  ;;  %v14713_v27 = vcombine.high %v14712_v20, %v14712_v20  ;;  %v14715_v51 = vrot.slane %v14714_v57, 2 }
 0x197   :  { %v3390_v4 = vsel %vm1145_vm2, %v14710_v40, %v3389_v24  ;;  %v3862_v3 = vrot.slane %v3657_v32, 2  ;;  %v4442_v28 = vcombine.high %v14716_v9, %v14716_v9  ;;  %v5144_v0 = vsel %vm5031_vm4, %v14716_v9, -inf }
 0x198   :  { %v2787_v59 = vsel %vm1615_vm1, %v14711_v1, %v14222_v8  ;;  %v3578_v63 = vadd.f32 %v3390_v4, %v3107_v26  ;;  %v4441_v5 = vrot.slane %v14713_v27, %v14513_v2  ;;  %v3861_v19 = vsel %vm1615_vm1, %v14715_v51, %v3860_v46 }
 0x199   :  { %v2305_v10 = vsel %vm1145_vm2, %v2302_v16, %v2304_v48  ;;  %v3392_v22 = vsel %vm1145_vm2, %v3389_v24, %v3391_v15  ;;  %v3863_v4 = vsel %vm1615_vm1, %v3860_v46, %v3862_v3  ;;  %v5145_v1 = vrot.slane %v5144_v0, 4 }
 0x19a   :  { %v4049_v26 = vadd.f32 %v3861_v19, %v3578_v63  ;;  %v4443_v21 = vcombine.high %v4441_v5, %v4441_v5  ;;  %v3579_v40 = vadd.f32 %v3392_v22, %v3108_v42  ;;  %v5151_v20 = vsel %vm5031_vm4, %v4442_v28, -inf }
 0x19b   :  { %v5152_v27 = vrot.slane %v5151_v20, 4  ;;  %v5158_v57 = vsel %vm5031_vm4, %v4441_v5, -inf  ;;  %v5146_v8 = vmax.f32 %v5144_v0, %v5145_v1  ;;  %v6224_v42 = vsel %vm161_vm0, %v6176_v58, 0.0 }
 0x19c   :  { %v4120_v32 = vadd.f32 %v9765_v36, %v4049_v26  ;;  %v5165_v51 = vsel %vm5031_vm4, %v4443_v21, -inf  ;;  %v4050_v9 = vadd.f32 %v3863_v4, %v3579_v40  ;;  %v5159_v16 = vrot.slane %v5158_v57, 4 }
 0x19d   :  { %v5166_v48 = vrot.slane %v5165_v51, 4  ;;  %v5153_v15 = vmax.f32 %v5151_v20, %v5152_v27  ;;  %v6318_v46 = vrot.slane %v10254_v35, 2  ;;  %v5147_v19 = vrot.slane %v5146_v8, 2 }
 0x19e   :  { %v4184_v24 = vmax.f32 %v4120_v32, 0.0  ;;  %v4121_v63 = vadd.f32 %v9765_v36, %v4050_v9  ;;  %v5160_v3 = vmax.f32 %v5158_v57, %v5159_v16  ;;  %v10305_v22 = vadd.f32 %v1675_v29, %v1386_v38  ;;  %v14717_v38 = vld [vmem:[#allocation6_spill] sm:$0xff] }
 0x19f   :  { %v5167_v28 = vmax.f32 %v5165_v51, %v5166_v48  ;;  %v2788_v5 = vrot.slane %v2575_v7, 2  ;;  %v5154_v26 = vrot.slane %v5153_v15, 2  ;;  %v6319_v21 = vrot.slane %v6224_v42, 2 }
 0x1a0   :  { %v4185_v40 = vmax.f32 %v4121_v63, 0.0  ;;  %v4256_v0 = vsel %vm4230_vm3, %v4184_v24, -inf  ;;  %v5148_v4 = vmax.f32 %v5146_v8, %v5147_v19  ;;  %v5161_v1 = vrot.slane %v5160_v3, 2  ;;  %v14722_v24 = vld [vmem:[#allocation18_spill] sm:$0xff] }
 0x1a1   :  { %v2496_v20 = vadd.f32 %v2305_v10, %v2002_v11  ;;  %v5155_v32 = vmax.f32 %v5153_v15, %v5154_v26  ;;  %v5168_v58 = vrot.slane %v5167_v28, 2  ;;  %v10309_v27 = vsel %vm1615_vm1, %v6318_v46, %v6319_v21 }
 0x1a2   :  { %v10311_v36 = vadd.f32 %v2787_v59, %v2495_v47  ;;  %v4259_v57 = vsel %vm4230_vm3, %v4185_v40, -inf  ;;  %v5149_v29 = vrot.slane %v5148_v4, 1  ;;  %v14718_v7 = vcombine.high %v14717_v38, %v14717_v38  ;;  %7771 = vmatprep.mubr.msk.f32.mxu0 %vm4230_vm3, %v10309_v27 }
 0x1a3   :  { %v10321_v8 = vmax.f32 %v10176_v52, %v4256_v0  ;;  %v5156_v11 = vrot.slane %v5155_v32, 1  ;;  %v5162_v10 = vmax.f32 %v5160_v3, %v5161_v1  ;;  %v5169_v9 = vmax.f32 %v5167_v28, %v5168_v58 }
 0x1a4   :  { %v4458_v51 = vrot.slane %v14718_v7, %v14513_v2  ;;  %v14720_v47 = vrot.slane %v10241_v12, 2  ;;  %v10327_v16 = vmax.f32 %v10180_v25, %v4259_v57  ;;  %v7944_v48 = vpack.i.bf16 %v10309_v27, %v10068_v50 }
 0x1a5   :  { %14719 = vst [vmem:[#allocation36_spill] sm:$0xff] %v10321_v8  ;;  %v4459_v15 = vcombine.high %v14722_v24, %v14722_v24  ;;  %v5150_v52 = vmax.f32 %v5148_v4, %v5149_v29  ;;  %v5157_v63 = vmax.f32 %v5155_v32, %v5156_v11  ;;  %v5163_v19 = vrot.slane %v5162_v10, 1 }
 0x1a6   :  { %v2789_v59 = vsel %vm1615_vm1, %v14720_v47, %v2788_v5  ;;  %14721 = vst [vmem:[#allocation10_spill] sm:$0xff] %v10327_v16  ;;  %v5170_v3 = vrot.slane %v5169_v9, 1  ;;  %v4460_v28 = vcombine.high %v4458_v51, %v4458_v51  ;;  %v5172_v12 = vsel %vm5031_vm4, %v14722_v24, -inf  ;;  %7945 = vrot.lane.b32.xlu0 %v7944_v48, %s8217_s25 }
 0x1a7   :  { %v10333_v46 = vadd.f32 %v2789_v59, %v2496_v20  ;;  %v5179_v5 = vsel %vm5031_vm4, %v4459_v15, -inf  ;;  %v10341_v50 = vrot.slane %v10321_v8, %v14513_v2  ;;  %v5164_v25 = vmax.f32 %v5162_v10, %v5163_v19 }
 0x1a8   :  { %v6077_v26 = vsel %vm6056_vm5, %v5157_v63, %v5150_v52  ;;  %v6274_v21 = vrot.slane %v6224_v42, 1  ;;  %v10348_v0 = vrot.slane %v10327_v16, %v14513_v2  ;;  %v5173_v4 = vrot.slane %v5172_v12, 4  ;;  %v14740_v16 = vld [vmem:[#allocation40_spill] sm:$0xff] }
 0x1a9   :  { %14723 = vst [vmem:[#allocation19_spill] sm:$0xff] %v10341_v50  ;;  %v5180_v1 = vrot.slane %v5179_v5, 4  ;;  %v5171_v20 = vmax.f32 %v5169_v9, %v5170_v3  ;;  %v5186_v32 = vsel %vm5031_vm4, %v4458_v51, -inf  ;;  %v5193_v58 = vsel %vm5031_vm4, %v4460_v28, -inf  ;;  %v10361_v51 = vpop.permute.xlu1 %593 }
 0x1aa   :  { %14724 = vst [vmem:[#allocation32_spill] sm:$0xff] %v10348_v0  ;;  %v6273_v57 = vrot.slane %v10254_v35, 1  ;;  %v6078_v29 = vsel %vm6058_vm6, %v5164_v25, %v6077_v26  ;;  %v5174_v38 = vmax.f32 %v5172_v12, %v5173_v4  ;;  %v5187_v7 = vrot.slane %v5186_v32, 4  ;;  %14725 = vst [vmem:[#allocation5_spill] sm:$0xff] %v10361_v51 }
 0x1ab   :  { %v5181_v42 = vmax.f32 %v5179_v5, %v5180_v1  ;;  %v5194_v47 = vrot.slane %v5193_v58, 4  ;;  %v10369_v63 = vsel %vm5031_vm4, %v10348_v0, -inf  ;;  %v6079_v19 = vsel %vm6060_vm7, %v5171_v20, %v6078_v29 }
 0x1ac   :  { %v10359_v9 = vsel %vm1145_vm2, %v6273_v57, %v6274_v21  ;;  %v5175_v59 = vrot.slane %v5174_v38, 2  ;;  %v5188_v24 = vmax.f32 %v5186_v32, %v5187_v7  ;;  %14726 = vst [vmem:[#allocation7_spill] sm:$0xff] %v10369_v63  ;;  %v10375_v25 = vmul.f32 %v8537_v53, %v10361_v51 }
 0x1ad   :  { %v5182_v48 = vrot.slane %v5181_v42, 2  ;;  %v7939_v15 = vpack.i.bf16 %v10359_v9, %v10071_v23  ;;  %v5195_v3 = vmax.f32 %v5193_v58, %v5194_v47  ;;  %v10379_v26 = vmul.f32 %v8539_v54, %v10361_v51  ;;  %v898_v10 = vpop.permute.xlu1 %897 }
 0x1ae   :  { %v5176_v28 = vmax.f32 %v5174_v38, %v5175_v59  ;;  %v5189_v5 = vrot.slane %v5188_v24, 2  ;;  %14727 = vst [vmem:[#allocation44_spill] sm:$0xff] %v10375_v25  ;;  %v10383_v21 = vmul.f32 %v8541_v55, %v10361_v51  ;;  %v10387_v4 = vmul.f32 %v8543_v56, %v10361_v51  ;;  %v14769_v25 = vld [vmem:[#allocation53_spill] sm:$0xff] }
 0x1af   :  { %v5183_v12 = vmax.f32 %v5181_v42, %v5182_v48  ;;  %7940 = vrot.lane.b32.xlu1 %v7939_v15, %s8218_s26  ;;  %v5196_v23 = vrot.slane %v5195_v3, 2  ;;  %14728 = vst [vmem:[#allocation6_spill] sm:$0xff] %v10379_v26  ;;  %v1017_v58 = vmul.f32 %v8537_v53, %v10115_v17  ;;  %v1487_v29 = vmul.f32 %v8539_v54, %v10115_v17 }
 0x1b0   :  { %14729 = vst [vmem:[#allocation18_spill] sm:$0xff] %v10383_v21  ;;  %14730 = vst [vmem:[#allocation72_spill] sm:$0xff] %v10387_v4  ;;  %v5177_v1 = vrot.slane %v5176_v28, 1  ;;  %v5190_v32 = vmax.f32 %v5188_v24, %v5189_v5  ;;  %v2117_v38 = vmul.f32 %v8543_v56, %v10115_v17  ;;  %v2601_v42 = vmul.f32 %v8556_v60, %v10115_v17 }
 0x1b1   :  { %v5184_v20 = vrot.slane %v5183_v12, 1  ;;  %v5197_v57 = vmax.f32 %v5195_v3, %v5196_v23  ;;  %v1242_v48 = vrot.slane %v1017_v58, 1  ;;  %v10399_v24 = vmul.f32 %v8556_v60, %v10361_v51 }
 0x1b2   :  { %v5178_v7 = vmax.f32 %v5176_v28, %v5177_v1  ;;  %v5191_v59 = vrot.slane %v5190_v32, 1  ;;  %v10403_v3 = vmul.f32 %v8558_v61, %v10361_v51  ;;  %v10407_v5 = vmul.f32 %v8560_v62, %v10361_v51  ;;  %v10410_v28 = vpop.permute.xlu0 %588 }
 0x1b3   :  { %v5185_v47 = vmax.f32 %v5183_v12, %v5184_v20  ;;  %v5198_v15 = vrot.slane %v5197_v57, 1  ;;  %14731 = vst [vmem:[#allocation73_spill] sm:$0xff] %v10399_v24  ;;  %v14734_v12 = vld [vmem:[#allocation41_spill] sm:$0xff]  ;;  %v1712_v58 = vrot.slane %v1487_v29, 2  ;;  %v10418_v45 = vmul.f32 %v10223_v31, %v10361_v51  ;;  %v10465_v51 = vpop.permute.xlu1 %521 }
 0x1b4   :  { %14732 = vst [vmem:[#allocation74_spill] sm:$0xff] %v10403_v3  ;;  %14733 = vst [vmem:[#allocation75_spill] sm:$0xff] %v10407_v5  ;;  %v5192_v23 = vmax.f32 %v5190_v32, %v5191_v59  ;;  %v6080_v52 = vsel %vm14440_vm8, %v5178_v7, %v6079_v19  ;;  %v14735_v1 = vrot.slane %v14734_v12, 1  ;;  %v2347_v0 = vrot.slane %v2117_v38, 1  ;;  %v14737_v12 = vld [vmem:[#allocation38_spill] sm:$0xff]  ;;  %v14745_v5 = vld [vmem:[#allocation45_spill] sm:$0xff] }
 0x1b5   :  { %v5199_v11 = vmax.f32 %v5197_v57, %v5198_v15  ;;  %v6081_v40 = vsel %vm14437_vm9, %v5185_v47, %v6080_v52  ;;  %14736 = vst [vmem:[#allocation41_spill] sm:$0xff] %v10418_v45  ;;  %v715_v19 = vmul.f32 %v8522_v49, %v10115_v17  ;;  %v2831_v7 = vrot.slane %v2601_v42, 2  ;;  %v14738_v15 = vld [vmem:[#allocation39_spill] sm:$0xff]  ;;  %14749 = vst [vmem:[#allocation77_spill] sm:$0xff] %v10465_v51 }
 0x1b6   :  { %v1243_v20 = vsel %vm1145_vm2, %v14735_v1, %v1242_v48  ;;  %v6082_v32 = vsel %vm6066_vm10, %v5192_v23, %v6081_v40  ;;  %v3212_v59 = vmul.f32 %v8560_v62, %v10115_v17  ;;  %v10429_v52 = vmul.f32 %v10223_v31, %v10115_v17  ;;  %v10451_v8 = vpop.permute.xlu0 %597 }
 0x1b7   :  { %v6083_v29 = vsel %vm6068_vm11, %v5199_v11, %v6082_v32  ;;  %v1401_v57 = vadd.f32 %v1243_v20, %v14737_v12  ;;  %v1018_v47 = vmul.f32 %v8537_v53, %v898_v10  ;;  %v14739_v40 = vrot.slane %v14738_v15, 2  ;;  %14744 = vst [vmem:[#allocation40_spill] sm:$0xff] %v10451_v8 }
 0x1b8   :  { %v6177_v38 = vrot.slane %v6083_v29, 7  ;;  %v1488_v42 = vmul.f32 %v8539_v54, %v898_v10  ;;  %v2118_v1 = vmul.f32 %v8543_v56, %v898_v10  ;;  %v14741_v50 = vrot.slane %v14740_v16, 1 }
 0x1b9   :  { %v1713_v23 = vsel %vm1615_vm1, %v14739_v40, %v1712_v58  ;;  %v1244_v20 = vrot.slane %v1018_v47, 1  ;;  %v2602_v32 = vmul.f32 %v8556_v60, %v898_v10  ;;  %v3213_v12 = vmul.f32 %v8560_v62, %v898_v10 }
 0x1ba   :  { %v10440_v11 = vsel %vm1145_vm2, %v14741_v50, %v2347_v0  ;;  %v10445_v29 = vsel %vm161_vm0, 0.0, %v6177_v38  ;;  %v10448_v15 = vsel %vm161_vm0, %v6177_v38, 0.0  ;;  %v3434_v40 = vrot.slane %v3212_v59, 1 }
 0x1bb   :  { %14742 = vst [vmem:[#allocation38_spill] sm:$0xff] %v10440_v11  ;;  %14743 = vst [vmem:[#allocation39_spill] sm:$0xff] %v10445_v29  ;;  %v6321_v16 = vrot.slane %v10445_v29, 2  ;;  %v6322_v50 = vrot.slane %v10448_v15, 2  ;;  %v1714_v47 = vrot.slane %v1488_v42, 2  ;;  %v2349_v11 = vrot.slane %v2118_v1, 1 }
 0x1bc   :  { %v1871_v45 = vadd.f32 %v1713_v23, %v1401_v57  ;;  %v14746_v3 = vrot.slane %v14745_v5, 2  ;;  %v1245_v38 = vsel %vm1145_vm2, %v1242_v48, %v1244_v20  ;;  %v2833_v4 = vrot.slane %v2602_v32, 2  ;;  %v14750_v57 = vld [vmem:[#allocation48_spill] sm:$0xff]  ;;  %v14754_v48 = vld [vmem:[#allocation49_spill] sm:$0xff] }
 0x1bd   :  { %v10462_v59 = vsel %vm1615_vm1, %v6321_v16, %v6322_v50  ;;  %v1402_v17 = vadd.f32 %v1245_v38, %v715_v19  ;;  %v3436_v21 = vrot.slane %v3213_v12, 1  ;;  %v3684_v26 = vmul.f32 %v10223_v31, %v898_v10 }
 0x1be   :  { %v10458_v24 = vsel %vm1615_vm1, %v14746_v3, %v2831_v7  ;;  %14748 = vst [vmem:[#allocation76_spill] sm:$0xff] %v10462_v59  ;;  %v14751_v23 = vrot.slane %v14750_v57, 1  ;;  %v14753_v3 = vrot.slane %v10429_v52, 2  ;;  %v14755_v1 = vrot.slane %v14754_v48, 2 }
 0x1bf   :  { %14747 = vst [vmem:[#allocation45_spill] sm:$0xff] %v10458_v24  ;;  %v7949_v19 = vpack.i.bf16 %v10445_v29, %v10254_v35  ;;  %v1715_v32 = vsel %vm1615_vm1, %v1712_v58, %v1714_v47  ;;  %v10486_v12 = vsel %vm1145_vm2, %v2347_v0, %v2349_v11  ;;  %v10489_v16 = vsel %vm1615_vm1, %v2831_v7, %v2833_v4  ;;  %v14768_v24 = vld [vmem:[#allocation42_spill] sm:$0xff] }
 0x1c0   :  { %v10471_v5 = vsel %vm1145_vm2, %v14751_v23, %v3434_v40  ;;  %v10478_v20 = vsel %vm1615_vm1, %v14755_v1, %v14753_v3  ;;  %14757 = vst [vmem:[#allocation78_spill] sm:$0xff] %v10486_v12  ;;  %14758 = vst [vmem:[#allocation79_spill] sm:$0xff] %v10489_v16  ;;  %v1872_v50 = vadd.f32 %v1715_v32, %v1402_v17  ;;  %v3907_v57 = vrot.slane %v3684_v26, 2  ;;  %v903_v3 = vpop.permute.xlu0 %902  ;;  %v14766_v16 = vld [vmem:[#allocation26_spill] sm:$0xff] }
 0x1c1   :  { %14752 = vst [vmem:[#allocation48_spill] sm:$0xff] %v10471_v5  ;;  %14756 = vst [vmem:[#allocation49_spill] sm:$0xff] %v10478_v20  ;;  %v10492_v38 = vsel %vm1145_vm2, %v3434_v40, %v3436_v21  ;;  %7950 = vrot.lane.b32.xlu1 %v7949_v19, %s8219_s27  ;;  %v10497_v23 = vmul.f32 %v8541_v55, %v10465_v51  ;;  %v10501_v0 = vmul.f32 %v8543_v56, %v10465_v51 }
 0x1c2   :  { %14759 = vst [vmem:[#allocation80_spill] sm:$0xff] %v10492_v38  ;;  %v10505_v4 = vmul.f32 %v8556_v60, %v10465_v51  ;;  %v1020_v17 = vmul.f32 %v8537_v53, %v10145_v43  ;;  %v1490_v26 = vmul.f32 %v8539_v54, %v10145_v43  ;;  %v10513_v21 = vmul.f32 %v8558_v61, %v10465_v51 }
 0x1c3   :  { %14760 = vst [vmem:[#allocation81_spill] sm:$0xff] %v10497_v23  ;;  %14761 = vst [vmem:[#allocation82_spill] sm:$0xff] %v10501_v0  ;;  %v10517_v58 = vmul.f32 %v8560_v62, %v10465_v51  ;;  %v2120_v7 = vmul.f32 %v8543_v56, %v10145_v43  ;;  %v2604_v11 = vmul.f32 %v8556_v60, %v10145_v43  ;;  %v14767_v20 = vrot.slane %v14766_v16, 1 }
 0x1c4   :  { %14762 = vst [vmem:[#allocation83_spill] sm:$0xff] %v10505_v4  ;;  %14763 = vst [vmem:[#allocation84_spill] sm:$0xff] %v10513_v21  ;;  %v10525_v40 = vmul.f32 %v10223_v31, %v10465_v51  ;;  %v717_v47 = vmul.f32 %v8522_v49, %v10145_v43  ;;  %v1247_v48 = vrot.slane %v1020_v17, 1  ;;  %v1021_v1 = vmul.f32 %v8537_v53, %v903_v3  ;;  %v14770_v21 = vld [vmem:[#allocation28_spill] sm:$0xff] }
 0x1c5   :  { %14764 = vst [vmem:[#allocation85_spill] sm:$0xff] %v10517_v58  ;;  %v2352_v19 = vrot.slane %v2120_v7, 1  ;;  %v3215_v32 = vmul.f32 %v8560_v62, %v10145_v43  ;;  %v3686_v10 = vmul.f32 %v10223_v31, %v10145_v43  ;;  %v1491_v42 = vmul.f32 %v8539_v54, %v903_v3 }
 0x1c6   :  { %14765 = vst [vmem:[#allocation86_spill] sm:$0xff] %v10525_v40  ;;  %v1717_v35 = vrot.slane %v1490_v26, 2  ;;  %v1958_v38 = vmul.f32 %v8541_v55, %v10145_v43  ;;  %v1248_v12 = vsel %vm1145_vm2, %v14767_v20, %v1247_v48  ;;  %v1249_v17 = vrot.slane %v1021_v1, 1 }
 0x1c7   :  { %v2836_v5 = vrot.slane %v2604_v11, 2  ;;  %v1403_v7 = vadd.f32 %v1248_v12, %v14768_v24  ;;  %v1719_v51 = vrot.slane %v1491_v42, 2  ;;  %v2021_v8 = vadd.f32 %v14769_v25, %v1871_v45  ;;  %v14774_v12 = vld [vmem:[#allocation25_spill] sm:$0xff] }
 0x1c8   :  { %v1250_v40 = vsel %vm1145_vm2, %v1247_v48, %v1249_v17  ;;  %v2121_v58 = vmul.f32 %v8543_v56, %v903_v3  ;;  %v14771_v26 = vrot.slane %v14770_v21, 1  ;;  %v2605_v43 = vmul.f32 %v8556_v60, %v903_v3 }
 0x1c9   :  { %v3439_v16 = vrot.slane %v3215_v32, 1  ;;  %v3910_v0 = vrot.slane %v3686_v10, 2  ;;  %v1404_v20 = vadd.f32 %v1250_v40, %v717_v47  ;;  %v2022_v11 = vadd.f32 %v1958_v38, %v1872_v50  ;;  %v14780_v47 = vld [vmem:[#allocation29_spill] sm:$0xff] }
 0x1ca   :  { %v2353_v4 = vsel %vm1145_vm2, %v14771_v26, %v2352_v19  ;;  %v2354_v23 = vrot.slane %v2121_v58, 1  ;;  %v2838_v24 = vrot.slane %v2605_v43, 2  ;;  %v3216_v42 = vmul.f32 %v8560_v62, %v903_v3  ;;  %v14776_v43 = vld [vmem:[#allocation27_spill] sm:$0xff] }
 0x1cb   :  { %v2515_v1 = vadd.f32 %v2353_v4, %v2021_v8  ;;  %v14772_v45 = vrot.slane %v10429_v52, 2  ;;  %v14775_v21 = vrot.slane %v14774_v12, 2  ;;  %v1720_v17 = vsel %vm1615_vm1, %v1717_v35, %v1719_v51  ;;  %v10565_v4 = vpop.permute.xlu1 %530 }
 0x1cc   :  { %v3687_v10 = vmul.f32 %v10223_v31, %v903_v3  ;;  %v2355_v8 = vsel %vm1145_vm2, %v2352_v19, %v2354_v23  ;;  %v14777_v50 = vrot.slane %v14776_v43, 2  ;;  %v3441_v52 = vrot.slane %v3216_v42, 1  ;;  %14778 = vst [vmem:[#allocation42_spill] sm:$0xff] %v10565_v4  ;;  %v14783_v19 = vld [vmem:[#allocation50_spill] sm:$0xff] }
 0x1cd   :  { %v10552_v25 = vsel %vm1615_vm1, %v14772_v45, %v3907_v57  ;;  %v1718_v48 = vsel %vm1615_vm1, %v14775_v21, %v1717_v35  ;;  %v10567_v57 = vadd.f32 %v1720_v17, %v1404_v20  ;;  %v14781_v32 = vrot.slane %v14780_v47, 1  ;;  %v14794_v47 = vld [vmem:[#allocation61_spill] sm:$0xff] }
 0x1ce   :  { %14773 = vst [vmem:[#allocation26_spill] sm:$0xff] %v10552_v25  ;;  %v10559_v40 = vadd.f32 %v1718_v48, %v1403_v7  ;;  %v2837_v38 = vsel %vm1615_vm1, %v14777_v50, %v2836_v5  ;;  %v6276_v51 = vrot.slane %v10445_v29, 1  ;;  %v2516_v3 = vadd.f32 %v2355_v8, %v2022_v11  ;;  %v14789_v11 = vld [vmem:[#allocation33_spill] sm:$0xff] }
 0x1cf   :  { %v10569_v58 = vadd.f32 %v2837_v38, %v2515_v1  ;;  %v10574_v35 = vsel %vm1145_vm2, %v14781_v32, %v3439_v16  ;;  %v2839_v23 = vsel %vm1615_vm1, %v2836_v5, %v2838_v24  ;;  %v14784_v7 = vrot.slane %v14783_v19, 2  ;;  %v863_v38 = vpop.permute.xlu1 %862 }
 0x1d0   :  { %14782 = vst [vmem:[#allocation28_spill] sm:$0xff] %v10574_v35  ;;  %v3912_v42 = vrot.slane %v3687_v10, 2  ;;  %v10584_v20 = vsel %vm1145_vm2, %v3439_v16, %v3441_v52  ;;  %v14787_v1 = vrot.slane %v10448_v15, 1  ;;  %v10593_v12 = vmul.f32 %v8558_v61, %v10565_v4  ;;  %v14804_v35 = vld [vmem:[#allocation54_spill] sm:$0xff] }
 0x1d1   :  { %14779 = vst [vmem:[#allocation53_spill] sm:$0xff] %v10569_v58  ;;  %v10581_v26 = vsel %vm1615_vm1, %v14784_v7, %v3910_v0  ;;  %14786 = vst [vmem:[#allocation27_spill] sm:$0xff] %v10584_v20  ;;  %v996_v5 = vmul.f32 %v8537_v53, %v14789_v11  ;;  %v10601_v21 = vmul.f32 %v8560_v62, %v10565_v4  ;;  %v14802_v20 = vld [vmem:[#allocation15_spill] sm:$0xff] }
 0x1d2   :  { %14785 = vst [vmem:[#allocation25_spill] sm:$0xff] %v10581_v26  ;;  %v10589_v45 = vsel %vm1145_vm2, %v6276_v51, %v14787_v1  ;;  %14788 = vst [vmem:[#allocation29_spill] sm:$0xff] %v10593_v12  ;;  %v1466_v15 = vmul.f32 %v8539_v54, %v14789_v11  ;;  %v10607_v16 = vmul.f32 %v10223_v31, %v10565_v4 }
 0x1d3   :  { %v7954_v24 = vpack.i.bf16 %v10589_v45, %v10359_v9  ;;  %14790 = vst [vmem:[#allocation50_spill] sm:$0xff] %v10601_v21  ;;  %v701_v48 = vmul.f32 %v8522_v49, %v14789_v11  ;;  %v1207_v17 = vrot.slane %v996_v5, 1  ;;  %v2093_v10 = vmul.f32 %v8543_v56, %v14789_v11  ;;  %v14797_v9 = vld [vmem:[#allocation56_spill] sm:$0xff] }
 0x1d4   :  { %14791 = vst [vmem:[#allocation33_spill] sm:$0xff] %v10607_v16  ;;  %v10614_v8 = vadd.f32 %v2839_v23, %v2516_v3  ;;  %v1940_v43 = vmul.f32 %v8541_v55, %v14789_v11  ;;  %v10622_v50 = vmul.f32 %v8556_v60, %v14789_v11  ;;  %v10625_v52 = vsel %vm1615_vm1, %v3910_v0, %v3912_v42  ;;  %v14795_v23 = vld [vmem:[#allocation51_spill] sm:$0xff] }
 0x1d5   :  { %7955 = vrot.lane.b32.xlu0 %v7954_v24, %s8220_s28  ;;  %7960 = vrot.lane.b32.xlu1 %v7954_v24, %s8215_s21  ;;  %14793 = vst [vmem:[#allocation88_spill] sm:$0xff] %v10625_v52  ;;  %v2003_v32 = vadd.f32 %v14794_v47, %v10263_v39  ;;  %v2307_v51 = vrot.slane %v2093_v10, 1  ;;  %v3188_v3 = vmul.f32 %v8560_v62, %v14789_v11  ;;  %v14796_v19 = vrot.slane %v14795_v23, 1 }
 0x1d6   :  { %14792 = vst [vmem:[#allocation87_spill] sm:$0xff] %v10614_v8  ;;  %v1677_v1 = vrot.slane %v1466_v15, 2  ;;  %v2004_v5 = vadd.f32 %v1940_v43, %v10305_v22  ;;  %v3659_v24 = vmul.f32 %v10223_v31, %v14789_v11  ;;  %v14798_v0 = vrot.slane %v14797_v9, 1  ;;  %v14800_v15 = vld [vmem:[#allocation13_spill] sm:$0xff] }
 0x1d7   :  { %v1208_v7 = vsel %vm1145_vm2, %v14796_v19, %v1207_v17  ;;  %v3048_v39 = vmul.f32 %v8558_v61, %v14789_v11  ;;  %v3394_v10 = vrot.slane %v3188_v3, 1  ;;  %v997_v47 = vmul.f32 %v8537_v53, %v863_v38 }
 0x1d8   :  { %v2308_v42 = vsel %vm1145_vm2, %v14798_v0, %v2307_v51  ;;  %v14799_v23 = vpack.i.bf16 %v10462_v59, %v10309_v27  ;;  %v3109_v43 = vadd.f32 %v14800_v15, %v10311_v36  ;;  %v3865_v19 = vrot.slane %v3659_v24, 2  ;;  %v14801_v0 = vld [vmem:[#allocation58_spill] sm:$0xff] }
 0x1d9   :  { %v1467_v9 = vmul.f32 %v8539_v54, %v863_v38  ;;  %v1387_v52 = vadd.f32 %v1208_v7, %v14801_v0  ;;  %v14803_v11 = vrot.slane %v14802_v20, 1  ;;  %v1209_v25 = vrot.slane %v997_v47, 1  ;;  %v14806_v24 = vld [vmem:[#allocation62_spill] sm:$0xff] }
 0x1da   :  { %7965 = vrot.lane.b32.xlu0 %v14799_v23, %s8214_s0  ;;  %v2094_v26 = vmul.f32 %v8543_v56, %v863_v38  ;;  %v14805_v27 = vrot.slane %v14804_v35, 2  ;;  %v2497_v22 = vadd.f32 %v2308_v42, %v2003_v32  ;;  %v10660_v36 = vmul.f32 %v8556_v60, %v863_v38 }
 0x1db   :  { %v3395_v3 = vsel %vm1145_vm2, %v14803_v11, %v3394_v10  ;;  %v14807_v15 = vrot.slane %v14806_v24, 2  ;;  %v1210_v20 = vsel %vm1145_vm2, %v1207_v17, %v1209_v25  ;;  %v3189_v47 = vmul.f32 %v8560_v62, %v863_v38  ;;  %v14811_v25 = vld [vmem:[#allocation52_spill] sm:$0xff] }
 0x1dc   :  { %v1678_v23 = vsel %vm1615_vm1, %v14805_v27, %v1677_v1  ;;  %v3580_v4 = vadd.f32 %v3395_v3, %v3109_v43  ;;  %v2309_v0 = vrot.slane %v2094_v26, 1  ;;  %v3110_v11 = vadd.f32 %v3048_v39, %v10333_v46  ;;  %v14809_v43 = vld [vmem:[#allocation59_spill] sm:$0xff] }
 0x1dd   :  { %v3866_v7 = vsel %vm1615_vm1, %v14807_v15, %v3865_v19  ;;  %v1679_v35 = vrot.slane %v1467_v9, 2  ;;  %v3660_v27 = vmul.f32 %v10223_v31, %v863_v38  ;;  %v10669_v32 = vadd.f32 %v1678_v23, %v1387_v52  ;;  %v14813_v23 = vld [vmem:[#allocation57_spill] sm:$0xff] }
 0x1de   :  { %v4051_v63 = vadd.f32 %v3866_v7, %v3580_v4  ;;  %v14808_v42 = vrot.slane %v10622_v50, 2  ;;  %v14810_v3 = vrot.slane %v14809_v43, 2  ;;  %v3396_v15 = vrot.slane %v3189_v47, 1  ;;  %v10692_v47 = vld [vmem:[%s14094_s2] ss:$0 sm:$0xff] }
 0x1df   :  { %v14812_v26 = vcombine.high %v14811_v25, %v14811_v25  ;;  %v10682_v46 = vadd.f32 %v1210_v20, %v701_v48  ;;  %v2793_v4 = vrot.slane %v10660_v36, 2  ;;  %v3867_v38 = vrot.slane %v3660_v27, 2  ;;  %v14814_v20 = vld [vmem:[#allocation60_spill] sm:$0xff] }
 0x1e0   :  { %v2792_v24 = vsel %vm1615_vm1, %v14810_v3, %v14808_v42  ;;  %v2310_v52 = vsel %vm1145_vm2, %v2307_v51, %v2309_v0  ;;  %v3397_v39 = vsel %vm1145_vm2, %v3394_v10, %v3396_v15  ;;  %v5200_v7 = vsel %vm5031_vm4, %v14813_v23, -inf  ;;  %v14817_v25 = vld [vmem:[#allocation16_spill] sm:$0xff] }
 0x1e1   :  { %v4475_v17 = vrot.slane %v14812_v26, %v14513_v2  ;;  %v10680_v16 = vadd.f32 %v2792_v24, %v2497_v22  ;;  %v10695_v22 = vadd.f32 %v10692_v47, %v4051_v63  ;;  %v1680_v48 = vsel %vm1615_vm1, %v1677_v1, %v1679_v35 }
 0x1e2   :  { %v3581_v36 = vadd.f32 %v3397_v39, %v3110_v11  ;;  %v14815_v51 = vcombine.high %v14814_v20, %v14814_v20  ;;  %v3868_v0 = vsel %vm1615_vm1, %v3865_v19, %v3867_v38  ;;  %v5201_v27 = vrot.slane %v5200_v7, 4  ;;  %v14819_v19 = vld [vmem:[#allocation17_spill] sm:$0xff] }
 0x1e3   :  { %v4477_v9 = vcombine.high %v4475_v17, %v4475_v17  ;;  %v14816_v42 = vcombine.high %v14813_v23, %v14813_v23  ;;  %v5214_v3 = vsel %vm5031_vm4, %v4475_v17, -inf  ;;  %v2498_v63 = vadd.f32 %v2310_v52, %v2004_v5 }
 0x1e4   :  { %v4492_v10 = vrot.slane %v14815_v51, %v14513_v2  ;;  %v4052_v24 = vadd.f32 %v3868_v0, %v3581_v36  ;;  %v5215_v1 = vrot.slane %v5214_v3, 4  ;;  %v5202_v11 = vmax.f32 %v5200_v7, %v5201_v27 }
 0x1e5   :  { %v5207_v43 = vsel %vm5031_vm4, %v14816_v42, -inf  ;;  %v5221_v35 = vsel %vm5031_vm4, %v4477_v9, -inf  ;;  %v14818_v26 = vrot.slane %v14817_v25, 4  ;;  %v14820_v38 = vcombine.high %v14819_v19, %v14819_v19 }
 0x1e6   :  { %v5208_v15 = vrot.slane %v5207_v43, 4  ;;  %v4494_v20 = vcombine.high %v4492_v10, %v4492_v10  ;;  %v5216_v42 = vmax.f32 %v5214_v3, %v5215_v1  ;;  %v5222_v17 = vrot.slane %v5221_v35, 4 }
 0x1e7   :  { %v5230_v39 = vmax.f32 %v14817_v25, %v14818_v26  ;;  %v5235_v23 = vsel %vm5031_vm4, %v14820_v38, -inf  ;;  %v5203_v5 = vrot.slane %v5202_v11, 2  ;;  %v5242_v7 = vsel %vm5031_vm4, %v4492_v10, -inf  ;;  %v10718_v25 = vpop.permute.xlu0 %525 }
 0x1e8   :  { %v5209_v51 = vmax.f32 %v5207_v43, %v5208_v15  ;;  %v5236_v36 = vrot.slane %v5235_v23, 4  ;;  %v4123_v9 = vadd.f32 %v10692_v47, %v4052_v24  ;;  %v5217_v27 = vrot.slane %v5216_v42, 2  ;;  %14821 = vst [vmem:[#allocation61_spill] sm:$0xff] %v10718_v25 }
 0x1e9   :  { %v5231_v52 = vrot.slane %v5230_v39, 2  ;;  %v5223_v21 = vmax.f32 %v5221_v35, %v5222_v17  ;;  %v5204_v26 = vmax.f32 %v5202_v11, %v5203_v5  ;;  %v5243_v38 = vrot.slane %v5242_v7, 4 }
 0x1ea   :  { %v5210_v0 = vrot.slane %v5209_v51, 2  ;;  %v5237_v12 = vmax.f32 %v5235_v23, %v5236_v36  ;;  %v4186_v43 = vmax.f32 %v10695_v22, 0.0  ;;  %v5218_v15 = vmax.f32 %v5216_v42, %v5217_v27 }
 0x1eb   :  { %v5232_v19 = vmax.f32 %v5230_v39, %v5231_v52  ;;  %v5224_v1 = vrot.slane %v5223_v21, 2  ;;  %v5205_v8 = vrot.slane %v5204_v26, 1  ;;  %v5244_v10 = vmax.f32 %v5242_v7, %v5243_v38  ;;  %v10725_v36 = vpop.permute.xlu0 %534 }
 0x1ec   :  { %v5211_v3 = vmax.f32 %v5209_v51, %v5210_v0  ;;  %v5238_v18 = vrot.slane %v5237_v12, 2  ;;  %v5219_v24 = vrot.slane %v5218_v15, 1  ;;  %v5249_v35 = vsel %vm5031_vm4, %v4494_v20, -inf  ;;  %14823 = vst [vmem:[#allocation51_spill] sm:$0xff] %v10725_v36 }
 0x1ed   :  { %v5233_v37 = vrot.slane %v5232_v19, 1  ;;  %v5225_v58 = vmax.f32 %v5223_v21, %v5224_v1  ;;  %v4187_v17 = vmax.f32 %v4123_v9, 0.0  ;;  %v5206_v25 = vmax.f32 %v5204_v26, %v5205_v8 }
 0x1ee   :  { %v5212_v41 = vrot.slane %v5211_v3, 1  ;;  %v5239_v11 = vmax.f32 %v5237_v12, %v5238_v18  ;;  %v5245_v39 = vrot.slane %v5244_v10, 2  ;;  %v5220_v5 = vmax.f32 %v5218_v15, %v5219_v24  ;;  %v10729_v12 = vpop.permute.xlu1 %602 }
 0x1ef   :  { %v5226_v52 = vrot.slane %v5225_v58, 1  ;;  %v5250_v22 = vrot.slane %v5249_v35, 4  ;;  %v14822_v51 = vrot.slane %v10622_v50, 2  ;;  %v5234_v7 = vmax.f32 %v5232_v19, %v5233_v37 }
 0x1f0   :  { %v5213_v23 = vmax.f32 %v5211_v3, %v5212_v41  ;;  %v5240_v0 = vrot.slane %v5239_v11, 1  ;;  %v5246_v27 = vmax.f32 %v5244_v10, %v5245_v39  ;;  %v1858_v21 = vadd.f32 %v1680_v48, %v10682_v46 }
 0x1f1   :  { %v2794_v42 = vsel %vm1615_vm1, %v14822_v51, %v2793_v4  ;;  %v5227_v20 = vmax.f32 %v5225_v58, %v5226_v52  ;;  %v5251_v9 = vmax.f32 %v5249_v35, %v5250_v22  ;;  %v10735_v4 = vsel %vm4230_vm3, %v4186_v43, -inf }
 0x1f2   :  { %v6084_v18 = vsel %vm6056_vm5, %v5213_v23, %v5206_v25  ;;  %v10731_v41 = vadd.f32 %v2794_v42, %v2498_v63  ;;  %v5241_v8 = vmax.f32 %v5239_v11, %v5240_v0  ;;  %v5247_v26 = vrot.slane %v5246_v27, 1 }
 0x1f3   :  { %v6085_v50 = vsel %vm6058_vm6, %v5220_v5, %v6084_v18  ;;  %v10738_v37 = vsel %vm4230_vm3, %v4187_v17, -inf  ;;  %v5252_v19 = vrot.slane %v5251_v9, 2  ;;  %v10744_v63 = vmul.f32 %v8537_v53, %v10729_v12  ;;  %v868_v17 = vpop.permute.xlu0 %867 }
 0x1f4   :  { %v6086_v58 = vsel %vm6060_vm7, %v5227_v20, %v6085_v50  ;;  %v5248_v46 = vmax.f32 %v5246_v27, %v5247_v26  ;;  %v10748_v25 = vmul.f32 %v8539_v54, %v10729_v12  ;;  %v10753_v3 = vmul.f32 %v8541_v55, %v10729_v12  ;;  %v14828_v20 = vld [vmem:[#allocation14_spill] sm:$0xff] }
 0x1f5   :  { %v6087_v48 = vsel %vm14440_vm8, %v5234_v7, %v6086_v58  ;;  %v5253_v38 = vmax.f32 %v5251_v9, %v5252_v19  ;;  %v999_v15 = vmul.f32 %v8537_v53, %v10167_v6  ;;  %v10759_v1 = vmul.f32 %v8543_v56, %v10729_v12  ;;  %v14830_v50 = vld [vmem:[#allocation66_spill] sm:$0xff] }
 0x1f6   :  { %v6088_v43 = vsel %vm14437_vm9, %v5241_v8, %v6087_v48  ;;  %v10763_v10 = vmul.f32 %v8556_v60, %v10729_v12  ;;  %v10767_v24 = vmul.f32 %v8558_v61, %v10729_v12  ;;  %v1469_v35 = vmul.f32 %v8539_v54, %v10167_v6 }
 0x1f7   :  { %v5254_v11 = vrot.slane %v5253_v38, 1  ;;  %v10773_v39 = vmul.f32 %v8560_v62, %v10729_v12  ;;  %v1212_v23 = vrot.slane %v999_v15, 1  ;;  %v2096_v5 = vmul.f32 %v8543_v56, %v10167_v6 }
 0x1f8   :  { %14824 = vst [vmem:[#allocation56_spill] sm:$0xff] %v10763_v10  ;;  %14825 = vst [vmem:[#allocation13_spill] sm:$0xff] %v10767_v24  ;;  %v6089_v52 = vsel %vm6066_vm10, %v5248_v46, %v6088_v43  ;;  %v10780_v22 = vmul.f32 %v10223_v31, %v10729_v12  ;;  %v703_v51 = vmul.f32 %v8522_v49, %v10167_v6  ;;  %v1682_v0 = vrot.slane %v1469_v35, 2  ;;  %v14837_v10 = vld [vmem:[#allocation68_spill] sm:$0xff] }
 0x1f9   :  { %14826 = vst [vmem:[#allocation58_spill] sm:$0xff] %v10773_v39  ;;  %v3191_v42 = vmul.f32 %v8560_v62, %v10167_v6  ;;  %v5255_v7 = vmax.f32 %v5253_v38, %v5254_v11  ;;  %v1000_v27 = vmul.f32 %v8537_v53, %v868_v17  ;;  %v14829_v9 = vrot.slane %v14828_v20, 1 }
 0x1fa   :  { %14827 = vst [vmem:[#allocation15_spill] sm:$0xff] %v10780_v22  ;;  %v10792_v8 = vmul.f32 %v8556_v60, %v10167_v6  ;;  %v3662_v26 = vmul.f32 %v10223_v31, %v10167_v6  ;;  %v1470_v58 = vmul.f32 %v8539_v54, %v868_v17  ;;  %v1942_v48 = vmul.f32 %v8541_v55, %v10167_v6  ;;  %v14831_v22 = vld [vmem:[#allocation63_spill] sm:$0xff] }
 0x1fb   :  { %v1213_v18 = vsel %vm1145_vm2, %v14829_v9, %v1212_v23  ;;  %v6090_v46 = vsel %vm6068_vm11, %v5255_v7, %v6089_v52  ;;  %v2312_v38 = vrot.slane %v2096_v5, 1  ;;  %v1214_v43 = vrot.slane %v1000_v27, 1 }
 0x1fc   :  { %v1389_v19 = vadd.f32 %v1213_v18, %v14830_v50  ;;  %v6178_v15 = vrot.slane %v6090_v46, 7  ;;  %v3050_v35 = vmul.f32 %v8558_v61, %v10167_v6  ;;  %v3399_v11 = vrot.slane %v3191_v42, 1  ;;  %v14833_v50 = vld [vmem:[#allocation67_spill] sm:$0xff] }
 0x1fd   :  { %v1684_v20 = vrot.slane %v1470_v58, 2  ;;  %v1215_v9 = vsel %vm1145_vm2, %v1212_v23, %v1214_v43  ;;  %v14832_v24 = vrot.slane %v14831_v22, 2  ;;  %v2005_v52 = vadd.f32 %v14833_v50, %v10669_v32  ;;  %v14835_v22 = vld [vmem:[#allocation64_spill] sm:$0xff] }
 0x1fe   :  { %v2097_v7 = vmul.f32 %v8543_v56, %v868_v17  ;;  %v10811_v5 = vsel %vm161_vm0, 0.0, %v6178_v15  ;;  %v2796_v27 = vrot.slane %v10792_v8, 2  ;;  %v3870_v46 = vrot.slane %v3662_v26, 2 }
 0x1ff   :  { %v1683_v18 = vsel %vm1615_vm1, %v14832_v24, %v1682_v0  ;;  %14834 = vst [vmem:[#allocation54_spill] sm:$0xff] %v10811_v5  ;;  %v7969_v23 = vpack.i.bf16 %v10811_v5, %v10445_v29  ;;  %v2006_v42 = vadd.f32 %v1942_v48, %v1858_v21  ;;  %v14836_v58 = vrot.slane %v14835_v22, 1  ;;  %v14838_v48 = vld [vmem:[#allocation69_spill] sm:$0xff] }
 0x200   :  { %v10814_v6 = vadd.f32 %v1683_v18, %v1389_v19  ;;  %v2314_v43 = vrot.slane %v2097_v7, 1  ;;  %v1390_v32 = vadd.f32 %v1215_v9, %v703_v51  ;;  %v1685_v50 = vsel %vm1615_vm1, %v1682_v0, %v1684_v20  ;;  %v14840_v20 = vld [vmem:[#allocation70_spill] sm:$0xff] }
 0x201   :  { %v2313_v24 = vsel %vm1145_vm2, %v14836_v58, %v2312_v38  ;;  %v2581_v39 = vmul.f32 %v8556_v60, %v868_v17  ;;  %v3111_v8 = vadd.f32 %v14837_v10, %v10680_v16  ;;  %7970 = vrot.lane.b32.xlu1 %v7969_v23, %s8216_s24  ;;  %v3112_v19 = vadd.f32 %v3050_v35, %v10731_v41  ;;  %v14842_v23 = vld [vmem:[#allocation65_spill] sm:$0xff] }
 0x202   :  { %v2499_v26 = vadd.f32 %v2313_v24, %v2005_v52  ;;  %v3192_v21 = vmul.f32 %v8560_v62, %v868_v17  ;;  %v14839_v18 = vrot.slane %v14838_v48, 1  ;;  %v2315_v51 = vsel %vm1145_vm2, %v2312_v38, %v2314_v43 }
 0x203   :  { %v3663_v0 = vmul.f32 %v10223_v31, %v868_v17  ;;  %v14841_v7 = vrot.slane %v14840_v20, 2  ;;  %v6226_v52 = vsel %vm161_vm0, %v6178_v15, 0.0  ;;  %v6279_v41 = vrot.slane %v10811_v5, 1 }
 0x204   :  { %v3400_v22 = vsel %vm1145_vm2, %v14839_v18, %v3399_v11  ;;  %v3401_v10 = vrot.slane %v3192_v21, 1  ;;  %v6324_v35 = vrot.slane %v10811_v5, 2  ;;  %v14843_v58 = vrot.slane %v14842_v23, 2 }
 0x205   :  { %v3582_v9 = vadd.f32 %v3400_v22, %v3111_v8  ;;  %v3871_v16 = vsel %vm1615_vm1, %v14841_v7, %v3870_v46  ;;  %v3872_v48 = vrot.slane %v3663_v0, 2  ;;  %v6280_v43 = vrot.slane %v6226_v52, 1  ;;  %v612_v8 = vpop.permute.xlu1 %611 }
 0x206   :  { %v2797_v24 = vsel %vm1615_vm1, %v14843_v58, %v2796_v27  ;;  %v10842_v17 = vadd.f32 %v1685_v50, %v1390_v32  ;;  %v2798_v18 = vrot.slane %v2581_v39, 2  ;;  %v3402_v22 = vsel %vm1145_vm2, %v3399_v11, %v3401_v10 }
 0x207   :  { %v4053_v38 = vadd.f32 %v3871_v16, %v3582_v9  ;;  %v6325_v21 = vrot.slane %v6226_v52, 2  ;;  %v2500_v20 = vadd.f32 %v2315_v51, %v2006_v42  ;;  %v3583_v15 = vadd.f32 %v3402_v22, %v3112_v19 }
 0x208   :  { %v10847_v29 = vsel %vm1145_vm2, %v6279_v41, %v6280_v43  ;;  %v3873_v23 = vsel %vm1615_vm1, %v3870_v46, %v3872_v48  ;;  %v10856_v39 = vmul.f32 %v8537_v53, %v612_v8  ;;  %v10861_v50 = vmul.f32 %v8539_v54, %v612_v8  ;;  %v14860_v48 = vld [vmem:[#allocation34_spill] sm:$0xff] }
 0x209   :  { %v4124_v7 = vadd.f32 %v10692_v47, %v4053_v38  ;;  %v7974_v9 = vpack.i.bf16 %v10847_v29, %v10589_v45  ;;  %v10853_v0 = vsel %vm1615_vm1, %v6324_v35, %v6325_v21  ;;  %v4054_v11 = vadd.f32 %v3873_v23, %v3583_v15 }
 0x20a   :  { %14844 = vst [vmem:[#allocation62_spill] sm:$0xff] %v10853_v0  ;;  %14845 = vst [vmem:[#allocation59_spill] sm:$0xff] %v10856_v39  ;;  %v7979_v42 = vpack.i.bf16 %v10853_v0, %v10462_v59  ;;  %v2799_v19 = vsel %vm1615_vm1, %v2796_v27, %v2798_v18  ;;  %v10864_v46 = vadd.f32 %v2797_v24, %v2499_v26  ;;  %v1251_v23 = vrot.slane %v10185_v14, 1  ;;  %v908_v18 = vpop.permute.xlu1 %907 }
 0x20b   :  { %v4188_v32 = vmax.f32 %v4124_v7, 0.0  ;;  %14846 = vst [vmem:[#allocation52_spill] sm:$0xff] %v10861_v50  ;;  %7975 = vrot.lane.b32.xlu0 %v7974_v9, %s8218_s26  ;;  %v10868_v45 = vmul.f32 %v8543_v56, %v612_v8  ;;  %v10871_v51 = vmul.f32 %v8556_v60, %v612_v8  ;;  %v10873_v16 = vadd.f32 %v2799_v19, %v2500_v20 }
 0x20c   :  { %v4125_v10 = vadd.f32 %v10692_v47, %v4054_v11  ;;  %7980 = vrot.lane.b32.xlu1 %v7979_v42, %s8217_s25  ;;  %v10879_v27 = vmul.f32 %v8560_v62, %v612_v8  ;;  %v10885_v41 = vmul.f32 %v8522_v49, %v612_v8  ;;  %v10889_v58 = vmul.f32 %v10223_v31, %v612_v8 }
 0x20d   :  { %14847 = vst [vmem:[#allocation57_spill] sm:$0xff] %v10868_v45  ;;  %14848 = vst [vmem:[#allocation60_spill] sm:$0xff] %v10871_v51  ;;  %v4262_v52 = vsel %vm4230_vm3, %v4188_v32, -inf  ;;  %v10893_v38 = vmul.f32 %v8541_v55, %v612_v8  ;;  %v10896_v43 = vmul.f32 %v8558_v61, %v612_v8  ;;  %v718_v22 = vmul.f32 %v8522_v49, %v10170_v33  ;;  %v14863_v45 = vld [vmem:[#allocation87_spill] sm:$0xff] }
 0x20e   :  { %14849 = vst [vmem:[#allocation16_spill] sm:$0xff] %v10879_v27  ;;  %v10882_v26 = vmax.f32 %v10735_v4, %v4262_v52  ;;  %14851 = vst [vmem:[#allocation14_spill] sm:$0xff] %v10885_v41  ;;  %v4189_v24 = vmax.f32 %v4125_v10, 0.0  ;;  %v1023_v31 = vmul.f32 %v8537_v53, %v10410_v28  ;;  %v10912_v8 = vmul.f32 %v8539_v54, %v10410_v28 }
 0x20f   :  { %14852 = vst [vmem:[#allocation66_spill] sm:$0xff] %v10889_v58  ;;  %14853 = vst [vmem:[#allocation63_spill] sm:$0xff] %v10893_v38  ;;  %v719_v32 = vmul.f32 %v8522_v49, %v10410_v28  ;;  %v2123_v19 = vmul.f32 %v8543_v56, %v10410_v28  ;;  %v1960_v14 = vmul.f32 %v8541_v55, %v10410_v28  ;;  %v2356_v15 = vrot.slane %v10203_v13, 1 }
 0x210   :  { %14850 = vst [vmem:[#allocation17_spill] sm:$0xff] %v10882_v26  ;;  %14854 = vst [vmem:[#allocation67_spill] sm:$0xff] %v10896_v43  ;;  %v4265_v21 = vsel %vm4230_vm3, %v4189_v24, -inf  ;;  %v10907_v20 = vrot.slane %v10882_v26, %v14513_v2  ;;  %v1252_v9 = vrot.slane %v1023_v31, 1  ;;  %v1722_v42 = vrot.slane %v10912_v8, 2 }
 0x211   :  { %v10915_v7 = vmax.f32 %v10738_v37, %v4265_v21  ;;  %v2607_v52 = vmul.f32 %v8556_v60, %v10410_v28  ;;  %v1721_v31 = vrot.slane %v10190_v30, 2  ;;  %v2023_v21 = vadd.f32 %v10194_v34, %v10559_v40 }
 0x212   :  { %14855 = vst [vmem:[#allocation64_spill] sm:$0xff] %v10907_v20  ;;  %v1253_v10 = vsel %vm1145_vm2, %v1251_v23, %v1252_v9  ;;  %v2357_v8 = vrot.slane %v2123_v19, 1  ;;  %v2024_v33 = vadd.f32 %v1960_v14, %v10567_v57  ;;  %v2840_v34 = vrot.slane %v10207_v44, 2  ;;  %v14859_v14 = vld [vmem:[#allocation53_spill] sm:$0xff] }
 0x213   :  { %14856 = vst [vmem:[#allocation68_spill] sm:$0xff] %v10915_v7  ;;  %v10928_v37 = vrot.slane %v10915_v7, %v14513_v2  ;;  %v1405_v30 = vadd.f32 %v1253_v10, %v718_v22  ;;  %v1723_v4 = vsel %vm1615_vm1, %v1721_v31, %v1722_v42  ;;  %v2841_v19 = vrot.slane %v2607_v52, 2  ;;  %v10963_v22 = vld [vmem:[%s14093_s1 + $0x8] ss:$0 sm:$0xff] }
 0x214   :  { %v3068_v11 = vmul.f32 %v8558_v61, %v10410_v28  ;;  %v3218_v57 = vmul.f32 %v8560_v62, %v10410_v28  ;;  %v2358_v13 = vsel %vm1145_vm2, %v2356_v15, %v2357_v8  ;;  %v3129_v35 = vadd.f32 %v14860_v48, %v14859_v14  ;;  %v14861_v52 = vld [vmem:[#allocation31_spill] sm:$0xff] }
 0x215   :  { %14857 = vst [vmem:[#allocation69_spill] sm:$0xff] %v10928_v37  ;;  %v10944_v23 = vsel %vm5031_vm4, %v10928_v37, -inf  ;;  %v3689_v44 = vmul.f32 %v10963_v22, %v10410_v28  ;;  %v1024_v10 = vmul.f32 %v8537_v53, %v908_v18  ;;  %v3443_v31 = vrot.slane %v14861_v52, 1 }
 0x216   :  { %14858 = vst [vmem:[#allocation70_spill] sm:$0xff] %v10944_v23  ;;  %v3444_v24 = vrot.slane %v3218_v57, 1  ;;  %v1494_v40 = vmul.f32 %v8539_v54, %v908_v18  ;;  %v2124_v15 = vmul.f32 %v8543_v56, %v908_v18  ;;  %v2608_v48 = vmul.f32 %v8556_v60, %v908_v18  ;;  %v14862_v23 = vld [vmem:[#allocation30_spill] sm:$0xff] }
 0x217   :  { %v3915_v59 = vrot.slane %v3689_v44, 2  ;;  %v1254_v7 = vrot.slane %v1024_v10, 1  ;;  %v3219_v14 = vmul.f32 %v8560_v62, %v908_v18  ;;  %v3914_v20 = vrot.slane %v14862_v23, 2 }
 0x218   :  { %v3445_v37 = vsel %vm1145_vm2, %v3443_v31, %v3444_v24  ;;  %v2359_v28 = vrot.slane %v2124_v15, 1  ;;  %v3690_v26 = vmul.f32 %v10963_v22, %v908_v18  ;;  %v2517_v58 = vadd.f32 %v2358_v13, %v2023_v21  ;;  %v14869_v15 = vld [vmem:[#allocation83_spill] sm:$0xff] }
 0x219   :  { %v3600_v52 = vadd.f32 %v3445_v37, %v3129_v35  ;;  %v1255_v57 = vsel %vm1145_vm2, %v1252_v9, %v1254_v7  ;;  %v1724_v27 = vrot.slane %v1494_v40, 2  ;;  %v3916_v43 = vsel %vm1615_vm1, %v3914_v20, %v3915_v59  ;;  %v14864_v37 = vld [vmem:[#allocation61_spill] sm:$0xff]  ;;  %v11014_v40 = vpop.permute.xlu0 %606 }
 0x21a   :  { %v2360_v44 = vsel %vm1145_vm2, %v2357_v8, %v2359_v28  ;;  %v2843_v10 = vrot.slane %v2608_v48, 2  ;;  %v3446_v51 = vrot.slane %v3219_v14, 1  ;;  %v3130_v50 = vadd.f32 %v3068_v11, %v14863_v45  ;;  %v873_v28 = vpop.permute.xlu1 %872 }
 0x21b   :  { %v4071_v38 = vadd.f32 %v3916_v43, %v3600_v52  ;;  %v1406_v31 = vadd.f32 %v1255_v57, %v719_v32  ;;  %v3917_v41 = vrot.slane %v3690_v26, 2  ;;  %v10980_v23 = vadd.f32 %v1723_v4, %v1405_v30  ;;  %v14867_v32 = vld [vmem:[#allocation81_spill] sm:$0xff] }
 0x21c   :  { %v2842_v18 = vsel %vm1615_vm1, %v2840_v34, %v2841_v19  ;;  %v2518_v21 = vadd.f32 %v2360_v44, %v2024_v33  ;;  %v3447_v35 = vsel %vm1145_vm2, %v3444_v24, %v3446_v51  ;;  %v10989_v8 = vmul.f32 %v8537_v53, %v14864_v37  ;;  %v14868_v24 = vld [vmem:[#allocation82_spill] sm:$0xff] }
 0x21d   :  { %v10984_v7 = vadd.f32 %v2842_v18, %v2517_v58  ;;  %v4142_v20 = vadd.f32 %v10692_v47, %v4071_v38  ;;  %v3601_v9 = vadd.f32 %v3447_v35, %v3130_v50  ;;  %v1725_v45 = vsel %vm1615_vm1, %v1722_v42, %v1724_v27  ;;  %v14871_v18 = vld [vmem:[#allocation85_spill] sm:$0xff] }
 0x21e   :  { %14865 = vst [vmem:[#allocation65_spill] sm:$0xff] %v10989_v8  ;;  %v2844_v26 = vsel %vm1615_vm1, %v2841_v19, %v2843_v10  ;;  %v3918_v43 = vsel %vm1615_vm1, %v3915_v59, %v3917_v41  ;;  %v10996_v4 = vmul.f32 %v8539_v54, %v14864_v37  ;;  %v10998_v58 = vadd.f32 %v1725_v45, %v1406_v31 }
 0x21f   :  { %v4206_v51 = vmax.f32 %v4142_v20, 0.0  ;;  %v4072_v33 = vadd.f32 %v3918_v43, %v3601_v9  ;;  %v2099_v50 = vmul.f32 %v8543_v56, %v14864_v37  ;;  %v11002_v38 = vadd.f32 %v2844_v26, %v2518_v21 }
 0x220   :  { %14866 = vst [vmem:[#allocation53_spill] sm:$0xff] %v10996_v4  ;;  %v705_v27 = vmul.f32 %v8522_v49, %v14864_v37  ;;  %v1944_v11 = vmul.f32 %v8541_v55, %v14864_v37  ;;  %v2583_v59 = vmul.f32 %v8556_v60, %v14864_v37  ;;  %v14263_v41 = vrot.slane %v10989_v8, 1 }
 0x221   :  { %v2007_v42 = vadd.f32 %v14867_v32, %v10814_v6  ;;  %v2316_v30 = vrot.slane %v14868_v24, 1  ;;  %v2317_v34 = vrot.slane %v2099_v50, 1  ;;  %v14262_v19 = vrot.slane %v10996_v4, 2  ;;  %v11040_v24 = vpop.permute.xlu0 %615 }
 0x222   :  { %v2008_v13 = vadd.f32 %v1944_v11, %v10842_v17  ;;  %v2800_v48 = vrot.slane %v14869_v15, 2  ;;  %v3194_v14 = vmul.f32 %v8560_v62, %v14864_v37  ;;  %v11022_v52 = vsel %vm4230_vm3, %v4206_v51, -inf  ;;  %v14870_v17 = vld [vmem:[#allocation84_spill] sm:$0xff]  ;;  %v14872_v51 = vld [vmem:[#allocation86_spill] sm:$0xff]  ;;  %14873 = vst [vmem:[#allocation34_spill] sm:$0xff] %v11040_v24 }
 0x223   :  { %v4143_v6 = vadd.f32 %v10692_v47, %v4072_v33  ;;  %v3052_v57 = vmul.f32 %v8558_v61, %v14864_v37  ;;  %v3665_v44 = vmul.f32 %v10963_v22, %v14864_v37  ;;  %v2801_v10 = vrot.slane %v2583_v59, 2 }
 0x224   :  { %v3113_v31 = vadd.f32 %v14870_v17, %v10864_v46  ;;  %v3403_v21 = vrot.slane %v14871_v18, 1  ;;  %v3404_v35 = vrot.slane %v3194_v14, 1  ;;  %v2318_v20 = vsel %vm1145_vm2, %v2316_v30, %v2317_v34 }
 0x225   :  { %v3875_v9 = vrot.slane %v3665_v44, 2  ;;  %v1003_v45 = vmul.f32 %v8537_v53, %v873_v28  ;;  %v1473_v26 = vmul.f32 %v8539_v54, %v873_v28  ;;  %v3874_v33 = vrot.slane %v14872_v51, 2 }
 0x226   :  { %v3405_v43 = vsel %vm1145_vm2, %v3403_v21, %v3404_v35  ;;  %v2100_v37 = vmul.f32 %v8543_v56, %v873_v28  ;;  %v2584_v50 = vmul.f32 %v8556_v60, %v873_v28  ;;  %v4207_v11 = vmax.f32 %v4143_v6, 0.0 }
 0x227   :  { %v3114_v46 = vadd.f32 %v3052_v57, %v10873_v16  ;;  %v3584_v59 = vadd.f32 %v3405_v43, %v3113_v31  ;;  %v1219_v32 = vrot.slane %v1003_v45, 1  ;;  %v3876_v30 = vsel %vm1615_vm1, %v3874_v33, %v3875_v9 }
 0x228   :  { %v2319_v15 = vrot.slane %v2100_v37, 1  ;;  %v3195_v14 = vmul.f32 %v8560_v62, %v873_v28  ;;  %v3666_v44 = vmul.f32 %v10963_v22, %v873_v28  ;;  %v2501_v17 = vadd.f32 %v2318_v20, %v2007_v42  ;;  %v14874_v37 = vld [vmem:[#allocation40_spill] sm:$0xff] }
 0x229   :  { %v4055_v18 = vadd.f32 %v3876_v30, %v3584_v59  ;;  %v1220_v21 = vsel %vm1145_vm2, %v14263_v41, %v1219_v32  ;;  %v1689_v6 = vrot.slane %v1473_v26, 2  ;;  %v2802_v16 = vsel %vm1615_vm1, %v2800_v48, %v2801_v10  ;;  %v913_v30 = vpop.permute.xlu0 %912 }
 0x22a   :  { %v2320_v57 = vsel %vm1145_vm2, %v2317_v34, %v2319_v15  ;;  %v2803_v31 = vrot.slane %v2584_v50, 2  ;;  %v3406_v45 = vrot.slane %v3195_v14, 1  ;;  %v11051_v43 = vsel %vm4230_vm3, %v4207_v11, -inf }
 0x22b   :  { %v4126_v51 = vadd.f32 %v10692_v47, %v4055_v18  ;;  %v1392_v33 = vadd.f32 %v1220_v21, %v705_v27  ;;  %v3877_v28 = vrot.slane %v3666_v44, 2  ;;  %v2502_v42 = vadd.f32 %v2320_v57, %v2008_v13 }
 0x22c   :  { %v3407_v20 = vsel %vm1145_vm2, %v3404_v35, %v3406_v45  ;;  %v1026_v59 = vmul.f32 %v8537_v53, %v14874_v37  ;;  %v1496_v48 = vmul.f32 %v8539_v54, %v14874_v37  ;;  %v11059_v26 = vadd.f32 %v2802_v16, %v2501_v17 }
 0x22d   :  { %v4190_v34 = vmax.f32 %v4126_v51, 0.0  ;;  %v1690_v50 = vsel %vm1615_vm1, %v14262_v19, %v1689_v6  ;;  %v3585_v11 = vadd.f32 %v3407_v20, %v3114_v46  ;;  %v2804_v27 = vsel %vm1615_vm1, %v2801_v10, %v2803_v31  ;;  %v14876_v51 = vld [vmem:[#allocation44_spill] sm:$0xff] }
 0x22e   :  { %v3878_v13 = vsel %vm1615_vm1, %v3875_v9, %v3877_v28  ;;  %v721_v35 = vmul.f32 %v8522_v49, %v14874_v37  ;;  %v2126_v32 = vmul.f32 %v8543_v56, %v14874_v37  ;;  %v11070_v15 = vadd.f32 %v1690_v50, %v1392_v33 }
 0x22f   :  { %v4056_v14 = vadd.f32 %v3878_v13, %v3585_v11  ;;  %v1962_v44 = vmul.f32 %v8541_v55, %v14874_v37  ;;  %v2610_v46 = vmul.f32 %v8556_v60, %v14874_v37  ;;  %v11076_v17 = vadd.f32 %v2804_v27, %v2502_v42 }
 0x230   :  { %14875 = vst [vmem:[#allocation31_spill] sm:$0xff] %v11070_v15  ;;  %v1257_v10 = vrot.slane %v1026_v59, 1  ;;  %v1727_v9 = vrot.slane %v1496_v48, 2  ;;  %v3221_v18 = vmul.f32 %v8560_v62, %v14874_v37  ;;  %v11081_v21 = vsel %vm4230_vm3, %v4190_v34, -inf  ;;  %v14877_v59 = vld [vmem:[#allocation5_spill] sm:$0xff] }
 0x231   :  { %v4127_v6 = vadd.f32 %v10692_v47, %v4056_v14  ;;  %v3070_v16 = vmul.f32 %v8558_v61, %v14874_v37  ;;  %v1027_v57 = vmul.f32 %v8537_v53, %v913_v30  ;;  %v2362_v31 = vrot.slane %v2126_v32, 1  ;;  %v14878_v14 = vld [vmem:[#allocation6_spill] sm:$0xff] }
 0x232   :  { %v3692_v45 = vmul.f32 %v10963_v22, %v14874_v37  ;;  %v1256_v33 = vrot.slane %v14876_v51, 1  ;;  %v1497_v28 = vmul.f32 %v8539_v54, %v913_v30  ;;  %v2846_v20 = vrot.slane %v2610_v46, 2  ;;  %v14879_v51 = vld [vmem:[#allocation18_spill] sm:$0xff] }
 0x233   :  { %v4191_v42 = vmax.f32 %v4127_v6, 0.0  ;;  %v720_v48 = vmul.f32 %v8522_v49, %v14877_v59  ;;  %v1259_v34 = vrot.slane %v1027_v57, 1  ;;  %v3449_v50 = vrot.slane %v3221_v18, 1  ;;  %v14880_v59 = vld [vmem:[#allocation72_spill] sm:$0xff] }
 0x234   :  { %v1258_v11 = vsel %vm1145_vm2, %v1256_v33, %v1257_v10  ;;  %v1729_v27 = vrot.slane %v1497_v28, 2  ;;  %v2127_v13 = vmul.f32 %v8543_v56, %v913_v30  ;;  %v1726_v37 = vrot.slane %v14878_v14, 2 }
 0x235   :  { %v1260_v32 = vsel %vm1145_vm2, %v1257_v10, %v1259_v34  ;;  %v2025_v19 = vadd.f32 %v14879_v51, %v10980_v23  ;;  %v2611_v6 = vmul.f32 %v8556_v60, %v913_v30  ;;  %v3920_v46 = vrot.slane %v3692_v45, 2  ;;  %v14881_v51 = vld [vmem:[#allocation73_spill] sm:$0xff] }
 0x236   :  { %v2026_v41 = vadd.f32 %v1962_v44, %v10998_v58  ;;  %v2361_v57 = vrot.slane %v14880_v59, 1  ;;  %v2364_v18 = vrot.slane %v2127_v13, 1  ;;  %v11103_v33 = vsel %vm4230_vm3, %v4191_v42, -inf  ;;  %v14882_v44 = vld [vmem:[#allocation74_spill] sm:$0xff]  ;;  %v540_v59 = vpop.permute.xlu1 %539 }
 0x237   :  { %v1407_v28 = vadd.f32 %v1258_v11, %v720_v48  ;;  %v1408_v15 = vadd.f32 %v1260_v32, %v721_v35  ;;  %v1728_v10 = vsel %vm1615_vm1, %v1726_v37, %v1727_v9  ;;  %v1730_v34 = vsel %vm1615_vm1, %v1727_v9, %v1729_v27  ;;  %v14883_v11 = vld [vmem:[#allocation75_spill] sm:$0xff] }
 0x238   :  { %v2363_v14 = vsel %vm1145_vm2, %v2361_v57, %v2362_v31  ;;  %v2365_v23 = vsel %vm1145_vm2, %v2362_v31, %v2364_v18  ;;  %v2845_v45 = vrot.slane %v14881_v51, 2  ;;  %v2848_v58 = vrot.slane %v2611_v6, 2 }
 0x239   :  { %v2519_v39 = vadd.f32 %v2363_v14, %v2025_v19  ;;  %v3131_v13 = vadd.f32 %v14882_v44, %v10984_v7  ;;  %v3222_v42 = vmul.f32 %v8560_v62, %v913_v30  ;;  %v2520_v48 = vadd.f32 %v2365_v23, %v2026_v41  ;;  %v14884_v7 = vld [vmem:[#allocation41_spill] sm:$0xff] }
 0x23a   :  { %v3132_v35 = vadd.f32 %v3070_v16, %v11002_v38  ;;  %v3448_v32 = vrot.slane %v14883_v11, 1  ;;  %v3693_v9 = vmul.f32 %v10963_v22, %v913_v30  ;;  %v11116_v27 = vadd.f32 %v1728_v10, %v1407_v28 }
 0x23b   :  { %v11118_v31 = vadd.f32 %v1730_v34, %v1408_v15  ;;  %v2847_v19 = vsel %vm1615_vm1, %v2845_v45, %v2846_v20  ;;  %v3451_v37 = vrot.slane %v3222_v42, 1  ;;  %v3919_v57 = vrot.slane %v14884_v7, 2 }
 0x23c   :  { %v3450_v6 = vsel %vm1145_vm2, %v3448_v32, %v3449_v50  ;;  %v3922_v18 = vrot.slane %v3693_v9, 2  ;;  %v11124_v41 = vmul.f32 %v8537_v53, %v540_v59  ;;  %v2849_v38 = vsel %vm1615_vm1, %v2846_v20, %v2848_v58 }
 0x23d   :  { %v11127_v16 = vadd.f32 %v2847_v19, %v2519_v39  ;;  %v3452_v30 = vsel %vm1145_vm2, %v3449_v50, %v3451_v37  ;;  %v3602_v28 = vadd.f32 %v3450_v6, %v3131_v13  ;;  %v11130_v15 = vadd.f32 %v2849_v38, %v2520_v48  ;;  %v878_v39 = vpop.permute.xlu0 %877  ;;  %v14885_v37 = vld [vmem:[#allocation12_spill] sm:$0xff] }
 0x23e   :  { %v3603_v10 = vadd.f32 %v3452_v30, %v3132_v35  ;;  %v3921_v34 = vsel %vm1615_vm1, %v3919_v57, %v3920_v46  ;;  %v11134_v14 = vmul.f32 %v8539_v54, %v540_v59  ;;  %v3923_v23 = vsel %vm1615_vm1, %v3920_v46, %v3922_v18 }
 0x23f   :  { %v4073_v51 = vadd.f32 %v3921_v34, %v3602_v28  ;;  %v1949_v45 = vmul.f32 %v8541_v55, %v540_v59  ;;  %v11139_v20 = vmul.f32 %v8543_v56, %v540_v59  ;;  %v11142_v50 = vmul.f32 %v8522_v49, %v540_v59 }
 0x240   :  { %v4074_v58 = vadd.f32 %v3923_v23, %v3603_v10  ;;  %v11146_v13 = vmul.f32 %v8556_v60, %v540_v59  ;;  %v11151_v46 = vmul.f32 %v8537_v53, %v10725_v36  ;;  %v11155_v48 = vmul.f32 %v8543_v56, %v10725_v36 }
 0x241   :  { %v4144_v42 = vadd.f32 %v10692_v47, %v4073_v51  ;;  %v3197_v35 = vmul.f32 %v8560_v62, %v10725_v36  ;;  %v3668_v59 = vmul.f32 %v10963_v22, %v10725_v36  ;;  %v1006_v9 = vmul.f32 %v8537_v53, %v878_v39 }
 0x242   :  { %v4145_v11 = vadd.f32 %v10692_v47, %v4074_v58  ;;  %v11165_v6 = vadd.f32 %v1949_v45, %v14885_v37  ;;  %v11169_v57 = vmul.f32 %v8539_v54, %v878_v39  ;;  %v3054_v30 = vmul.f32 %v8558_v61, %v10725_v36 }
 0x243   :  { %v4208_v19 = vmax.f32 %v4144_v42, 0.0  ;;  %v2103_v28 = vmul.f32 %v8543_v56, %v878_v39  ;;  %v3409_v51 = vrot.slane %v3197_v35, 1  ;;  %v3880_v42 = vrot.slane %v3668_v59, 2  ;;  %v14888_v35 = vld [vmem:[#allocation29_spill] sm:$0xff] }
 0x244   :  { %14886 = vst [vmem:[#allocation30_spill] sm:$0xff] %v11169_v57  ;;  %v4209_v18 = vmax.f32 %v4145_v11, 0.0  ;;  %v1224_v11 = vrot.slane %v1006_v9, 1  ;;  %v11183_v32 = vmul.f32 %v8556_v60, %v878_v39  ;;  %v3115_v23 = vadd.f32 %v14888_v35, %v11059_v26  ;;  %v14889_v9 = vld [vmem:[#allocation50_spill] sm:$0xff] }
 0x245   :  { %v4292_v10 = vsel %vm4230_vm3, %v4208_v19, -inf  ;;  %v3198_v19 = vmul.f32 %v8560_v62, %v878_v39  ;;  %v2324_v44 = vrot.slane %v2103_v28, 1  ;;  %v3669_v57 = vmul.f32 %v10963_v22, %v878_v39 }
 0x246   :  { %v4293_v45 = vmax.f32 %v11022_v52, %v4292_v10  ;;  %v4295_v58 = vsel %vm4230_vm3, %v4209_v18, -inf  ;;  %14887 = vst [vmem:[#allocation87_spill] sm:$0xff] %v11183_v32  ;;  %v3116_v52 = vadd.f32 %v3054_v30, %v11076_v17 }
 0x247   :  { %v4296_v37 = vmax.f32 %v11051_v43, %v4295_v58  ;;  %v3408_v43 = vrot.slane %v14889_v9, 1  ;;  %v3411_v10 = vrot.slane %v3198_v19, 1 }
 0x248   :  { %v4706_v7 = vrot.slane %v4293_v45, %v14513_v2  ;;  %v4699_v18 = vcombine.high %v4293_v45, %v4293_v45  ;;  %v14890_v45 = vld [vmem:[#allocation33_spill] sm:$0xff] }
 0x249   :  { %v4723_v59 = vrot.slane %v4296_v37, %v14513_v2  ;;  %v4716_v38 = vcombine.high %v4296_v37, %v4296_v37  ;;  %v3410_v26 = vsel %vm1145_vm2, %v3408_v43, %v3409_v51  ;;  %v3412_v17 = vsel %vm1145_vm2, %v3409_v51, %v3411_v10 }
 0x24a   :  { %v4714_v58 = vcombine.high %v4706_v7, %v4706_v7  ;;  %v5592_v34 = vsel %vm5031_vm4, %v4706_v7, -inf  ;;  %v3586_v30 = vadd.f32 %v3410_v26, %v3115_v23  ;;  %v3879_v8 = vrot.slane %v14890_v45, 2  ;;  %v14897_v26 = vld [vmem:[#allocation36_spill] sm:$0xff] }
 0x24b   :  { %v4731_v24 = vcombine.high %v4723_v59, %v4723_v59  ;;  %v5593_v4 = vrot.slane %v5592_v34, 4  ;;  %v5620_v28 = vsel %vm5031_vm4, %v4723_v59, -inf  ;;  %v14891_v37 = vrot.slane %v11151_v46, 1 }
 0x24c   :  { %v5621_v35 = vrot.slane %v5620_v28, 4  ;;  %v5599_v19 = vsel %vm5031_vm4, %v4714_v58, -inf  ;;  %v3587_v9 = vadd.f32 %v3412_v17, %v3116_v52  ;;  %v14894_v59 = vrot.slane %v11155_v48, 1 }
 0x24d   :  { %v11202_v7 = vsel %vm1145_vm2, %v14891_v37, %v1224_v11  ;;  %v11205_v36 = vmax.f32 %v5592_v34, %v5593_v4  ;;  %v3881_v23 = vsel %vm1615_vm1, %v3879_v8, %v3880_v42  ;;  %v3882_v51 = vrot.slane %v3669_v57, 2  ;;  %v14900_v37 = vld [vmem:[#allocation19_spill] sm:$0xff] }
 0x24e   :  { %14892 = vst [vmem:[#allocation61_spill] sm:$0xff] %v11202_v7  ;;  %v11210_v43 = vsel %vm1145_vm2, %v14894_v59, %v2324_v44  ;;  %v11214_v10 = vrot.slane %v4699_v18, %v14513_v2  ;;  %v5627_v58 = vsel %vm5031_vm4, %v4731_v24, -inf  ;;  %v4057_v11 = vadd.f32 %v3881_v23, %v3586_v30 }
 0x24f   :  { %14893 = vst [vmem:[#allocation81_spill] sm:$0xff] %v11205_v36  ;;  %14895 = vst [vmem:[#allocation82_spill] sm:$0xff] %v11210_v43  ;;  %v14898_v52 = vcombine.high %v14897_v26, %v14897_v26  ;;  %v11222_v34 = vrot.slane %v4716_v38, %v14513_v2  ;;  %v5600_v17 = vrot.slane %v5599_v19, 4  ;;  %v5622_v44 = vmax.f32 %v5620_v28, %v5621_v35 }
 0x250   :  { %14896 = vst [vmem:[#allocation83_spill] sm:$0xff] %v11214_v10  ;;  %v3883_v45 = vsel %vm1615_vm1, %v3880_v42, %v3882_v51  ;;  %v4128_v57 = vadd.f32 %v10692_v47, %v4057_v11  ;;  %v5256_v24 = vsel %vm5031_vm4, %v14900_v37, -inf  ;;  %v5628_v59 = vrot.slane %v5627_v58, 4 }
 0x251   :  { %v4509_v4 = vrot.slane %v14898_v52, %v14513_v2  ;;  %14899 = vst [vmem:[#allocation84_spill] sm:$0xff] %v11222_v34  ;;  %v4058_v8 = vadd.f32 %v3883_v45, %v3587_v9  ;;  %v5257_v23 = vrot.slane %v5256_v24, 4  ;;  %v14901_v26 = vcombine.high %v14900_v37, %v14900_v37  ;;  %v14902_v45 = vld [vmem:[#allocation7_spill] sm:$0xff] }
 0x252   :  { %v4192_v35 = vmax.f32 %v4128_v57, 0.0  ;;  %v14903_v39 = vrot.slane %v14902_v45, 4 }
 0x253   :  { %v4511_v18 = vcombine.high %v4509_v4, %v4509_v4  ;;  %v5263_v38 = vsel %vm5031_vm4, %v14901_v26, -inf  ;;  %v4129_v28 = vadd.f32 %v10692_v47, %v4058_v8  ;;  %v5270_v9 = vsel %vm5031_vm4, %v4509_v4, -inf }
 0x254   :  { %v5264_v42 = vrot.slane %v5263_v38, 4  ;;  %v5258_v51 = vmax.f32 %v5256_v24, %v5257_v23  ;;  %v5271_v11 = vrot.slane %v5270_v9, 4  ;;  %v5286_v30 = vmax.f32 %v14902_v45, %v14903_v39  ;;  %v14904_v24 = vld [vmem:[#allocation10_spill] sm:$0xff] }
 0x255   :  { %v5277_v52 = vsel %vm5031_vm4, %v4511_v18, -inf  ;;  %v4193_v34 = vmax.f32 %v4129_v28, 0.0  ;;  %v4268_v36 = vsel %vm4230_vm3, %v4192_v35, -inf  ;;  %v5623_v26 = vrot.slane %v5622_v44, 2 }
 0x256   :  { %v5265_v37 = vmax.f32 %v5263_v38, %v5264_v42  ;;  %v5278_v10 = vrot.slane %v5277_v52, 4  ;;  %v4269_v47 = vmax.f32 %v11081_v21, %v4268_v36  ;;  %v5259_v8 = vrot.slane %v5258_v51, 2 }
 0x257   :  { %v5272_v57 = vmax.f32 %v5270_v9, %v5271_v11  ;;  %v4271_v4 = vsel %vm4230_vm3, %v4193_v34, -inf  ;;  %v14905_v18 = vcombine.high %v14904_v24, %v14904_v24  ;;  %v5287_v35 = vrot.slane %v5286_v30, 2 }
 0x258   :  { %v5266_v32 = vrot.slane %v5265_v37, 2  ;;  %v5279_v43 = vmax.f32 %v5277_v52, %v5278_v10  ;;  %v4272_v39 = vmax.f32 %v11103_v33, %v4271_v4  ;;  %v4570_v28 = vrot.slane %v4269_v47, %v14513_v2 }
 0x259   :  { %v4526_v23 = vrot.slane %v14905_v18, %v14513_v2  ;;  %v5260_v38 = vmax.f32 %v5258_v51, %v5259_v8  ;;  %v11248_v42 = vmax.f32 %v5599_v19, %v5600_v17  ;;  %v4563_v36 = vcombine.high %v4269_v47, %v4269_v47  ;;  %v14909_v8 = vld [vmem:[#allocation32_spill] sm:$0xff] }
 0x25a   :  { %v5267_v21 = vmax.f32 %v5265_v37, %v5266_v32  ;;  %v5273_v9 = vrot.slane %v5272_v57, 2  ;;  %v11250_v11 = vmax.f32 %v5627_v58, %v5628_v59  ;;  %v4580_v34 = vcombine.high %v4272_v39, %v4272_v39 }
 0x25b   :  { %14906 = vst [vmem:[#allocation85_spill] sm:$0xff] %v11248_v42  ;;  %v4587_v45 = vrot.slane %v4272_v39, %v14513_v2  ;;  %v5280_v24 = vrot.slane %v5279_v43, 2  ;;  %v4578_v18 = vcombine.high %v4570_v28, %v4570_v28  ;;  %v5261_v7 = vrot.slane %v5260_v38, 1 }
 0x25c   :  { %14907 = vst [vmem:[#allocation86_spill] sm:$0xff] %v11250_v11  ;;  %v5268_v10 = vrot.slane %v5267_v21, 1  ;;  %v5274_v52 = vmax.f32 %v5272_v57, %v5273_v9  ;;  %v11253_v33 = vmax.f32 %v5622_v44, %v5623_v26  ;;  %v4528_v4 = vcombine.high %v4526_v23, %v4526_v23 }
 0x25d   :  { %v5288_v51 = vmax.f32 %v5286_v30, %v5287_v35  ;;  %v14910_v19 = vcombine.high %v14909_v8, %v14909_v8  ;;  %v11260_v58 = vrot.slane %v4563_v36, %v14513_v2  ;;  %v11263_v17 = vrot.slane %v4580_v34, %v14513_v2 }
 0x25e   :  { %14908 = vst [vmem:[#allocation40_spill] sm:$0xff] %v11253_v33  ;;  %v5368_v59 = vsel %vm5031_vm4, %v4570_v28, -inf  ;;  %v5396_v37 = vsel %vm5031_vm4, %v4587_v45, -inf  ;;  %v4595_v47 = vcombine.high %v4587_v45, %v4587_v45  ;;  %v5269_v26 = vmax.f32 %v5267_v21, %v5268_v10  ;;  %v621_v45 = vpop.permute.xlu1 %620 }
 0x25f   :  { %v5291_v32 = vsel %vm5031_vm4, %v14910_v19, -inf  ;;  %14911 = vst [vmem:[#allocation44_spill] sm:$0xff] %v11260_v58  ;;  %14912 = vst [vmem:[#allocation5_spill] sm:$0xff] %v11263_v17  ;;  %v5397_v44 = vrot.slane %v5396_v37, 4  ;;  %v5275_v57 = vrot.slane %v5274_v52, 1  ;;  %v11268_v30 = vsel %vm5031_vm4, %v4578_v18, -inf }
 0x260   :  { %14913 = vst [vmem:[#allocation6_spill] sm:$0xff] %v11268_v30  ;;  %v5262_v39 = vmax.f32 %v5260_v38, %v5261_v7  ;;  %v5281_v35 = vmax.f32 %v5279_v43, %v5280_v24  ;;  %v5292_v9 = vrot.slane %v5291_v32, 4  ;;  %v5289_v36 = vrot.slane %v5288_v51, 1 }
 0x261   :  { %v5276_v8 = vmax.f32 %v5274_v52, %v5275_v57  ;;  %v5298_v19 = vsel %vm5031_vm4, %v4526_v23, -inf  ;;  %v5305_v34 = vsel %vm5031_vm4, %v4528_v4, -inf  ;;  %v5369_v33 = vrot.slane %v5368_v59, 4 }
 0x262   :  { %v5282_v28 = vrot.slane %v5281_v35, 1  ;;  %v5293_v11 = vmax.f32 %v5291_v32, %v5292_v9  ;;  %v5299_v42 = vrot.slane %v5298_v19, 4  ;;  %v11273_v10 = vmax.f32 %v5396_v37, %v5397_v44 }
 0x263   :  { %v5306_v18 = vrot.slane %v5305_v34, 4  ;;  %v6091_v7 = vsel %vm6056_vm5, %v5269_v26, %v5262_v39  ;;  %v11277_v43 = vsel %vm5031_vm4, %v4595_v47, -inf  ;;  %v5290_v52 = vmax.f32 %v5288_v51, %v5289_v36 }
 0x264   :  { %14914 = vst [vmem:[#allocation18_spill] sm:$0xff] %v11273_v10  ;;  %14915 = vst [vmem:[#allocation72_spill] sm:$0xff] %v11277_v43  ;;  %v5283_v38 = vmax.f32 %v5281_v35, %v5282_v28  ;;  %v5294_v24 = vrot.slane %v5293_v11, 2  ;;  %v5300_v23 = vmax.f32 %v5298_v19, %v5299_v42  ;;  %v6092_v57 = vsel %vm6058_vm6, %v5276_v8, %v6091_v7 }
 0x265   :  { %v5307_v4 = vmax.f32 %v5305_v34, %v5306_v18  ;;  %v11281_v32 = vmul.f32 %v8537_v53, %v621_v45  ;;  %v11283_v9 = vmax.f32 %v5368_v59, %v5369_v33  ;;  %v11286_v21 = vmul.f32 %v8539_v54, %v621_v45 }
 0x266   :  { %v5295_v37 = vmax.f32 %v5293_v11, %v5294_v24  ;;  %v5301_v44 = vrot.slane %v5300_v23, 2  ;;  %v11291_v42 = vmul.f32 %v8543_v56, %v621_v45  ;;  %v6093_v8 = vsel %vm6060_vm7, %v5283_v38, %v6092_v57  ;;  %v544_v11 = vpop.permute.xlu0 %543 }
 0x267   :  { %14916 = vst [vmem:[#allocation73_spill] sm:$0xff] %v11281_v32  ;;  %14917 = vst [vmem:[#allocation74_spill] sm:$0xff] %v11283_v9  ;;  %v5308_v39 = vrot.slane %v5307_v4, 2  ;;  %v11295_v33 = vmul.f32 %v8522_v49, %v621_v45  ;;  %v6094_v36 = vsel %vm14440_vm8, %v5290_v52, %v6093_v8  ;;  %v11300_v34 = vmul.f32 %v8541_v55, %v621_v45 }
 0x268   :  { %14918 = vst [vmem:[#allocation75_spill] sm:$0xff] %v11286_v21  ;;  %14919 = vst [vmem:[#allocation41_spill] sm:$0xff] %v11291_v42  ;;  %v5296_v51 = vrot.slane %v5295_v37, 1  ;;  %v5302_v35 = vmax.f32 %v5300_v23, %v5301_v44  ;;  %v11304_v24 = vmul.f32 %v8556_v60, %v621_v45  ;;  %v11308_v57 = vmul.f32 %v8560_v62, %v621_v45  ;;  %v630_v23 = vpop.permute.xlu1 %629  ;;  %v14945_v21 = vld [vmem:[#allocation15_spill] sm:$0xff] }
 0x269   :  { %14920 = vst [vmem:[#allocation12_spill] sm:$0xff] %v11295_v33  ;;  %v5309_v59 = vmax.f32 %v5307_v4, %v5308_v39  ;;  %v11311_v52 = vmul.f32 %v8537_v53, %v544_v11  ;;  %v11318_v39 = vmul.f32 %v8539_v54, %v544_v11  ;;  %v11322_v26 = vmul.f32 %v8543_v56, %v544_v11 }
 0x26a   :  { %v5297_v28 = vmax.f32 %v5295_v37, %v5296_v51  ;;  %v5303_v18 = vrot.slane %v5302_v35, 1  ;;  %14921 = vst [vmem:[#allocation29_spill] sm:$0xff] %v11304_v24  ;;  %14922 = vst [vmem:[#allocation50_spill] sm:$0xff] %v11308_v57  ;;  %v11315_v37 = vmul.f32 %v10963_v22, %v621_v45  ;;  %v11325_v47 = vmul.f32 %v8556_v60, %v544_v11  ;;  %v14942_v24 = vld [vmem:[#allocation56_spill] sm:$0xff] }
 0x26b   :  { %v5310_v38 = vrot.slane %v5309_v59, 1  ;;  %v14280_v8 = vrot.slane %v11311_v52, 1  ;;  %14924 = vst [vmem:[#allocation36_spill] sm:$0xff] %v11322_v26  ;;  %v14926_v7 = vrot.slane %v11124_v41, 1  ;;  %v11346_v17 = vmul.f32 %v8537_v53, %v630_v23 }
 0x26c   :  { %v5304_v4 = vmax.f32 %v5302_v35, %v5303_v18  ;;  %v6095_v44 = vsel %vm14437_vm9, %v5297_v28, %v6094_v36  ;;  %14923 = vst [vmem:[#allocation33_spill] sm:$0xff] %v11315_v37  ;;  %14925 = vst [vmem:[#allocation19_spill] sm:$0xff] %v11325_v47  ;;  %v11330_v28 = vmul.f32 %v8558_v61, %v621_v45  ;;  %v14286_v45 = vrot.slane %v11318_v39, 2  ;;  %v918_v57 = vpop.permute.xlu1 %917 }
 0x26d   :  { %v5311_v51 = vmax.f32 %v5309_v59, %v5310_v38  ;;  %v11333_v18 = vmul.f32 %v8522_v49, %v544_v11  ;;  %v1228_v19 = vsel %vm1145_vm2, %v14926_v7, %v14280_v8  ;;  %14927 = vst [vmem:[#allocation7_spill] sm:$0xff] %v11346_v17  ;;  %v14932_v43 = vrot.slane %v11134_v14, 2  ;;  %v14963_v17 = vld [vmem:[#allocation52_spill] sm:$0xff] }
 0x26e   :  { %v6096_v35 = vsel %vm6066_vm10, %v5304_v4, %v6095_v44  ;;  %v14281_v4 = vrot.slane %v11322_v26, 1  ;;  %v1395_v38 = vadd.f32 %v1228_v19, %v11142_v50  ;;  %v11379_v19 = vmul.f32 %v8543_v56, %v630_v23 }
 0x26f   :  { %v6097_v59 = vsel %vm6068_vm11, %v5311_v51, %v6096_v35  ;;  %v11349_v51 = vmul.f32 %v8541_v55, %v544_v11  ;;  %v14928_v35 = vrot.slane %v11139_v20, 1  ;;  %v11366_v11 = vmul.f32 %v8539_v54, %v630_v23 }
 0x270   :  { %v6179_v44 = vrot.slane %v6097_v59, 7  ;;  %v11358_v59 = vmul.f32 %v8522_v49, %v630_v23  ;;  %v1698_v10 = vsel %vm1615_vm1, %v14932_v43, %v14286_v45  ;;  %14933 = vst [vmem:[#allocation90_spill] sm:$0xff] %v11379_v19  ;;  %v11392_v14 = vmul.f32 %v10963_v22, %v630_v23 }
 0x271   :  { %v2333_v41 = vsel %vm1145_vm2, %v14928_v35, %v14281_v4  ;;  %14931 = vst [vmem:[#allocation89_spill] sm:$0xff] %v11366_v11  ;;  %v14937_v50 = vrot.slane %v11325_v47, 2  ;;  %v14938_v45 = vrot.slane %v11146_v13, 2  ;;  %v2129_v13 = vmul.f32 %v8543_v56, %v11014_v40 }
 0x272   :  { %14929 = vst [vmem:[#allocation10_spill] sm:$0xff] %v11358_v59  ;;  %v11361_v36 = vsel %vm161_vm0, 0.0, %v6179_v44  ;;  %v6227_v8 = vsel %vm161_vm0, %v6179_v44, 0.0  ;;  %v2507_v35 = vadd.f32 %v2333_v41, %v11165_v6  ;;  %v11382_v44 = vmul.f32 %v8556_v60, %v630_v23  ;;  %14936 = vst [vmem:[#allocation93_spill] sm:$0xff] %v11392_v14 }
 0x273   :  { %14930 = vst [vmem:[#allocation32_spill] sm:$0xff] %v11361_v36  ;;  %v7984_v20 = vpack.i.bf16 %v11361_v36, %v10811_v5  ;;  %v6282_v4 = vrot.slane %v11361_v36, 1  ;;  %v6283_v7 = vrot.slane %v6227_v8, 1  ;;  %v11389_v41 = vmul.f32 %v8560_v62, %v630_v23 }
 0x274   :  { %14934 = vst [vmem:[#allocation91_spill] sm:$0xff] %v11382_v44  ;;  %v6327_v43 = vrot.slane %v11361_v36, 2  ;;  %v2817_v5 = vsel %vm1615_vm1, %v14938_v45, %v14937_v50  ;;  %v6328_v58 = vrot.slane %v6227_v8, 2  ;;  %v11414_v45 = vmul.f32 %v8558_v61, %v630_v23 }
 0x275   :  { %7985 = vrot.lane.b32.xlu0 %v7984_v20, %s8219_s27  ;;  %v11386_v6 = vsel %vm1145_vm2, %v6282_v4, %v6283_v7  ;;  %14935 = vst [vmem:[#allocation92_spill] sm:$0xff] %v11389_v41  ;;  %v11403_v4 = vmul.f32 %v8541_v55, %v630_v23  ;;  %v11405_v7 = vadd.f32 %v1698_v10, %v1395_v38  ;;  %v1261_v23 = vrot.slane %v10744_v63, 1 }
 0x276   :  { %v7989_v20 = vpack.i.bf16 %v11386_v6, %v10847_v29  ;;  %v11407_v30 = vadd.f32 %v2817_v5, %v2507_v35  ;;  %14940 = vst [vmem:[#allocation95_spill] sm:$0xff] %v11414_v45  ;;  %v1029_v29 = vmul.f32 %v8537_v53, %v11014_v40  ;;  %v11422_v8 = vsel %vm1615_vm1, %v6327_v43, %v6328_v58 }
 0x277   :  { %14939 = vst [vmem:[#allocation94_spill] sm:$0xff] %v11403_v4  ;;  %14941 = vst [vmem:[#allocation96_spill] sm:$0xff] %v11422_v8  ;;  %v1499_v38 = vmul.f32 %v8539_v54, %v11014_v40  ;;  %v7999_v35 = vpack.i.bf16 %v11422_v8, %v10853_v0  ;;  %v723_v10 = vmul.f32 %v8522_v49, %v11014_v40  ;;  %v2367_v37 = vrot.slane %v2129_v13, 1  ;;  %v14943_v13 = vld [vmem:[#allocation58_spill] sm:$0xff] }
 0x278   :  { %7990 = vrot.lane.b32.xlu1 %v7989_v20, %s8220_s28  ;;  %v1262_v50 = vrot.slane %v1029_v29, 1  ;;  %v1964_v58 = vmul.f32 %v8541_v55, %v11014_v40  ;;  %v2613_v43 = vmul.f32 %v8556_v60, %v11014_v40  ;;  %v1731_v29 = vrot.slane %v10748_v25, 2 }
 0x279   :  { %7995 = vrot.lane.b32.xlu0 %v7989_v20, %s8215_s21  ;;  %v722_v20 = vmul.f32 %v8522_v49, %v10729_v12  ;;  %v2027_v5 = vadd.f32 %v10753_v3, %v11116_v27  ;;  %v1732_v12 = vrot.slane %v1499_v38, 2  ;;  %v2366_v0 = vrot.slane %v10759_v1, 1  ;;  %v14944_v1 = vld [vmem:[#allocation13_spill] sm:$0xff] }
 0x27a   :  { %v1263_v63 = vsel %vm1145_vm2, %v1261_v23, %v1262_v50  ;;  %v2028_v9 = vadd.f32 %v1964_v58, %v11118_v31  ;;  %v3224_v45 = vmul.f32 %v8560_v62, %v11014_v40  ;;  %v3072_v23 = vmul.f32 %v8558_v61, %v11014_v40 }
 0x27b   :  { %v1409_v4 = vadd.f32 %v1263_v63, %v722_v20  ;;  %v3695_v25 = vmul.f32 %v10963_v22, %v11014_v40  ;;  %v2368_v3 = vsel %vm1145_vm2, %v2366_v0, %v2367_v37  ;;  %v2851_v27 = vrot.slane %v2613_v43, 2 }
 0x27c   :  { %8000 = vrot.lane.b32.xlu1 %v7999_v35, %s8214_s0  ;;  %v2850_v35 = vrot.slane %v14942_v24, 2  ;;  %v3453_v31 = vrot.slane %v14943_v13, 1  ;;  %v3454_v38 = vrot.slane %v3224_v45, 1  ;;  %v3133_v58 = vadd.f32 %v14944_v1, %v11127_v16 }
 0x27d   :  { %v3925_v42 = vrot.slane %v3695_v25, 2  ;;  %v1030_v20 = vmul.f32 %v8537_v53, %v918_v57  ;;  %v1500_v24 = vmul.f32 %v8539_v54, %v918_v57  ;;  %v3924_v33 = vrot.slane %v14945_v21, 2 }
 0x27e   :  { %v3455_v63 = vsel %vm1145_vm2, %v3453_v31, %v3454_v38  ;;  %v2130_v40 = vmul.f32 %v8543_v56, %v918_v57  ;;  %v2614_v0 = vmul.f32 %v8556_v60, %v918_v57  ;;  %v2521_v43 = vadd.f32 %v2368_v3, %v2027_v5 }
 0x27f   :  { %v3604_v32 = vadd.f32 %v3455_v63, %v3133_v58  ;;  %v1264_v13 = vrot.slane %v1030_v20, 1  ;;  %v1734_v45 = vrot.slane %v1500_v24, 2  ;;  %v3926_v14 = vsel %vm1615_vm1, %v3924_v33, %v3925_v42  ;;  %v14946_v63 = vld [vmem:[#allocation77_spill] sm:$0xff] }
 0x280   :  { %v2369_v16 = vrot.slane %v2130_v40, 1  ;;  %v3225_v25 = vmul.f32 %v8560_v62, %v918_v57  ;;  %v3696_v1 = vmul.f32 %v10963_v22, %v918_v57  ;;  %v1733_v41 = vsel %vm1615_vm1, %v1731_v29, %v1732_v12 }
 0x281   :  { %v3134_v31 = vadd.f32 %v3072_v23, %v11130_v15  ;;  %v4075_v21 = vadd.f32 %v3926_v14, %v3604_v32  ;;  %v2853_v44 = vrot.slane %v2614_v0, 2  ;;  %v11468_v19 = vadd.f32 %v1733_v41, %v1409_v4  ;;  %v14947_v41 = vld [vmem:[#allocation42_spill] sm:$0xff]  ;;  %v11483_v4 = vpop.permute.xlu0 %624 }
 0x282   :  { %v2852_v5 = vsel %vm1615_vm1, %v2850_v35, %v2851_v27  ;;  %v1265_v3 = vsel %vm1145_vm2, %v1262_v50, %v1264_v13  ;;  %v3456_v58 = vrot.slane %v3225_v25, 1  ;;  %v1735_v33 = vsel %vm1615_vm1, %v1732_v12, %v1734_v45  ;;  %14948 = vst [vmem:[#allocation56_spill] sm:$0xff] %v11483_v4  ;;  %v11488_v50 = vld [vmem:[%s14094_s2] ss:$0 sm:$0xff] }
 0x283   :  { %v11472_v20 = vadd.f32 %v2852_v5, %v2521_v43  ;;  %v3927_v24 = vrot.slane %v3696_v1, 2  ;;  %v704_v22 = vmul.f32 %v8522_v49, %v14946_v63  ;;  %v2370_v57 = vsel %vm1145_vm2, %v2367_v37, %v2369_v16  ;;  %v14949_v16 = vld [vmem:[#allocation51_spill] sm:$0xff] }
 0x284   :  { %v3457_v15 = vsel %vm1145_vm2, %v3454_v38, %v3456_v58  ;;  %v1001_v32 = vmul.f32 %v8537_v53, %v14946_v63  ;;  %v1004_v14 = vmul.f32 %v8537_v53, %v14947_v41  ;;  %v4146_v29 = vadd.f32 %v11488_v50, %v4075_v21 }
 0x285   :  { %v1410_v12 = vadd.f32 %v1265_v3, %v723_v10  ;;  %v2854_v37 = vsel %vm1615_vm1, %v2851_v27, %v2853_v44  ;;  %v3605_v35 = vadd.f32 %v3457_v15, %v3134_v31  ;;  %v3928_v23 = vsel %vm1615_vm1, %v3925_v42, %v3927_v24  ;;  %v14951_v10 = vld [vmem:[#allocation65_spill] sm:$0xff] }
 0x286   :  { %v1216_v38 = vrot.slane %v1001_v32, 1  ;;  %v1221_v40 = vrot.slane %v1004_v14, 1  ;;  %v1471_v0 = vmul.f32 %v8539_v54, %v14946_v63  ;;  %v2522_v43 = vadd.f32 %v2370_v57, %v2028_v9  ;;  %v14954_v24 = vld [vmem:[#allocation53_spill] sm:$0xff]  ;;  %v1898_v14 = vpop.permute.xlu1 %1897 }
 0x287   :  { %v4076_v13 = vadd.f32 %v3928_v23, %v3605_v35  ;;  %v1474_v45 = vmul.f32 %v8539_v54, %v14947_v41  ;;  %v11499_v25 = vmul.f32 %v8539_v54, %v14949_v16  ;;  %v706_v44 = vmul.f32 %v8522_v49, %v14947_v41 }
 0x288   :  { %v14952_v27 = vrot.slane %v14951_v10, 1  ;;  %v14953_v1 = vrot.slane %v11151_v46, 1  ;;  %v1686_v9 = vrot.slane %v1471_v0, 2  ;;  %v4210_v21 = vmax.f32 %v4146_v29, 0.0  ;;  %v11522_v29 = vpop.permute.xlu0 %633 }
 0x289   :  { %14950 = vst [vmem:[#allocation58_spill] sm:$0xff] %v11499_v25  ;;  %v4147_v5 = vadd.f32 %v11488_v50, %v4076_v13  ;;  %v14304_v58 = vrot.slane %v11499_v25, 2  ;;  %v14955_v63 = vrot.slane %v14954_v24, 2  ;;  %v2101_v15 = vmul.f32 %v8543_v56, %v14947_v41  ;;  %v14958_v24 = vld [vmem:[#allocation34_spill] sm:$0xff] }
 0x28a   :  { %v1218_v42 = vsel %vm1145_vm2, %v1216_v38, %v14952_v27  ;;  %v1223_v31 = vsel %vm1145_vm2, %v1221_v40, %v14953_v1  ;;  %v2585_v32 = vmul.f32 %v8556_v60, %v14947_v41  ;;  %v11520_v46 = vmul.f32 %v8556_v60, %v14949_v16  ;;  %v14962_v16 = vld [vmem:[#allocation63_spill] sm:$0xff] }
 0x28b   :  { %v1391_v3 = vadd.f32 %v1218_v42, %v704_v22  ;;  %v1688_v57 = vsel %vm1615_vm1, %v1686_v9, %v14955_v63  ;;  %v1393_v22 = vadd.f32 %v1223_v31, %v706_v44  ;;  %v1691_v35 = vrot.slane %v1474_v45, 2 }
 0x28c   :  { %14956 = vst [vmem:[#allocation13_spill] sm:$0xff] %v11520_v46  ;;  %v1945_v38 = vmul.f32 %v8541_v55, %v14947_v41  ;;  %v1880_v40 = vadd.f32 %v1735_v33, %v1410_v12  ;;  %v4211_v0 = vmax.f32 %v4147_v5, 0.0  ;;  %v2321_v13 = vrot.slane %v2101_v15, 1 }
 0x28d   :  { %v1861_v23 = vadd.f32 %v1688_v57, %v1391_v3  ;;  %v14303_v10 = vrot.slane %v11520_v46, 2  ;;  %v11527_v27 = vadd.f32 %v2854_v37, %v2522_v43  ;;  %v1693_v42 = vsel %vm1615_vm1, %v1691_v35, %v14304_v58 }
 0x28e   :  { %v1947_v9 = vmul.f32 %v8541_v55, %v1898_v14  ;;  %v14957_v45 = vrot.slane %v11155_v48, 1  ;;  %v2805_v31 = vrot.slane %v2585_v32, 2  ;;  %v11537_v33 = vmul.f32 %v8543_v56, %v1898_v14  ;;  %v11564_v32 = vld [vmem:[%s14093_s1 + $0x8] ss:$0 sm:$0xff] }
 0x28f   :  { %v2009_v1 = vadd.f32 %v1945_v38, %v1861_v23  ;;  %v11540_v41 = vmul.f32 %v8556_v60, %v1898_v14  ;;  %v11543_v12 = vsel %vm4230_vm3, %v4210_v21, -inf  ;;  %v1863_v37 = vadd.f32 %v1693_v42, %v1393_v22  ;;  %v923_v23 = vpop.permute.xlu0 %922 }
 0x290   :  { %v2323_v44 = vsel %vm1145_vm2, %v2321_v13, %v14957_v45  ;;  %v11546_v5 = vmul.f32 %v8560_v62, %v1898_v14  ;;  %v11549_v3 = vsel %vm4230_vm3, %v4211_v0, -inf  ;;  %v2807_v48 = vsel %vm1615_vm1, %v2805_v31, %v14303_v10  ;;  %v14959_v10 = vld [vmem:[#allocation59_spill] sm:$0xff] }
 0x291   :  { %v2503_v43 = vadd.f32 %v2323_v44, %v2009_v1  ;;  %v1032_v63 = vmul.f32 %v8537_v53, %v14958_v24  ;;  %v1502_v57 = vmul.f32 %v8539_v54, %v14958_v24  ;;  %v11558_v21 = vadd.f32 %v1947_v9, %v1863_v37 }
 0x292   :  { %v3055_v15 = vmul.f32 %v8558_v61, %v1898_v14  ;;  %v11567_v22 = vmul.f32 %v11564_v32, %v1898_v14  ;;  %v2132_v35 = vmul.f32 %v8543_v56, %v14958_v24  ;;  %v2616_v42 = vmul.f32 %v8556_v60, %v14958_v24 }
 0x293   :  { %v1267_v13 = vrot.slane %v1032_v63, 1  ;;  %v2987_v1 = vadd.f32 %v2807_v48, %v2503_v43  ;;  %v725_v45 = vmul.f32 %v8522_v49, %v14958_v24  ;;  %v3227_v14 = vmul.f32 %v8560_v62, %v14958_v24 }
 0x294   :  { %v1737_v44 = vrot.slane %v1502_v57, 2  ;;  %v3698_v31 = vmul.f32 %v11564_v32, %v14958_v24  ;;  %v1033_v37 = vmul.f32 %v8537_v53, %v923_v23  ;;  %v14960_v63 = vrot.slane %v14959_v10, 1  ;;  %v14961_v57 = vld [vmem:[#allocation14_spill] sm:$0xff] }
 0x295   :  { %v1966_v48 = vmul.f32 %v8541_v55, %v14958_v24  ;;  %v2372_v9 = vrot.slane %v2132_v35, 1  ;;  %v1503_v0 = vmul.f32 %v8539_v54, %v923_v23  ;;  %v2856_v38 = vrot.slane %v2616_v42, 2 }
 0x296   :  { %v1268_v58 = vsel %vm1145_vm2, %v14960_v63, %v1267_v13  ;;  %v1269_v46 = vrot.slane %v1033_v37, 1  ;;  %v2029_v4 = vadd.f32 %v14962_v16, %v11468_v19  ;;  %v11593_v11 = vadd.f32 %v3055_v15, %v2987_v1 }
 0x297   :  { %v1411_v25 = vadd.f32 %v1268_v58, %v14961_v57  ;;  %v3074_v10 = vmul.f32 %v8558_v61, %v14958_v24  ;;  %v3459_v63 = vrot.slane %v3227_v14, 1  ;;  %v2133_v43 = vmul.f32 %v8543_v56, %v923_v23  ;;  %v14965_v57 = vld [vmem:[#allocation57_spill] sm:$0xff]  ;;  %v14967_v14 = vld [vmem:[#allocation60_spill] sm:$0xff] }
 0x298   :  { %v3930_v59 = vrot.slane %v3698_v31, 2  ;;  %v1270_v35 = vsel %vm1145_vm2, %v1267_v13, %v1269_v46  ;;  %v14964_v47 = vrot.slane %v14963_v17, 2  ;;  %v1739_v37 = vrot.slane %v1503_v0, 2  ;;  %v14969_v46 = vld [vmem:[#allocation67_spill] sm:$0xff]  ;;  %v14970_v0 = vld [vmem:[#allocation16_spill] sm:$0xff] }
 0x299   :  { %v2030_v58 = vadd.f32 %v1966_v48, %v1880_v40  ;;  %v14966_v8 = vrot.slane %v14965_v57, 1  ;;  %v2374_v16 = vrot.slane %v2133_v43, 1  ;;  %v2617_v15 = vmul.f32 %v8556_v60, %v923_v23  ;;  %v549_v43 = vpop.permute.xlu1 %548 }
 0x29a   :  { %v1738_v42 = vsel %vm1615_vm1, %v14964_v47, %v1737_v44  ;;  %v14968_v26 = vrot.slane %v14967_v14, 2  ;;  %v3135_v17 = vadd.f32 %v14969_v46, %v11472_v20  ;;  %v1412_v13 = vadd.f32 %v1270_v35, %v725_v45 }
 0x29b   :  { %v2373_v19 = vsel %vm1145_vm2, %v14966_v8, %v2372_v9  ;;  %v1881_v24 = vadd.f32 %v1738_v42, %v1411_v25  ;;  %v2375_v47 = vsel %vm1145_vm2, %v2372_v9, %v2374_v16  ;;  %v3228_v40 = vmul.f32 %v8560_v62, %v923_v23  ;;  %v14972_v9 = vld [vmem:[#allocation66_spill] sm:$0xff] }
 0x29c   :  { %v2523_v1 = vadd.f32 %v2373_v19, %v2029_v4  ;;  %v2857_v31 = vsel %vm1615_vm1, %v14968_v26, %v2856_v38  ;;  %v14971_v48 = vrot.slane %v14970_v0, 1  ;;  %v1740_v25 = vsel %vm1615_vm1, %v1737_v44, %v1739_v37 }
 0x29d   :  { %v11618_v4 = vadd.f32 %v11300_v34, %v1881_v24  ;;  %v3136_v26 = vadd.f32 %v3074_v10, %v11527_v27  ;;  %v2858_v57 = vrot.slane %v2617_v15, 2  ;;  %v3461_v20 = vrot.slane %v3228_v40, 1  ;;  %v1902_v24 = vpop.permute.xlu0 %1901 }
 0x29e   :  { %v3460_v8 = vsel %vm1145_vm2, %v14971_v48, %v3459_v63  ;;  %v3699_v45 = vmul.f32 %v11564_v32, %v923_v23  ;;  %v14973_v35 = vrot.slane %v14972_v9, 2  ;;  %v2524_v16 = vadd.f32 %v2375_v47, %v2030_v58 }
 0x29f   :  { %v3606_v42 = vadd.f32 %v3460_v8, %v3135_v17  ;;  %v3007_v14 = vadd.f32 %v2857_v31, %v2523_v1  ;;  %v11626_v0 = vmul.f32 %v8537_v53, %v549_v43  ;;  %v3462_v34 = vsel %vm1145_vm2, %v3459_v63, %v3461_v20 }
 0x2a0   :  { %v3931_v19 = vsel %vm1615_vm1, %v14973_v35, %v3930_v59  ;;  %v3932_v44 = vrot.slane %v3699_v45, 2  ;;  %v11630_v27 = vmul.f32 %v8539_v54, %v549_v43  ;;  %v1951_v10 = vmul.f32 %v8541_v55, %v549_v43 }
 0x2a1   :  { %v4077_v46 = vadd.f32 %v3931_v19, %v3606_v42  ;;  %v11633_v37 = vadd.f32 %v1740_v25, %v1412_v13  ;;  %v3607_v23 = vadd.f32 %v3462_v34, %v3136_v26  ;;  %v11637_v58 = vmul.f32 %v8543_v56, %v549_v43 }
 0x2a2   :  { %v2859_v1 = vsel %vm1615_vm1, %v2856_v38, %v2858_v57  ;;  %v11641_v31 = vadd.f32 %v11330_v28, %v3007_v14  ;;  %v3933_v63 = vsel %vm1615_vm1, %v3930_v59, %v3932_v44  ;;  %v11645_v17 = vmul.f32 %v8522_v49, %v549_v43 }
 0x2a3   :  { %v4148_v15 = vadd.f32 %v11488_v50, %v4077_v46  ;;  %v11647_v47 = vadd.f32 %v2859_v1, %v2524_v16  ;;  %v4078_v13 = vadd.f32 %v3933_v63, %v3607_v23  ;;  %v11650_v48 = vmul.f32 %v8556_v60, %v549_v43 }
 0x2a4   :  { %v11655_v38 = vadd.f32 %v1951_v10, %v11405_v7  ;;  %v11658_v28 = vmul.f32 %v8543_v56, %v1902_v24  ;;  %v3059_v57 = vmul.f32 %v8558_v61, %v549_v43  ;;  %v11666_v45 = vmul.f32 %v8560_v62, %v549_v43 }
 0x2a5   :  { %v4212_v40 = vmax.f32 %v4148_v15, 0.0  ;;  %14974 = vst [vmem:[#allocation15_spill] sm:$0xff] %v11650_v48  ;;  %v4149_v59 = vadd.f32 %v11488_v50, %v4078_v13  ;;  %v11670_v7 = vmul.f32 %v8556_v60, %v1902_v24  ;;  %v11674_v16 = vmul.f32 %v8560_v62, %v1902_v24 }
 0x2a6   :  { %14975 = vst [vmem:[#allocation77_spill] sm:$0xff] %v11658_v28  ;;  %14976 = vst [vmem:[#allocation42_spill] sm:$0xff] %v11666_v45  ;;  %v14315_v9 = vrot.slane %v11658_v28, 1  ;;  %v11677_v14 = vmul.f32 %v11564_v32, %v1902_v24  ;;  %v14981_v34 = vrot.slane %v11537_v33, 1  ;;  %v11699_v33 = vmul.f32 %v8541_v55, %v1902_v24 }
 0x2a7   :  { %v4298_v26 = vsel %vm4230_vm3, %v4212_v40, -inf  ;;  %14977 = vst [vmem:[#allocation65_spill] sm:$0xff] %v11670_v7  ;;  %v4213_v35 = vmax.f32 %v4149_v59, 0.0  ;;  %14978 = vst [vmem:[#allocation53_spill] sm:$0xff] %v11674_v16  ;;  %v14316_v10 = vrot.slane %v11670_v7, 2  ;;  %v14317_v1 = vrot.slane %v11674_v16, 1 }
 0x2a8   :  { %v4299_v20 = vmax.f32 %v11543_v12, %v4298_v26  ;;  %14979 = vst [vmem:[#allocation34_spill] sm:$0xff] %v11677_v14  ;;  %v11681_v12 = vmul.f32 %v11564_v32, %v549_v43  ;;  %v2328_v44 = vsel %vm1145_vm2, %v14981_v34, %v14315_v9  ;;  %v14318_v63 = vrot.slane %v11677_v14, 2  ;;  %14983 = vst [vmem:[#allocation63_spill] sm:$0xff] %v11699_v33 }
 0x2a9   :  { %v4301_v23 = vsel %vm4230_vm3, %v4213_v35, -inf  ;;  %v2505_v15 = vadd.f32 %v2328_v44, %v11558_v21  ;;  %v11696_v40 = vadd.f32 %v3059_v57, %v11407_v30  ;;  %v14984_v21 = vrot.slane %v11540_v41, 2 }
 0x2aa   :  { %v4740_v46 = vrot.slane %v4299_v20, %v14513_v2  ;;  %14980 = vst [vmem:[#allocation59_spill] sm:$0xff] %v11681_v12  ;;  %v4302_v13 = vmax.f32 %v11549_v3, %v4301_v23  ;;  %v14985_v3 = vrot.slane %v11546_v5, 1  ;;  %v11717_v23 = vpop.permute.xlu1 %557  ;;  %v4733_v9 = vcombine.high %v4299_v20, %v4299_v20 }
 0x2ab   :  { %14982 = vst [vmem:[#allocation14_spill] sm:$0xff] %v11696_v40  ;;  %v2812_v35 = vsel %vm1615_vm1, %v14984_v21, %v14316_v10  ;;  %v14987_v5 = vrot.slane %v11567_v22, 2  ;;  %v14992_v22 = vld [vmem:[#allocation20_spill] sm:$0xff]  ;;  %v11761_v25 = vmul.f32 %v8522_v49, %v11717_v23 }
 0x2ac   :  { %v5648_v43 = vsel %vm5031_vm4, %v4740_v46, -inf  ;;  %v4748_v59 = vcombine.high %v4740_v46, %v4740_v46  ;;  %v3415_v34 = vsel %vm1145_vm2, %v14985_v3, %v14317_v1  ;;  %v4757_v30 = vrot.slane %v4302_v13, %v14513_v2 }
 0x2ad   :  { %v2989_v44 = vadd.f32 %v2812_v35, %v2505_v15  ;;  %v11715_v46 = vmul.f32 %v8558_v61, %v1902_v24  ;;  %v5649_v41 = vrot.slane %v5648_v43, 4  ;;  %v3588_v21 = vadd.f32 %v3415_v34, %v11593_v11  ;;  %v14988_v15 = vld [vmem:[#allocation11_spill] sm:$0xff]  ;;  %15000 = vst [vmem:[#allocation101_spill] sm:$0xff] %v11761_v25 }
 0x2ae   :  { %v3886_v3 = vsel %vm1615_vm1, %v14987_v5, %v14318_v63  ;;  %v4750_v10 = vcombine.high %v4302_v13, %v4302_v13  ;;  %v4765_v1 = vcombine.high %v4757_v30, %v4757_v30  ;;  %v5676_v19 = vsel %vm5031_vm4, %v4757_v30, -inf  ;;  %v14999_v63 = vld [vmem:[#allocation21_spill] sm:$0xff]  ;;  %v639_v40 = vpop.permute.xlu1 %638 }
 0x2af   :  { %14986 = vst [vmem:[#allocation52_spill] sm:$0xff] %v11715_v46  ;;  %v3119_v35 = vadd.f32 %v14988_v15, %v2989_v44  ;;  %v11728_v24 = vsel %vm5031_vm4, %v4748_v59, -inf  ;;  %v5677_v57 = vrot.slane %v5676_v19, 4  ;;  %v4059_v20 = vadd.f32 %v3886_v3, %v3588_v21 }
 0x2b0   :  { %14989 = vst [vmem:[#allocation57_spill] sm:$0xff] %v11728_v24  ;;  %v11732_v11 = vmul.f32 %v8537_v53, %v11717_v23  ;;  %v11735_v34 = vsel %vm5031_vm4, %v4765_v1, -inf  ;;  %v11740_v13 = vmul.f32 %v8539_v54, %v11717_v23  ;;  %v11744_v30 = vmul.f32 %v8543_v56, %v11717_v23 }
 0x2b1   :  { %14991 = vst [vmem:[#allocation67_spill] sm:$0xff] %v11735_v34  ;;  %v3590_v5 = vadd.f32 %v14992_v22, %v3119_v35  ;;  %v11747_v59 = vrot.slane %v4733_v9, %v14513_v2  ;;  %v11749_v44 = vmax.f32 %v5648_v43, %v5649_v41  ;;  %v11751_v21 = vmax.f32 %v5676_v19, %v5677_v57 }
 0x2b2   :  { %14990 = vst [vmem:[#allocation60_spill] sm:$0xff] %v11732_v11  ;;  %14993 = vst [vmem:[#allocation16_spill] sm:$0xff] %v11740_v13  ;;  %v4130_v1 = vadd.f32 %v11488_v50, %v4059_v20  ;;  %v11755_v3 = vrot.slane %v4750_v10, %v14513_v2  ;;  %v11767_v19 = vmul.f32 %v8541_v55, %v11717_v23  ;;  %v15002_v20 = vld [vmem:[#allocation17_spill] sm:$0xff] }
 0x2b3   :  { %14994 = vst [vmem:[#allocation66_spill] sm:$0xff] %v11744_v30  ;;  %14995 = vst [vmem:[#allocation97_spill] sm:$0xff] %v11747_v59  ;;  %v4061_v26 = vadd.f32 %v14999_v63, %v3590_v5  ;;  %v15003_v5 = vcombine.high %v15002_v20, %v15002_v20  ;;  %v11783_v43 = vmul.f32 %v8558_v61, %v11717_v23 }
 0x2b4   :  { %14996 = vst [vmem:[#allocation98_spill] sm:$0xff] %v11749_v44  ;;  %14997 = vst [vmem:[#allocation99_spill] sm:$0xff] %v11751_v21  ;;  %v4194_v42 = vmax.f32 %v4130_v1, 0.0  ;;  %v11779_v1 = vmul.f32 %v8556_v60, %v11717_v23  ;;  %v11789_v41 = vmul.f32 %v8560_v62, %v11717_v23 }
 0x2b5   :  { %14998 = vst [vmem:[#allocation100_spill] sm:$0xff] %v11755_v3  ;;  %15001 = vst [vmem:[#allocation102_spill] sm:$0xff] %v11767_v19  ;;  %v4132_v10 = vadd.f32 %v11488_v50, %v4061_v26  ;;  %v4543_v35 = vrot.slane %v15003_v5, %v14513_v2  ;;  %v15006_v26 = vld [vmem:[#allocation64_spill] sm:$0xff]  ;;  %v15009_v3 = vld [vmem:[#allocation70_spill] sm:$0xff] }
 0x2b6   :  { %15004 = vst [vmem:[#allocation17_spill] sm:$0xff] %v11779_v1  ;;  %15005 = vst [vmem:[#allocation103_spill] sm:$0xff] %v11783_v43  ;;  %v5312_v57 = vsel %vm5031_vm4, %v15006_v26, -inf  ;;  %v4273_v9 = vsel %vm4230_vm3, %v4194_v42, -inf  ;;  %v15008_v63 = vcombine.high %v15006_v26, %v15006_v26  ;;  %v15010_v34 = vrot.slane %v15009_v3, 4  ;;  %v15011_v19 = vld [vmem:[#allocation69_spill] sm:$0xff] }
 0x2b7   :  { %v4196_v8 = vmax.f32 %v4132_v10, 0.0  ;;  %15007 = vst [vmem:[#allocation64_spill] sm:$0xff] %v11789_v41  ;;  %v4545_v20 = vcombine.high %v4543_v35, %v4543_v35  ;;  %v5313_v5 = vrot.slane %v5312_v57, 4  ;;  %v5326_v15 = vsel %vm5031_vm4, %v4543_v35, -inf }
 0x2b8   :  { %v5319_v22 = vsel %vm5031_vm4, %v15008_v63, -inf  ;;  %v5342_v21 = vmax.f32 %v15009_v3, %v15010_v34  ;;  %v5327_v59 = vrot.slane %v5326_v15, 4  ;;  %v15012_v26 = vcombine.high %v15011_v19, %v15011_v19 }
 0x2b9   :  { %v4274_v10 = vsel %vm4230_vm3, %v4196_v8, -inf  ;;  %v5314_v24 = vmax.f32 %v5312_v57, %v5313_v5  ;;  %v5320_v44 = vrot.slane %v5319_v22, 4  ;;  %v5333_v30 = vsel %vm5031_vm4, %v4545_v20, -inf  ;;  %v15013_v8 = vld [vmem:[#allocation68_spill] sm:$0xff] }
 0x2ba   :  { %v4275_v43 = vmax.f32 %v4273_v9, %v4274_v10  ;;  %v5343_v42 = vrot.slane %v5342_v21, 2  ;;  %v5347_v63 = vsel %vm5031_vm4, %v15012_v26, -inf  ;;  %v5328_v25 = vmax.f32 %v5326_v15, %v5327_v59 }
 0x2bb   :  { %v5315_v13 = vrot.slane %v5314_v24, 2  ;;  %v5321_v35 = vmax.f32 %v5319_v22, %v5320_v44  ;;  %v5334_v11 = vrot.slane %v5333_v30, 4  ;;  %v15014_v3 = vcombine.high %v15013_v8, %v15013_v8 }
 0x2bc   :  { %v4597_v14 = vcombine.high %v4275_v43, %v4275_v43  ;;  %v4604_v34 = vrot.slane %v4275_v43, %v14513_v2  ;;  %v5344_v57 = vmax.f32 %v5342_v21, %v5343_v42  ;;  %v5329_v10 = vrot.slane %v5328_v25, 2 }
 0x2bd   :  { %v4560_v9 = vrot.slane %v15014_v3, %v14513_v2  ;;  %v5316_v20 = vmax.f32 %v5314_v24, %v5315_v13  ;;  %v5322_v5 = vrot.slane %v5321_v35, 2  ;;  %v5335_v7 = vmax.f32 %v5333_v30, %v5334_v11 }
 0x2be   :  { %v11812_v19 = vrot.slane %v4597_v14, %v14513_v2  ;;  %v4612_v26 = vcombine.high %v4604_v34, %v4604_v34  ;;  %v5424_v15 = vsel %vm5031_vm4, %v4604_v34, -inf  ;;  %v5348_v22 = vrot.slane %v5347_v63, 4 }
 0x2bf   :  { %v5425_v59 = vrot.slane %v5424_v15, 4  ;;  %v5317_v44 = vrot.slane %v5316_v20, 1  ;;  %v5323_v43 = vmax.f32 %v5321_v35, %v5322_v5  ;;  %v5330_v46 = vmax.f32 %v5328_v25, %v5329_v10 }
 0x2c0   :  { %15015 = vst [vmem:[#allocation70_spill] sm:$0xff] %v11812_v19  ;;  %v5431_v16 = vsel %vm5031_vm4, %v4612_v26, -inf  ;;  %v5438_v21 = vsel %vm5031_vm4, %v11812_v19, -inf  ;;  %v11820_v24 = vmul.f32 %v11564_v32, %v11717_v23  ;;  %v5336_v11 = vrot.slane %v5335_v7, 2 }
 0x2c1   :  { %v5426_v14 = vmax.f32 %v5424_v15, %v5425_v59  ;;  %v5432_v13 = vrot.slane %v5431_v16, 4  ;;  %v5439_v30 = vrot.slane %v5438_v21, 4  ;;  %v4562_v42 = vcombine.high %v4560_v9, %v4560_v9 }
 0x2c2   :  { %15016 = vst [vmem:[#allocation69_spill] sm:$0xff] %v11820_v24  ;;  %v5324_v34 = vrot.slane %v5323_v43, 1  ;;  %v5331_v8 = vrot.slane %v5330_v46, 1  ;;  %v5337_v3 = vmax.f32 %v5335_v7, %v5336_v11  ;;  %v5345_v28 = vrot.slane %v5344_v57, 1  ;;  %v15073_v24 = vld [vmem:[#allocation41_spill] sm:$0xff] }
 0x2c3   :  { %v5427_v35 = vrot.slane %v5426_v14, 2  ;;  %v5433_v25 = vmax.f32 %v5431_v16, %v5432_v13  ;;  %v5318_v5 = vmax.f32 %v5316_v20, %v5317_v44  ;;  %v5349_v10 = vmax.f32 %v5347_v63, %v5348_v22 }
 0x2c4   :  { %v5325_v26 = vmax.f32 %v5323_v43, %v5324_v34  ;;  %v5332_v33 = vmax.f32 %v5330_v46, %v5331_v8  ;;  %v5338_v48 = vrot.slane %v5337_v3, 1  ;;  %v5354_v2 = vsel %vm5031_vm4, %v4560_v9, -inf }
 0x2c5   :  { %v11823_v23 = vmax.f32 %v5438_v21, %v5439_v30  ;;  %v5350_v12 = vrot.slane %v5349_v10, 2  ;;  %v11827_v45 = vmax.f32 %v5426_v14, %v5427_v35  ;;  %v5355_v7 = vrot.slane %v5354_v2, 4 }
 0x2c6   :  { %v5361_v16 = vsel %vm5031_vm4, %v4562_v42, -inf  ;;  %v6098_v63 = vsel %vm6056_vm5, %v5325_v26, %v5318_v5  ;;  %v5434_v20 = vrot.slane %v5433_v25, 2  ;;  %v5339_v46 = vmax.f32 %v5337_v3, %v5338_v48  ;;  %v648_v3 = vpop.permute.xlu1 %647 }
 0x2c7   :  { %15017 = vst [vmem:[#allocation68_spill] sm:$0xff] %v11823_v23  ;;  %15018 = vst [vmem:[#allocation104_spill] sm:$0xff] %v11827_v45  ;;  %v5351_v22 = vmax.f32 %v5349_v10, %v5350_v12  ;;  %v5362_v44 = vrot.slane %v5361_v16, 4  ;;  %v5346_v43 = vmax.f32 %v5344_v57, %v5345_v28  ;;  %v5356_v21 = vmax.f32 %v5354_v2, %v5355_v7 }
 0x2c8   :  { %v6099_v11 = vsel %vm6058_vm6, %v5332_v33, %v6098_v63  ;;  %v11836_v34 = vmul.f32 %v8537_v53, %v639_v40  ;;  %v11841_v8 = vmul.f32 %v8539_v54, %v639_v40  ;;  %v11843_v28 = vmax.f32 %v5433_v25, %v5434_v20 }
 0x2c9   :  { %v5352_v14 = vrot.slane %v5351_v22, 1  ;;  %v5363_v30 = vmax.f32 %v5361_v16, %v5362_v44  ;;  %v5357_v12 = vrot.slane %v5356_v21, 2  ;;  %v6100_v57 = vsel %vm6060_vm7, %v5339_v46, %v6099_v11 }
 0x2ca   :  { %15019 = vst [vmem:[#allocation105_spill] sm:$0xff] %v11836_v34  ;;  %15020 = vst [vmem:[#allocation106_spill] sm:$0xff] %v11841_v8  ;;  %v6101_v5 = vsel %vm14440_vm8, %v5346_v43, %v6100_v57  ;;  %v11848_v10 = vmul.f32 %v8522_v49, %v639_v40  ;;  %v11851_v26 = vmul.f32 %v8543_v56, %v639_v40  ;;  %v11867_v43 = vpop.permute.xlu0 %552  ;;  %v883_v46 = vpop.permute.xlu1 %882  ;;  %v15070_v34 = vld [vmem:[#allocation12_spill] sm:$0xff]  ;;  %v15074_v41 = vrot.slane %v15073_v24, 1  ;;  %v15077_v24 = vld [vmem:[#allocation94_spill] sm:$0xff] }
 0x2cb   :  { %15021 = vst [vmem:[#allocation107_spill] sm:$0xff] %v11843_v28  ;;  %v5353_v2 = vmax.f32 %v5351_v22, %v5352_v14  ;;  %v5364_v33 = vrot.slane %v5363_v30, 2  ;;  %v5358_v35 = vmax.f32 %v5356_v21, %v5357_v12  ;;  %v11855_v25 = vmul.f32 %v8556_v60, %v639_v40 }
 0x2cc   :  { %15022 = vst [vmem:[#allocation108_spill] sm:$0xff] %v11848_v10  ;;  %15023 = vst [vmem:[#allocation109_spill] sm:$0xff] %v11851_v26  ;;  %v11858_v63 = vmul.f32 %v8560_v62, %v639_v40  ;;  %v11862_v22 = vmul.f32 %v8541_v55, %v639_v40  ;;  %v11865_v44 = vmul.f32 %v11564_v32, %v639_v40  ;;  %v15060_v26 = vld [vmem:[#allocation92_spill] sm:$0xff] }
 0x2cd   :  { %v5365_v7 = vmax.f32 %v5363_v30, %v5364_v33  ;;  %15024 = vst [vmem:[#allocation110_spill] sm:$0xff] %v11855_v25  ;;  %v5359_v20 = vrot.slane %v5358_v35, 1  ;;  %v6102_v11 = vsel %vm14437_vm9, %v5353_v2, %v6101_v5  ;;  %v11871_v14 = vmul.f32 %v8537_v53, %v648_v3 }
 0x2ce   :  { %15025 = vst [vmem:[#allocation111_spill] sm:$0xff] %v11858_v63  ;;  %15026 = vst [vmem:[#allocation112_spill] sm:$0xff] %v11865_v44  ;;  %v11874_v30 = vmul.f32 %v8539_v54, %v648_v3  ;;  %v11878_v57 = vmul.f32 %v8558_v61, %v639_v40  ;;  %v11881_v48 = vmul.f32 %v8543_v56, %v648_v3  ;;  %v11907_v9 = vpop.permute.xlu0 %561 }
 0x2cf   :  { %v5366_v21 = vrot.slane %v5365_v7, 1  ;;  %15027 = vst [vmem:[#allocation113_spill] sm:$0xff] %v11871_v14  ;;  %v5360_v12 = vmax.f32 %v5358_v35, %v5359_v20  ;;  %v11886_v5 = vmul.f32 %v8522_v49, %v648_v3  ;;  %v11891_v20 = vmul.f32 %v8541_v55, %v648_v3  ;;  %15035 = vst [vmem:[#allocation121_spill] sm:$0xff] %v11907_v9 }
 0x2d0   :  { %15028 = vst [vmem:[#allocation114_spill] sm:$0xff] %v11874_v30  ;;  %15029 = vst [vmem:[#allocation115_spill] sm:$0xff] %v11881_v48  ;;  %v11894_v40 = vmul.f32 %v8556_v60, %v648_v3  ;;  %v11900_v2 = vmul.f32 %v8558_v61, %v648_v3  ;;  %v1009_v35 = vmul.f32 %v8537_v53, %v883_v46 }
 0x2d1   :  { %v5367_v42 = vmax.f32 %v5365_v7, %v5366_v21  ;;  %15030 = vst [vmem:[#allocation116_spill] sm:$0xff] %v11886_v5  ;;  %v6103_v16 = vsel %vm6066_vm10, %v5360_v12, %v6102_v11  ;;  %15031 = vst [vmem:[#allocation117_spill] sm:$0xff] %v11891_v20  ;;  %v11904_v12 = vmul.f32 %v8560_v62, %v648_v3  ;;  %v15038_v21 = vld [vmem:[#allocation22_spill] sm:$0xff] }
 0x2d2   :  { %15032 = vst [vmem:[#allocation118_spill] sm:$0xff] %v11894_v40  ;;  %15033 = vst [vmem:[#allocation119_spill] sm:$0xff] %v11900_v2  ;;  %v11910_v59 = vmul.f32 %v11564_v32, %v648_v3  ;;  %v2593_v13 = vmul.f32 %v8556_v60, %v883_v46  ;;  %v2014_v15 = vadd.f32 %v11349_v51, %v15038_v21  ;;  %v1229_v23 = vrot.slane %v1009_v35, 1 }
 0x2d3   :  { %v6104_v7 = vsel %vm6068_vm11, %v5367_v42, %v6103_v16  ;;  %15034 = vst [vmem:[#allocation120_spill] sm:$0xff] %v11904_v12  ;;  %v1479_v42 = vmul.f32 %v8539_v54, %v883_v46  ;;  %v2109_v16 = vmul.f32 %v8543_v56, %v883_v46  ;;  %v15039_v46 = vrot.slane %v11311_v52, 1 }
 0x2d4   :  { %v6180_v33 = vrot.slane %v6104_v7, 7  ;;  %15036 = vst [vmem:[#allocation122_spill] sm:$0xff] %v11910_v59  ;;  %v2818_v35 = vrot.slane %v2593_v13, 2  ;;  %v1038_v21 = vmul.f32 %v8537_v53, %v11522_v29  ;;  %v11948_v13 = vpop.permute.xlu0 %642 }
 0x2d5   :  { %v1230_v48 = vsel %vm1145_vm2, %v15039_v46, %v1229_v23  ;;  %v1699_v30 = vrot.slane %v1479_v42, 2  ;;  %v2334_v5 = vrot.slane %v2109_v16, 1  ;;  %v15042_v23 = vrot.slane %v11318_v39, 2 }
 0x2d6   :  { %v11916_v7 = vsel %vm161_vm0, 0.0, %v6180_v33  ;;  %v6228_v11 = vsel %vm161_vm0, %v6180_v33, 0.0  ;;  %v1396_v33 = vadd.f32 %v1230_v48, %v11333_v18  ;;  %v1277_v39 = vrot.slane %v1038_v21, 1  ;;  %v933_v21 = vpop.permute.xlu1 %932 }
 0x2d7   :  { %15037 = vst [vmem:[#allocation123_spill] sm:$0xff] %v11916_v7  ;;  %v8004_v45 = vpack.i.bf16 %v11916_v7, %v11361_v36  ;;  %v6285_v3 = vrot.slane %v11916_v7, 1  ;;  %v6286_v19 = vrot.slane %v6228_v11, 1  ;;  %v6330_v28 = vrot.slane %v11916_v7, 2  ;;  %v15047_v36 = vld [vmem:[#allocation19_spill] sm:$0xff] }
 0x2d8   :  { %v6331_v2 = vrot.slane %v6228_v11, 2  ;;  %v1700_v42 = vsel %vm1615_vm1, %v15042_v23, %v1699_v30  ;;  %v1508_v30 = vmul.f32 %v8539_v54, %v11522_v29  ;;  %v1952_v23 = vmul.f32 %v8541_v55, %v11867_v43  ;;  %v11985_v14 = vpop.permute.xlu0 %651 }
 0x2d9   :  { %8005 = vrot.lane.b32.xlu0 %v8004_v45, %s8216_s24  ;;  %v11930_v51 = vsel %vm1145_vm2, %v6285_v3, %v6286_v19  ;;  %v15043_v45 = vld [vmem:[#allocation36_spill] sm:$0xff]  ;;  %v1866_v48 = vadd.f32 %v1700_v42, %v1396_v33  ;;  %v3060_v42 = vmul.f32 %v8558_v61, %v11867_v43  ;;  %v1039_v40 = vmul.f32 %v8537_v53, %v933_v21 }
 0x2da   :  { %15040 = vst [vmem:[#allocation22_spill] sm:$0xff] %v11930_v51  ;;  %v8009_v11 = vpack.i.bf16 %v11930_v51, %v11386_v6  ;;  %v11938_v52 = vsel %vm1615_vm1, %v6330_v28, %v6331_v2  ;;  %v15044_v16 = vrot.slane %v15043_v45, 1  ;;  %v15045_v3 = vld [vmem:[#allocation96_spill] sm:$0xff]  ;;  %15046 = vst [vmem:[#allocation36_spill] sm:$0xff] %v11948_v13  ;;  %v15048_v6 = vrot.slane %v15047_v36, 2  ;;  %v15049_v45 = vld [vmem:[#allocation7_spill] sm:$0xff] }
 0x2db   :  { %15041 = vst [vmem:[#allocation124_spill] sm:$0xff] %v11938_v52  ;;  %v8014_v18 = vpack.i.bf16 %v11938_v52, %v15045_v3  ;;  %v2138_v2 = vmul.f32 %v8543_v56, %v11522_v29  ;;  %v3233_v36 = vmul.f32 %v8560_v62, %v11522_v29  ;;  %15053 = vst [vmem:[#allocation7_spill] sm:$0xff] %v11985_v14  ;;  %v1279_v59 = vrot.slane %v1039_v40, 1  ;;  %v15058_v14 = vld [vmem:[#allocation91_spill] sm:$0xff] }
 0x2dc   :  { %v2335_v19 = vsel %vm1145_vm2, %v15044_v16, %v2334_v5  ;;  %v2819_v28 = vsel %vm1615_vm1, %v15048_v6, %v2818_v35  ;;  %8010 = vrot.lane.b32.xlu1 %v8009_v11, %s8218_s26  ;;  %v2622_v5 = vmul.f32 %v8556_v60, %v11522_v29  ;;  %v11966_v35 = vmul.f32 %v11564_v32, %v11522_v29  ;;  %v15052_v11 = vld [vmem:[#allocation10_spill] sm:$0xff] }
 0x2dd   :  { %v2508_v46 = vadd.f32 %v2335_v19, %v2014_v15  ;;  %8015 = vrot.lane.b32.xlu0 %v8014_v18, %s8217_s25  ;;  %v15050_v16 = vrot.slane %v15049_v45, 1  ;;  %v1747_v6 = vrot.slane %v1508_v30, 2  ;;  %v11979_v15 = vadd.f32 %v1952_v23, %v1866_v48 }
 0x2de   :  { %v2866_v12 = vrot.slane %v2622_v5, 2  ;;  %v3469_v45 = vrot.slane %v3233_v36, 1  ;;  %v1509_v18 = vmul.f32 %v8539_v54, %v933_v21  ;;  %v2139_v30 = vmul.f32 %v8543_v56, %v933_v21 }
 0x2df   :  { %v2992_v33 = vadd.f32 %v2819_v28, %v2508_v46  ;;  %v1278_v19 = vsel %vm1145_vm2, %v15050_v16, %v1277_v39  ;;  %v729_v46 = vmul.f32 %v8522_v49, %v11522_v29  ;;  %v2382_v28 = vrot.slane %v2138_v2, 1  ;;  %15051 = vst [vmem:[#allocation19_spill] sm:$0xff] %v11979_v15 }
 0x2e0   :  { %v1415_v3 = vadd.f32 %v1278_v19, %v15052_v11  ;;  %v2623_v48 = vmul.f32 %v8556_v60, %v933_v21  ;;  %v3234_v2 = vmul.f32 %v8560_v62, %v933_v21  ;;  %v15054_v11 = vld [vmem:[#allocation89_spill] sm:$0xff]  ;;  %v1749_v36 = vrot.slane %v1509_v18, 2  ;;  %v15062_v18 = vld [vmem:[#allocation56_spill] sm:$0xff] }
 0x2e1   :  { %v11983_v20 = vadd.f32 %v3060_v42, %v2992_v33  ;;  %v15055_v5 = vrot.slane %v15054_v11, 2  ;;  %v15056_v33 = vld [vmem:[#allocation90_spill] sm:$0xff]  ;;  %v12001_v16 = vmul.f32 %v11564_v32, %v933_v21  ;;  %v15059_v44 = vrot.slane %v15058_v14, 2 }
 0x2e2   :  { %v15057_v42 = vrot.slane %v15056_v33, 1  ;;  %v1280_v63 = vsel %vm1145_vm2, %v1277_v39, %v1279_v59  ;;  %v2384_v11 = vrot.slane %v2139_v30, 1  ;;  %v3471_v8 = vrot.slane %v3234_v2, 1 }
 0x2e3   :  { %v1748_v23 = vsel %vm1615_vm1, %v15055_v5, %v1747_v6  ;;  %v12006_v25 = vsel %vm1615_vm1, %v15059_v44, %v2866_v12  ;;  %v15061_v5 = vrot.slane %v15060_v26, 1  ;;  %v1035_v21 = vmul.f32 %v8537_v53, %v15062_v18  ;;  %v15065_v44 = vld [vmem:[#allocation93_spill] sm:$0xff] }
 0x2e4   :  { %v11998_v19 = vsel %vm1145_vm2, %v15057_v42, %v2382_v28  ;;  %v1885_v40 = vadd.f32 %v1748_v23, %v1415_v3  ;;  %v2868_v42 = vrot.slane %v2623_v48, 2  ;;  %v15064_v14 = vrot.slane %v11966_v35, 2 }
 0x2e5   :  { %v12012_v33 = vsel %vm1145_vm2, %v15061_v5, %v3469_v45  ;;  %v15066_v23 = vrot.slane %v15065_v44, 2  ;;  %v727_v26 = vmul.f32 %v8522_v49, %v15062_v18  ;;  %v1505_v39 = vmul.f32 %v8539_v54, %v15062_v18 }
 0x2e6   :  { %v12017_v3 = vadd.f32 %v11862_v22, %v1885_v40  ;;  %v1416_v30 = vadd.f32 %v1280_v63, %v729_v46  ;;  %v1750_v48 = vsel %vm1615_vm1, %v1747_v6, %v1749_v36  ;;  %v3942_v2 = vrot.slane %v12001_v16, 2  ;;  %v928_v40 = vpop.permute.xlu0 %927 }
 0x2e7   :  { %v12024_v59 = vsel %vm1615_vm1, %v15066_v23, %v15064_v14  ;;  %v1272_v22 = vrot.slane %v1035_v21, 1  ;;  %v12033_v5 = vsel %vm1145_vm2, %v2382_v28, %v2384_v11  ;;  %v1968_v14 = vmul.f32 %v8541_v55, %v15062_v18 }
 0x2e8   :  { %15063 = vst [vmem:[#allocation10_spill] sm:$0xff] %v12017_v3  ;;  %v2135_v44 = vmul.f32 %v8543_v56, %v15062_v18  ;;  %v2619_v23 = vmul.f32 %v8556_v60, %v15062_v18  ;;  %v12042_v63 = vsel %vm1615_vm1, %v2866_v12, %v2868_v42  ;;  %v3472_v46 = vsel %vm1145_vm2, %v3469_v45, %v3471_v8  ;;  %v15068_v12 = vld [vmem:[#allocation73_spill] sm:$0xff] }
 0x2e9   :  { %15067 = vst [vmem:[#allocation89_spill] sm:$0xff] %v12042_v63  ;;  %v1742_v6 = vrot.slane %v1505_v39, 2  ;;  %v3230_v16 = vmul.f32 %v8560_v62, %v15062_v18  ;;  %v2032_v28 = vadd.f32 %v1968_v14, %v11633_v37  ;;  %v3076_v11 = vmul.f32 %v8558_v61, %v15062_v18 }
 0x2ea   :  { %v2377_v36 = vrot.slane %v2135_v44, 1  ;;  %v1036_v21 = vmul.f32 %v8537_v53, %v928_v40  ;;  %v2861_v3 = vrot.slane %v2619_v23, 2  ;;  %v3701_v10 = vmul.f32 %v11564_v32, %v15062_v18  ;;  %v15071_v44 = vld [vmem:[#allocation75_spill] sm:$0xff] }
 0x2eb   :  { %v15069_v42 = vrot.slane %v15068_v12, 1  ;;  %v1506_v45 = vmul.f32 %v8539_v54, %v928_v40  ;;  %v3464_v39 = vrot.slane %v3230_v16, 1  ;;  %v2136_v14 = vmul.f32 %v8543_v56, %v928_v40 }
 0x2ec   :  { %v1274_v63 = vrot.slane %v1036_v21, 1  ;;  %v15072_v13 = vrot.slane %v15071_v44, 2  ;;  %v2378_v18 = vsel %vm1145_vm2, %v15074_v41, %v2377_v36  ;;  %v2620_v12 = vmul.f32 %v8556_v60, %v928_v40  ;;  %v15075_v44 = vld [vmem:[#allocation29_spill] sm:$0xff] }
 0x2ed   :  { %v1273_v8 = vsel %vm1145_vm2, %v15069_v42, %v1272_v22  ;;  %v1744_v23 = vrot.slane %v1506_v45, 2  ;;  %v2379_v16 = vrot.slane %v2136_v14, 1  ;;  %v2525_v21 = vadd.f32 %v2378_v18, %v11618_v4 }
 0x2ee   :  { %v1413_v37 = vadd.f32 %v1273_v8, %v15070_v34  ;;  %v1743_v52 = vsel %vm1615_vm1, %v15072_v13, %v1742_v6  ;;  %v1275_v42 = vsel %vm1145_vm2, %v1272_v22, %v1274_v63  ;;  %v3078_v34 = vmul.f32 %v8558_v61, %v11522_v29 }
 0x2ef   :  { %v1414_v8 = vadd.f32 %v1275_v42, %v727_v26  ;;  %v15076_v9 = vrot.slane %v15075_v44, 2  ;;  %v2863_v45 = vrot.slane %v2620_v12, 2  ;;  %v2380_v41 = vsel %vm1145_vm2, %v2377_v36, %v2379_v16 }
 0x2f0   :  { %v1883_v1 = vadd.f32 %v1743_v52, %v1413_v37  ;;  %v3231_v22 = vmul.f32 %v8560_v62, %v928_v40  ;;  %v3935_v52 = vrot.slane %v3701_v10, 2  ;;  %v1745_v63 = vsel %vm1615_vm1, %v1742_v6, %v1744_v23  ;;  %v15078_v37 = vld [vmem:[#allocation50_spill] sm:$0xff] }
 0x2f1   :  { %v2862_v13 = vsel %vm1615_vm1, %v15076_v9, %v2861_v3  ;;  %v2526_v4 = vadd.f32 %v2380_v41, %v2032_v28  ;;  %v15079_v14 = vrot.slane %v15078_v37, 1  ;;  %v1884_v18 = vadd.f32 %v1745_v63, %v1414_v8  ;;  %v15080_v9 = vld [vmem:[#allocation95_spill] sm:$0xff] }
 0x2f2   :  { %v2033_v51 = vadd.f32 %v15077_v24, %v1883_v1  ;;  %v3009_v15 = vadd.f32 %v2862_v13, %v2525_v21  ;;  %v2864_v42 = vsel %vm1615_vm1, %v2861_v3, %v2863_v45  ;;  %v3466_v44 = vrot.slane %v3231_v22, 1  ;;  %v15084_v24 = vld [vmem:[#allocation44_spill] sm:$0xff] }
 0x2f3   :  { %v3465_v26 = vsel %vm1145_vm2, %v15079_v14, %v3464_v39  ;;  %v3010_v1 = vadd.f32 %v2864_v42, %v2526_v4  ;;  %v3138_v36 = vadd.f32 %v3076_v11, %v11647_v47  ;;  %v3702_v10 = vmul.f32 %v11564_v32, %v928_v40  ;;  %v15082_v40 = vld [vmem:[#allocation33_spill] sm:$0xff] }
 0x2f4   :  { %v3139_v12 = vadd.f32 %v15080_v9, %v3009_v15  ;;  %v3608_v16 = vadd.f32 %v3465_v26, %v11641_v31  ;;  %v1970_v6 = vmul.f32 %v8541_v55, %v11522_v29  ;;  %v2527_v28 = vadd.f32 %v11998_v19, %v2033_v51 }
 0x2f5   :  { %v3467_v23 = vsel %vm1145_vm2, %v3464_v39, %v3466_v44  ;;  %v12090_v3 = vadd.f32 %v1750_v48, %v1416_v30  ;;  %v3140_v15 = vadd.f32 %v3078_v34, %v3010_v1  ;;  %v3937_v13 = vrot.slane %v3702_v10, 2  ;;  %v15085_v48 = vld [vmem:[#allocation74_spill] sm:$0xff]  ;;  %v15090_v10 = vld [vmem:[#allocation72_spill] sm:$0xff] }
 0x2f6   :  { %v3610_v21 = vadd.f32 %v12012_v33, %v3139_v12  ;;  %v3609_v8 = vadd.f32 %v3467_v23, %v3138_v36  ;;  %v15081_v47 = vrot.slane %v11966_v35, 2  ;;  %v2034_v11 = vadd.f32 %v1970_v6, %v1884_v18  ;;  %v15088_v36 = vld [vmem:[#allocation18_spill] sm:$0xff]  ;;  %v15093_v23 = vld [vmem:[#allocation5_spill] sm:$0xff] }
 0x2f7   :  { %v15083_v45 = vrot.slane %v15082_v40, 2  ;;  %v4579_v51 = vcombine.high %v15084_v24, %v15084_v24  ;;  %v3611_v19 = vadd.f32 %v3472_v46, %v3140_v15  ;;  %v3938_v33 = vsel %vm1615_vm1, %v3935_v52, %v3937_v13 }
 0x2f8   :  { %v3943_v31 = vsel %vm1615_vm1, %v15081_v47, %v3942_v2  ;;  %v5371_v39 = vrot.slane %v15085_v48, 2  ;;  %v3011_v34 = vadd.f32 %v12006_v25, %v2527_v28  ;;  %v4080_v41 = vadd.f32 %v3938_v33, %v3609_v8  ;;  %v15086_v2 = vld [vmem:[#allocation6_spill] sm:$0xff] }
 0x2f9   :  { %v3936_v29 = vsel %vm1615_vm1, %v15083_v45, %v3935_v52  ;;  %v4081_v35 = vadd.f32 %v12024_v59, %v3610_v21  ;;  %v15087_v22 = vrot.slane %v15086_v2, 4  ;;  %v4082_v4 = vadd.f32 %v3943_v31, %v3611_v19 }
 0x2fa   :  { %v4079_v30 = vadd.f32 %v3936_v29, %v3608_v16  ;;  %v5372_v37 = vmax.f32 %v15085_v48, %v5371_v39  ;;  %v5382_v46 = vsel %vm5031_vm4, %v15084_v24, -inf  ;;  %v5389_v52 = vsel %vm5031_vm4, %v4579_v51, -inf }
 0x2fb   :  { %v5377_v63 = vmax.f32 %v15086_v2, %v15087_v22  ;;  %v12112_v14 = vadd.f32 %v12033_v5, %v2034_v11  ;;  %v12115_v25 = vadd.f32 %v11878_v57, %v3011_v34  ;;  %v4151_v59 = vadd.f32 %v11488_v50, %v4080_v41 }
 0x2fc   :  { %v12119_v18 = vadd.f32 %v11488_v50, %v4079_v30  ;;  %v4153_v42 = vadd.f32 %v11488_v50, %v4082_v4  ;;  %v5383_v9 = vrot.slane %v5382_v46, 4  ;;  %v5390_v12 = vrot.slane %v5389_v52, 4 }
 0x2fd   :  { %v5378_v26 = vrot.slane %v5377_v63, 2  ;;  %v5373_v44 = vrot.slane %v5372_v37, 1  ;;  %v15089_v16 = vrot.slane %v15088_v36, 2  ;;  %v15091_v6 = vrot.slane %v15090_v10, 4 }
 0x2fe   :  { %v12129_v28 = vadd.f32 %v11488_v50, %v4081_v35  ;;  %v4596_v21 = vcombine.high %v15093_v23, %v15093_v23  ;;  %v5384_v15 = vmax.f32 %v5382_v46, %v5383_v9  ;;  %v5391_v8 = vmax.f32 %v5389_v52, %v5390_v12 }
 0x2ff   :  { %v5379_v1 = vmax.f32 %v5377_v63, %v5378_v26  ;;  %v5400_v5 = vmax.f32 %v15088_v36, %v15089_v16  ;;  %v5405_v57 = vmax.f32 %v15090_v10, %v15091_v6  ;;  %v4215_v13 = vmax.f32 %v4151_v59, 0.0 }
 0x300   :  { %15092 = vst [vmem:[#allocation90_spill] sm:$0xff] %v12129_v28  ;;  %v4217_v47 = vmax.f32 %v4153_v42, 0.0  ;;  %v5385_v40 = vrot.slane %v5384_v15, 2  ;;  %v5392_v45 = vrot.slane %v5391_v8, 2  ;;  %v5410_v24 = vsel %vm5031_vm4, %v15093_v23, -inf }
 0x301   :  { %v5380_v31 = vrot.slane %v5379_v1, 1  ;;  %v5406_v11 = vrot.slane %v5405_v57, 2  ;;  %v5401_v29 = vrot.slane %v5400_v5, 1  ;;  %v4214_v51 = vmax.f32 %v12119_v18, 0.0 }
 0x302   :  { %v5374_v19 = vmax.f32 %v5372_v37, %v5373_v44  ;;  %v5386_v30 = vmax.f32 %v5384_v15, %v5385_v40  ;;  %v5393_v48 = vmax.f32 %v5391_v8, %v5392_v45  ;;  %v5411_v39 = vrot.slane %v5410_v24, 4  ;;  %v15153_v15 = vld [vmem:[#allocation35_spill] sm:$0xff] }
 0x303   :  { %v5381_v50 = vmax.f32 %v5379_v1, %v5380_v31  ;;  %v5407_v33 = vmax.f32 %v5405_v57, %v5406_v11  ;;  %v5417_v34 = vsel %vm5031_vm4, %v4596_v21, -inf  ;;  %v4306_v41 = vsel %vm4230_vm3, %v4215_v13, -inf }
 0x304   :  { %v4307_v35 = vsel %vm4230_vm3, %v4217_v47, -inf  ;;  %v5418_v22 = vrot.slane %v5417_v34, 4  ;;  %v5387_v63 = vrot.slane %v5386_v30, 1  ;;  %v5394_v4 = vrot.slane %v5393_v48, 1 }
 0x305   :  { %v5408_v2 = vrot.slane %v5407_v33, 1  ;;  %v5402_v46 = vmax.f32 %v5400_v5, %v5401_v29  ;;  %v5412_v52 = vmax.f32 %v5410_v24, %v5411_v39  ;;  %v6105_v37 = vsel %vm6056_vm5, %v5381_v50, %v5374_v19  ;;  %v888_v24 = vpop.permute.xlu1 %887 }
 0x306   :  { %v5419_v59 = vmax.f32 %v5417_v34, %v5418_v22  ;;  %v1011_v26 = vmul.f32 %v8537_v53, %v11867_v43  ;;  %v12144_v42 = vmul.f32 %v8539_v54, %v11867_v43  ;;  %v5388_v9 = vmax.f32 %v5386_v30, %v5387_v63 }
 0x307   :  { %v5395_v12 = vmax.f32 %v5393_v48, %v5394_v4  ;;  %v5413_v44 = vrot.slane %v5412_v52, 2  ;;  %v12148_v1 = vmul.f32 %v8543_v56, %v11867_v43  ;;  %v5409_v36 = vmax.f32 %v5407_v33, %v5408_v2 }
 0x308   :  { %v5420_v16 = vrot.slane %v5419_v59, 2  ;;  %v1232_v5 = vrot.slane %v1011_v26, 1  ;;  %v1702_v10 = vrot.slane %v12144_v42, 2  ;;  %v6106_v57 = vsel %vm6058_vm6, %v5388_v9, %v6105_v37 }
 0x309   :  { %v5414_v6 = vmax.f32 %v5412_v52, %v5413_v44  ;;  %v2337_v23 = vrot.slane %v12148_v1, 1  ;;  %v3206_v21 = vmul.f32 %v8560_v62, %v11867_v43  ;;  %v12156_v8 = vmax.f32 %v4306_v41, %v4307_v35  ;;  %v15098_v52 = vld [vmem:[#allocation42_spill] sm:$0xff] }
 0x30a   :  { %v5421_v13 = vmax.f32 %v5419_v59, %v5420_v16  ;;  %v6107_v47 = vsel %vm6060_vm7, %v5395_v12, %v6106_v57  ;;  %v711_v40 = vmul.f32 %v8522_v49, %v11867_v43  ;;  %v15095_v45 = vrot.slane %v11626_v0, 1  ;;  %v15101_v12 = vld [vmem:[#allocation59_spill] sm:$0xff] }
 0x30b   :  { %15094 = vst [vmem:[#allocation91_spill] sm:$0xff] %v12156_v8  ;;  %v5415_v31 = vrot.slane %v5414_v6, 1  ;;  %v6108_v11 = vsel %vm14440_vm8, %v5402_v46, %v6107_v47  ;;  %v15096_v33 = vrot.slane %v11637_v58, 1  ;;  %v2595_v48 = vmul.f32 %v8556_v60, %v11867_v43 }
 0x30c   :  { %v1233_v29 = vsel %vm1145_vm2, %v15095_v45, %v1232_v5  ;;  %v5422_v19 = vrot.slane %v5421_v13, 1  ;;  %v6109_v50 = vsel %vm14437_vm9, %v5409_v36, %v6108_v11  ;;  %v15097_v34 = vrot.slane %v11630_v27, 2 }
 0x30d   :  { %v2338_v30 = vsel %vm1145_vm2, %v15096_v33, %v2337_v23  ;;  %v5416_v39 = vmax.f32 %v5414_v6, %v5415_v31  ;;  %v3424_v35 = vrot.slane %v3206_v21, 1  ;;  %v3677_v0 = vmul.f32 %v11564_v32, %v11867_v43  ;;  %v15100_v32 = vld [vmem:[#allocation14_spill] sm:$0xff] }
 0x30e   :  { %v1703_v41 = vsel %vm1615_vm1, %v15097_v34, %v1702_v10  ;;  %v5423_v2 = vmax.f32 %v5421_v13, %v5422_v19  ;;  %v1397_v22 = vadd.f32 %v1233_v29, %v11645_v17  ;;  %v1012_v63 = vmul.f32 %v8537_v53, %v888_v24  ;;  %v12201_v29 = vld [vmem:[%s14094_s2] ss:$0 sm:$0xff]  ;;  %v15107_v34 = vld [vmem:[#allocation51_spill] sm:$0xff] }
 0x30f   :  { %v1482_v58 = vmul.f32 %v8539_v54, %v888_v24  ;;  %v6110_v4 = vsel %vm6066_vm10, %v5416_v39, %v6109_v50  ;;  %v2509_v46 = vadd.f32 %v2338_v30, %v11655_v38  ;;  %v15099_v59 = vrot.slane %v15098_v52, 1  ;;  %v12209_v50 = vld [vmem:[%s14093_s1 + $0x8] ss:$0 sm:$0xff]  ;;  %v15105_v30 = vld [vmem:[#allocation8_spill] sm:$0xff] }
 0x310   :  { %v3895_v37 = vrot.slane %v3677_v0, 2  ;;  %v6111_v26 = vsel %vm6068_vm11, %v5423_v2, %v6110_v4  ;;  %v2821_v42 = vrot.slane %v2595_v48, 2  ;;  %v1234_v9 = vrot.slane %v1012_v63, 1  ;;  %v15108_v2 = vld [vmem:[#allocation15_spill] sm:$0xff] }
 0x311   :  { %v3425_v27 = vsel %vm1145_vm2, %v15099_v59, %v3424_v35  ;;  %v6181_v17 = vrot.slane %v6111_v26, 7  ;;  %v15102_v44 = vrot.slane %v15101_v12, 2  ;;  %v2112_v36 = vmul.f32 %v8543_v56, %v888_v24 }
 0x312   :  { %v3592_v43 = vadd.f32 %v3425_v27, %v15100_v32  ;;  %v2596_v38 = vmul.f32 %v8556_v60, %v888_v24  ;;  %v1235_v6 = vsel %vm1145_vm2, %v1232_v5, %v1234_v9  ;;  %v1704_v57 = vrot.slane %v1482_v58, 2  ;;  %v2048_v27 = vpop.permute.xlu0 %2047 }
 0x313   :  { %v3896_v1 = vsel %vm1615_vm1, %v15102_v44, %v3895_v37  ;;  %v3207_v21 = vmul.f32 %v8560_v62, %v888_v24  ;;  %v12194_v13 = vsel %vm161_vm0, 0.0, %v6181_v17  ;;  %v1398_v47 = vadd.f32 %v1235_v6, %v711_v40  ;;  %v15114_v44 = vld [vmem:[#allocation58_spill] sm:$0xff] }
 0x314   :  { %v4063_v16 = vadd.f32 %v3896_v1, %v3592_v43  ;;  %15103 = vst [vmem:[#allocation92_spill] sm:$0xff] %v12194_v13  ;;  %v2339_v31 = vrot.slane %v2112_v36, 1  ;;  %v2823_v11 = vrot.slane %v2596_v38, 2  ;;  %v8019_v45 = vpack.i.bf16 %v12194_v13, %v11916_v7 }
 0x315   :  { %v3426_v5 = vrot.slane %v3207_v21, 1  ;;  %v3678_v40 = vmul.f32 %v12209_v50, %v888_v24  ;;  %v12215_v33 = vsel %vm4230_vm3, %v4214_v51, -inf  ;;  %v12219_v48 = vrot.slane %v12156_v8, %v15105_v30 }
 0x316   :  { %v12204_v19 = vadd.f32 %v12201_v29, %v4063_v16  ;;  %15104 = vst [vmem:[#allocation56_spill] sm:$0xff] %v12215_v33  ;;  %v12221_v39 = vadd.f32 %v1703_v41, %v1397_v22  ;;  %v707_v0 = vmul.f32 %v8522_v49, %v15107_v34  ;;  %8020 = vrot.lane.b32.xlu1 %v8019_v45, %s8219_s27  ;;  %v15109_v63 = vrot.slane %v15108_v2, 2  ;;  %v15110_v41 = vld [vmem:[#allocation61_spill] sm:$0xff]  ;;  %v15119_v45 = vld [vmem:[#allocation87_spill] sm:$0xff]  ;;  %v15156_v33 = vld [vmem:[#allocation60_spill] sm:$0xff] }
 0x317   :  { %15106 = vst [vmem:[#allocation93_spill] sm:$0xff] %v12219_v48  ;;  %v2340_v18 = vsel %vm1145_vm2, %v2337_v23, %v2339_v31  ;;  %v3427_v51 = vsel %vm1145_vm2, %v3424_v35, %v3426_v5  ;;  %v3897_v58 = vrot.slane %v3678_v40, 2  ;;  %v1705_v4 = vsel %vm1615_vm1, %v1702_v10, %v1704_v57  ;;  %v15111_v35 = vld [vmem:[#allocation19_spill] sm:$0xff]  ;;  %v15112_v10 = vld [vmem:[#allocation30_spill] sm:$0xff]  ;;  %v15121_v5 = vld [vmem:[#allocation13_spill] sm:$0xff] }
 0x318   :  { %v2822_v24 = vsel %vm1615_vm1, %v15109_v63, %v2821_v42  ;;  %v3593_v52 = vadd.f32 %v3427_v51, %v11983_v20  ;;  %v1394_v22 = vadd.f32 %v15110_v41, %v707_v0  ;;  %v1946_v59 = vmul.f32 %v8541_v55, %v15107_v34  ;;  %v15117_v31 = vld [vmem:[#allocation82_spill] sm:$0xff]  ;;  %v15126_v41 = vld [vmem:[#allocation77_spill] sm:$0xff] }
 0x319   :  { %v12236_v26 = vadd.f32 %v2822_v24, %v2509_v46  ;;  %v4198_v32 = vmax.f32 %v12204_v19, 0.0  ;;  %v12239_v43 = vadd.f32 %v1705_v4, %v1398_v47  ;;  %v12242_v23 = vsel %vm1615_vm1, %v2821_v42, %v2823_v11  ;;  %v15116_v46 = vld [vmem:[#allocation31_spill] sm:$0xff] }
 0x31a   :  { %v12245_v9 = vadd.f32 %v2340_v18, %v15111_v35  ;;  %v3898_v20 = vsel %vm1615_vm1, %v3895_v37, %v3897_v58  ;;  %v15113_v12 = vrot.slane %v15112_v10, 2  ;;  %v15115_v1 = vrot.slane %v15114_v44, 2  ;;  %v15123_v24 = vld [vmem:[#allocation63_spill] sm:$0xff] }
 0x31b   :  { %v2010_v38 = vadd.f32 %v1946_v59, %v15116_v46  ;;  %v2106_v16 = vmul.f32 %v8543_v56, %v2048_v27  ;;  %v2590_v6 = vmul.f32 %v8556_v60, %v2048_v27  ;;  %v3201_v42 = vmul.f32 %v8560_v62, %v2048_v27 }
 0x31c   :  { %v1695_v36 = vsel %vm1615_vm1, %v15115_v1, %v15113_v12  ;;  %v3672_v57 = vmul.f32 %v12209_v50, %v2048_v27  ;;  %v4064_v21 = vadd.f32 %v3898_v20, %v3593_v52  ;;  %v12260_v11 = vsel %vm161_vm0, %v6181_v17, 0.0  ;;  %v15124_v52 = vld [vmem:[#allocation9_spill] sm:$0xff]  ;;  %v15130_v1 = vld [vmem:[#allocation52_spill] sm:$0xff] }
 0x31d   :  { %v1864_v47 = vadd.f32 %v1695_v36, %v1394_v22  ;;  %v2504_v37 = vadd.f32 %v15117_v31, %v2010_v38  ;;  %15118 = vst [vmem:[#allocation73_spill] sm:$0xff] %v12260_v11  ;;  %v15120_v19 = vrot.slane %v15119_v45, 2  ;;  %v15122_v40 = vrot.slane %v15121_v5, 2  ;;  %v15128_v27 = vld [vmem:[#allocation53_spill] sm:$0xff]  ;;  %v15135_v31 = vld [vmem:[#allocation83_spill] sm:$0xff] }
 0x31e   :  { %v2329_v0 = vrot.slane %v2106_v16, 1  ;;  %v2813_v2 = vrot.slane %v2590_v6, 2  ;;  %v3416_v63 = vrot.slane %v3201_v42, 1  ;;  %v6288_v58 = vrot.slane %v12194_v13, 1  ;;  %v15132_v38 = vld [vmem:[#allocation65_spill] sm:$0xff]  ;;  %v15134_v42 = vld [vmem:[#allocation22_spill] sm:$0xff] }
 0x31f   :  { %v2809_v34 = vsel %vm1615_vm1, %v15122_v40, %v15120_v19  ;;  %v2012_v18 = vadd.f32 %v15123_v24, %v1864_v47  ;;  %v6289_v4 = vrot.slane %v12260_v11, 1  ;;  %v12272_v17 = vmul.f32 %v15124_v52, %v8558_v61  ;;  %v15136_v45 = vld [vmem:[#allocation81_spill] sm:$0xff] }
 0x320   :  { %v2988_v51 = vadd.f32 %v2809_v34, %v2504_v37  ;;  %v15127_v22 = vrot.slane %v15126_v41, 1  ;;  %v15129_v35 = vrot.slane %v15128_v27, 1  ;;  %v3887_v10 = vrot.slane %v3672_v57, 2  ;;  %v15138_v40 = vld [vmem:[#allocation85_spill] sm:$0xff] }
 0x321   :  { %15125 = vst [vmem:[#allocation12_spill] sm:$0xff] %v12272_v17  ;;  %v4135_v12 = vadd.f32 %v12201_v29, %v4064_v21  ;;  %v12283_v46 = vsel %vm1145_vm2, %v6288_v58, %v6289_v4  ;;  %v15133_v16 = vrot.slane %v15132_v38, 2  ;;  %v4715_v37 = vcombine.high %v15135_v31, %v15135_v31 }
 0x322   :  { %v2330_v59 = vsel %vm1145_vm2, %v15127_v22, %v2329_v0  ;;  %v3417_v20 = vsel %vm1145_vm2, %v15129_v35, %v3416_v63  ;;  %v3118_v36 = vadd.f32 %v15130_v1, %v2988_v51  ;;  %15131 = vst [vmem:[#allocation75_spill] sm:$0xff] %v12283_v46  ;;  %v8024_v47 = vpack.i.bf16 %v12283_v46, %v15134_v42  ;;  %v15139_v63 = vld [vmem:[#allocation34_spill] sm:$0xff]  ;;  %v15143_v1 = vld [vmem:[#allocation23_spill] sm:$0xff] }
 0x323   :  { %v2506_v44 = vadd.f32 %v2330_v59, %v2012_v18  ;;  %v2814_v6 = vsel %vm1615_vm1, %v15133_v16, %v2813_v2  ;;  %v15137_v57 = vrot.slane %v15136_v45, 2  ;;  %v5602_v34 = vrot.slane %v15138_v40, 2  ;;  %v15141_v18 = vld [vmem:[#allocation84_spill] sm:$0xff] }
 0x324   :  { %v3589_v5 = vadd.f32 %v3417_v20, %v3118_v36  ;;  %v5606_v0 = vsel %vm5031_vm4, %v15135_v31, -inf  ;;  %v15140_v24 = vrot.slane %v15139_v63, 2  ;;  %8025 = vrot.lane.b32.xlu0 %v8024_v47, %s8220_s28  ;;  %v4732_v51 = vcombine.high %v15141_v18, %v15141_v18 }
 0x325   :  { %v5596_v21 = vmax.f32 %v15136_v45, %v15137_v57  ;;  %v2990_v19 = vadd.f32 %v2814_v6, %v2506_v44  ;;  %v5607_v58 = vrot.slane %v5606_v0, 4  ;;  %v5613_v4 = vsel %vm5031_vm4, %v4715_v37, -inf  ;;  %v15144_v57 = vld [vmem:[#allocation24_spill] sm:$0xff] }
 0x326   :  { %v3888_v2 = vsel %vm1615_vm1, %v15140_v24, %v3887_v10  ;;  %v5603_v22 = vmax.f32 %v15138_v40, %v5602_v34  ;;  %v5614_v59 = vrot.slane %v5613_v4, 4  ;;  %v12308_v27 = vsel %vm4230_vm3, %v4198_v32, -inf  ;;  %v15142_v10 = vld [vmem:[#allocation86_spill] sm:$0xff] }
 0x327   :  { %v3120_v52 = vadd.f32 %v12272_v17, %v2990_v19  ;;  %v4060_v41 = vadd.f32 %v3888_v2, %v3589_v5  ;;  %v5597_v35 = vrot.slane %v5596_v21, 1  ;;  %v5608_v20 = vmax.f32 %v5606_v0, %v5607_v58  ;;  %v15145_v0 = vld [vmem:[#allocation40_spill] sm:$0xff] }
 0x328   :  { %v5630_v44 = vrot.slane %v15142_v10, 2  ;;  %v5604_v16 = vrot.slane %v5603_v22, 1  ;;  %v5615_v6 = vmax.f32 %v5613_v4, %v5614_v59  ;;  %v4199_v47 = vmax.f32 %v4135_v12, 0.0 }
 0x329   :  { %v3591_v36 = vadd.f32 %v15143_v1, %v3120_v52  ;;  %v4131_v38 = vadd.f32 %v12201_v29, %v4060_v41  ;;  %v5609_v31 = vrot.slane %v5608_v20, 2  ;;  %v5634_v37 = vsel %vm5031_vm4, %v15141_v18, -inf  ;;  %v15161_v1 = vld [vmem:[#allocation102_spill] sm:$0xff] }
 0x32a   :  { %v5641_v45 = vsel %vm5031_vm4, %v4732_v51, -inf  ;;  %v5605_v19 = vmax.f32 %v5603_v22, %v5604_v16  ;;  %v5616_v5 = vrot.slane %v5615_v6, 2  ;;  %v5631_v40 = vmax.f32 %v15142_v10, %v5630_v44 }
 0x32b   :  { %v4062_v32 = vadd.f32 %v15144_v57, %v3591_v36  ;;  %v5610_v34 = vmax.f32 %v5608_v20, %v5609_v31  ;;  %v5625_v63 = vrot.slane %v15145_v0, 1  ;;  %v5635_v24 = vrot.slane %v5634_v37, 4 }
 0x32c   :  { %v5642_v2 = vrot.slane %v5641_v45, 4  ;;  %v4195_v12 = vmax.f32 %v4131_v38, 0.0  ;;  %v5598_v4 = vmax.f32 %v5596_v21, %v5597_v35  ;;  %v5617_v52 = vmax.f32 %v5615_v6, %v5616_v5  ;;  %v12328_v21 = vpop.permute.xlu1 %656 }
 0x32d   :  { %v4133_v58 = vadd.f32 %v12201_v29, %v4062_v32  ;;  %v12322_v18 = vadd.f32 %v12242_v23, %v12245_v9  ;;  %v5611_v51 = vrot.slane %v5610_v34, 1  ;;  %v5636_v41 = vmax.f32 %v5634_v37, %v5635_v24 }
 0x32e   :  { %v5643_v22 = vmax.f32 %v5641_v45, %v5642_v2  ;;  %v5618_v36 = vrot.slane %v5617_v52, 1  ;;  %v5632_v10 = vrot.slane %v5631_v40, 1  ;;  %v6133_v20 = vsel %vm6056_vm5, %v5605_v19, %v5598_v4 }
 0x32f   :  { %v4197_v59 = vmax.f32 %v4133_v58, 0.0  ;;  %v12326_v44 = vsel %vm4230_vm3, %v4199_v47, -inf  ;;  %v5612_v16 = vmax.f32 %v5610_v34, %v5611_v51  ;;  %v5637_v31 = vrot.slane %v5636_v41, 2 }
 0x330   :  { %v5644_v38 = vrot.slane %v5643_v22, 2  ;;  %v4276_v35 = vsel %vm4230_vm3, %v4195_v12, -inf  ;;  %v5619_v9 = vmax.f32 %v5617_v52, %v5618_v36  ;;  %v5626_v6 = vmax.f32 %v15145_v0, %v5625_v63 }
 0x331   :  { %v4277_v23 = vsel %vm4230_vm3, %v4197_v59, -inf  ;;  %v5638_v45 = vmax.f32 %v5636_v41, %v5637_v31  ;;  %v6134_v19 = vsel %vm6058_vm6, %v5612_v16, %v6133_v20  ;;  %v5633_v5 = vmax.f32 %v5631_v40, %v5632_v10  ;;  %v893_v16 = vpop.permute.xlu0 %892 }
 0x332   :  { %v4278_v37 = vmax.f32 %v4276_v35, %v4277_v23  ;;  %v5645_v32 = vmax.f32 %v5643_v22, %v5644_v38  ;;  %v6135_v47 = vsel %vm6060_vm7, %v5619_v9, %v6134_v19  ;;  %v12337_v34 = vmul.f32 %v8537_v53, %v12328_v21 }
 0x333   :  { %v12341_v24 = vmul.f32 %v8539_v54, %v12328_v21  ;;  %v5639_v0 = vrot.slane %v5638_v45, 1  ;;  %v6136_v12 = vsel %vm14440_vm8, %v5626_v6, %v6135_v47  ;;  %v12347_v40 = vmul.f32 %v8522_v49, %v12328_v21 }
 0x334   :  { %15146 = vst [vmem:[#allocation41_spill] sm:$0xff] %v12337_v34  ;;  %v4614_v2 = vcombine.high %v4278_v37, %v4278_v37  ;;  %v4621_v58 = vrot.slane %v4278_v37, %v15105_v30  ;;  %v5646_v63 = vrot.slane %v5645_v32, 1  ;;  %v12351_v4 = vmul.f32 %v8543_v56, %v12328_v21  ;;  %v15162_v34 = vld [vmem:[#allocation66_spill] sm:$0xff] }
 0x335   :  { %15147 = vst [vmem:[#allocation29_spill] sm:$0xff] %v12341_v24  ;;  %15148 = vst [vmem:[#allocation94_spill] sm:$0xff] %v12347_v40  ;;  %v12355_v52 = vmul.f32 %v8556_v60, %v12328_v21  ;;  %v5640_v59 = vmax.f32 %v5638_v45, %v5639_v0  ;;  %v6137_v20 = vsel %vm14437_vm9, %v5633_v5, %v6136_v12  ;;  %v15151_v0 = vld [vmem:[#allocation121_spill] sm:$0xff]  ;;  %v15157_v8 = vrot.slane %v15156_v33, 1 }
 0x336   :  { %v12358_v51 = vrot.slane %v4614_v2, %v15105_v30  ;;  %v4629_v41 = vcombine.high %v4621_v58, %v4621_v58  ;;  %v5452_v22 = vsel %vm5031_vm4, %v4621_v58, -inf  ;;  %v5647_v10 = vmax.f32 %v5645_v32, %v5646_v63 }
 0x337   :  { %v5453_v36 = vrot.slane %v5452_v22, 4  ;;  %v6138_v38 = vsel %vm6066_vm10, %v5640_v59, %v6137_v20  ;;  %v12370_v23 = vmul.f32 %v8541_v55, %v12328_v21  ;;  %v12383_v5 = vmul.f32 %v8558_v61, %v12328_v21 }
 0x338   :  { %15149 = vst [vmem:[#allocation50_spill] sm:$0xff] %v12358_v51  ;;  %v12364_v31 = vsel %vm5031_vm4, %v4629_v41, -inf  ;;  %v12374_v9 = vsel %vm5031_vm4, %v12358_v51, -inf  ;;  %v6139_v6 = vsel %vm6068_vm11, %v5647_v10, %v6138_v38  ;;  %v12387_v47 = vmul.f32 %v8560_v62, %v12328_v21 }
 0x339   :  { %15150 = vst [vmem:[#allocation95_spill] sm:$0xff] %v12374_v9  ;;  %v6185_v19 = vrot.slane %v6139_v6, 7  ;;  %v12389_v2 = vmax.f32 %v5452_v22, %v5453_v36  ;;  %v1014_v63 = vmul.f32 %v8537_v53, %v15151_v0  ;;  %v1484_v12 = vmul.f32 %v8539_v54, %v15151_v0 }
 0x33a   :  { %v713_v22 = vmul.f32 %v8522_v49, %v15151_v0  ;;  %v1954_v6 = vmul.f32 %v8541_v55, %v15151_v0  ;;  %v1956_v41 = vmul.f32 %v8541_v55, %v15153_v15  ;;  %v2114_v35 = vmul.f32 %v8543_v56, %v15151_v0 }
 0x33b   :  { %v12398_v59 = vsel %vm161_vm0, 0.0, %v6185_v19  ;;  %v12401_v10 = vsel %vm161_vm0, %v6185_v19, 0.0  ;;  %v1237_v38 = vrot.slane %v1014_v63, 1  ;;  %v1707_v32 = vrot.slane %v1484_v12, 2  ;;  %v15155_v12 = vld [vmem:[#allocation37_spill] sm:$0xff] }
 0x33c   :  { %15152 = vst [vmem:[#allocation33_spill] sm:$0xff] %v12398_v59  ;;  %v6297_v36 = vrot.slane %v12398_v59, 1  ;;  %v6298_v20 = vrot.slane %v12401_v10, 1  ;;  %v2598_v19 = vmul.f32 %v8556_v60, %v15151_v0  ;;  %v3062_v63 = vmul.f32 %v8558_v61, %v15151_v0 }
 0x33d   :  { %v3064_v37 = vmul.f32 %v8558_v61, %v15153_v15  ;;  %v12424_v58 = vmul.f32 %v8558_v61, %v15155_v12  ;;  %v2342_v51 = vrot.slane %v2114_v35, 1  ;;  %v3209_v48 = vmul.f32 %v8560_v62, %v15151_v0 }
 0x33e   :  { %v12416_v45 = vsel %vm1145_vm2, %v6297_v36, %v6298_v20  ;;  %v2826_v9 = vrot.slane %v2598_v19, 2  ;;  %v3680_v36 = vmul.f32 %v12209_v50, %v15151_v0  ;;  %v1015_v20 = vmul.f32 %v8537_v53, %v893_v16  ;;  %v15159_v19 = vld [vmem:[#allocation16_spill] sm:$0xff] }
 0x33f   :  { %15154 = vst [vmem:[#allocation44_spill] sm:$0xff] %v12416_v45  ;;  %v8029_v7 = vpack.i.bf16 %v12416_v45, %v15134_v42  ;;  %v1238_v15 = vsel %vm1145_vm2, %v15157_v8, %v1237_v38  ;;  %v1485_v12 = vmul.f32 %v8539_v54, %v893_v16  ;;  %v3429_v28 = vrot.slane %v3209_v48, 1  ;;  %v15158_v42 = vld [vmem:[#allocation101_spill] sm:$0xff] }
 0x340   :  { %v1399_v35 = vadd.f32 %v1238_v15, %v15158_v42  ;;  %v15160_v45 = vrot.slane %v15159_v19, 2  ;;  %v2017_v0 = vadd.f32 %v15161_v1, %v12221_v39  ;;  %v3900_v17 = vrot.slane %v3680_v36, 2  ;;  %v15164_v39 = vld [vmem:[#allocation17_spill] sm:$0xff] }
 0x341   :  { %8030 = vrot.lane.b32.xlu1 %v8029_v7, %s8215_s21  ;;  %v1239_v11 = vrot.slane %v1015_v20, 1  ;;  %v1709_v24 = vrot.slane %v1485_v12, 2  ;;  %v2018_v33 = vadd.f32 %v1954_v6, %v12239_v43  ;;  %v2115_v40 = vmul.f32 %v8543_v56, %v893_v16  ;;  %v15166_v43 = vld [vmem:[#allocation46_spill] sm:$0xff] }
 0x342   :  { %v1708_v57 = vsel %vm1615_vm1, %v15160_v45, %v1707_v32  ;;  %v15163_v7 = vrot.slane %v15162_v34, 1  ;;  %v2599_v15 = vmul.f32 %v8556_v60, %v893_v16  ;;  %v15165_v1 = vrot.slane %v15164_v39, 2  ;;  %v15167_v34 = vld [vmem:[#allocation103_spill] sm:$0xff] }
 0x343   :  { %v1869_v8 = vadd.f32 %v1708_v57, %v1399_v35  ;;  %v1240_v42 = vsel %vm1145_vm2, %v1237_v38, %v1239_v11  ;;  %v1710_v45 = vsel %vm1615_vm1, %v1707_v32, %v1709_v24  ;;  %v2344_v6 = vrot.slane %v2115_v40, 1  ;;  %v15168_v32 = vld [vmem:[#allocation38_spill] sm:$0xff]  ;;  %v15170_v40 = vld [vmem:[#allocation64_spill] sm:$0xff] }
 0x344   :  { %v2343_v48 = vsel %vm1145_vm2, %v15163_v7, %v2342_v51  ;;  %v2827_v36 = vsel %vm1615_vm1, %v15165_v1, %v2826_v9  ;;  %v1400_v20 = vadd.f32 %v1240_v42, %v713_v22  ;;  %v2828_v12 = vrot.slane %v2599_v15, 2  ;;  %v15169_v42 = vld [vmem:[#allocation47_spill] sm:$0xff]  ;;  %v15172_v1 = vld [vmem:[#allocation45_spill] sm:$0xff] }
 0x345   :  { %v2511_v19 = vadd.f32 %v2343_v48, %v2017_v0  ;;  %v2019_v57 = vadd.f32 %v15166_v43, %v1869_v8  ;;  %v3123_v7 = vadd.f32 %v15167_v34, %v12236_v26  ;;  %v3124_v46 = vadd.f32 %v3062_v63, %v12322_v18 }
 0x346   :  { %v3210_v11 = vmul.f32 %v8560_v62, %v893_v16  ;;  %v1870_v38 = vadd.f32 %v1710_v45, %v1400_v20  ;;  %v2345_v24 = vsel %vm1145_vm2, %v2342_v51, %v2344_v6  ;;  %v2829_v48 = vsel %vm1615_vm1, %v2826_v9, %v2828_v12  ;;  %v15173_v20 = vld [vmem:[#allocation48_spill] sm:$0xff]  ;;  %v15174_v9 = vld [vmem:[#allocation69_spill] sm:$0xff]  ;;  %v15176_v6 = vld [vmem:[#allocation78_spill] sm:$0xff] }
 0x347   :  { %v2995_v35 = vadd.f32 %v2827_v36, %v2511_v19  ;;  %v2513_v0 = vadd.f32 %v15168_v32, %v2019_v57  ;;  %v2512_v22 = vadd.f32 %v2345_v24, %v2018_v33  ;;  %v15171_v15 = vrot.slane %v15170_v40, 1  ;;  %v15181_v40 = vld [vmem:[#allocation80_spill] sm:$0xff] }
 0x348   :  { %v3431_v39 = vrot.slane %v3210_v11, 1  ;;  %v2020_v26 = vadd.f32 %v1956_v41, %v1870_v38  ;;  %v3681_v45 = vmul.f32 %v12209_v50, %v893_v16  ;;  %v15175_v33 = vrot.slane %v15174_v9, 2  ;;  %v15185_v9 = vld [vmem:[#allocation27_spill] sm:$0xff] }
 0x349   :  { %v3125_v8 = vadd.f32 %v15169_v42, %v2995_v35  ;;  %v3430_v19 = vsel %vm1145_vm2, %v15171_v15, %v3429_v28  ;;  %v2997_v18 = vadd.f32 %v15172_v1, %v2513_v0  ;;  %v2996_v36 = vadd.f32 %v2829_v48, %v2512_v22  ;;  %v15177_v35 = vld [vmem:[#allocation55_spill] sm:$0xff]  ;;  %v15180_v48 = vld [vmem:[#allocation28_spill] sm:$0xff]  ;;  %v15182_v1 = vld [vmem:[#allocation25_spill] sm:$0xff] }
 0x34a   :  { %v3594_v63 = vadd.f32 %v3430_v19, %v3123_v7  ;;  %v3432_v51 = vsel %vm1145_vm2, %v3429_v28, %v3431_v39  ;;  %v3901_v57 = vsel %vm1615_vm1, %v15175_v33, %v3900_v17  ;;  %v2514_v12 = vadd.f32 %v15176_v6, %v2020_v26  ;;  %v15178_v7 = vld [vmem:[#allocation49_spill] sm:$0xff]  ;;  %v15179_v0 = vld [vmem:[#allocation79_spill] sm:$0xff] }
 0x34b   :  { %v3596_v43 = vadd.f32 %v15173_v20, %v3125_v8  ;;  %v3127_v34 = vadd.f32 %v15177_v35, %v2997_v18  ;;  %v3595_v11 = vadd.f32 %v3432_v51, %v3124_v46  ;;  %v3902_v41 = vrot.slane %v3681_v45, 2  ;;  %v12496_v20 = vpop.permute.xlu1 %665 }
 0x34c   :  { %v3126_v38 = vadd.f32 %v3064_v37, %v2996_v36  ;;  %v4065_v24 = vadd.f32 %v3901_v57, %v3594_v63  ;;  %v6342_v16 = vrot.slane %v12398_v59, 2  ;;  %v2998_v28 = vadd.f32 %v15179_v0, %v2514_v12 }
 0x34d   :  { %v4067_v32 = vadd.f32 %v15178_v7, %v3596_v43  ;;  %v3598_v22 = vadd.f32 %v15180_v48, %v3127_v34  ;;  %v3903_v42 = vsel %vm1615_vm1, %v3900_v17, %v3902_v41  ;;  %v6343_v8 = vrot.slane %v12401_v10, 2  ;;  %v15184_v17 = vld [vmem:[#allocation26_spill] sm:$0xff] }
 0x34e   :  { %v3597_v15 = vadd.f32 %v15181_v40, %v3126_v38  ;;  %v4066_v19 = vadd.f32 %v3903_v42, %v3595_v11  ;;  %v4136_v46 = vadd.f32 %v12201_v29, %v4065_v24  ;;  %v12487_v39 = vmul.f32 %v12209_v50, %v12328_v21  ;;  %v15189_v38 = vld [vmem:[#allocation88_spill] sm:$0xff] }
 0x34f   :  { %v4138_v37 = vadd.f32 %v12201_v29, %v4067_v32  ;;  %v3128_v26 = vadd.f32 %v12424_v58, %v2998_v28  ;;  %v4069_v18 = vadd.f32 %v15182_v1, %v3598_v22  ;;  %v12492_v63 = vsel %vm1615_vm1, %v6342_v16, %v6343_v8  ;;  %v15186_v58 = vld [vmem:[#allocation124_spill] sm:$0xff] }
 0x350   :  { %15183 = vst [vmem:[#allocation74_spill] sm:$0xff] %v12492_v63  ;;  %v4068_v10 = vadd.f32 %v15184_v17, %v3597_v15  ;;  %v4137_v45 = vadd.f32 %v12201_v29, %v4066_v19  ;;  %v4200_v36 = vmax.f32 %v4136_v46, 0.0  ;;  %v8034_v57 = vpack.i.bf16 %v12492_v63, %v15186_v58  ;;  %v15214_v63 = vld [vmem:[#allocation111_spill] sm:$0xff] }
 0x351   :  { %v4202_v51 = vmax.f32 %v4138_v37, 0.0  ;;  %v3599_v21 = vadd.f32 %v15185_v9, %v3128_v26  ;;  %v4140_v33 = vadd.f32 %v12201_v29, %v4069_v18  ;;  %v5455_v6 = vrot.slane %v12389_v2, 2  ;;  %v15198_v26 = vld [vmem:[#allocation36_spill] sm:$0xff] }
 0x352   :  { %v4139_v12 = vadd.f32 %v12201_v29, %v4068_v10  ;;  %v4201_v35 = vmax.f32 %v4137_v45, 0.0  ;;  %v4280_v34 = vsel %vm4230_vm3, %v4200_v36, -inf  ;;  %v15187_v11 = vrot.slane %v12364_v31, 4  ;;  %8035 = vrot.lane.b32.xlu0 %v8034_v57, %s8214_s0 }
 0x353   :  { %v4070_v24 = vadd.f32 %v15189_v38, %v3599_v21  ;;  %v4204_v7 = vmax.f32 %v4140_v33, 0.0  ;;  %v12515_v32 = vmul.f32 %v8560_v62, %v12496_v20  ;;  %v12519_v0 = vmax.f32 %v12308_v27, %v4280_v34 }
 0x354   :  { %v12509_v41 = vmax.f32 %v12364_v31, %v15187_v11  ;;  %v4283_v28 = vsel %vm4230_vm3, %v4201_v35, -inf  ;;  %v4285_v48 = vsel %vm4230_vm3, %v4202_v51, -inf  ;;  %v4203_v22 = vmax.f32 %v4139_v12, 0.0  ;;  %v15203_v35 = vld [vmem:[#allocation105_spill] sm:$0xff] }
 0x355   :  { %15190 = vst [vmem:[#allocation18_spill] sm:$0xff] %v12515_v32  ;;  %15191 = vst [vmem:[#allocation72_spill] sm:$0xff] %v12519_v0  ;;  %v4141_v31 = vadd.f32 %v12201_v29, %v4070_v24  ;;  %v12525_v42 = vmax.f32 %v12326_v44, %v4283_v28  ;;  %v4286_v8 = vsel %vm4230_vm3, %v4204_v7, -inf  ;;  %v12529_v40 = vmax.f32 %v12389_v2, %v5455_v6 }
 0x356   :  { %15188 = vst [vmem:[#allocation6_spill] sm:$0xff] %v12509_v41  ;;  %v12531_v15 = vmax.f32 %v4285_v48, %v4286_v8  ;;  %v12535_v27 = vmul.f32 %v8558_v61, %v12496_v20  ;;  %v12539_v19 = vmul.f32 %v12209_v50, %v12496_v20  ;;  %v1041_v2 = vmul.f32 %v8537_v53, %v15198_v26 }
 0x357   :  { %15192 = vst [vmem:[#allocation5_spill] sm:$0xff] %v12525_v42  ;;  %15193 = vst [vmem:[#allocation42_spill] sm:$0xff] %v12529_v40  ;;  %v4205_v46 = vmax.f32 %v4141_v31, 0.0  ;;  %v12543_v44 = vrot.slane %v12525_v42, %v15105_v30  ;;  %v12552_v18 = vrot.slane %v12519_v0, %v15105_v30  ;;  %v12556_v17 = vmul.f32 %v8522_v49, %v15198_v26  ;;  %v15239_v42 = vld [vmem:[#allocation117_spill] sm:$0xff] }
 0x358   :  { %15194 = vst [vmem:[#allocation14_spill] sm:$0xff] %v12531_v15  ;;  %15195 = vst [vmem:[#allocation59_spill] sm:$0xff] %v12535_v27  ;;  %v12560_v10 = vmul.f32 %v8539_v54, %v15198_v26  ;;  %v4288_v45 = vsel %vm4230_vm3, %v4203_v22, -inf  ;;  %v12566_v51 = vrot.slane %v12531_v15, %v15105_v30  ;;  %v1282_v9 = vrot.slane %v1041_v2, 1  ;;  %v15209_v22 = vld [vmem:[#allocation109_spill] sm:$0xff] }
 0x359   :  { %15196 = vst [vmem:[#allocation8_spill] sm:$0xff] %v12539_v19  ;;  %15197 = vst [vmem:[#allocation51_spill] sm:$0xff] %v12543_v44  ;;  %v4289_v36 = vsel %vm4230_vm3, %v4205_v46, -inf  ;;  %v12576_v12 = vsel %vm5031_vm4, %v12543_v44, -inf  ;;  %v15204_v34 = vrot.slane %v15203_v35, 1  ;;  %v2141_v38 = vmul.f32 %v8543_v56, %v15198_v26  ;;  %v15206_v46 = vld [vmem:[#allocation108_spill] sm:$0xff] }
 0x35a   :  { %15199 = vst [vmem:[#allocation15_spill] sm:$0xff] %v12552_v18  ;;  %15200 = vst [vmem:[#allocation61_spill] sm:$0xff] %v12566_v51  ;;  %v12568_v21 = vmax.f32 %v4288_v45, %v4289_v36  ;;  %v1752_v6 = vrot.slane %v12560_v10, 2  ;;  %v12585_v24 = vmul.f32 %v8556_v60, %v15198_v26  ;;  %v1972_v31 = vmul.f32 %v8541_v55, %v15198_v26  ;;  %v938_v45 = vpop.permute.xlu1 %937 }
 0x35b   :  { %15202 = vst [vmem:[#allocation30_spill] sm:$0xff] %v12576_v12  ;;  %v1283_v11 = vsel %vm1145_vm2, %v15204_v34, %v1282_v9  ;;  %v2387_v10 = vrot.slane %v2141_v38, 1  ;;  %v15207_v34 = vld [vmem:[#allocation106_spill] sm:$0xff]  ;;  %v15210_v1 = vrot.slane %v15209_v22, 1  ;;  %v15211_v38 = vld [vmem:[#allocation89_spill] sm:$0xff]  ;;  %v3236_v36 = vmul.f32 %v8560_v62, %v15198_v26  ;;  %v12692_v12 = vpop.permute.xlu0 %660 }
 0x35c   :  { %15201 = vst [vmem:[#allocation19_spill] sm:$0xff] %v12568_v21  ;;  %v12593_v48 = vrot.slane %v12568_v21, %v15105_v30  ;;  %v1417_v2 = vadd.f32 %v1283_v11, %v15206_v46  ;;  %v15208_v28 = vrot.slane %v15207_v34, 2  ;;  %v12609_v7 = vadd.f32 %v1972_v31, %v12090_v3 }
 0x35d   :  { %v2388_v8 = vsel %vm1145_vm2, %v15210_v1, %v2387_v10  ;;  %v2871_v11 = vrot.slane %v12585_v24, 2  ;;  %v3012_v46 = vadd.f32 %v15211_v38, %v12112_v14  ;;  %v3707_v3 = vmul.f32 %v12209_v50, %v15198_v26  ;;  %v15213_v38 = vld [vmem:[#allocation10_spill] sm:$0xff] }
 0x35e   :  { %15205 = vst [vmem:[#allocation58_spill] sm:$0xff] %v12593_v48  ;;  %v1753_v33 = vsel %vm1615_vm1, %v15208_v28, %v1752_v6  ;;  %v12623_v28 = vsel %vm5031_vm4, %v12593_v48, -inf  ;;  %v1042_v1 = vmul.f32 %v8537_v53, %v938_v45  ;;  %v3474_v24 = vrot.slane %v3236_v36, 1  ;;  %v15216_v36 = vld [vmem:[#allocation110_spill] sm:$0xff] }
 0x35f   :  { %15212 = vst [vmem:[#allocation31_spill] sm:$0xff] %v12623_v28  ;;  %v12628_v31 = vadd.f32 %v1753_v33, %v1417_v2  ;;  %v1512_v14 = vmul.f32 %v8539_v54, %v938_v45  ;;  %v2142_v22 = vmul.f32 %v8543_v56, %v938_v45  ;;  %v2529_v35 = vadd.f32 %v2388_v8, %v15213_v38  ;;  %v6813_v38 = vld [vmem:[%s14095_s3] sm:$0xff] }
 0x360   :  { %v3945_v57 = vrot.slane %v3707_v3, 2  ;;  %v1284_v34 = vrot.slane %v1042_v1, 1  ;;  %v3237_v37 = vmul.f32 %v8560_v62, %v938_v45  ;;  %v3080_v43 = vmul.f32 %v8558_v61, %v15198_v26 }
 0x361   :  { %v15215_v59 = vrot.slane %v15214_v63, 1  ;;  %v2626_v2 = vmul.f32 %v8556_v60, %v938_v45  ;;  %v15217_v58 = vrot.slane %v15216_v36, 2  ;;  %v1754_v3 = vrot.slane %v1512_v14, 2  ;;  %v6814_v63 = vld [vmem:[%s14095_s3 + $0x8] sm:$0xff] }
 0x362   :  { %v3476_v1 = vrot.slane %v3237_v37, 1  ;;  %v3142_v26 = vadd.f32 %v3080_v43, %v3012_v46  ;;  %v1285_v36 = vsel %vm1145_vm2, %v1282_v9, %v1284_v34  ;;  %v3708_v14 = vmul.f32 %v12209_v50, %v938_v45  ;;  %v15221_v45 = vld [vmem:[#allocation98_spill] sm:$0xff]  ;;  %v15222_v34 = vld [vmem:[#allocation57_spill] sm:$0xff] }
 0x363   :  { %v3475_v33 = vsel %vm1145_vm2, %v15215_v59, %v3474_v24  ;;  %v2872_v48 = vsel %vm1615_vm1, %v15217_v58, %v2871_v11  ;;  %v15218_v59 = vld [vmem:[#allocation112_spill] sm:$0xff]  ;;  %v2389_v58 = vrot.slane %v2142_v22, 1  ;;  %v7846_v15 = vpack.c.bf16 %v6814_v63, %v6813_v38 }
 0x364   :  { %v3612_v8 = vadd.f32 %v3475_v33, %v12115_v25  ;;  %v15219_v16 = vrot.slane %v15218_v59, 2  ;;  %v12655_v51 = vadd.f32 %v2872_v48, %v2529_v35  ;;  %v3477_v37 = vsel %vm1145_vm2, %v3474_v24, %v3476_v1 }
 0x365   :  { %v2873_v33 = vrot.slane %v2626_v2, 2  ;;  %v3613_v21 = vadd.f32 %v3477_v37, %v3142_v26  ;;  %v1418_v44 = vadd.f32 %v1285_v36, %v12556_v17  ;;  %v1755_v43 = vsel %vm1615_vm1, %v1752_v6, %v1754_v3 }
 0x366   :  { %v3946_v28 = vsel %vm1615_vm1, %v15219_v16, %v3945_v57  ;;  %v3947_v46 = vrot.slane %v3708_v14, 2  ;;  %v14399_v59 = vmov 0.0|0.0   ;;  %v15220_v16 = vld [vmem:[#allocation97_spill] sm:$0xff]  ;;  %v2390_v48 = vsel %vm1145_vm2, %v2387_v10, %v2389_v58  ;;  %v15228_v14 = vld [vmem:[#allocation100_spill] sm:$0xff] }
 0x367   :  { %v4083_v25 = vadd.f32 %v3946_v28, %v3612_v8  ;;  %7845 = vmatprep.subr.bf16.mxu0 %v14399_v59  ;;  %v4749_v9 = vcombine.high %v15220_v16, %v15220_v16  ;;  %7888 = vmatprep.subr.bf16.mxu1 %v14399_v59  ;;  %v5651_v35 = vrot.slane %v15221_v45, 2  ;;  %v15223_v28 = vrot.slane %v15222_v34, 4 }
 0x368   :  { %7847 = vmatpush1.bf16.msra.mxu0 %v7846_v15  ;;  %v5662_v6 = vsel %vm5031_vm4, %v15220_v16, -inf  ;;  %7897 = vmatpush1.bf16.msra.mxu1 %v7846_v15  ;;  %v3948_v22 = vsel %vm1615_vm1, %v3945_v57, %v3947_v46  ;;  %v2874_v63 = vsel %vm1615_vm1, %v2871_v11, %v2873_v33  ;;  %v15224_v15 = vld [vmem:[#allocation99_spill] sm:$0xff]  ;;  %v4766_v46 = vcombine.high %v15228_v14, %v15228_v14 }
 0x369   :  { %v5657_v17 = vmax.f32 %v15222_v34, %v15223_v28  ;;  %v4154_v24 = vadd.f32 %v12201_v29, %v4083_v25  ;;  %v5663_v2 = vrot.slane %v5662_v6, 4  ;;  %v5669_v8 = vsel %vm5031_vm4, %v4749_v9, -inf  ;;  %7848 = vmatprep.subr.bf16.mxu0 %v14399_v59  ;;  %7889 = vmatprep.subr.bf16.mxu1 %v14399_v59  ;;  %v15226_v57 = vld [vmem:[#allocation67_spill] sm:$0xff] }
 0x36a   :  { %v4084_v10 = vadd.f32 %v3948_v22, %v3613_v21  ;;  %v5652_v3 = vmax.f32 %v15221_v45, %v5651_v35  ;;  %v5670_v38 = vrot.slane %v5669_v8, 4  ;;  %v15225_v36 = vrot.slane %v15224_v15, 2 }
 0x36b   :  { %v5658_v1 = vrot.slane %v5657_v17, 2  ;;  %v5664_v26 = vmax.f32 %v5662_v6, %v5663_v2  ;;  %v15227_v25 = vrot.slane %v15226_v57, 4  ;;  %v2530_v45 = vadd.f32 %v2390_v48, %v12609_v7 }
 0x36c   :  { %v5680_v58 = vmax.f32 %v15224_v15, %v15225_v36  ;;  %v5653_v16 = vrot.slane %v5652_v3, 1  ;;  %v5671_v9 = vmax.f32 %v5669_v8, %v5670_v38  ;;  %v5690_v11 = vsel %vm5031_vm4, %v15228_v14, -inf }
 0x36d   :  { %v5685_v37 = vmax.f32 %v15226_v57, %v15227_v25  ;;  %v5659_v21 = vmax.f32 %v5657_v17, %v5658_v1  ;;  %v5665_v35 = vrot.slane %v5664_v26, 2  ;;  %v4218_v33 = vmax.f32 %v4154_v24, 0.0 }
 0x36e   :  { %v4155_v28 = vadd.f32 %v12201_v29, %v4084_v10  ;;  %v5672_v22 = vrot.slane %v5671_v9, 2  ;;  %v5681_v15 = vrot.slane %v5680_v58, 1  ;;  %v5691_v57 = vrot.slane %v5690_v11, 4 }
 0x36f   :  { %v5686_v34 = vrot.slane %v5685_v37, 2  ;;  %v5660_v6 = vrot.slane %v5659_v21, 1  ;;  %v5666_v2 = vmax.f32 %v5664_v26, %v5665_v35  ;;  %v5654_v25 = vmax.f32 %v5652_v3, %v5653_v16 }
 0x370   :  { %v5673_v17 = vmax.f32 %v5671_v9, %v5672_v22  ;;  %v5697_v8 = vsel %vm5031_vm4, %v4766_v46, -inf  ;;  %v5692_v1 = vmax.f32 %v5690_v11, %v5691_v57  ;;  %v12694_v24 = vadd.f32 %v1755_v43, %v1418_v44 }
 0x371   :  { %v5687_v36 = vmax.f32 %v5685_v37, %v5686_v34  ;;  %v5661_v59 = vmax.f32 %v5659_v21, %v5660_v6  ;;  %v5667_v7 = vrot.slane %v5666_v2, 1  ;;  %v5698_v38 = vrot.slane %v5697_v8, 4 }
 0x372   :  { %v4219_v29 = vmax.f32 %v4155_v28, 0.0  ;;  %v5674_v10 = vrot.slane %v5673_v17, 1  ;;  %v5682_v37 = vmax.f32 %v5680_v58, %v5681_v15  ;;  %v5693_v35 = vrot.slane %v5692_v1, 2 }
 0x373   :  { %v5688_v48 = vrot.slane %v5687_v36, 1  ;;  %v6140_v26 = vsel %vm6056_vm5, %v5661_v59, %v5654_v25  ;;  %v5668_v14 = vmax.f32 %v5666_v2, %v5667_v7  ;;  %v5699_v3 = vmax.f32 %v5697_v8, %v5698_v38 }
 0x374   :  { %v12698_v16 = vsel %vm4230_vm3, %v4218_v33, -inf  ;;  %v12700_v46 = vadd.f32 %v2874_v63, %v2530_v45  ;;  %v5675_v21 = vmax.f32 %v5673_v17, %v5674_v10  ;;  %v5694_v34 = vmax.f32 %v5692_v1, %v5693_v35  ;;  %v948_v45 = vpop.permute.xlu1 %947 }
 0x375   :  { %v5689_v9 = vmax.f32 %v5687_v36, %v5688_v48  ;;  %v5700_v11 = vrot.slane %v5699_v3, 2  ;;  %v6141_v44 = vsel %vm6058_vm6, %v5668_v14, %v6140_v26  ;;  %v2147_v43 = vmul.f32 %v8543_v56, %v12692_v12  ;;  %v12730_v26 = vpop.permute.xlu0 %669 }
 0x376   :  { %v12706_v59 = vsel %vm4230_vm3, %v4219_v29, -inf  ;;  %v6142_v58 = vsel %vm6060_vm7, %v5675_v21, %v6141_v44  ;;  %v2631_v33 = vmul.f32 %v8556_v60, %v12692_v12  ;;  %v3242_v63 = vmul.f32 %v8560_v62, %v12692_v12 }
 0x377   :  { %v5695_v28 = vrot.slane %v5694_v34, 1  ;;  %v5701_v6 = vmax.f32 %v5699_v3, %v5700_v11  ;;  %v6143_v22 = vsel %vm14440_vm8, %v5682_v37, %v6142_v58  ;;  %v735_v2 = vmul.f32 %v8522_v49, %v12692_v12 }
 0x378   :  { %v6144_v15 = vsel %vm14437_vm9, %v5689_v9, %v6143_v22  ;;  %v12719_v36 = vmul.f32 %v8537_v53, %v12692_v12  ;;  %v12723_v57 = vmul.f32 %v8539_v54, %v12692_v12  ;;  %v3713_v25 = vmul.f32 %v12209_v50, %v12692_v12 }
 0x379   :  { %v5696_v17 = vmax.f32 %v5694_v34, %v5695_v28  ;;  %v5702_v8 = vrot.slane %v5701_v6, 1  ;;  %v2397_v7 = vrot.slane %v2147_v43, 1  ;;  %v1048_v48 = vmul.f32 %v8537_v53, %v948_v45 }
 0x37a   :  { %v2881_v1 = vrot.slane %v2631_v33, 2  ;;  %v3484_v38 = vrot.slane %v3242_v63, 1  ;;  %v1518_v29 = vmul.f32 %v8539_v54, %v948_v45  ;;  %v2148_v10 = vmul.f32 %v8543_v56, %v948_v45 }
 0x37b   :  { %v5703_v14 = vmax.f32 %v5701_v6, %v5702_v8  ;;  %v6145_v37 = vsel %vm6066_vm10, %v5696_v17, %v6144_v15  ;;  %v1294_v35 = vrot.slane %v1048_v48, 1  ;;  %v2632_v3 = vmul.f32 %v8556_v60, %v948_v45 }
 0x37c   :  { %v14404_v21 = vrot.slane %v12719_v36, 1  ;;  %v14403_v9 = vrot.slane %v12723_v57, 2  ;;  %v3955_v34 = vrot.slane %v3713_v25, 2  ;;  %v3243_v11 = vmul.f32 %v8560_v62, %v948_v45 }
 0x37d   :  { %v12738_v44 = vsel %vm6068_vm11, %v5703_v14, %v6145_v37  ;;  %v1764_v43 = vrot.slane %v1518_v29, 2  ;;  %v2399_v58 = vrot.slane %v2148_v10, 1  ;;  %v3714_v33 = vmul.f32 %v12209_v50, %v948_v45 }
 0x37e   :  { %v14405_v63 = vrot.slane %v12738_v44, 7  ;;  %v15229_v28 = vrot.slane %v12351_v4, 1  ;;  %v1295_v22 = vsel %vm1145_vm2, %v14404_v21, %v1294_v35  ;;  %v2883_v15 = vrot.slane %v2632_v3, 2 }
 0x37f   :  { %v15230_v25 = vrot.slane %v12355_v52, 2  ;;  %v15232_v8 = vrot.slane %v12387_v47, 1  ;;  %v3486_v48 = vrot.slane %v3243_v11, 1  ;;  %v3957_v4 = vrot.slane %v3714_v33, 2  ;;  %v15235_v52 = vld [vmem:[#allocation7_spill] sm:$0xff]  ;;  %v943_v33 = vpop.permute.xlu0 %942 }
 0x380   :  { %v12745_v6 = vsel %vm1145_vm2, %v15229_v28, %v2397_v7  ;;  %v12763_v29 = vsel %vm161_vm0, 0.0, %v14405_v63  ;;  %v15234_v10 = vrot.slane %v12487_v39, 2  ;;  %v1044_v37 = vmul.f32 %v8537_v53, %v15235_v52 }
 0x381   :  { %v12753_v17 = vsel %vm1615_vm1, %v15230_v25, %v2881_v1  ;;  %v12758_v45 = vsel %vm1145_vm2, %v15232_v8, %v3484_v38  ;;  %15233 = vst [vmem:[#allocation87_spill] sm:$0xff] %v12763_v29  ;;  %v1514_v47 = vmul.f32 %v8539_v54, %v15235_v52  ;;  %v8039_v35 = vpack.i.bf16 %v12763_v29, %v12194_v13 }
 0x382   :  { %15231 = vst [vmem:[#allocation82_spill] sm:$0xff] %v12753_v17  ;;  %v12768_v14 = vsel %vm1615_vm1, %v15234_v10, %v3955_v34  ;;  %v12776_v3 = vadd.f32 %v1295_v22, %v735_v2  ;;  %v12781_v11 = vsel %vm1615_vm1, %v14403_v9, %v1764_v43  ;;  %v12784_v39 = vsel %vm1145_vm2, %v2397_v7, %v2399_v58 }
 0x383   :  { %v12787_v28 = vsel %vm1615_vm1, %v2881_v1, %v2883_v15  ;;  %v733_v25 = vmul.f32 %v8522_v49, %v15235_v52  ;;  %v1287_v8 = vrot.slane %v1044_v37, 1  ;;  %v2144_v2 = vmul.f32 %v8543_v56, %v15235_v52  ;;  %8040 = vrot.lane.b32.xlu1 %v8039_v35, %s8216_s24 }
 0x384   :  { %15236 = vst [vmem:[#allocation13_spill] sm:$0xff] %v12787_v28  ;;  %v12795_v22 = vsel %vm1145_vm2, %v3484_v38, %v3486_v48  ;;  %v12798_v43 = vsel %vm1615_vm1, %v3955_v34, %v3957_v4  ;;  %v2628_v7 = vmul.f32 %v8556_v60, %v15235_v52  ;;  %v3239_v1 = vmul.f32 %v8560_v62, %v15235_v52  ;;  %v15237_v4 = vld [vmem:[#allocation113_spill] sm:$0xff]  ;;  %v15245_v28 = vld [vmem:[#allocation118_spill] sm:$0xff] }
 0x385   :  { %v1757_v58 = vrot.slane %v1514_v47, 2  ;;  %v1974_v15 = vmul.f32 %v8541_v55, %v15235_v52  ;;  %v12808_v10 = vmul.f32 %v8541_v55, %v12692_v12  ;;  %v1045_v38 = vmul.f32 %v8537_v53, %v943_v33 }
 0x386   :  { %v2392_v48 = vrot.slane %v2144_v2, 1  ;;  %v3710_v34 = vmul.f32 %v12209_v50, %v15235_v52  ;;  %v15238_v37 = vrot.slane %v15237_v4, 1  ;;  %v1515_v9 = vmul.f32 %v8539_v54, %v943_v33 }
 0x387   :  { %v2876_v47 = vrot.slane %v2628_v7, 2  ;;  %v3082_v21 = vmul.f32 %v8558_v61, %v15235_v52  ;;  %v1289_v63 = vrot.slane %v1045_v38, 1  ;;  %v2037_v18 = vadd.f32 %v15239_v42, %v12628_v31  ;;  %v15241_v38 = vld [vmem:[#allocation114_spill] sm:$0xff]  ;;  %v15243_v31 = vld [vmem:[#allocation115_spill] sm:$0xff] }
 0x388   :  { %v1288_v35 = vsel %vm1145_vm2, %v15238_v37, %v1287_v8  ;;  %v3084_v2 = vmul.f32 %v8558_v61, %v12692_v12  ;;  %v3479_v40 = vrot.slane %v3239_v1, 1  ;;  %v1759_v41 = vrot.slane %v1515_v9, 2  ;;  %v15240_v37 = vld [vmem:[#allocation116_spill] sm:$0xff] }
 0x389   :  { %v2145_v0 = vmul.f32 %v8543_v56, %v943_v33  ;;  %v1290_v4 = vsel %vm1145_vm2, %v1287_v8, %v1289_v63  ;;  %v1419_v13 = vadd.f32 %v1288_v35, %v15240_v37  ;;  %v2038_v7 = vadd.f32 %v1974_v15, %v12694_v24  ;;  %v15247_v24 = vld [vmem:[#allocation119_spill] sm:$0xff] }
 0x38a   :  { %v2629_v19 = vmul.f32 %v8556_v60, %v943_v33  ;;  %v3950_v52 = vrot.slane %v3710_v34, 2  ;;  %v15242_v32 = vrot.slane %v15241_v38, 2  ;;  %v15244_v27 = vrot.slane %v15243_v31, 1 }
 0x38b   :  { %v2394_v9 = vrot.slane %v2145_v0, 1  ;;  %v15246_v17 = vrot.slane %v15245_v28, 2  ;;  %v3143_v15 = vadd.f32 %v15247_v24, %v12655_v51  ;;  %v1420_v35 = vadd.f32 %v1290_v4, %v733_v25  ;;  %v6815_v0 = vld [vmem:[%s14095_s3 + $0x10] sm:$0xff] }
 0x38c   :  { %v1758_v42 = vsel %vm1615_vm1, %v15242_v32, %v1757_v58  ;;  %v2393_v12 = vsel %vm1145_vm2, %v15244_v27, %v2392_v48  ;;  %v2878_v8 = vrot.slane %v2629_v19, 2  ;;  %v1760_v34 = vsel %vm1615_vm1, %v1757_v58, %v1759_v41  ;;  %v6816_v27 = vld [vmem:[%s14095_s3 + $0x18] sm:$0xff]  ;;  %v15248_v51 = vld [vmem:[#allocation120_spill] sm:$0xff] }
 0x38d   :  { %v2531_v1 = vadd.f32 %v2393_v12, %v2037_v18  ;;  %v2877_v63 = vsel %vm1615_vm1, %v15246_v17, %v2876_v47  ;;  %v2395_v37 = vsel %vm1145_vm2, %v2392_v48, %v2394_v9  ;;  %v3240_v32 = vmul.f32 %v8560_v62, %v943_v33  ;;  %v15250_v12 = vld [vmem:[#allocation122_spill] sm:$0xff] }
 0x38e   :  { %v2532_v18 = vadd.f32 %v2395_v37, %v2038_v7  ;;  %v3144_v17 = vadd.f32 %v3082_v21, %v12700_v46  ;;  %v15249_v28 = vrot.slane %v15248_v51, 1  ;;  %v2879_v25 = vsel %vm1615_vm1, %v2876_v47, %v2878_v8  ;;  %v12869_v8 = vld [vmem:[%s14094_s2] ss:$0 sm:$0xff] }
 0x38f   :  { %v3015_v19 = vadd.f32 %v2877_v63, %v2531_v1  ;;  %v3481_v58 = vrot.slane %v3240_v32, 1  ;;  %v3711_v4 = vmul.f32 %v12209_v50, %v943_v33  ;;  %v15251_v9 = vrot.slane %v15250_v12, 2 }
 0x390   :  { %v3480_v41 = vsel %vm1145_vm2, %v15249_v28, %v3479_v40  ;;  %v3016_v38 = vadd.f32 %v2879_v25, %v2532_v18  ;;  %v7849_v1 = vpack.c.bf16 %v6816_v27, %v6815_v0  ;;  %v1890_v63 = vadd.f32 %v1760_v34, %v1420_v35  ;;  %v15257_v25 = vld [vmem:[#allocation41_spill] sm:$0xff] }
 0x391   :  { %v3614_v48 = vadd.f32 %v3480_v41, %v3143_v15  ;;  %v3145_v31 = vadd.f32 %v12383_v5, %v3015_v19  ;;  %v3951_v7 = vsel %vm1615_vm1, %v15251_v9, %v3950_v52  ;;  %v3482_v46 = vsel %vm1145_vm2, %v3479_v40, %v3481_v58  ;;  %v15259_v9 = vld [vmem:[#allocation94_spill] sm:$0xff] }
 0x392   :  { %v3952_v21 = vrot.slane %v3711_v4, 2  ;;  %v3146_v37 = vadd.f32 %v3084_v2, %v3016_v38  ;;  %v3615_v51 = vadd.f32 %v3482_v46, %v3144_v17  ;;  %7850 = vmatpush1.bf16.msra.mxu0 %v7849_v1  ;;  %v15252_v50 = vrot.slane %v12738_v44, 7  ;;  %7898 = vmatpush1.bf16.msra.mxu1 %v7849_v1 }
 0x393   :  { %v4085_v24 = vadd.f32 %v3951_v7, %v3614_v48  ;;  %v3616_v47 = vadd.f32 %v12758_v45, %v3145_v31  ;;  %v6300_v2 = vrot.slane %v12763_v29, 1  ;;  %v15253_v15 = vmov 0.0|0.0  }
 0x394   :  { %v12863_v33 = vsel %vm161_vm0, %v15252_v50, 0.0  ;;  %v3953_v5 = vsel %vm1615_vm1, %v3950_v52, %v3952_v21  ;;  %7851 = vmatprep.subr.bf16.mxu0 %v15253_v15  ;;  %7890 = vmatprep.subr.bf16.mxu1 %v15253_v15  ;;  %v1889_v44 = vadd.f32 %v1758_v42, %v1419_v13  ;;  %v3617_v35 = vadd.f32 %v12795_v22, %v3146_v37  ;;  %v15255_v42 = vld [vmem:[#allocation75_spill] sm:$0xff] }
 0x395   :  { %v4156_v40 = vadd.f32 %v12869_v8, %v4085_v24  ;;  %v6301_v45 = vrot.slane %v12863_v33, 1  ;;  %v4086_v34 = vadd.f32 %v3953_v5, %v3615_v51  ;;  %v4087_v52 = vadd.f32 %v12768_v14, %v3616_v47 }
 0x396   :  { %v1049_v27 = vmul.f32 %v8537_v53, %v12496_v20  ;;  %v12885_v18 = vmul.f32 %v8537_v53, %v12730_v26  ;;  %v2039_v19 = vadd.f32 %v12370_v23, %v1889_v44  ;;  %v2040_v17 = vadd.f32 %v12808_v10, %v1890_v63 }
 0x397   :  { %v4220_v32 = vmax.f32 %v4156_v40, 0.0  ;;  %v12879_v0 = vsel %vm1145_vm2, %v6300_v2, %v6301_v45  ;;  %v4157_v13 = vadd.f32 %v12869_v8, %v4086_v34  ;;  %v4158_v22 = vadd.f32 %v12869_v8, %v4087_v52 }
 0x398   :  { %15254 = vst [vmem:[#allocation63_spill] sm:$0xff] %v12879_v0  ;;  %v8044_v14 = vpack.i.bf16 %v12879_v0, %v15255_v42  ;;  %v15256_v41 = vrot.slane %v12719_v36, 1  ;;  %v15258_v58 = vrot.slane %v15257_v25, 1  ;;  %v4088_v4 = vadd.f32 %v12798_v43, %v3617_v35 }
 0x399   :  { %v4310_v28 = vsel %vm4230_vm3, %v4220_v32, -inf  ;;  %v4221_v23 = vmax.f32 %v4157_v13, 0.0  ;;  %v1296_v31 = vrot.slane %v1049_v27, 1  ;;  %v4222_v12 = vmax.f32 %v4158_v22, 0.0 }
 0x39a   :  { %v1293_v48 = vsel %vm1145_vm2, %v15258_v58, %v15256_v41  ;;  %v4311_v38 = vmax.f32 %v12698_v16, %v4310_v28  ;;  %8045 = vrot.lane.b32.xlu0 %v8044_v14, %s8218_s26  ;;  %8050 = vrot.lane.b32.xlu1 %v8044_v14, %s8215_s21  ;;  %v1297_v10 = vrot.slane %v12885_v18, 1  ;;  %v12907_v36 = vmul.f32 %v8539_v54, %v12730_v26  ;;  %v1907_v14 = vpop.permute.xlu1 %1906 }
 0x39b   :  { %v1421_v7 = vadd.f32 %v1293_v48, %v15259_v9  ;;  %v4313_v1 = vsel %vm4230_vm3, %v4221_v23, -inf  ;;  %v1519_v16 = vmul.f32 %v8539_v54, %v12496_v20  ;;  %v12915_v46 = vadd.f32 %v12781_v11, %v12776_v3  ;;  %v15261_v11 = vld [vmem:[#allocation29_spill] sm:$0xff] }
 0x39c   :  { %v4801_v43 = vcombine.high %v4311_v38, %v4311_v38  ;;  %v4808_v63 = vrot.slane %v4311_v38, %v15105_v30  ;;  %v12918_v21 = vadd.f32 %v12745_v6, %v2039_v19  ;;  %v12921_v24 = vadd.f32 %v12784_v39, %v2040_v17 }
 0x39d   :  { %v4314_v37 = vmax.f32 %v12706_v59, %v4313_v1  ;;  %v12925_v51 = vadd.f32 %v12869_v8, %v4088_v4  ;;  %v736_v47 = vmul.f32 %v8522_v49, %v12496_v20  ;;  %v1298_v50 = vsel %vm1145_vm2, %v1296_v31, %v1297_v10 }
 0x39e   :  { %v15260_v3 = vrot.slane %v12723_v57, 2  ;;  %v15262_v6 = vrot.slane %v15261_v11, 2  ;;  %v4816_v39 = vcombine.high %v4808_v63, %v4808_v63  ;;  %v5760_v59 = vsel %vm5031_vm4, %v4808_v63, -inf }
 0x39f   :  { %v4825_v40 = vrot.slane %v4314_v37, %v15105_v30  ;;  %v14419_v2 = vrot.slane %v12907_v36, 2  ;;  %v12941_v45 = vsel %vm4230_vm3, %v4222_v12, -inf  ;;  %v12944_v44 = vrot.slane %v4801_v43, %v15105_v30 }
 0x3a0   :  { %v1763_v5 = vsel %vm1615_vm1, %v15262_v6, %v15260_v3  ;;  %v1766_v35 = vrot.slane %v1519_v16, 2  ;;  %v1423_v52 = vadd.f32 %v1298_v50, %v736_v47  ;;  %v1977_v32 = vmul.f32 %v8541_v55, %v12496_v20  ;;  %v953_v50 = vpop.permute.xlu0 %952  ;;  %v15268_v16 = vld [vmem:[#allocation8_spill] sm:$0xff] }
 0x3a1   :  { %v1891_v34 = vadd.f32 %v1763_v5, %v1421_v7  ;;  %v4833_v57 = vcombine.high %v4825_v40, %v4825_v40  ;;  %v2149_v27 = vmul.f32 %v8543_v56, %v12496_v20  ;;  %v4818_v19 = vcombine.high %v4314_v37, %v4314_v37 }
 0x3a2   :  { %v5761_v13 = vrot.slane %v5760_v59, 4  ;;  %v5788_v22 = vsel %vm5031_vm4, %v4825_v40, -inf  ;;  %v12953_v42 = vmul.f32 %v8543_v56, %v12730_v26  ;;  %v12956_v17 = vsel %vm5031_vm4, %v4816_v39, -inf }
 0x3a3   :  { %v5789_v28 = vrot.slane %v5788_v22, 4  ;;  %v1768_v41 = vsel %vm1615_vm1, %v1766_v35, %v14419_v2  ;;  %v2041_v25 = vadd.f32 %v1977_v32, %v1891_v34  ;;  %v12962_v58 = vsel %vm5031_vm4, %v4833_v57, -inf  ;;  %v13003_v35 = vld [vmem:[%s14093_s1 + $0x8] ss:$0 sm:$0xff] }
 0x3a4   :  { %v14420_v48 = vrot.slane %v12953_v42, 1  ;;  %v2633_v4 = vmul.f32 %v8556_v60, %v12496_v20  ;;  %v12969_v23 = vmul.f32 %v8556_v60, %v12730_v26  ;;  %v1893_v31 = vadd.f32 %v1768_v41, %v1423_v52 }
 0x3a5   :  { %v12971_v38 = vmax.f32 %v5788_v22, %v5789_v28  ;;  %v2401_v12 = vrot.slane %v2149_v27, 1  ;;  %v1979_v9 = vmul.f32 %v8541_v55, %v1907_v14  ;;  %v12975_v7 = vrot.slane %v4818_v19, %v15105_v30 }
 0x3a6   :  { %v14418_v1 = vrot.slane %v12969_v23, 2  ;;  %v12979_v43 = vmul.f32 %v8543_v56, %v1907_v14  ;;  %v12982_v20 = vmul.f32 %v8556_v60, %v1907_v14  ;;  %v12984_v63 = vmax.f32 %v5760_v59, %v5761_v13 }
 0x3a7   :  { %v2403_v47 = vsel %vm1145_vm2, %v2401_v12, %v14420_v48  ;;  %v2885_v11 = vrot.slane %v2633_v4, 2  ;;  %v3087_v6 = vmul.f32 %v8558_v61, %v1907_v14  ;;  %v12993_v5 = vmul.f32 %v8560_v62, %v1907_v14 }
 0x3a8   :  { %v2535_v3 = vadd.f32 %v2403_v47, %v2041_v25  ;;  %v12996_v40 = vadd.f32 %v1979_v9, %v1893_v31  ;;  %v3245_v59 = vmul.f32 %v8560_v62, %v12730_v26  ;;  %v3716_v34 = vmul.f32 %v13003_v35, %v12730_v26  ;;  %v15263_v31 = vld [vmem:[#allocation82_spill] sm:$0xff] }
 0x3a9   :  { %v2887_v57 = vsel %vm1615_vm1, %v2885_v11, %v14418_v1  ;;  %v1051_v27 = vmul.f32 %v8537_v53, %v953_v50  ;;  %v13014_v19 = vmul.f32 %v13003_v35, %v1907_v14  ;;  %v2151_v28 = vmul.f32 %v8543_v56, %v953_v50  ;;  %v15264_v53 = vld [vmem:[#allocation13_spill] sm:$0xff] }
 0x3aa   :  { %v3489_v13 = vrot.slane %v3245_v59, 1  ;;  %v3960_v22 = vrot.slane %v3716_v34, 2  ;;  %v3019_v41 = vadd.f32 %v2887_v57, %v2535_v3  ;;  %v3086_v4 = vmul.f32 %v8558_v61, %v12730_v26  ;;  %v6817_v3 = vld [vmem:[%s14095_s3 + $0x20] sm:$0xff]  ;;  %v6818_v59 = vld [vmem:[%s14095_s3 + $0x28] sm:$0xff] }
 0x3ab   :  { %v3017_v12 = vadd.f32 %v15263_v31, %v12918_v21  ;;  %v1299_v9 = vrot.slane %v1051_v27, 1  ;;  %v1521_v47 = vmul.f32 %v8539_v54, %v953_v50  ;;  %v3018_v14 = vadd.f32 %v15264_v53, %v12921_v24  ;;  %v15265_v21 = vld [vmem:[#allocation59_spill] sm:$0xff]  ;;  %v15266_v24 = vld [vmem:[#allocation18_spill] sm:$0xff] }
 0x3ac   :  { %v3246_v11 = vmul.f32 %v8560_v62, %v953_v50  ;;  %v2404_v34 = vrot.slane %v2151_v28, 1  ;;  %v13033_v57 = vmul.f32 %v8556_v60, %v953_v50  ;;  %v3717_v54 = vmul.f32 %v13003_v35, %v953_v50  ;;  %v15271_v50 = vld [vmem:[#allocation73_spill] sm:$0xff] }
 0x3ad   :  { %v3147_v27 = vadd.f32 %v15265_v21, %v3017_v12  ;;  %v3148_v31 = vadd.f32 %v3086_v4, %v3018_v14  ;;  %v15267_v53 = vrot.slane %v15266_v24, 1  ;;  %v15269_v25 = vrot.slane %v15268_v16, 2  ;;  %v15270_v12 = vld [vmem:[#allocation92_spill] sm:$0xff] }
 0x3ae   :  { %v3491_v39 = vrot.slane %v3246_v11, 1  ;;  %v3962_v1 = vrot.slane %v3717_v54, 2  ;;  %v4223_v28 = vmax.f32 %v12925_v51, 0.0  ;;  %v7852_v2 = vpack.c.bf16 %v6818_v59, %v6817_v3 }
 0x3af   :  { %v3490_v37 = vsel %vm1145_vm2, %v15267_v53, %v3489_v13  ;;  %v3961_v32 = vsel %vm1615_vm1, %v15269_v25, %v3960_v22  ;;  %v6333_v21 = vrot.slane %v15270_v12, 2  ;;  %v6334_v4 = vrot.slane %v15271_v50, 2 }
 0x3b0   :  { %v3618_v52 = vadd.f32 %v3490_v37, %v3147_v27  ;;  %v3492_v48 = vsel %vm1145_vm2, %v3489_v13, %v3491_v39  ;;  %v6345_v14 = vrot.slane %v12763_v29, 2  ;;  %v13048_v24 = vadd.f32 %v3087_v6, %v3019_v41  ;;  %7853 = vmatpush1.bf16.msra.mxu0 %v7852_v2  ;;  %7899 = vmatpush1.bf16.msra.mxu1 %v7852_v2 }
 0x3b1   :  { %v3964_v11 = vrot.slane %v13014_v19, 2  ;;  %v3619_v16 = vadd.f32 %v3492_v48, %v3148_v31  ;;  %v1300_v51 = vsel %vm1145_vm2, %v1297_v10, %v1299_v9  ;;  %v1769_v37 = vrot.slane %v1521_v47, 2  ;;  %7854 = vmatprep.subr.bf16.mxu0 %v15253_v15  ;;  %7891 = vmatprep.subr.bf16.mxu1 %v15253_v15  ;;  %v1911_v9 = vpop.permute.xlu0 %1910 }
 0x3b2   :  { %v4089_v53 = vadd.f32 %v3961_v32, %v3618_v52  ;;  %v3963_v39 = vsel %vm1615_vm1, %v3960_v22, %v3962_v1  ;;  %v6346_v13 = vrot.slane %v12863_v33, 2  ;;  %v15272_v6 = vrot.slane %v12953_v42, 1  ;;  %v2053_v32 = vpop.permute.xlu1 %2052 }
 0x3b3   :  { %v2888_v52 = vrot.slane %v13033_v57, 2  ;;  %v4090_v2 = vadd.f32 %v3963_v39, %v3619_v16  ;;  %v4318_v10 = vsel %vm4230_vm3, %v4223_v28, -inf  ;;  %v13065_v1 = vsel %vm1615_vm1, %v6333_v21, %v6334_v4 }
 0x3b4   :  { %v2405_v48 = vsel %vm1145_vm2, %v15272_v6, %v2404_v34  ;;  %v4160_v18 = vadd.f32 %v12869_v8, %v4089_v53  ;;  %15273 = vst [vmem:[#allocation9_spill] sm:$0xff] %v13065_v1  ;;  %v13068_v33 = vsel %vm1615_vm1, %v6345_v14, %v6346_v13  ;;  %v737_v22 = vmul.f32 %v8522_v49, %v12730_v26 }
 0x3b5   :  { %15274 = vst [vmem:[#allocation77_spill] sm:$0xff] %v13068_v33  ;;  %v4161_v42 = vadd.f32 %v12869_v8, %v4090_v2  ;;  %v8054_v25 = vpack.i.bf16 %v13068_v33, %v13065_v1  ;;  %v2154_v47 = vmul.f32 %v8543_v56, %v2053_v32  ;;  %v2638_v3 = vmul.f32 %v8556_v60, %v2053_v32 }
 0x3b6   :  { %v4224_v41 = vmax.f32 %v4160_v18, 0.0  ;;  %v13078_v59 = vmul.f32 %v8560_v62, %v2053_v32  ;;  %v1424_v34 = vadd.f32 %v1300_v51, %v737_v22  ;;  %v15275_v49 = vrot.slane %v12907_v36, 2 }
 0x3b7   :  { %v4225_v57 = vmax.f32 %v4161_v42, 0.0  ;;  %8055 = vrot.lane.b32.xlu0 %v8054_v25, %s8217_s25  ;;  %8060 = vrot.lane.b32.xlu1 %v8054_v25, %s8214_s0  ;;  %v1978_v31 = vmul.f32 %v8541_v55, %v12730_v26  ;;  %v13090_v21 = vmul.f32 %v13003_v35, %v2053_v32  ;;  %v2153_v4 = vmul.f32 %v8543_v56, %v1911_v9 }
 0x3b8   :  { %v4316_v27 = vsel %vm4230_vm3, %v4224_v41, -inf  ;;  %v1770_v54 = vsel %vm1615_vm1, %v15275_v49, %v1769_v37  ;;  %v1980_v16 = vmul.f32 %v8541_v55, %v1911_v9  ;;  %v2637_v36 = vmul.f32 %v8556_v60, %v1911_v9 }
 0x3b9   :  { %v4317_v28 = vmax.f32 %v12941_v45, %v4316_v27  ;;  %v1894_v50 = vadd.f32 %v1770_v54, %v1424_v34  ;;  %v4319_v14 = vsel %vm4230_vm3, %v4225_v57, -inf  ;;  %v2042_v53 = vadd.f32 %v1978_v31, %v12915_v46  ;;  %v6820_v27 = vld [vmem:[%s14095_s3 + $0x38] sm:$0xff] }
 0x3ba   :  { %v4320_v51 = vmax.f32 %v4318_v10, %v4319_v14  ;;  %v2409_v39 = vrot.slane %v2154_v47, 1  ;;  %v2893_v45 = vrot.slane %v2638_v3, 2  ;;  %v2407_v6 = vrot.slane %v2153_v4, 1 }
 0x3bb   :  { %v4835_v37 = vcombine.high %v4317_v28, %v4317_v28  ;;  %v4842_v26 = vrot.slane %v4317_v28, %v15105_v30  ;;  %v2044_v13 = vadd.f32 %v1980_v16, %v1894_v50  ;;  %v2891_v2 = vrot.slane %v2637_v36, 2 }
 0x3bc   :  { %v4852_v32 = vcombine.high %v4320_v51, %v4320_v51  ;;  %v4859_v56 = vrot.slane %v4320_v51, %v15105_v30  ;;  %v3496_v22 = vrot.slane %v13078_v59, 1  ;;  %v3967_v55 = vrot.slane %v13090_v21, 2  ;;  %v7926_v21 = vpop.permute.xlu0 %7925  ;;  %v15279_v51 = vld [vmem:[#allocation11_spill] sm:$0xff] }
 0x3bd   :  { %v4850_v18 = vcombine.high %v4842_v26, %v4842_v26  ;;  %v15276_v46 = vrot.slane %v12969_v23, 2  ;;  %v15277_v10 = vrot.slane %v12979_v43, 1  ;;  %v2536_v41 = vadd.f32 %v2405_v48, %v2042_v53  ;;  %v6819_v48 = vld [vmem:[%s14095_s3 + $0x30] sm:$0xff] }
 0x3be   :  { %v13108_v25 = vrot.slane %v4835_v37, %v15105_v30  ;;  %v2410_v47 = vsel %vm1145_vm2, %v2407_v6, %v2409_v39  ;;  %v3088_v3 = vmul.f32 %v8558_v61, %v1911_v9  ;;  %v3248_v59 = vmul.f32 %v8560_v62, %v1911_v9 }
 0x3bf   :  { %v2889_v60 = vsel %vm1615_vm1, %v15276_v46, %v2888_v52  ;;  %v2408_v42 = vsel %vm1145_vm2, %v15277_v10, %v2407_v6  ;;  %v5816_v34 = vsel %vm5031_vm4, %v4842_v26, -inf  ;;  %v2538_v57 = vadd.f32 %v2410_v47, %v2044_v13  ;;  %v15280_v26 = vld [vmem:[#allocation12_spill] sm:$0xff]  ;;  %v15283_v46 = vld [vmem:[#allocation23_spill] sm:$0xff]  ;;  %v7931_v10 = vpop.permute.xlu1 %7930 }
 0x3c0   :  { %v2537_v23 = vadd.f32 %v2408_v42, %v12996_v40  ;;  %v15278_v52 = vrot.slane %v12982_v20, 2  ;;  %v13125_v61 = vrot.slane %v4852_v32, %v15105_v30  ;;  %v4867_v62 = vcombine.high %v4859_v56, %v4859_v56  ;;  %v15282_v32 = vld [vmem:[#allocation20_spill] sm:$0xff] }
 0x3c1   :  { %v13128_v49 = vsel %vm5031_vm4, %v4850_v18, -inf  ;;  %v2894_v40 = vsel %vm1615_vm1, %v2891_v2, %v2893_v45  ;;  %v5844_v20 = vsel %vm5031_vm4, %v4859_v56, -inf  ;;  %v3020_v54 = vadd.f32 %v2889_v60, %v2536_v41 }
 0x3c2   :  { %v2892_v43 = vsel %vm1615_vm1, %v15278_v52, %v2891_v2  ;;  %v3022_v28 = vadd.f32 %v2894_v40, %v2538_v57  ;;  %v5817_v50 = vrot.slane %v5816_v34, 4  ;;  %v3494_v4 = vrot.slane %v3248_v59, 1  ;;  %v15285_v52 = vld [vmem:[#allocation24_spill] sm:$0xff] }
 0x3c3   :  { %v3021_v31 = vadd.f32 %v2892_v43, %v2537_v23  ;;  %v3719_v14 = vmul.f32 %v13003_v35, %v1911_v9  ;;  %v7855_v16 = vpack.c.bf16 %v6820_v27, %v6819_v48  ;;  %v3150_v36 = vadd.f32 %v3088_v3, %v3020_v54  ;;  %v15284_v23 = vld [vmem:[#allocation21_spill] sm:$0xff]  ;;  %v7936_v48 = vpop.permute.xlu0 %7935 }
 0x3c4   :  { %v3152_v39 = vadd.f32 %v15280_v26, %v3022_v28  ;;  %v5845_v13 = vrot.slane %v5844_v20, 4  ;;  %v15281_v45 = vrot.slane %v12993_v5, 1  ;;  %v3497_v2 = vsel %vm1145_vm2, %v3494_v4, %v3496_v22  ;;  %v6821_v5 = vld [vmem:[%s14095_s3 + $0x40] sm:$0xff]  ;;  %v6822_v22 = vld [vmem:[%s14095_s3 + $0x48] sm:$0xff] }
 0x3c5   :  { %v3151_v37 = vadd.f32 %v15279_v51, %v3021_v31  ;;  %v3965_v18 = vrot.slane %v3719_v14, 2  ;;  %7856 = vmatpush1.bf16.msra.mxu0 %v7855_v16  ;;  %7900 = vmatpush1.bf16.msra.mxu1 %v7855_v16  ;;  %v3621_v9 = vadd.f32 %v3497_v2, %v3150_v36  ;;  %v13150_v42 = vmax.f32 %v5816_v34, %v5817_v50  ;;  %v15286_v50 = vld [vmem:[#allocation71_spill] sm:$0xff]  ;;  %v7941_v36 = vpop.permute.xlu1 %7940 }
 0x3c6   :  { %v3495_v6 = vsel %vm1145_vm2, %v15281_v45, %v3494_v4  ;;  %v3623_v60 = vadd.f32 %v15283_v46, %v3152_v39  ;;  %7857 = vmatprep.subr.bf16.mxu0 %v15253_v15  ;;  %v7928_v47 = vunpack.i.h.bf16 %v7926_v21  ;;  %7892 = vmatprep.subr.bf16.mxu1 %v15253_v15  ;;  %v13159_v27 = vmax.f32 %v5844_v20, %v5845_v13  ;;  %v6823_v39 = vld [vmem:[%s14095_s3 + $0x50] sm:$0xff]  ;;  %v6824_v13 = vld [vmem:[%s14095_s3 + $0x58] sm:$0xff]  ;;  %v6825_v46 = vld [vmem:[%s14095_s3 + $0x60] sm:$0xff] }
 0x3c7   :  { %v3620_v35 = vadd.f32 %v3495_v6, %v13048_v24  ;;  %v3622_v56 = vadd.f32 %v15282_v32, %v3151_v37  ;;  %v3966_v24 = vsel %vm1615_vm1, %v3964_v11, %v3965_v18  ;;  %v3968_v41 = vsel %vm1615_vm1, %v3965_v18, %v3967_v55  ;;  %v15287_v37 = vld [vmem:[#allocation2_spill] sm:$0xff] }
 0x3c8   :  { %v4092_v59 = vadd.f32 %v3968_v41, %v3621_v9  ;;  %v4094_v43 = vadd.f32 %v15285_v52, %v3623_v60  ;;  %v13162_v34 = vsel %vm5031_vm4, %v4867_v62, -inf  ;;  %v7927_v19 = vunpack.i.l.bf16 %v7926_v21  ;;  %v6826_v60 = vld [vmem:[%s14095_s3 + $0x68] sm:$0xff] }
 0x3c9   :  { %v4091_v3 = vadd.f32 %v3966_v24, %v3620_v35  ;;  %v4093_v57 = vadd.f32 %v15284_v23, %v3622_v56  ;;  %v7858_v40 = vpack.c.bf16 %v6822_v22, %v6821_v5  ;;  %v7933_v28 = vunpack.i.h.bf16 %v7931_v10  ;;  %v15309_v23 = vld [vmem:[#allocation95_spill] sm:$0xff] }
 0x3ca   :  { %v4163_v55 = vadd.f32 %v12869_v8, %v4092_v59  ;;  %v4165_v31 = vadd.f32 %v12869_v8, %v4094_v43  ;;  %v6698_v4 = vsel %vm4230_vm3, %v15286_v50, %v7928_v47  ;;  %v7938_v20 = vunpack.i.h.bf16 %v7936_v48  ;;  %v13203_v59 = vpop.permute.xlu0 %7945 }
 0x3cb   :  { %v4162_v11 = vadd.f32 %v12869_v8, %v4091_v3  ;;  %v4164_v54 = vadd.f32 %v12869_v8, %v4093_v57  ;;  %7859 = vmatpush1.bf16.msra.mxu0 %v7858_v40  ;;  %7901 = vmatpush1.bf16.msra.mxu1 %v7858_v40  ;;  %v7932_v51 = vunpack.i.l.bf16 %v7931_v10  ;;  %v6697_v8 = vsel %vm4230_vm3, %v15287_v37, %v7927_v19  ;;  %v6828_v19 = vld [vmem:[%s14095_s3 + $0x78] sm:$0xff] }
 0x3cc   :  { %v4227_v14 = vmax.f32 %v4163_v55, 0.0  ;;  %v4229_v16 = vmax.f32 %v4165_v31, 0.0  ;;  %7860 = vmatprep.subr.bf16.mxu0 %v15253_v15  ;;  %7893 = vmatprep.subr.bf16.mxu1 %v15253_v15  ;;  %v7937_v26 = vunpack.i.l.bf16 %v7936_v48  ;;  %v6714_v32 = vsel %vm14438_vm12, %v6698_v4, %v7933_v28  ;;  %v6827_v48 = vld [vmem:[%s14095_s3 + $0x70] sm:$0xff]  ;;  %v15308_v31 = vld [vmem:[#allocation6_spill] sm:$0xff] }
 0x3cd   :  { %v4226_v62 = vmax.f32 %v4162_v11, 0.0  ;;  %v4228_v21 = vmax.f32 %v4164_v54, 0.0  ;;  %v7943_v56 = vunpack.i.h.bf16 %v7941_v36  ;;  %v6730_v5 = vsel %vm14439_vm13, %v6714_v32, %v7938_v20  ;;  %v13226_v20 = vpop.permute.xlu1 %7950 }
 0x3ce   :  { %v4324_v2 = vsel %vm4230_vm3, %v4227_v14, -inf  ;;  %v4325_v18 = vsel %vm4230_vm3, %v4229_v16, -inf  ;;  %v7861_v22 = vpack.c.bf16 %v6824_v13, %v6823_v39  ;;  %v13201_v3 = vsel %vm14438_vm12, %v6697_v8, %v7932_v51 }
 0x3cf   :  { %v4321_v45 = vsel %vm4230_vm3, %v4226_v62, -inf  ;;  %v4322_v6 = vsel %vm4230_vm3, %v4228_v21, -inf  ;;  %v13184_v9 = vmax.f32 %v4324_v2, %v4325_v18  ;;  %15290 = vst [vmem:[#allocation65_spill] sm:$0xff] %v13201_v3  ;;  %v6729_v57 = vsel %vm14439_vm13, %v13201_v3, %v7937_v26  ;;  %v13238_v2 = vpop.permute.xlu0 %7955  ;;  %v6829_v18 = vld [vmem:[%s14095_s3 + $0x80] sm:$0xff] }
 0x3d0   :  { %v4323_v35 = vmax.f32 %v4321_v45, %v4322_v6  ;;  %v7942_v52 = vunpack.i.l.bf16 %v7941_v36  ;;  %7862 = vmatpush1.bf16.msra.mxu0 %v7861_v22  ;;  %v7864_v43 = vpack.c.bf16 %v6826_v60, %v6825_v46  ;;  %7902 = vmatpush1.bf16.msra.mxu1 %v7861_v22  ;;  %v13217_v54 = vsel %vm14436_vm14, %v6730_v5, %v7943_v56  ;;  %v15293_v22 = vld [vmem:[#allocation90_spill] sm:$0xff] }
 0x3d1   :  { %15288 = vst [vmem:[#allocation53_spill] sm:$0xff] %v13184_v9  ;;  %v13198_v47 = vrot.slane %v13184_v9, %v15105_v30  ;;  %7863 = vmatprep.subr.bf16.mxu0 %v15253_v15  ;;  %7894 = vmatprep.subr.bf16.mxu1 %v15253_v15  ;;  %v7867_v16 = vpack.c.bf16 %v6828_v19, %v6827_v48  ;;  %v15297_v48 = vld [vmem:[#allocation91_spill] sm:$0xff]  ;;  %v5462_v10 = vrot.slane %v15308_v31, 2  ;;  %v15310_v53 = vrot.slane %v15309_v23, 4 }
 0x3d2   :  { %v4869_v24 = vcombine.high %v4323_v35, %v4323_v35  ;;  %v4876_v41 = vrot.slane %v4323_v35, %v15105_v30  ;;  %v13233_v13 = vsel %vm14436_vm14, %v6729_v57, %v7942_v52  ;;  %v6830_v35 = vld [vmem:[%s14095_s3 + $0x88] sm:$0xff]  ;;  %v15295_v57 = vld [vmem:[#allocation72_spill] sm:$0xff]  ;;  %v4784_v19 = vcombine.high %v15297_v48, %v15297_v48 }
 0x3d3   :  { %15289 = vst [vmem:[#allocation52_spill] sm:$0xff] %v13198_v47  ;;  %v5900_v50 = vsel %vm5031_vm4, %v13198_v47, -inf  ;;  %v15296_v52 = vcombine.high %v15295_v57, %v15295_v57  ;;  %vm6779_vm14 = vcmask 785408  }
 0x3d4   :  { %v4883_v40 = vrot.slane %v4869_v24, %v15105_v30  ;;  %v4884_v11 = vcombine.high %v4876_v41, %v4876_v41  ;;  %v5872_v55 = vsel %vm5031_vm4, %v4876_v41, -inf  ;;  %v5901_v26 = vrot.slane %v5900_v50, 4  ;;  %7865 = vmatpush1.bf16.msra.mxu0 %v7864_v43  ;;  %7903 = vmatpush1.bf16.msra.mxu1 %v7864_v43 }
 0x3d5   :  { %v5873_v28 = vrot.slane %v5872_v55, 4  ;;  %7866 = vmatprep.subr.bf16.mxu0 %v15253_v15  ;;  %7895 = vmatprep.subr.bf16.mxu1 %v15253_v15  ;;  %v15294_v24 = vmax.f32 %v15293_v22, 0.0  ;;  %v4645_v43 = vrot.slane %v15296_v52, %v15105_v30  ;;  %v15302_v52 = vld [vmem:[#allocation70_spill] sm:$0xff] }
 0x3d6   :  { %v4885_v62 = vcombine.high %v4883_v40, %v4883_v40  ;;  %v5879_v14 = vsel %vm5031_vm4, %v4884_v11, -inf  ;;  %v5886_v21 = vsel %vm5031_vm4, %v4883_v40, -inf  ;;  %v13264_v40 = vmax.f32 %v5900_v50, %v5901_v26 }
 0x3d7   :  { %v5874_v36 = vmax.f32 %v5872_v55, %v5873_v28  ;;  %v5880_v51 = vrot.slane %v5879_v14, 4  ;;  %v5887_v8 = vrot.slane %v5886_v21, 4  ;;  %v4304_v41 = vsel %vm4230_vm3, %v15294_v24, -inf  ;;  %v15299_v28 = vld [vmem:[#allocation56_spill] sm:$0xff] }
 0x3d8   :  { %v13250_v46 = vsel %vm5031_vm4, %v4885_v62, -inf  ;;  %15298 = vst [vmem:[#allocation81_spill] sm:$0xff] %v13264_v40  ;;  %7868 = vmatpush1.bf16.msra.mxu0 %v7867_v16  ;;  %v7870_v55 = vpack.c.bf16 %v6830_v35, %v6829_v18  ;;  %v4305_v62 = vmax.f32 %v15299_v28, %v4304_v41  ;;  %7904 = vmatpush1.bf16.msra.mxu1 %v7867_v16  ;;  %v15301_v41 = vld [vmem:[#allocation107_spill] sm:$0xff]  ;;  %v15304_v28 = vld [vmem:[#allocation104_spill] sm:$0xff] }
 0x3d9   :  { %v5875_v32 = vrot.slane %v5874_v36, 2  ;;  %v13247_v56 = vmax.f32 %v5879_v14, %v5880_v51  ;;  %15291 = vst [vmem:[#allocation22_spill] sm:$0xff] %v13250_v46  ;;  %v13253_v5 = vmax.f32 %v5886_v21, %v5887_v8  ;;  %7869 = vmatprep.subr.bf16.mxu0 %v15253_v15  ;;  %v13272_v51 = vrot.slane %v4784_v19, %v15105_v30  ;;  %v15300_v8 = vld [vmem:[#allocation93_spill] sm:$0xff]  ;;  %v15306_v16 = vld [vmem:[#allocation68_spill] sm:$0xff]  ;;  %v15311_v21 = vld [vmem:[#allocation42_spill] sm:$0xff] }
 0x3da   :  { %v4767_v18 = vcombine.high %v4305_v62, %v4305_v62  ;;  %v4774_v35 = vrot.slane %v4305_v62, %v15105_v30  ;;  %7896 = vmatprep.subr.bf16.mxu1 %v15253_v15  ;;  %v4647_v24 = vcombine.high %v4645_v43, %v4645_v43  ;;  %v5436_v57 = vrot.slane %v15301_v41, 1 }
 0x3db   :  { %15292 = vst [vmem:[#allocation83_spill] sm:$0xff] %v13253_v5  ;;  %v13276_v26 = vmax.f32 %v5874_v36, %v5875_v32  ;;  %v15303_v48 = vcombine.high %v15302_v52, %v15302_v52  ;;  %v15305_v62 = vrot.slane %v15304_v28, 1  ;;  %v15307_v52 = vrot.slane %v15306_v16, 2  ;;  %v15314_v32 = vld [vmem:[#allocation15_spill] sm:$0xff] }
 0x3dc   :  { %7871 = vmatpush1.bf16.msra.mxu0 %v7870_v55  ;;  %7905 = vmatpush1.bf16.msra.mxu1 %v7870_v55  ;;  %v4781_v14 = vrot.slane %v4767_v18, %v15105_v30  ;;  %v5468_v11 = vmax.f32 %v15309_v23, %v15310_v53  ;;  %v4782_v6 = vcombine.high %v4774_v35, %v4774_v35  ;;  %v5457_v60 = vrot.slane %v15311_v21, 1 }
 0x3dd   :  { %v5445_v19 = vsel %vm5031_vm4, %v15303_v48, -inf  ;;  %v13294_v15 = vmax.f32 %v15304_v28, %v15305_v62  ;;  %v5442_v48 = vmax.f32 %v15306_v16, %v15307_v52  ;;  %v15312_v28 = vld [vmem:[#allocation50_spill] sm:$0xff]  ;;  %v13310_v18 = vmax.f32 %v15301_v41, %v5436_v57 }
 0x3de   :  { %v5446_v39 = vrot.slane %v5445_v19, 4  ;;  %v15313_v62 = vcombine.high %v15312_v28, %v15312_v28  ;;  %v5463_v16 = vmax.f32 %v15308_v31, %v5462_v10  ;;  %v5469_v52 = vrot.slane %v5468_v11, 2 }
 0x3df   :  { %v5480_v53 = vsel %vm5031_vm4, %v15314_v32, -inf  ;;  %v15315_v23 = vcombine.high %v15314_v32, %v15314_v32  ;;  %v5443_v28 = vrot.slane %v5442_v48, 1  ;;  %v5501_v31 = vsel %vm5031_vm4, %v4647_v24, -inf }
 0x3e0   :  { %v5447_v4 = vmax.f32 %v5445_v19, %v5446_v39  ;;  %v5473_v55 = vsel %vm5031_vm4, %v15313_v62, -inf  ;;  %v5494_v19 = vsel %vm5031_vm4, %v4645_v43, -inf  ;;  %v5470_v62 = vmax.f32 %v5468_v11, %v5469_v52 }
 0x3e1   :  { %v5474_v45 = vrot.slane %v5473_v55, 4  ;;  %v5487_v39 = vsel %vm5031_vm4, %v15315_v23, -inf  ;;  %v5481_v41 = vrot.slane %v5480_v53, 4  ;;  %v5495_v10 = vrot.slane %v5494_v19, 4 }
 0x3e2   :  { %v5448_v22 = vrot.slane %v5447_v4, 2  ;;  %v5488_v50 = vrot.slane %v5487_v39, 4  ;;  %v4783_v33 = vcombine.high %v4781_v14, %v4781_v14  ;;  %v13322_v3 = vmax.f32 %v15311_v21, %v5457_v60 }
 0x3e3   :  { %v5475_v36 = vmax.f32 %v5473_v55, %v5474_v45  ;;  %v5482_v29 = vmax.f32 %v5480_v53, %v5481_v41  ;;  %v5464_v32 = vrot.slane %v5463_v16, 1  ;;  %v5496_v23 = vmax.f32 %v5494_v19, %v5495_v10 }
 0x3e4   :  { %v5449_v57 = vmax.f32 %v5447_v4, %v5448_v22  ;;  %v5489_v0 = vmax.f32 %v5487_v39, %v5488_v50  ;;  %v5502_v1 = vrot.slane %v5501_v31, 4  ;;  %v5471_v43 = vrot.slane %v5470_v62, 1 }
 0x3e5   :  { %v5476_v12 = vrot.slane %v5475_v36, 2  ;;  %v5483_v11 = vrot.slane %v5482_v29, 2  ;;  %v5704_v45 = vsel %vm5031_vm4, %v4774_v35, -inf  ;;  %v5497_v55 = vrot.slane %v5496_v23, 2 }
 0x3e6   :  { %v5450_v4 = vrot.slane %v5449_v57, 1  ;;  %v5490_v22 = vrot.slane %v5489_v0, 2  ;;  %v5503_v52 = vmax.f32 %v5501_v31, %v5502_v1  ;;  %v5705_v46 = vrot.slane %v5704_v45, 4 }
 0x3e7   :  { %v5477_v47 = vmax.f32 %v5475_v36, %v5476_v12  ;;  %v5484_v40 = vmax.f32 %v5482_v29, %v5483_v11  ;;  %v5711_v60 = vsel %vm5031_vm4, %v4782_v6, -inf  ;;  %v5498_v53 = vmax.f32 %v5496_v23, %v5497_v55 }
 0x3e8   :  { %v5491_v21 = vmax.f32 %v5489_v0, %v5490_v22  ;;  %v5504_v41 = vrot.slane %v5503_v52, 2  ;;  %v5712_v50 = vrot.slane %v5711_v60, 4  ;;  %v13326_v39 = vmax.f32 %v5442_v48, %v5443_v28 }
 0x3e9   :  { %v5478_v24 = vrot.slane %v5477_v47, 1  ;;  %v5485_v19 = vrot.slane %v5484_v40, 1  ;;  %v5706_v12 = vmax.f32 %v5704_v45, %v5705_v46  ;;  %v5718_v36 = vsel %vm5031_vm4, %v4781_v14, -inf }
 0x3ea   :  { %v13329_v35 = vmax.f32 %v5463_v16, %v5464_v32  ;;  %v13331_v10 = vmax.f32 %v5470_v62, %v5471_v43  ;;  %v5492_v1 = vrot.slane %v5491_v21, 1  ;;  %v5713_v31 = vmax.f32 %v5711_v60, %v5712_v50 }
 0x3eb   :  { %v13333_v29 = vmax.f32 %v5449_v57, %v5450_v4  ;;  %v5707_v11 = vrot.slane %v5706_v12, 2  ;;  %v5719_v6 = vrot.slane %v5718_v36, 4  ;;  %v5725_v0 = vsel %vm5031_vm4, %v4783_v33, -inf }
 0x3ec   :  { %v13336_v23 = vmax.f32 %v5477_v47, %v5478_v24  ;;  %v5499_v48 = vrot.slane %v5498_v53, 1  ;;  %v13338_v28 = vmax.f32 %v5503_v52, %v5504_v41  ;;  %v5714_v46 = vrot.slane %v5713_v31, 2 }
 0x3ed   :  { %v13340_v45 = vmax.f32 %v5484_v40, %v5485_v19  ;;  %v5720_v14 = vmax.f32 %v5718_v36, %v5719_v6  ;;  %v5726_v16 = vrot.slane %v5725_v0, 4  ;;  %v5732_v62 = vsel %vm5031_vm4, %v15300_v8, -inf }
 0x3ee   :  { %v5493_v32 = vmax.f32 %v5491_v21, %v5492_v1  ;;  %v5708_v57 = vmax.f32 %v5706_v12, %v5707_v11  ;;  %v5733_v43 = vrot.slane %v5732_v62, 4  ;;  %v15316_v4 = vcombine.high %v15300_v8, %v15300_v8 }
 0x3ef   :  { %v5715_v47 = vmax.f32 %v5713_v31, %v5714_v46  ;;  %v5721_v22 = vrot.slane %v5720_v14, 2  ;;  %v5727_v55 = vmax.f32 %v5725_v0, %v5726_v16  ;;  %v13348_v24 = vmax.f32 %v5498_v53, %v5499_v48 }
 0x3f0   :  { %v5739_v33 = vsel %vm5031_vm4, %v15316_v4, -inf  ;;  %v5734_v40 = vmax.f32 %v5732_v62, %v5733_v43  ;;  %v5746_v60 = vsel %vm5031_vm4, %v13272_v51, -inf  ;;  %v15317_v21 = vcombine.high %v13272_v51, %v13272_v51 }
 0x3f1   :  { %v5740_v52 = vrot.slane %v5739_v33, 4  ;;  %v5722_v8 = vmax.f32 %v5720_v14, %v5721_v22  ;;  %v5728_v19 = vrot.slane %v5727_v55, 2  ;;  %v5709_v36 = vrot.slane %v5708_v57, 1 }
 0x3f2   :  { %v5753_v41 = vsel %vm5031_vm4, %v15317_v21, -inf  ;;  %v5735_v1 = vrot.slane %v5734_v40, 2  ;;  %v5747_v31 = vrot.slane %v5746_v60, 4  ;;  %v5716_v53 = vrot.slane %v5715_v47, 1 }
 0x3f3   :  { %v5741_v12 = vmax.f32 %v5739_v33, %v5740_v52  ;;  %v5754_v11 = vrot.slane %v5753_v41, 4  ;;  %v5729_v6 = vmax.f32 %v5727_v55, %v5728_v19  ;;  %v5763_v48 = vrot.slane %v12984_v63, 2 }
 0x3f4   :  { %v5736_v46 = vmax.f32 %v5734_v40, %v5735_v1  ;;  %v5748_v16 = vmax.f32 %v5746_v60, %v5747_v31  ;;  %v15318_v51 = vrot.slane %v12956_v17, 4  ;;  %v5723_v4 = vrot.slane %v5722_v8, 1 }
 0x3f5   :  { %v5742_v0 = vrot.slane %v5741_v12, 2  ;;  %v5755_v62 = vmax.f32 %v5753_v41, %v5754_v11  ;;  %v5730_v14 = vrot.slane %v5729_v6, 1  ;;  %v5764_v33 = vmax.f32 %v12984_v63, %v5763_v48 }
 0x3f6   :  { %v5769_v43 = vmax.f32 %v12956_v17, %v15318_v51  ;;  %v5737_v52 = vrot.slane %v5736_v46, 1  ;;  %v5749_v21 = vrot.slane %v5748_v16, 2  ;;  %v5710_v55 = vmax.f32 %v5708_v57, %v5709_v36 }
 0x3f7   :  { %v5743_v22 = vmax.f32 %v5741_v12, %v5742_v0  ;;  %v5756_v50 = vrot.slane %v5755_v62, 2  ;;  %v5717_v19 = vmax.f32 %v5715_v47, %v5716_v53  ;;  %v5774_v40 = vsel %vm5031_vm4, %v12944_v44, -inf }
 0x3f8   :  { %v5770_v5 = vrot.slane %v5769_v43, 2  ;;  %v5750_v60 = vmax.f32 %v5748_v16, %v5749_v21  ;;  %v5765_v1 = vrot.slane %v5764_v33, 1  ;;  %v5724_v17 = vmax.f32 %v5722_v8, %v5723_v4 }
 0x3f9   :  { %v5744_v9 = vrot.slane %v5743_v22, 1  ;;  %v5757_v41 = vmax.f32 %v5755_v62, %v5756_v50  ;;  %v5731_v11 = vmax.f32 %v5729_v6, %v5730_v14  ;;  %v5775_v51 = vrot.slane %v5774_v40, 4 }
 0x3fa   :  { %v5771_v31 = vmax.f32 %v5769_v43, %v5770_v5  ;;  %v15319_v63 = vcombine.high %v12944_v44, %v12944_v44  ;;  %v5738_v0 = vmax.f32 %v5736_v46, %v5737_v52  ;;  %v5751_v48 = vrot.slane %v5750_v60, 1 }
 0x3fb   :  { %v5758_v57 = vrot.slane %v5757_v41, 1  ;;  %v5776_v53 = vmax.f32 %v5774_v40, %v5775_v51  ;;  %v6112_v50 = vsel %vm6056_vm5, %v13310_v18, %v13294_v15  ;;  %v6147_v5 = vsel %vm6056_vm5, %v5717_v19, %v5710_v55  ;;  %v15320_v55 = vld [vmem:[#allocation5_spill] sm:$0xff] }
 0x3fc   :  { %v5781_v12 = vsel %vm5031_vm4, %v15319_v63, -inf  ;;  %v5772_v36 = vrot.slane %v5771_v31, 1  ;;  %v5745_v8 = vmax.f32 %v5743_v22, %v5744_v9  ;;  %v5766_v6 = vmax.f32 %v5764_v33, %v5765_v1 }
 0x3fd   :  { %v5782_v47 = vrot.slane %v5781_v12, 4  ;;  %v6119_v44 = vsel %vm6056_vm5, %v5493_v32, %v13340_v45  ;;  %v5752_v62 = vmax.f32 %v5750_v60, %v5751_v48  ;;  %v5777_v43 = vrot.slane %v5776_v53, 2 }
 0x3fe   :  { %v6113_v46 = vsel %vm6058_vm6, %v13326_v39, %v6112_v50  ;;  %v6148_v4 = vsel %vm6058_vm6, %v5724_v17, %v6147_v5  ;;  %v5759_v14 = vmax.f32 %v5757_v41, %v5758_v57  ;;  %v5773_v9 = vmax.f32 %v5771_v31, %v5772_v36  ;;  %v15325_v50 = vld [vmem:[#allocation51_spill] sm:$0xff] }
 0x3ff   :  { %v5783_v16 = vmax.f32 %v5781_v12, %v5782_v47  ;;  %v6114_v15 = vsel %vm6060_vm7, %v13333_v29, %v6113_v46  ;;  %v6149_v18 = vsel %vm6060_vm7, %v5731_v11, %v6148_v4  ;;  %v5778_v22 = vmax.f32 %v5776_v53, %v5777_v43 }
 0x400   :  { %v6115_v33 = vsel %vm14440_vm8, %v13322_v3, %v6114_v15  ;;  %v6150_v45 = vsel %vm14440_vm8, %v5738_v0, %v6149_v18  ;;  %v15321_v19 = vcombine.high %v15320_v55, %v15320_v55  ;;  %v15322_v3 = vld [vmem:[#allocation30_spill] sm:$0xff]  ;;  %v15324_v63 = vrot.slane %v13338_v28, 1 }
 0x401   :  { %v5784_v52 = vrot.slane %v5783_v16, 2  ;;  %v6116_v39 = vsel %vm14437_vm9, %v13329_v35, %v6115_v33  ;;  %v6151_v21 = vsel %vm14437_vm9, %v5745_v8, %v6150_v45  ;;  %v5779_v40 = vrot.slane %v5778_v22, 1 }
 0x402   :  { %v4662_v29 = vrot.slane %v15321_v19, %v15105_v30  ;;  %v6117_v60 = vsel %vm6066_vm10, %v13331_v10, %v6116_v39  ;;  %v6152_v41 = vsel %vm6066_vm10, %v5752_v62, %v6151_v21  ;;  %v15323_v1 = vrot.slane %v15322_v3, 4 }
 0x403   :  { %v5785_v32 = vmax.f32 %v5783_v16, %v5784_v52  ;;  %v6118_v35 = vsel %vm6068_vm11, %v13336_v23, %v6117_v60  ;;  %v6153_v11 = vsel %vm6068_vm11, %v5759_v14, %v6152_v41  ;;  %v5507_v12 = vmax.f32 %v13338_v28, %v15324_v63 }
 0x404   :  { %v5510_v31 = vmax.f32 %v15322_v3, %v15323_v1  ;;  %v4664_v51 = vcombine.high %v4662_v29, %v4662_v29  ;;  %v5780_v0 = vmax.f32 %v5778_v22, %v5779_v40  ;;  %v6182_v48 = vrot.slane %v6118_v35, 7 }
 0x405   :  { %v5786_v17 = vrot.slane %v5785_v32, 1  ;;  %v6187_v10 = vrot.slane %v6153_v11, 7  ;;  %v5877_v57 = vrot.slane %v13276_v26, 1  ;;  %v6120_v47 = vsel %vm6058_vm6, %v13348_v24, %v6119_v44 }
 0x406   :  { %v6154_v36 = vsel %vm6056_vm5, %v5773_v9, %v5766_v6  ;;  %v5511_v53 = vrot.slane %v5510_v31, 2  ;;  %v15326_v5 = vcombine.high %v15325_v50, %v15325_v50  ;;  %v5522_v28 = vsel %vm5031_vm4, %v4662_v29, -inf }
 0x407   :  { %v13407_v23 = vsel %vm161_vm0, 0.0, %v6187_v10  ;;  %v5529_v16 = vsel %vm5031_vm4, %v4664_v51, -inf  ;;  %v15327_v62 = vrot.slane %v13247_v56, 2  ;;  %v5787_v24 = vmax.f32 %v5785_v32, %v5786_v17 }
 0x408   :  { %v5515_v8 = vsel %vm5031_vm4, %v15326_v5, -inf  ;;  %v13421_v6 = vsel %vm161_vm0, %v6187_v10, 0.0  ;;  %v6348_v44 = vrot.slane %v13407_v23, 2  ;;  %v6121_v46 = vsel %vm6060_vm7, %v5507_v12, %v6120_v47 }
 0x409   :  { %v13418_v43 = vmax.f32 %v13247_v56, %v15327_v62  ;;  %v6155_v4 = vsel %vm6058_vm6, %v5780_v0, %v6154_v36  ;;  %v13427_v14 = vsel %vm161_vm0, 0.0, %v6182_v48  ;;  %v6349_v52 = vrot.slane %v13421_v6, 2 }
 0x40a   :  { %v5512_v15 = vmax.f32 %v5510_v31, %v5511_v53  ;;  %v5516_v18 = vrot.slane %v5515_v8, 4  ;;  %v5523_v9 = vrot.slane %v5522_v28, 4  ;;  %v5530_v56 = vrot.slane %v5529_v16, 4 }
 0x40b   :  { %v13431_v22 = vsel %vm161_vm0, %v6182_v48, 0.0  ;;  %v13434_v33 = vsel %vm1615_vm1, %v6348_v44, %v6349_v52  ;;  %v4834_v45 = vcombine.high %v12975_v7, %v12975_v7  ;;  %v15328_v32 = vrot.slane %v12971_v38, 2 }
 0x40c   :  { %v6156_v21 = vsel %vm6060_vm7, %v5787_v24, %v6155_v4  ;;  %v5513_v55 = vrot.slane %v5512_v15, 1  ;;  %v5517_v19 = vmax.f32 %v5515_v8, %v5516_v18  ;;  %v5524_v29 = vmax.f32 %v5522_v28, %v5523_v9  ;;  %7782 = vmatprep.mubr.msk.f32.mxu1 %vm4230_vm3, %v13434_v33  ;;  %v7961_v4 = vpop.permute.xlu1 %7960 }
 0x40d   :  { %v5792_v39 = vmax.f32 %v12971_v38, %v15328_v32  ;;  %v5531_v40 = vmax.f32 %v5529_v16, %v5530_v56  ;;  %v15329_v41 = vrot.slane %v12962_v58, 4  ;;  %v5802_v1 = vsel %vm5031_vm4, %v12975_v7, -inf }
 0x40e   :  { %v6362_v31 = vrot.slane %v13431_v22, 1  ;;  %v5518_v38 = vrot.slane %v5517_v19, 2  ;;  %v5525_v17 = vrot.slane %v5524_v29, 2  ;;  %v5803_v35 = vrot.slane %v5802_v1, 4 }
 0x40f   :  { %v5793_v60 = vrot.slane %v5792_v39, 1  ;;  %v5797_v3 = vmax.f32 %v12962_v58, %v15329_v41  ;;  %v5514_v11 = vmax.f32 %v5512_v15, %v5513_v55  ;;  %v5532_v51 = vrot.slane %v5531_v40, 2  ;;  %v7966_v55 = vpop.permute.xlu0 %7965 }
 0x410   :  { %v5809_v12 = vsel %vm5031_vm4, %v4834_v45, -inf  ;;  %v5519_v0 = vmax.f32 %v5517_v19, %v5518_v38  ;;  %v5526_v48 = vmax.f32 %v5524_v29, %v5525_v17  ;;  %v5804_v47 = vmax.f32 %v5802_v1, %v5803_v35 }
 0x411   :  { %v5798_v63 = vrot.slane %v5797_v3, 2  ;;  %v5794_v10 = vmax.f32 %v5792_v39, %v5793_v60  ;;  %v6367_v36 = vrot.slane %v13427_v14, 2  ;;  %v5533_v58 = vmax.f32 %v5531_v40, %v5532_v51 }
 0x412   :  { %v5810_v50 = vrot.slane %v5809_v12, 4  ;;  %v6368_v7 = vrot.slane %v13431_v22, 2  ;;  %v5520_v5 = vrot.slane %v5519_v0, 1  ;;  %v5527_v8 = vrot.slane %v5526_v48, 1 }
 0x413   :  { %v5799_v53 = vmax.f32 %v5797_v3, %v5798_v63  ;;  %v5805_v28 = vrot.slane %v5804_v47, 2  ;;  %v5534_v16 = vrot.slane %v5533_v58, 1  ;;  %v6122_v62 = vsel %vm14440_vm8, %v5514_v11, %v6121_v46 }
 0x414   :  { %v5811_v44 = vmax.f32 %v5809_v12, %v5810_v50  ;;  %v5521_v52 = vmax.f32 %v5519_v0, %v5520_v5  ;;  %v5528_v15 = vmax.f32 %v5526_v48, %v5527_v8  ;;  %v6157_v9 = vsel %vm14440_vm8, %v5794_v10, %v6156_v21  ;;  %v13483_v5 = vpop.permute.xlu1 %7970 }
 0x415   :  { %v5800_v24 = vrot.slane %v5799_v53, 1  ;;  %v5806_v18 = vmax.f32 %v5804_v47, %v5805_v28  ;;  %v6304_v56 = vrot.slane %v13421_v6, 1  ;;  %v5535_v45 = vmax.f32 %v5533_v58, %v5534_v16 }
 0x416   :  { %v5812_v39 = vrot.slane %v5811_v44, 2  ;;  %v13457_v19 = vsel %vm1615_vm1, %v6367_v36, %v6368_v7  ;;  %v6123_v29 = vsel %vm14437_vm9, %v5521_v52, %v6122_v62  ;;  %v7963_v40 = vunpack.i.h.bf16 %v7961_v4 }
 0x417   :  { %v5801_v32 = vmax.f32 %v5799_v53, %v5800_v24  ;;  %v5807_v46 = vrot.slane %v5806_v18, 1  ;;  %v6124_v60 = vsel %vm6066_vm10, %v5528_v15, %v6123_v29  ;;  %v8069_v21 = vpack.i.bf16 %v13407_v23, %v13427_v14  ;;  %v15334_v15 = vld [vmem:[#allocation76_spill] sm:$0xff] }
 0x418   :  { %v5813_v41 = vmax.f32 %v5811_v44, %v5812_v39  ;;  %v6125_v6 = vsel %vm6068_vm11, %v5535_v45, %v6124_v60  ;;  %v7962_v38 = vunpack.i.l.bf16 %v7961_v4  ;;  %v7968_v17 = vunpack.i.h.bf16 %v7966_v55  ;;  %v15338_v60 = vld [vmem:[#allocation43_spill] sm:$0xff] }
 0x419   :  { %v6158_v3 = vsel %vm14437_vm9, %v5801_v32, %v6157_v9  ;;  %v5808_v1 = vmax.f32 %v5806_v18, %v5807_v46  ;;  %v6183_v35 = vrot.slane %v6125_v6, 7  ;;  %8070 = vrot.lane.b32.xlu1 %v8069_v21, %s8216_s24  ;;  %v15330_v63 = vunpack.i.l.bf16 %v13203_v59  ;;  %8065 = vrot.lane.b32.xlu0 %v8069_v21, %s8219_s27 }
 0x41a   :  { %v5814_v11 = vrot.slane %v5813_v41, 1  ;;  %vm6796_vm9 = vcmask 916480   ;;  %v15331_v47 = vunpack.i.l.bf16 %v13226_v20  ;;  %v7967_v50 = vunpack.i.l.bf16 %v7966_v55 }
 0x41b   :  { %v6159_v51 = vsel %vm6066_vm10, %v5808_v1, %v6158_v3  ;;  %v6763_v12 = vsel %vm6762_vm15, %v13233_v13, %v15330_v63  ;;  %v13472_v0 = vsel %vm161_vm0, 0.0, %v6183_v35  ;;  %v6231_v48 = vsel %vm161_vm0, %v6183_v35, 0.0 }
 0x41c   :  { %v5815_v10 = vmax.f32 %v5813_v41, %v5814_v11  ;;  %v6780_v36 = vsel %vm6779_vm14, %v6763_v12, %v15331_v47  ;;  %v6336_v58 = vrot.slane %v13472_v0, 2  ;;  %v6337_v53 = vrot.slane %v6231_v48, 2  ;;  %v15339_v11 = vld [vmem:[#allocation62_spill] sm:$0xff] }
 0x41d   :  { %v15332_v13 = vunpack.i.l.bf16 %v13238_v2  ;;  %v6303_v28 = vrot.slane %v13407_v23, 1  ;;  %v6361_v16 = vrot.slane %v13427_v14, 1  ;;  %v15333_v62 = vunpack.i.h.bf16 %v13203_v59 }
 0x41e   :  { %v6160_v8 = vsel %vm6068_vm11, %v5815_v10, %v6159_v51  ;;  %v6292_v44 = vrot.slane %v6231_v48, 1  ;;  %v13493_v4 = vsel %vm1615_vm1, %v6336_v58, %v6337_v53  ;;  %v15335_v18 = vunpack.i.h.bf16 %v13226_v20 }
 0x41f   :  { %v6797_v7 = vsel %vm6796_vm9, %v6780_v36, %v15332_v13  ;;  %v6764_v24 = vsel %vm6762_vm15, %v13217_v54, %v15333_v62  ;;  %v6188_v52 = vrot.slane %v6160_v8, 7  ;;  %v6305_v45 = vsel %vm1145_vm2, %v6303_v28, %v6304_v56  ;;  %v15337_v56 = vld [vmem:[#allocation39_spill] sm:$0xff]  ;;  %v15340_v36 = vld [vmem:[#allocation14_spill] sm:$0xff] }
 0x420   :  { %6933 = vmatmul.mubr.f32.vlgmr.msra.gmra.mrb[0].mxu0 %v6797_v7  ;;  %v6781_v9 = vsel %vm6779_vm14, %v6764_v24, %v15335_v18  ;;  %v6363_v59 = vsel %vm1145_vm2, %v6361_v16, %v6362_v31  ;;  %v15336_v54 = vunpack.i.h.bf16 %v13238_v2  ;;  %v7973_v32 = vunpack.i.h.bf16 %v13483_v5  ;;  %v13517_v2 = vpop.permute.xlu0 %7975 }
 0x421   :  { %7772 = vmatprep.mubr.msk.f32.mxu0 %vm4230_vm3, %v15334_v15  ;;  %v13509_v39 = vsel %vm161_vm0, 0.0, %v6188_v52  ;;  %v6236_v55 = vsel %vm161_vm0, %v6188_v52, 0.0  ;;  %v8079_v20 = vpack.i.bf16 %v6305_v45, %v6363_v59  ;;  %v6700_v22 = vsel %vm4230_vm3, %v15337_v56, %v7963_v40  ;;  %v15349_v56 = vld [vmem:[#allocation58_spill] sm:$0xff] }
 0x422   :  { %v6798_v14 = vsel %vm6796_vm9, %v6781_v9, %v15336_v54  ;;  %v6351_v29 = vrot.slane %v13509_v39, 2  ;;  %v6352_v46 = vrot.slane %v6236_v55, 2  ;;  %v6699_v31 = vsel %vm4230_vm3, %v15338_v60, %v7962_v38  ;;  %v15348_v9 = vld [vmem:[#allocation3_spill] sm:$0xff] }
 0x423   :  { %v8084_v41 = vpack.i.bf16 %v13434_v33, %v13457_v19  ;;  %v13522_v3 = vsel %vm14438_vm12, %v6699_v31, %v7967_v50  ;;  %v6716_v21 = vsel %vm14438_vm12, %v6700_v22, %v7968_v17  ;;  %8080 = vrot.lane.b32.xlu1 %v8079_v20, %s8218_s26  ;;  %8075 = vrot.lane.b32.xlu0 %v8079_v20, %s8220_s28  ;;  %v6291_v40 = vrot.slane %v13472_v0, 1  ;;  %v15342_v50 = vld [vmem:[#allocation19_spill] sm:$0xff] }
 0x424   :  { %6938 = vmatmul.mubr.f32.gmra.mrb[2].mxu0 %v6798_v14  ;;  %v8099_v6 = vpack.i.bf16 %v13493_v4, %v13434_v33  ;;  %v13531_v1 = vsel %vm1615_vm1, %v6351_v29, %v6352_v46  ;;  %v7972_v38 = vunpack.i.l.bf16 %v13483_v5  ;;  %v13535_v35 = vsel %vm14439_vm13, %v6716_v21, %v7973_v32 }
 0x425   :  { %7773 = vmatprep.mubr.msk.f32.mxu0 %vm4230_vm3, %v15339_v11  ;;  %v7978_v17 = vunpack.i.h.bf16 %v13517_v2  ;;  %v7977_v51 = vunpack.i.l.bf16 %v13517_v2  ;;  %v6293_v63 = vsel %vm1145_vm2, %v6291_v40, %v6292_v44  ;;  %v8094_v33 = vpack.i.bf16 %v13509_v39, %v15287_v37  ;;  %v15344_v37 = vld [vmem:[#allocation61_spill] sm:$0xff] }
 0x426   :  { %v8119_v12 = vpack.i.bf16 %v13531_v1, %v13493_v4  ;;  %v8089_v48 = vpack.i.bf16 %v6293_v63, %v6305_v45  ;;  %v6306_v10 = vrot.slane %v13509_v39, 1  ;;  %v6307_v47 = vrot.slane %v6236_v55, 1  ;;  %v15346_v4 = vld [vmem:[#allocation31_spill] sm:$0xff] }
 0x427   :  { %8085 = vrot.lane.b32.xlu0 %v8084_v41, %s8217_s25  ;;  %v15341_v58 = vcombine.high %v15340_v36, %v15340_v36  ;;  %v15343_v13 = vcombine.high %v15342_v50, %v15342_v50  ;;  %v5536_v8 = vsel %vm5031_vm4, %v15344_v37, -inf  ;;  %v15345_v28 = vcombine.high %v15344_v37, %v15344_v37 }
 0x428   :  { %8090 = vrot.lane.b32.xlu1 %v8089_v48, %s8215_s21  ;;  %v13564_v62 = vsel %vm1145_vm2, %v6306_v10, %v6307_v47  ;;  %v5537_v24 = vrot.slane %v5536_v8, 4  ;;  %v15347_v52 = vrot.slane %v15346_v4, 4  ;;  %v8104_v18 = vpack.i.bf16 %v13509_v39, %v13472_v0 }
 0x429   :  { %v4679_v53 = vrot.slane %v15341_v58, %v15105_v30  ;;  %v4696_v7 = vrot.slane %v15343_v13, %v15105_v30  ;;  %v5543_v16 = vsel %vm5031_vm4, %v15345_v28, -inf  ;;  %v8109_v45 = vpack.i.bf16 %v13564_v62, %v15348_v9 }
 0x42a   :  { %v5544_v44 = vrot.slane %v5543_v16, 4  ;;  %v5566_v15 = vmax.f32 %v15346_v4, %v15347_v52  ;;  %v5538_v14 = vmax.f32 %v5536_v8, %v5537_v24  ;;  %v15350_v22 = vcombine.high %v15349_v56, %v15349_v56 }
 0x42b   :  { %v4681_v59 = vcombine.high %v4679_v53, %v4679_v53  ;;  %v4698_v54 = vcombine.high %v4696_v7, %v4696_v7  ;;  %v5550_v55 = vsel %vm5031_vm4, %v4679_v53, -inf  ;;  %8095 = vrot.lane.b32.xlu0 %v8094_v33, %s8219_s27  ;;  %v5578_v31 = vsel %vm5031_vm4, %v4696_v7, -inf }
 0x42c   :  { %v5545_v32 = vmax.f32 %v5543_v16, %v5544_v44  ;;  %v5567_v20 = vrot.slane %v5566_v15, 2  ;;  %v5551_v29 = vrot.slane %v5550_v55, 4  ;;  %v5571_v60 = vsel %vm5031_vm4, %v15350_v22, -inf  ;;  %8100 = vrot.lane.b32.xlu1 %v8099_v6, %s8214_s0 }
 0x42d   :  { %v5557_v46 = vsel %vm5031_vm4, %v4681_v59, -inf  ;;  %v5539_v41 = vrot.slane %v5538_v14, 2  ;;  %v5572_v10 = vrot.slane %v5571_v60, 4  ;;  %v5579_v47 = vrot.slane %v5578_v31, 4 }
 0x42e   :  { %v5546_v21 = vrot.slane %v5545_v32, 2  ;;  %v5558_v40 = vrot.slane %v5557_v46, 4  ;;  %v5568_v11 = vmax.f32 %v5566_v15, %v5567_v20  ;;  %v5552_v48 = vmax.f32 %v5550_v55, %v5551_v29 }
 0x42f   :  { %v5585_v33 = vsel %vm5031_vm4, %v4698_v54, -inf  ;;  %v5540_v36 = vmax.f32 %v5538_v14, %v5539_v41  ;;  %8105 = vrot.lane.b32.xlu0 %v8104_v18, %s8216_s24  ;;  %v5573_v37 = vmax.f32 %v5571_v60, %v5572_v10  ;;  %v5580_v7 = vmax.f32 %v5578_v31, %v5579_v47 }
 0x430   :  { %v5547_v58 = vmax.f32 %v5545_v32, %v5546_v21  ;;  %v5559_v53 = vmax.f32 %v5557_v46, %v5558_v40  ;;  %v5569_v50 = vrot.slane %v5568_v11, 1  ;;  %v5553_v13 = vrot.slane %v5552_v48, 2  ;;  %8110 = vrot.lane.b32.xlu1 %v8109_v45, %s8220_s28 }
 0x431   :  { %v5586_v8 = vrot.slane %v5585_v33, 4  ;;  %v8114_v6 = vpack.i.bf16 %v13564_v62, %v6293_v63  ;;  %v5541_v28 = vrot.slane %v5540_v36, 1  ;;  %v5574_v4 = vrot.slane %v5573_v37, 2 }
 0x432   :  { %v5548_v16 = vrot.slane %v5547_v58, 1  ;;  %v5560_v24 = vrot.slane %v5559_v53, 2  ;;  %v5554_v44 = vmax.f32 %v5552_v48, %v5553_v13  ;;  %v5581_v52 = vrot.slane %v5580_v7, 2 }
 0x433   :  { %v5587_v15 = vmax.f32 %v5585_v33, %v5586_v8  ;;  %v5542_v9 = vmax.f32 %v5540_v36, %v5541_v28  ;;  %v5570_v14 = vmax.f32 %v5568_v11, %v5569_v50  ;;  %8115 = vrot.lane.b32.xlu0 %v8114_v6, %s8218_s26  ;;  %v5575_v32 = vmax.f32 %v5573_v37, %v5574_v4 }
 0x434   :  { %v5549_v59 = vmax.f32 %v5547_v58, %v5548_v16  ;;  %v5561_v54 = vmax.f32 %v5559_v53, %v5560_v24  ;;  %v5555_v18 = vrot.slane %v5554_v44, 1  ;;  %v5582_v55 = vmax.f32 %v5580_v7, %v5581_v52  ;;  %8120 = vrot.lane.b32.xlu1 %v8119_v12, %s8217_s25 }
 0x435   :  { %v5588_v20 = vrot.slane %v5587_v15, 2  ;;  %v4851_v29 = vcombine.high %v13108_v25, %v13108_v25  ;;  %v5819_v46 = vrot.slane %v13150_v42, 2  ;;  %v5576_v22 = vrot.slane %v5575_v32, 1 }
 0x436   :  { %v5562_v63 = vrot.slane %v5561_v54, 1  ;;  %v6126_v45 = vsel %vm6056_vm5, %v5549_v59, %v5542_v9  ;;  %v5556_v56 = vmax.f32 %v5554_v44, %v5555_v18  ;;  %v5583_v60 = vrot.slane %v5582_v55, 1 }
 0x437   :  { %v5589_v31 = vmax.f32 %v5587_v15, %v5588_v20  ;;  %v5820_v21 = vmax.f32 %v13150_v42, %v5819_v46  ;;  %v15351_v40 = vrot.slane %v13128_v49, 4  ;;  %v5830_v12 = vsel %vm5031_vm4, %v13108_v25, -inf }
 0x438   :  { %v5563_v41 = vmax.f32 %v5561_v54, %v5562_v63  ;;  %v5577_v48 = vmax.f32 %v5575_v32, %v5576_v22  ;;  %v5584_v10 = vmax.f32 %v5582_v55, %v5583_v60  ;;  %v6127_v33 = vsel %vm6058_vm6, %v5556_v56, %v6126_v45  ;;  %v13615_v55 = vpop.permute.xlu1 %7980  ;;  %v7986_v60 = vpop.permute.xlu0 %7985 }
 0x439   :  { %v5825_v11 = vmax.f32 %v13128_v49, %v15351_v40  ;;  %v5590_v47 = vrot.slane %v5589_v31, 1  ;;  %v5821_v58 = vrot.slane %v5820_v21, 1  ;;  %v5831_v50 = vrot.slane %v5830_v12, 4 }
 0x43a   :  { %v6128_v36 = vsel %vm6060_vm7, %v5563_v41, %v6127_v33  ;;  %v5837_v37 = vsel %vm5031_vm4, %v4851_v29, -inf  ;;  %v15352_v49 = vrot.slane %v13159_v27, 2  ;;  %vm15353_vm12 = vcmask 1045509  }
 0x43b   :  { %v5826_v53 = vrot.slane %v5825_v11, 2  ;;  %v5591_v13 = vmax.f32 %v5589_v31, %v5590_v47  ;;  %v6129_v42 = vsel %vm14440_vm8, %v5570_v14, %v6128_v36  ;;  %v4868_v8 = vcombine.high %v13125_v61, %v13125_v61 }
 0x43c   :  { %v5848_v7 = vmax.f32 %v13159_v27, %v15352_v49  ;;  %v6130_v25 = vsel %vm15353_vm12, %v5577_v48, %v6129_v42  ;;  %v5832_v28 = vmax.f32 %v5830_v12, %v5831_v50  ;;  %v5822_v24 = vmax.f32 %v5820_v21, %v5821_v58  ;;  %v7991_v58 = vpop.permute.xlu1 %7990 }
 0x43d   :  { %v5827_v6 = vmax.f32 %v5825_v11, %v5826_v53  ;;  %v6131_v16 = vsel %vm6066_vm10, %v5584_v10, %v6130_v25  ;;  %v5838_v44 = vrot.slane %v5837_v37, 4  ;;  %v15354_v4 = vrot.slane %v13162_v34, 4 }
 0x43e   :  { %v6132_v15 = vsel %vm6068_vm11, %v5591_v13, %v6131_v16  ;;  %v5833_v59 = vrot.slane %v5832_v28, 2  ;;  %v5858_v27 = vsel %vm5031_vm4, %v13125_v61, -inf  ;;  %v5849_v18 = vrot.slane %v5848_v7, 1 }
 0x43f   :  { %v5853_v52 = vmax.f32 %v13162_v34, %v15354_v4  ;;  %v5828_v9 = vrot.slane %v5827_v6, 1  ;;  %v6184_v54 = vrot.slane %v6132_v15, 7  ;;  %v5839_v14 = vmax.f32 %v5837_v37, %v5838_v44 }
 0x440   :  { %v5834_v63 = vmax.f32 %v5832_v28, %v5833_v59  ;;  %v5859_v45 = vrot.slane %v5858_v27, 4  ;;  %v5865_v29 = vsel %vm5031_vm4, %v4868_v8, -inf  ;;  %v7983_v10 = vunpack.i.h.bf16 %v13615_v55 }
 0x441   :  { %v5854_v32 = vrot.slane %v5853_v52, 2  ;;  %v5829_v20 = vmax.f32 %v5827_v6, %v5828_v9  ;;  %v13619_v34 = vsel %vm161_vm0, 0.0, %v6184_v54  ;;  %v6232_v46 = vsel %vm161_vm0, %v6184_v54, 0.0 }
 0x442   :  { %v5840_v56 = vrot.slane %v5839_v14, 2  ;;  %v6294_v61 = vrot.slane %v13619_v34, 1  ;;  %v6295_v31 = vrot.slane %v6232_v46, 1  ;;  %v5835_v41 = vrot.slane %v5834_v63, 1 }
 0x443   :  { %v5855_v22 = vmax.f32 %v5853_v52, %v5854_v32  ;;  %v5860_v21 = vmax.f32 %v5858_v27, %v5859_v45  ;;  %v5866_v12 = vrot.slane %v5865_v29, 4  ;;  %v6161_v48 = vsel %vm6056_vm5, %v5829_v20, %v5822_v24  ;;  %v13637_v24 = vpop.permute.xlu0 %7995 }
 0x444   :  { %v5841_v40 = vmax.f32 %v5839_v14, %v5840_v56  ;;  %v13626_v47 = vsel %vm1145_vm2, %v6294_v61, %v6295_v31  ;;  %v5836_v33 = vmax.f32 %v5834_v63, %v5835_v41  ;;  %v6731_v53 = vsel %vm14439_vm13, %v13522_v3, %v7972_v38 }
 0x445   :  { %v5856_v11 = vrot.slane %v5855_v22, 1  ;;  %v5861_v36 = vrot.slane %v5860_v21, 2  ;;  %v8124_v50 = vpack.i.bf16 %v13626_v47, %v13564_v62  ;;  %v5867_v42 = vmax.f32 %v5865_v29, %v5866_v12 }
 0x446   :  { %v5842_v13 = vrot.slane %v5841_v40, 1  ;;  %v5850_v37 = vmax.f32 %v5848_v7, %v5849_v18  ;;  %v6162_v25 = vsel %vm6058_vm6, %v5836_v33, %v6161_v48  ;;  %v6339_v8 = vrot.slane %v13619_v34, 2  ;;  %v15360_v48 = vld [vmem:[#allocation83_spill] sm:$0xff] }
 0x447   :  { %v5862_v49 = vmax.f32 %v5860_v21, %v5861_v36  ;;  %8125 = vrot.lane.b32.xlu0 %v8124_v50, %s8215_s21  ;;  %v5857_v28 = vmax.f32 %v5855_v22, %v5856_v11  ;;  %v5868_v16 = vrot.slane %v5867_v42, 2  ;;  %v6340_v5 = vrot.slane %v6232_v46, 2  ;;  %v15363_v50 = vld [vmem:[#allocation22_spill] sm:$0xff] }
 0x448   :  { %v5843_v6 = vmax.f32 %v5841_v40, %v5842_v13  ;;  %vm15355_vm12 = vcmask 523264   ;;  %v7982_v38 = vunpack.i.l.bf16 %v13615_v55  ;;  %v7987_v7 = vunpack.i.l.bf16 %v7986_v60 }
 0x449   :  { %v6748_v3 = vsel %vm15355_vm12, %v6731_v53, %v7977_v51  ;;  %v5863_v62 = vrot.slane %v5862_v49, 1  ;;  %v5869_v44 = vmax.f32 %v5867_v42, %v5868_v16  ;;  %v13645_v52 = vsel %vm1615_vm1, %v6339_v8, %v6340_v5  ;;  %v13651_v51 = vpop.permute.xlu1 %8000  ;;  %v15362_v53 = vld [vmem:[#allocation96_spill] sm:$0xff] }
 0x44a   :  { %v6163_v4 = vsel %vm6060_vm7, %v5843_v6, %v6162_v25  ;;  %v7992_v15 = vunpack.i.l.bf16 %v7991_v58  ;;  %v8134_v27 = vpack.i.bf16 %v13645_v52, %v13531_v1  ;;  %v7997_v54 = vunpack.i.l.bf16 %v13637_v24 }
 0x44b   :  { %v5864_v9 = vmax.f32 %v5862_v49, %v5863_v62  ;;  %v6164_v59 = vsel %vm14440_vm8, %v5850_v37, %v6163_v4  ;;  %v6749_v14 = vsel %vm15355_vm12, %v13535_v35, %v7978_v17  ;;  %v5870_v18 = vrot.slane %v5869_v44, 1  ;;  %v15357_v35 = vld [vmem:[#allocation53_spill] sm:$0xff]  ;;  %v15366_v49 = vld [vmem:[#allocation52_spill] sm:$0xff] }
 0x44c   :  { %vm15356_vm13 = vcmask 1045509   ;;  %v7988_v55 = vunpack.i.h.bf16 %v7986_v60  ;;  %8135 = vrot.lane.b32.xlu0 %v8134_v27, %s8214_s0  ;;  %v7993_v63 = vunpack.i.h.bf16 %v7991_v58  ;;  %v7998_v45 = vunpack.i.h.bf16 %v13637_v24  ;;  %v15359_v60 = vld [vmem:[#allocation54_spill] sm:$0xff] }
 0x44d   :  { %v6165_v32 = vsel %vm15356_vm13, %v5857_v28, %v6164_v59  ;;  %v6765_v29 = vsel %vm6762_vm15, %v6748_v3, %v7982_v38  ;;  %v5871_v46 = vmax.f32 %v5869_v44, %v5870_v18  ;;  %v8003_v56 = vunpack.i.h.bf16 %v13651_v51  ;;  %v13696_v44 = vpop.permute.xlu0 %8005 }
 0x44e   :  { %v6166_v20 = vsel %vm6066_vm10, %v5864_v9, %v6165_v32  ;;  %v6782_v2 = vsel %vm6779_vm14, %v6765_v29, %v7987_v7  ;;  %v15358_v17 = vcombine.high %v15357_v35, %v15357_v35  ;;  %v6701_v61 = vsel %vm4230_vm3, %v15359_v60, %v7997_v54 }
 0x44f   :  { %v8002_v31 = vunpack.i.l.bf16 %v13651_v51  ;;  %v6799_v41 = vsel %vm6796_vm9, %v6782_v2, %v7992_v15  ;;  %v6766_v21 = vsel %vm6762_vm15, %v6749_v14, %v7983_v10  ;;  %v6167_v40 = vsel %vm6068_vm11, %v5871_v46, %v6166_v20  ;;  %v15365_v10 = vld [vmem:[#allocation81_spill] sm:$0xff]  ;;  %v15368_v14 = vld [vmem:[#allocation124_spill] sm:$0xff] }
 0x450   :  { %v4900_v22 = vrot.slane %v15358_v17, %v15105_v30  ;;  %6943 = vmatmul.mubr.f32.gmra.mrb[4].mxu0 %v6799_v41  ;;  %v6783_v11 = vsel %vm6779_vm14, %v6766_v21, %v7988_v55  ;;  %v5884_v12 = vrot.slane %v13418_v43, 1  ;;  %v15361_v33 = vrot.slane %v15360_v48, 2  ;;  %v8011_v41 = vpop.permute.xlu1 %8010 }
 0x451   :  { %v6189_v58 = vrot.slane %v6167_v40, 7  ;;  %7774 = vmatprep.mubr.msk.f32.mxu0 %vm4230_vm3, %v15362_v53  ;;  %v15364_v13 = vrot.slane %v15363_v50, 4  ;;  %v5903_v37 = vrot.slane %v15365_v10, 2  ;;  %v15367_v25 = vcombine.high %v15366_v49, %v15366_v49 }
 0x452   :  { %v5890_v36 = vmax.f32 %v15360_v48, %v15361_v33  ;;  %v6800_v6 = vsel %vm6796_vm9, %v6783_v11, %v7993_v63  ;;  %v5914_v5 = vsel %vm5031_vm4, %v4900_v22, -inf  ;;  %v4902_v59 = vcombine.high %v4900_v22, %v4900_v22 }
 0x453   :  { %v5895_v42 = vmax.f32 %v15363_v50, %v15364_v13  ;;  %v5907_v8 = vsel %vm5031_vm4, %v15367_v25, -inf  ;;  %v13692_v3 = vsel %vm161_vm0, 0.0, %v6189_v58  ;;  %v6237_v38 = vsel %vm161_vm0, %v6189_v58, 0.0 }
 0x454   :  { %v5891_v28 = vrot.slane %v5890_v36, 1  ;;  %v5908_v16 = vrot.slane %v5907_v8, 4  ;;  %v5904_v7 = vmax.f32 %v15365_v10, %v5903_v37  ;;  %v8129_v4 = vpack.i.bf16 %v13692_v3, %v13619_v34  ;;  %6948 = vmatmul.mubr.f32.gmra.mrb[6].mxu0 %v6800_v6 }
 0x455   :  { %v5896_v62 = vrot.slane %v5895_v42, 2  ;;  %v6309_v15 = vrot.slane %v13692_v3, 1  ;;  %v6310_v9 = vrot.slane %v6237_v38, 1  ;;  %v6354_v27 = vrot.slane %v13692_v3, 2  ;;  %7775 = vmatprep.mubr.msk.f32.mxu0 %vm4230_vm3, %v15368_v14 }
 0x456   :  { %v6355_v54 = vrot.slane %v6237_v38, 2  ;;  %v5885_v18 = vmax.f32 %v13418_v43, %v5884_v12  ;;  %8130 = vrot.lane.b32.xlu1 %v8129_v4, %s8219_s27  ;;  %v5892_v20 = vmax.f32 %v5890_v36, %v5891_v28  ;;  %v5909_v63 = vmax.f32 %v5907_v8, %v5908_v16  ;;  %v8016_v12 = vpop.permute.xlu0 %8015 }
 0x457   :  { %v5897_v32 = vmax.f32 %v5895_v42, %v5896_v62  ;;  %v6311_v55 = vsel %vm1145_vm2, %v6309_v15, %v6310_v9  ;;  %v5915_v29 = vrot.slane %v5914_v5, 4  ;;  %v5878_v2 = vmax.f32 %v13276_v26, %v5877_v57  ;;  %v8021_v42 = vpop.permute.xlu1 %8020 }
 0x458   :  { %v8144_v46 = vpack.i.bf16 %v6311_v55, %v13626_v47  ;;  %v5905_v17 = vrot.slane %v5904_v7, 1  ;;  %v13712_v22 = vsel %vm1615_vm1, %v6354_v27, %v6355_v54  ;;  %v5910_v43 = vrot.slane %v5909_v63, 2 }
 0x459   :  { %v5898_v35 = vrot.slane %v5897_v32, 1  ;;  %v5916_v60 = vmax.f32 %v5914_v5, %v5915_v29  ;;  %vm15369_vm13 = vcmask 261120   ;;  %v5921_v11 = vsel %vm5031_vm4, %v4902_v59, -inf }
 0x45a   :  { %8145 = vrot.lane.b32.xlu0 %v8144_v46, %s8220_s28  ;;  %v6717_v21 = vsel %vm15369_vm13, %v6701_v61, %v8002_v31  ;;  %v6168_v47 = vsel %vm6056_vm5, %v5885_v18, %v5878_v2  ;;  %8140 = vrot.lane.b32.xlu1 %v8129_v4, %s8216_s24  ;;  %v5911_v26 = vmax.f32 %v5909_v63, %v5910_v43  ;;  %v5922_v48 = vrot.slane %v5921_v11, 4  ;;  %v8026_v8 = vpop.permute.xlu0 %8025  ;;  %v15371_v4 = vld [vmem:[#allocation32_spill] sm:$0xff]  ;;  %v15375_v2 = vld [vmem:[#allocation9_spill] sm:$0xff] }
 0x45b   :  { %v5899_v40 = vmax.f32 %v5897_v32, %v5898_v35  ;;  %v5917_v57 = vrot.slane %v5916_v60, 2  ;;  %v6169_v33 = vsel %vm6058_vm6, %v5892_v20, %v6168_v47  ;;  %v8154_v36 = vpack.i.bf16 %v13712_v22, %v13645_v52 }
 0x45c   :  { %v5906_v58 = vmax.f32 %v5904_v7, %v5905_v17  ;;  %v8007_v61 = vunpack.i.l.bf16 %v13696_v44  ;;  %v5912_v31 = vrot.slane %v5911_v26, 1  ;;  %v5923_v13 = vmax.f32 %v5921_v11, %v5922_v48 }
 0x45d   :  { %v6170_v53 = vsel %vm6060_vm7, %v5899_v40, %v6169_v33  ;;  %v5918_v50 = vmax.f32 %v5916_v60, %v5917_v57  ;;  %v8008_v37 = vunpack.i.h.bf16 %v13696_v44  ;;  %vm15370_vm4 = vcmask 392192   ;;  %v15376_v40 = vld [vmem:[#allocation33_spill] sm:$0xff]  ;;  %v15377_v33 = vld [vmem:[#allocation44_spill] sm:$0xff] }
 0x45e   :  { %8155 = vrot.lane.b32.xlu0 %v8154_v36, %s8217_s25  ;;  %v6171_v10 = vsel %vm14440_vm8, %v5906_v58, %v6170_v53  ;;  %v6733_v49 = vsel %vm15370_vm4, %v6717_v21, %v8007_v61  ;;  %v8012_v25 = vunpack.i.l.bf16 %v8011_v41  ;;  %8150 = vrot.lane.b32.xlu1 %v8144_v46, %s8218_s26  ;;  %v5913_v6 = vmax.f32 %v5911_v26, %v5912_v31  ;;  %v15378_v53 = vld [vmem:[#allocation74_spill] sm:$0xff]  ;;  %v15380_v31 = vld [vmem:[#allocation87_spill] sm:$0xff] }
 0x45f   :  { %v5919_v28 = vrot.slane %v5918_v50, 1  ;;  %v5924_v16 = vrot.slane %v5923_v13, 2  ;;  %v8017_v5 = vunpack.i.l.bf16 %v8016_v12  ;;  %v8013_v38 = vunpack.i.h.bf16 %v8011_v41 }
 0x460   :  { %v6750_v62 = vsel %vm15355_vm12, %v6733_v49, %v8012_v25  ;;  %v8022_v7 = vunpack.i.l.bf16 %v8021_v42  ;;  %v6702_v15 = vsel %vm4230_vm3, %v15371_v4, %v7998_v45  ;;  %vm15372_vm13 = vcmask 1045509  }
 0x461   :  { %v5925_v44 = vmax.f32 %v5923_v13, %v5924_v16  ;;  %v6172_v9 = vsel %vm15372_vm13, %v5913_v6, %v6171_v10  ;;  %v8027_v59 = vunpack.i.l.bf16 %v8026_v8  ;;  %vm15373_vm4 = vcmask 261120   ;;  %vm15386_vm13 = vmmov %vm15355_vm12 }
 0x462   :  { %v6718_v27 = vsel %vm15373_vm4, %v6702_v15, %v8003_v56  ;;  %v5920_v54 = vmax.f32 %v5918_v50, %v5919_v28  ;;  %6401 = vrot.lane.b32.xlu1 %v6311_v55, %s8215_s21  ;;  %vm15374_vm8 = vcmask 392192   ;;  %v8018_v32 = vunpack.i.h.bf16 %v8016_v12  ;;  %v8031_v50 = vpop.permute.xlu1 %8030 }
 0x463   :  { %v5926_v14 = vrot.slane %v5925_v44, 1  ;;  %v6734_v18 = vsel %vm15374_vm8, %v6718_v27, %v8008_v37  ;;  %v6767_v24 = vsel %vm6762_vm15, %v6750_v62, %v8017_v5  ;;  %v8023_v63 = vunpack.i.h.bf16 %v8021_v42  ;;  %v8036_v42 = vpop.permute.xlu0 %8035 }
 0x464   :  { %v6173_v20 = vsel %vm6066_vm10, %v5920_v54, %v6172_v9  ;;  %v6751_v45 = vsel %vm15355_vm12, %v6734_v18, %v8013_v38  ;;  %v6784_v29 = vsel %vm6779_vm14, %v6767_v24, %v8022_v7  ;;  %v8028_v51 = vunpack.i.h.bf16 %v8026_v8  ;;  %v15381_v9 = vld [vmem:[#allocation123_spill] sm:$0xff] }
 0x465   :  { %v5927_v46 = vmax.f32 %v5925_v44, %v5926_v14  ;;  %v6801_v56 = vsel %vm6796_vm9, %v6784_v29, %v8027_v59  ;;  %v6768_v35 = vsel %vm6762_vm15, %v6751_v45, %v8018_v32  ;;  %v8033_v8 = vunpack.i.h.bf16 %v8031_v50 }
 0x466   :  { %6953 = vmatmul.mubr.f32.gmra.mrb[8].mxu0 %v6801_v56  ;;  %6446 = vrot.lane.b32.xlu1 %v13712_v22, %s8214_s0  ;;  %v6785_v43 = vsel %vm6779_vm14, %v6768_v35, %v8023_v63  ;;  %v8041_v13 = vpop.permute.xlu1 %8040  ;;  %v8032_v6 = vunpack.i.l.bf16 %v8031_v50  ;;  %v8038_v28 = vunpack.i.h.bf16 %v8036_v42  ;;  %v8037_v16 = vunpack.i.l.bf16 %v8036_v42  ;;  %v15389_v42 = vld [vmem:[#allocation92_spill] sm:$0xff] }
 0x467   :  { %v6174_v55 = vsel %vm6068_vm11, %v5927_v46, %v6173_v20  ;;  %7776 = vmatprep.mubr.msk.f32.mxu0 %vm4230_vm3, %v15375_v2  ;;  %v6802_v60 = vsel %vm6796_vm9, %v6785_v43, %v8028_v51  ;;  %v8046_v10 = vpop.permute.xlu0 %8045  ;;  %v8043_v62 = vunpack.i.h.bf16 %v8041_v13  ;;  %v8042_v7 = vunpack.i.l.bf16 %v8041_v13 }
 0x468   :  { %v6190_v17 = vrot.slane %v6174_v55, 7  ;;  %v8048_v4 = vunpack.i.h.bf16 %v8046_v10  ;;  %v8047_v15 = vunpack.i.l.bf16 %v8046_v10  ;;  %v6707_v44 = vsel %vm4230_vm3, %v15376_v40, %v8033_v8 }
 0x469   :  { %v6703_v59 = vsel %vm4230_vm3, %v15381_v9, %v8032_v6 }
 0x46a   :  { %v6222_v41 = vsel %vm161_vm0, 0.0, %v6190_v17  ;;  %v6238_v21 = vsel %vm161_vm0, %v6190_v17, 0.0  ;;  %6958 = vmatmul.mubr.f32.gmra.mrb[10].mxu0 %v6802_v60  ;;  %v8051_v37 = vpop.permute.xlu1 %8050  ;;  %vm15382_vm0 = vmmov %vm15373_vm4 }
 0x46b   :  { %v8159_v11 = vpack.i.bf16 %v6222_v41, %v15376_v40  ;;  %v6364_v47 = vrot.slane %v6222_v41, 1  ;;  %v6365_v12 = vrot.slane %v6238_v21, 1  ;;  %7777 = vmatprep.mubr.msk.f32.mxu0 %vm4230_vm3, %v13457_v19  ;;  %v6370_v26 = vrot.slane %v6222_v41, 2  ;;  %v15379_v19 = vld [vmem:[#allocation63_spill] sm:$0xff]  ;;  %v8056_v49 = vpop.permute.xlu0 %8055  ;;  %vm15387_vm4 = vmmov %vm15355_vm12 }
 0x46c   :  { %v6371_v57 = vrot.slane %v6238_v21, 2  ;;  %v8058_v27 = vunpack.i.h.bf16 %v8056_v49  ;;  %v8057_v54 = vunpack.i.l.bf16 %v8056_v49  ;;  %v6719_v14 = vsel %vm15382_vm0, %v6703_v59, %v8037_v16  ;;  %vm15390_vm12 = vmmov %vm15382_vm0 }
 0x46d   :  { %8160 = vrot.lane.b32.xlu0 %v8159_v11, %s8219_s27  ;;  %v6366_v48 = vsel %vm1145_vm2, %v6364_v47, %v6365_v12  ;;  %vm15384_vm2 = vmmov %vm15374_vm8  ;;  %v8053_v47 = vunpack.i.h.bf16 %v8051_v37  ;;  %v8052_v12 = vunpack.i.l.bf16 %v8051_v37 }
 0x46e   :  { %v8169_v36 = vpack.i.bf16 %v6366_v48, %v15377_v33  ;;  %v13762_v58 = vsel %vm1615_vm1, %v6370_v26, %v6371_v57  ;;  %v8061_v25 = vpop.permute.xlu1 %8060  ;;  %vm15383_vm1 = vmmov %vm15382_vm0  ;;  %v6735_v20 = vsel %vm15384_vm2, %v6719_v14, %v8042_v7 }
 0x46f   :  { %v8179_v61 = vpack.i.bf16 %v13762_v58, %v15378_v53  ;;  %v6723_v18 = vsel %vm15383_vm1, %v6707_v44, %v8038_v28  ;;  %vm15385_vm8 = vmmov %vm15384_vm2  ;;  %v6752_v63 = vsel %vm15386_vm13, %v6735_v20, %v8047_v15  ;;  %v8063_v26 = vunpack.i.h.bf16 %v8061_v25 }
 0x470   :  { %8170 = vrot.lane.b32.xlu1 %v8169_v36, %s8220_s28  ;;  %v6740_v45 = vsel %vm15385_vm8, %v6723_v18, %v8043_v62  ;;  %v6769_v2 = vsel %vm6762_vm15, %v6752_v63, %v8057_v54  ;;  %v8062_v57 = vunpack.i.l.bf16 %v8061_v25  ;;  %v6708_v13 = vsel %vm4230_vm3, %v15380_v31, %v8053_v47  ;;  %vm15391_vm1 = vmmov %vm15384_vm2 }
 0x471   :  { %8165 = vrot.lane.b32.xlu0 %v8159_v11, %s8216_s24  ;;  %v6757_v29 = vsel %vm15387_vm4, %v6740_v45, %v8048_v4  ;;  %v15388_v11 = vld [vmem:[#allocation4_spill] sm:$0xff]  ;;  %v6724_v25 = vsel %vm15382_vm0, %v6708_v13, %v8063_v26  ;;  %vm15392_vm2 = vmmov %vm15391_vm1 }
 0x472   :  { %v6774_v35 = vsel %vm6762_vm15, %v6757_v29, %v8058_v27  ;;  %vm15393_vm8 = vmmov %vm15387_vm4 }
 0x473   :  { %vm15394_vm13 = vmmov %vm15387_vm4 }
 0x474   :  { %8180 = vrot.lane.b32.xlu1 %v8179_v61, %s8217_s25  ;;  %vm15395_vm4 = vmmov %vm15382_vm0 }
 0x475   :  { %8175 = vrot.lane.b32.xlu0 %v8169_v36, %s8218_s26  ;;  %vm15398_vm0 = vmmov %vm15391_vm1 }
 0x478   :  { %6672 = vrot.lane.b32.xlu1 %v15379_v19, %s8220_s28 }
 0x479   :  { %6627 = vrot.lane.b32.xlu0 %v15380_v31, %s8219_s27 }
 0x48b   :  { %v8066_v5 = vpop.permute.xlu0 %8065  ;;  %v8071_v38 = vpop.permute.xlu1 %8070 }
 0x48c   :  { %v8068_v32 = vunpack.i.h.bf16 %v8066_v5  ;;  %v8067_v24 = vunpack.i.l.bf16 %v8066_v5  ;;  %v8073_v48 = vunpack.i.h.bf16 %v8071_v38  ;;  %v8072_v33 = vunpack.i.l.bf16 %v8071_v38 }
 0x48e   :  { %v6786_v17 = vsel %vm6779_vm14, %v6769_v2, %v8067_v24  ;;  %v6791_v43 = vsel %vm6779_vm14, %v6774_v35, %v8068_v32  ;;  %v6741_v16 = vsel %vm15392_vm2, %v6724_v25, %v8073_v48 }
 0x495   :  { %v8076_v46 = vpop.permute.xlu0 %8075  ;;  %v8081_v51 = vpop.permute.xlu1 %8080 }
 0x496   :  { %v8078_v56 = vunpack.i.h.bf16 %v8076_v46  ;;  %v8077_v55 = vunpack.i.l.bf16 %v8076_v46  ;;  %v8083_v61 = vunpack.i.h.bf16 %v8081_v51  ;;  %v8082_v19 = vunpack.i.l.bf16 %v8081_v51 }
 0x498   :  { %v6803_v60 = vsel %vm6796_vm9, %v6786_v17, %v8077_v55  ;;  %v6808_v41 = vsel %vm6796_vm9, %v6791_v43, %v8078_v56  ;;  %v6758_v31 = vsel %vm15394_vm13, %v6741_v16, %v8083_v61  ;;  %v15396_v56 = vld [vmem:[#allocation65_spill] sm:$0xff]  ;;  %vm15402_vm13 = vmmov %vm15395_vm4 }
 0x499   :  { %v8086_v21 = vpop.permute.xlu0 %8085  ;;  %6963 = vmatmul.mubr.f32.gmra.mrb[12].mxu0 %v6803_v60  ;;  %6988 = vmatmul.mubr.f32.vlgmr.msra.gmra.mrb[0].mxu1 %v6808_v41 }
 0x49a   :  { %v13790_v40 = vpop.permute.xlu1 %8090  ;;  %7783 = vmatprep.mubr.msk.f32.mxu1 %vm4230_vm3, %v13531_v1  ;;  %7778 = vmatprep.mubr.msk.f32.mxu0 %vm4230_vm3, %v15388_v11  ;;  %v6704_v1 = vsel %vm4230_vm3, %v15389_v42, %v8052_v12  ;;  %v8088_v10 = vunpack.i.h.bf16 %v8086_v21  ;;  %v8087_v49 = vunpack.i.l.bf16 %v8086_v21 }
 0x49b   :  { %v6720_v37 = vsel %vm15390_vm12, %v6704_v1, %v8062_v57  ;;  %v8092_v32 = vunpack.i.l.bf16 %v13790_v40  ;;  %vm15397_vm12 = vmmov %vm15391_vm1 }
 0x49c   :  { %v6736_v28 = vsel %vm15391_vm1, %v6720_v37, %v8072_v33  ;;  %v6775_v15 = vsel %vm6762_vm15, %v6758_v31, %v8088_v10  ;;  %vm15399_vm1 = vmmov %vm15393_vm8 }
 0x49d   :  { %v13796_v36 = vpop.permute.xlu0 %8095  ;;  %v6753_v5 = vsel %vm15393_vm8, %v6736_v28, %v8082_v19  ;;  %vm15400_vm2 = vmmov %vm15399_vm1 }
 0x49e   :  { %v13798_v50 = vpop.permute.xlu1 %8100  ;;  %v8098_v8 = vunpack.i.h.bf16 %v13796_v36  ;;  %v8097_v6 = vunpack.i.l.bf16 %v13796_v36  ;;  %v6770_v4 = vsel %vm6762_vm15, %v6753_v5, %v8087_v49  ;;  %vm15401_vm8 = vmmov %vm15395_vm4 }
 0x49f   :  { %v8102_v20 = vunpack.i.l.bf16 %v13798_v50  ;;  %v8103_v28 = vunpack.i.h.bf16 %v13798_v50 }
 0x4a0   :  { %v6787_v44 = vsel %vm6779_vm14, %v6770_v4, %v8097_v6  ;;  %v6792_v9 = vsel %vm6779_vm14, %v6775_v15, %v8098_v8  ;;  %v8093_v8 = vunpack.i.h.bf16 %v13790_v40 }
 0x4a1   :  { %v8106_v54 = vpop.permute.xlu0 %8105 }
 0x4a2   :  { %v13812_v38 = vpop.permute.xlu1 %8110  ;;  %v8108_v45 = vunpack.i.h.bf16 %v8106_v54  ;;  %v8107_v63 = vunpack.i.l.bf16 %v8106_v54  ;;  %v6705_v15 = vsel %vm4230_vm3, %v13472_v0, %v8093_v8 }
 0x4a3   :  { %v8113_v62 = vunpack.i.h.bf16 %v13812_v38  ;;  %v8112_v7 = vunpack.i.l.bf16 %v13812_v38  ;;  %v6721_v40 = vsel %vm15402_vm13, %v6705_v15, %v8103_v28 }
 0x4a4   :  { %v6737_v55 = vsel %vm15397_vm12, %v15396_v56, %v8107_v63  ;;  %vm15404_vm12 = vmmov %vm15398_vm0 }
 0x4a5   :  { %v6804_v59 = vsel %vm6796_vm9, %v6787_v44, %v8112_v7  ;;  %v6809_v27 = vsel %vm6796_vm9, %v6792_v9, %v8113_v62  ;;  %v8116_v14 = vpop.permute.xlu0 %8115 }
 0x4a6   :  { %6968 = vmatmul.mubr.f32.gmra.mrb[14].mxu0 %v6804_v59  ;;  %6993 = vmatmul.mubr.f32.gmra.mrb[2].mxu1 %v6809_v27  ;;  %v8121_v24 = vpop.permute.xlu1 %8120  ;;  %v8118_v29 = vunpack.i.h.bf16 %v8116_v14  ;;  %v8117_v46 = vunpack.i.l.bf16 %v8116_v14 }
 0x4a7   :  { %7779 = vmatprep.mubr.msk.f32.mxu0 %vm4230_vm3, %v13645_v52  ;;  %7784 = vmatprep.mubr.msk.f32.mxu1 %vm4230_vm3, %v13712_v22  ;;  %v6709_v52 = vsel %vm4230_vm3, %v13407_v23, %v8092_v32  ;;  %v8123_v35 = vunpack.i.h.bf16 %v8121_v24  ;;  %v8122_v17 = vunpack.i.l.bf16 %v8121_v24 }
 0x4a8   :  { %v6725_v22 = vsel %vm15395_vm4, %v6709_v52, %v8102_v20  ;;  %v6754_v60 = vsel %vm15399_vm1, %v6737_v55, %v8117_v46  ;;  %vm15403_vm4 = vmmov %vm15398_vm0 }
 0x4a9   :  { %v6742_v2 = vsel %vm15398_vm0, %v6725_v22, %v8108_v45  ;;  %v6771_v48 = vsel %vm6762_vm15, %v6754_v60, %v8122_v17  ;;  %vm15405_vm0 = vmmov %vm15399_vm1 }
 0x4aa   :  { %v6759_v41 = vsel %vm15400_vm2, %v6742_v2, %v8118_v29  ;;  %vm15406_vm1 = vmmov %vm15405_vm0 }
 0x4ab   :  { %v6776_v33 = vsel %vm6762_vm15, %v6759_v41, %v8123_v35  ;;  %vm15408_vm2 = vmmov %vm15401_vm8 }
 0x4ac   :  { %vm15410_vm13 = vmmov %vm15403_vm4 }
 0x4b9   :  { %v13830_v18 = vpop.permute.xlu0 %8125 }
 0x4ba   :  { %v8127_v49 = vunpack.i.l.bf16 %v13830_v18  ;;  %v8128_v14 = vunpack.i.h.bf16 %v13830_v18 }
 0x4bc   :  { %v6710_v5 = vsel %vm4230_vm3, %v13509_v39, %v8127_v49 }
 0x4be   :  { %v13834_v51 = vpop.permute.xlu0 %8135 }
 0x4bf   :  { %v8137_v25 = vunpack.i.l.bf16 %v13834_v51  ;;  %v8138_v52 = vunpack.i.h.bf16 %v13834_v51 }
 0x4c8   :  { %v8131_v43 = vpop.permute.xlu1 %8130 }
 0x4c9   :  { %v8133_v21 = vunpack.i.h.bf16 %v8131_v43  ;;  %v8132_v47 = vunpack.i.l.bf16 %v8131_v43  ;;  %v6706_v43 = vsel %vm4230_vm3, %v13619_v34, %v8128_v14 }
 0x4cb   :  { %v6788_v61 = vsel %vm6779_vm14, %v6771_v48, %v8132_v47  ;;  %v6793_v19 = vsel %vm6779_vm14, %v6776_v33, %v8133_v21  ;;  %v15407_v47 = vld [vmem:[#allocation77_spill] sm:$0xff] }
 0x4cc   :  { %v8146_v12 = vpop.permute.xlu0 %8145  ;;  %v8141_v26 = vpop.permute.xlu1 %8140 }
 0x4cd   :  { %v8148_v57 = vunpack.i.h.bf16 %v8146_v12  ;;  %v8147_v23 = vunpack.i.l.bf16 %v8146_v12  ;;  %v8143_v31 = vunpack.i.h.bf16 %v8141_v26  ;;  %v8142_v62 = vunpack.i.l.bf16 %v8141_v26 }
 0x4ce   :  { %v6722_v12 = vsel %vm15408_vm2, %v6706_v43, %v8138_v52 }
 0x4cf   :  { %v6805_v13 = vsel %vm6796_vm9, %v6788_v61, %v8147_v23  ;;  %v6810_v42 = vsel %vm6796_vm9, %v6793_v19, %v8148_v57  ;;  %v6738_v39 = vsel %vm15404_vm12, %v6721_v40, %v8142_v62  ;;  %vm15411_vm12 = vmmov %vm15405_vm0 }
 0x4d0   :  { %6973 = vmatmul.mubr.f32.gmra.mrb[16].mxu0 %v6805_v13  ;;  %6998 = vmatmul.mubr.f32.gmra.mrb[4].mxu1 %v6810_v42  ;;  %v8151_v1 = vpop.permute.xlu1 %8150  ;;  %v8156_v37 = vpop.permute.xlu0 %8155 }
 0x4d1   :  { %7780 = vmatprep.mubr.msk.f32.mxu0 %vm4230_vm3, %v15378_v53  ;;  %7785 = vmatprep.mubr.msk.f32.mxu1 %vm4230_vm3, %v13762_v58  ;;  %v6726_v53 = vsel %vm15401_vm8, %v6710_v5, %v8137_v25  ;;  %v8153_v4 = vunpack.i.h.bf16 %v8151_v1  ;;  %v8152_v58 = vunpack.i.l.bf16 %v8151_v1  ;;  %v8158_v44 = vunpack.i.h.bf16 %v8156_v37  ;;  %vm15409_vm8 = vmmov %vm15408_vm2 }
 0x4d2   :  { %v8157_v9 = vunpack.i.l.bf16 %v8156_v37  ;;  %v6743_v54 = vsel %vm15403_vm4, %v6726_v53, %v8143_v31  ;;  %v13903_v37 = vld [vmem:[%s14096_s4] ss:$0 sm:$0xff]  ;;  %vm15413_vm2 = vcmask 1045509  }
 0x4d3   :  { %v6755_v32 = vsel %vm15405_vm0, %v6738_v39, %v8152_v58  ;;  %v6760_v24 = vsel %vm15406_vm1, %v6743_v54, %v8153_v4  ;;  %vm15412_vm1 = vcmask 1044484  }
 0x4d4   :  { %v6402_v10 = vpop.permute.xlu1 %6401  ;;  %v6772_v29 = vsel %vm6762_vm15, %v6755_v32, %v8157_v9  ;;  %v6777_v46 = vsel %vm6762_vm15, %v6760_v24, %v8158_v44 }
 0x4d5   :  { %v6711_v60 = vsel %vm4230_vm3, %v13692_v3, %v6402_v10 }
 0x4d8   :  { %v6447_v16 = vpop.permute.xlu1 %6446 }
 0x4d9   :  { %v6727_v26 = vsel %vm15409_vm8, %v6711_v60, %v6447_v16  ;;  %vm15414_vm8 = vmmov %vm15412_vm1 }
 0x4df   :  { %v8161_v59 = vpop.permute.xlu0 %8160 }
 0x4e0   :  { %v8163_v27 = vunpack.i.h.bf16 %v8161_v59  ;;  %v8162_v50 = vunpack.i.l.bf16 %v8161_v59 }
 0x4e2   :  { %v8171_v20 = vpop.permute.xlu1 %8170  ;;  %v6789_v22 = vsel %vm6779_vm14, %v6772_v29, %v8162_v50  ;;  %v6794_v56 = vsel %vm6779_vm14, %v6777_v46, %v8163_v27 }
 0x4e3   :  { %v8166_v45 = vpop.permute.xlu0 %8165  ;;  %v8173_v0 = vunpack.i.h.bf16 %v8171_v20  ;;  %v8172_v63 = vunpack.i.l.bf16 %v8171_v20 }
 0x4e4   :  { %v8168_v55 = vunpack.i.h.bf16 %v8166_v45  ;;  %v8167_v18 = vunpack.i.l.bf16 %v8166_v45 }
 0x4e5   :  { %v6806_v2 = vsel %vm6796_vm9, %v6789_v22, %v8172_v63  ;;  %v6811_v35 = vsel %vm6796_vm9, %v6794_v56, %v8173_v0 }
 0x4e6   :  { %v8181_v17 = vpop.permute.xlu1 %8180  ;;  %6978 = vmatmul.mubr.f32.gmra.mrb[18].mxu0 %v6806_v2  ;;  %7003 = vmatmul.mubr.f32.gmra.mrb[6].mxu1 %v6811_v35  ;;  %v6739_v34 = vsel %vm15410_vm13, %v6722_v12, %v8167_v18  ;;  %v6744_v48 = vsel %vm15403_vm4, %v6727_v26, %v8168_v55  ;;  %vm15415_vm13 = vmmov %vm15413_vm2 }
 0x4e7   :  { %v8176_v51 = vpop.permute.xlu0 %8175  ;;  %v8183_v41 = vunpack.i.h.bf16 %v8181_v17  ;;  %v8182_v21 = vunpack.i.l.bf16 %v8181_v17  ;;  %7781 = vmatprep.mubr.msk.f32.mxu0 %vm4230_vm3, %v15407_v47  ;;  %7786 = vmatprep.mubr.msk.f32.mxu1 %vm4230_vm3, %v15388_v11  ;;  %vm15417_vm4 = vmmov %vm15413_vm2 }
 0x4e8   :  { %v8178_v57 = vunpack.i.h.bf16 %v8176_v51  ;;  %v8177_v23 = vunpack.i.l.bf16 %v8176_v51 }
 0x4ea   :  { %v6761_v3 = vsel %vm15411_vm12, %v6744_v48, %v8178_v57  ;;  %v6756_v33 = vsel %vm15405_vm0, %v6739_v34, %v8177_v23  ;;  %v6673_v61 = vpop.permute.xlu1 %6672  ;;  %vm15418_vm12 = vmmov %vm15412_vm1 }
 0x4eb   :  { %v6628_v19 = vpop.permute.xlu0 %6627  ;;  %v6773_v13 = vsel %vm6762_vm15, %v6756_v33, %v8182_v21  ;;  %v6778_v11 = vsel %vm6762_vm15, %v6761_v3, %v8183_v41  ;;  %vm7531_vm15 = vcmask 1043456   ;;  %vm15419_vm0 = vmmov %vm15413_vm2 }
 0x4ec   :  { %v6790_v42 = vsel %vm6779_vm14, %v6773_v13, %v6628_v19  ;;  %v6795_v1 = vsel %vm6779_vm14, %v6778_v11, %v8097_v6  ;;  %vm7029_vm14 = vcmask 31744  }
 0x4ed   :  { %v6807_v10 = vsel %vm6796_vm9, %v6790_v42, %v6673_v61  ;;  %v6812_v49 = vsel %vm6796_vm9, %v6795_v1, %v8112_v7  ;;  %vm7230_vm9 = vcmask 25600  }
 0x4ee   :  { %6983 = vmatmul.mubr.f32.gmra.mrb[20].mxu0 %v6807_v10  ;;  %7008 = vmatmul.mubr.f32.gmra.mrb[8].mxu1 %v6812_v49 }
 0x4f3   :  { %v6934_v25 = vpop.f32.mrb[0].mxu0 }
 0x4f4   :  { %v6935_v8 = vadd.f32 %v13903_v37, %v6934_v25  ;;  %v6936_v28 = vpop.f32.mrb[1].mxu0 }
 0x4f6   :  { %v7013_v16 = vmax.f32 %v6935_v8, 0.0 }
 0x4f7   :  { %v6939_v36 = vpop.f32.mrb[2].mxu0 }
 0x4f8   :  { %v6940_v6 = vadd.f32 %v13903_v37, %v6939_v36  ;;  %v6941_v5 = vpop.f32.mrb[3].mxu0  ;;  %v7030_v7 = vsel %vm7029_vm14, %v7013_v16, -inf }
 0x4fa   :  { %v7014_v38 = vmax.f32 %v6940_v6, 0.0 }
 0x4fc   :  { %v7031_v31 = vsel %vm7029_vm14, %v7014_v38, -inf }
 0x4fd   :  { %v7032_v62 = vmax.f32 %v7030_v7, %v7031_v31 }
 0x4ff   :  { %v7069_v53 = vrot.slane %v7032_v62, %v15105_v30  ;;  %v7062_v4 = vcombine.high %v7032_v62, %v7032_v62 }
 0x501   :  { %v7077_v58 = vcombine.high %v7069_v53, %v7069_v53  ;;  %v7076_v15 = vrot.slane %v7062_v4, %v15105_v30  ;;  %v7231_v9 = vsel %vm7230_vm9, %v7069_v53, -inf }
 0x502   :  { %v7232_v50 = vrot.slane %v7231_v9, 4 }
 0x503   :  { %v7238_v44 = vsel %vm7230_vm9, %v7077_v58, -inf  ;;  %v7078_v59 = vcombine.high %v7076_v15, %v7076_v15  ;;  %v7245_v27 = vsel %vm7230_vm9, %v7076_v15, -inf }
 0x504   :  { %v7239_v40 = vrot.slane %v7238_v44, 4  ;;  %v7246_v54 = vrot.slane %v7245_v27, 4  ;;  %v7233_v32 = vmax.f32 %v7231_v9, %v7232_v50 }
 0x505   :  { %v7252_v14 = vsel %vm7230_vm9, %v7078_v59, -inf }
 0x506   :  { %v7240_v39 = vmax.f32 %v7238_v44, %v7239_v40  ;;  %v7247_v20 = vmax.f32 %v7245_v27, %v7246_v54  ;;  %v7253_v45 = vrot.slane %v7252_v14, 4  ;;  %v7234_v46 = vrot.slane %v7233_v32, 2 }
 0x508   :  { %v7241_v29 = vrot.slane %v7240_v39, 2  ;;  %v7248_v22 = vrot.slane %v7247_v20, 2  ;;  %v7254_v56 = vmax.f32 %v7252_v14, %v7253_v45  ;;  %v7235_v43 = vmax.f32 %v7233_v32, %v7234_v46  ;;  %v7455_v14 = vld [vmem:[%s14097_s5] sm:$0xf] }
 0x509   :  { %7815 = vmatprep.subr.msk.mxu1 %vm7531_vm15, %v7455_v14 }
 0x50a   :  { %v7242_v35 = vmax.f32 %v7240_v39, %v7241_v29  ;;  %v7249_v60 = vmax.f32 %v7247_v20, %v7248_v22  ;;  %v7255_v51 = vrot.slane %v7254_v56, 2  ;;  %v7236_v26 = vrot.slane %v7235_v43, 1  ;;  %7816 = vmatpush3.msk.msra.mxu1 %vm7531_vm15, %v7455_v14 }
 0x50c   :  { %v7243_v47 = vrot.slane %v7242_v35, 1  ;;  %v7250_v34 = vrot.slane %v7249_v60, 1  ;;  %v7256_v48 = vmax.f32 %v7254_v56, %v7255_v51  ;;  %v7237_v11 = vmax.f32 %v7235_v43, %v7236_v26 }
 0x50e   :  { %v7244_v3 = vmax.f32 %v7242_v35, %v7243_v47  ;;  %v7251_v28 = vmax.f32 %v7249_v60, %v7250_v34  ;;  %v7257_v36 = vrot.slane %v7256_v48, 1  ;;  %v7624_v47 = vld [vmem:[%s14098_s7] sm:$0xff] }
 0x510   :  { %v7495_v6 = vsel %vm6056_vm5, %v7244_v3, %v7237_v11  ;;  %v7258_v44 = vmax.f32 %v7256_v48, %v7257_v36 }
 0x511   :  { %v7496_v9 = vsel %vm6058_vm6, %v7251_v28, %v7495_v6 }
 0x523   :  { %v6944_v24 = vpop.f32.mrb[4].mxu0 }
 0x524   :  { %v6945_v0 = vadd.f32 %v13903_v37, %v6944_v24  ;;  %v6946_v63 = vpop.f32.mrb[5].mxu0 }
 0x525   :  { %v7497_v63 = vsel %vm6060_vm7, %v7258_v44, %v7496_v9 }
 0x526   :  { %v7015_v55 = vmax.f32 %v6945_v0, 0.0 }
 0x527   :  { %v6949_v52 = vpop.f32.mrb[6].mxu0 }
 0x528   :  { %v6950_v18 = vadd.f32 %v13903_v37, %v6949_v52  ;;  %v6951_v2 = vpop.f32.mrb[7].mxu0  ;;  %v7033_v41 = vsel %vm7029_vm14, %v7015_v55, -inf }
 0x52a   :  { %v7016_v17 = vmax.f32 %v6950_v18, 0.0 }
 0x52c   :  { %v7034_v21 = vsel %vm7029_vm14, %v7016_v17, -inf }
 0x52d   :  { %v7035_v12 = vmax.f32 %v7033_v41, %v7034_v21 }
 0x52f   :  { %v7079_v57 = vcombine.high %v7035_v12, %v7035_v12  ;;  %v7086_v23 = vrot.slane %v7035_v12, %v15105_v30  ;;  %v7625_v12 = vld [vmem:[%s14098_s7 + $0x8] sm:$0xff] }
 0x530   :  { %v13946_v26 = vpack.c.bf16 %v7625_v12, %v7624_v47 }
 0x531   :  { %v7093_v33 = vrot.slane %v7079_v57, %v15105_v30  ;;  %v7094_v61 = vcombine.high %v7086_v23, %v7086_v23  ;;  %v7259_v19 = vsel %vm7230_vm9, %v7086_v23, -inf }
 0x532   :  { %v7260_v13 = vrot.slane %v7259_v19, 4  ;;  %7873 = vmatprep.subr.bf16.mxu1 %v13946_v26 }
 0x533   :  { %v7095_v42 = vcombine.high %v7093_v33, %v7093_v33  ;;  %v7266_v1 = vsel %vm7230_vm9, %v7094_v61, -inf  ;;  %v7273_v10 = vsel %vm7230_vm9, %v7093_v33, -inf }
 0x534   :  { %v7261_v49 = vmax.f32 %v7259_v19, %v7260_v13  ;;  %v7267_v25 = vrot.slane %v7266_v1, 4  ;;  %v7274_v8 = vrot.slane %v7273_v10, 4 }
 0x535   :  { %v7280_v16 = vsel %vm7230_vm9, %v7095_v42, -inf }
 0x536   :  { %v7262_v5 = vrot.slane %v7261_v49, 2  ;;  %v7268_v38 = vmax.f32 %v7266_v1, %v7267_v25  ;;  %v7275_v7 = vmax.f32 %v7273_v10, %v7274_v8  ;;  %v7281_v31 = vrot.slane %v7280_v16, 4 }
 0x538   :  { %v7263_v62 = vmax.f32 %v7261_v49, %v7262_v5  ;;  %v7269_v53 = vrot.slane %v7268_v38, 2  ;;  %v7276_v4 = vrot.slane %v7275_v7, 2  ;;  %v7282_v58 = vmax.f32 %v7280_v16, %v7281_v31 }
 0x539   :  { %v6954_v15 = vpop.f32.mrb[8].mxu0 }
 0x53a   :  { %v6955_v59 = vadd.f32 %v13903_v37, %v6954_v15  ;;  %v6956_v40 = vpop.f32.mrb[9].mxu0  ;;  %v7264_v27 = vrot.slane %v7263_v62, 1  ;;  %v7270_v50 = vmax.f32 %v7268_v38, %v7269_v53  ;;  %v7277_v54 = vmax.f32 %v7275_v7, %v7276_v4 }
 0x53b   :  { %v7283_v39 = vrot.slane %v7282_v58, 2 }
 0x53c   :  { %v7265_v32 = vmax.f32 %v7263_v62, %v7264_v27  ;;  %v7271_v24 = vrot.slane %v7270_v50, 1  ;;  %v7278_v20 = vrot.slane %v7277_v54, 1  ;;  %v7017_v29 = vmax.f32 %v6955_v59, 0.0 }
 0x53d   :  { %v7284_v45 = vmax.f32 %v7282_v58, %v7283_v39  ;;  %v6959_v0 = vpop.f32.mrb[10].mxu0 }
 0x53e   :  { %v6960_v46 = vadd.f32 %v13903_v37, %v6959_v0  ;;  %v6961_v52 = vpop.f32.mrb[11].mxu0  ;;  %v7272_v22 = vmax.f32 %v7270_v50, %v7271_v24  ;;  %v7279_v56 = vmax.f32 %v7277_v54, %v7278_v20  ;;  %v7498_v18 = vsel %vm15412_vm1, %v7265_v32, %v7497_v63 }
 0x53f   :  { %v7285_v55 = vrot.slane %v7284_v45, 1  ;;  %v7036_v60 = vsel %vm7029_vm14, %v7017_v29, -inf }
 0x540   :  { %v7018_v2 = vmax.f32 %v6960_v46, 0.0  ;;  %v7499_v17 = vsel %vm15413_vm2, %v7272_v22, %v7498_v18 }
 0x541   :  { %v7286_v35 = vmax.f32 %v7284_v45, %v7285_v55  ;;  %v7500_v43 = vsel %vm6066_vm10, %v7279_v56, %v7499_v17 }
 0x542   :  { %v7037_v51 = vsel %vm7029_vm14, %v7018_v2, -inf }
 0x543   :  { %v7501_v41 = vsel %vm6068_vm11, %v7286_v35, %v7500_v43  ;;  %v7038_v21 = vmax.f32 %v7036_v60, %v7037_v51 }
 0x544   :  { %7817 = vmatprep.mubr.msk.f32.mxu1 %vm7029_vm14, %v7501_v41 }
 0x545   :  { %v7103_v57 = vrot.slane %v7038_v21, %v15105_v30  ;;  %v7096_v23 = vcombine.high %v7038_v21, %v7038_v21 }
 0x547   :  { %v7111_v34 = vcombine.high %v7103_v57, %v7103_v57  ;;  %v7110_v48 = vrot.slane %v7096_v23, %v15105_v30  ;;  %v7287_v11 = vsel %vm7230_vm9, %v7103_v57, -inf }
 0x548   :  { %v7288_v49 = vrot.slane %v7287_v11, 4 }
 0x549   :  { %v7294_v3 = vsel %vm7230_vm9, %v7111_v34, -inf  ;;  %v7112_v42 = vcombine.high %v7110_v48, %v7110_v48  ;;  %v7301_v10 = vsel %vm7230_vm9, %v7110_v48, -inf }
 0x54a   :  { %v7295_v1 = vrot.slane %v7294_v3, 4  ;;  %v7302_v25 = vrot.slane %v7301_v10, 4  ;;  %v7289_v36 = vmax.f32 %v7287_v11, %v7288_v49 }
 0x54b   :  { %v7308_v28 = vsel %vm7230_vm9, %v7112_v42, -inf }
 0x54c   :  { %v7296_v8 = vmax.f32 %v7294_v3, %v7295_v1  ;;  %v7303_v16 = vmax.f32 %v7301_v10, %v7302_v25  ;;  %v7309_v6 = vrot.slane %v7308_v28, 4  ;;  %v7290_v7 = vrot.slane %v7289_v36, 2 }
 0x54e   :  { %v7297_v38 = vrot.slane %v7296_v8, 2  ;;  %v7304_v53 = vrot.slane %v7303_v16, 2  ;;  %v7310_v4 = vmax.f32 %v7308_v28, %v7309_v6  ;;  %v7291_v27 = vmax.f32 %v7289_v36, %v7290_v7 }
 0x550   :  { %v7298_v59 = vmax.f32 %v7296_v8, %v7297_v38  ;;  %v7305_v50 = vmax.f32 %v7303_v16, %v7304_v53  ;;  %v7311_v54 = vrot.slane %v7310_v4, 2  ;;  %v7292_v20 = vrot.slane %v7291_v27, 1  ;;  %v7626_v53 = vld [vmem:[%s14098_s7 + $0x10] sm:$0xff] }
 0x552   :  { %v7299_v32 = vrot.slane %v7298_v59, 1  ;;  %v7306_v63 = vrot.slane %v7305_v50, 1  ;;  %v7312_v29 = vmax.f32 %v7310_v4, %v7311_v54  ;;  %v7293_v18 = vmax.f32 %v7291_v27, %v7292_v20  ;;  %v7627_v4 = vld [vmem:[%s14098_s7 + $0x18] sm:$0xff]  ;;  %v7629_v27 = vld [vmem:[%s14098_s7 + $0x28] sm:$0xff] }
 0x554   :  { %v7300_v46 = vmax.f32 %v7298_v59, %v7299_v32  ;;  %v7307_v41 = vmax.f32 %v7305_v50, %v7306_v63  ;;  %v7313_v21 = vrot.slane %v7312_v29, 1 }
 0x556   :  { %v7502_v47 = vsel %vm6056_vm5, %v7300_v46, %v7293_v18  ;;  %v7314_v11 = vmax.f32 %v7312_v29, %v7313_v21 }
 0x557   :  { %v7503_v42 = vsel %vm6058_vm6, %v7307_v41, %v7502_v47 }
 0x558   :  { %v7504_v6 = vsel %vm6060_vm7, %v7314_v11, %v7503_v42 }
 0x56c   :  { %v6964_v33 = vpop.f32.mrb[12].mxu0  ;;  %v13952_v61 = vpop.f32.mrb[0].mxu1 }
 0x56d   :  { %v6966_v19 = vpop.f32.mrb[13].mxu0  ;;  %v6991_v13 = vpop.f32.mrb[1].mxu1  ;;  %v6965_v5 = vadd.f32 %v13903_v37, %v6964_v33 }
 0x56f   :  { %v7019_v58 = vmax.f32 %v6965_v5, 0.0 }
 0x571   :  { %v7039_v39 = vsel %vm7029_vm14, %v7019_v58, -inf }
 0x579   :  { %v6969_v31 = vpop.f32.mrb[14].mxu0  ;;  %v13958_v62 = vpop.f32.mrb[2].mxu1 }
 0x57a   :  { %v6970_v15 = vadd.f32 %v13903_v37, %v6969_v31  ;;  %v6971_v44 = vpop.f32.mrb[15].mxu0  ;;  %v6996_v9 = vpop.f32.mrb[3].mxu1  ;;  %v6995_v54 = vadd.f32 %v13903_v37, %v13958_v62 }
 0x57b   :  { %v7876_v9 = vpack.c.bf16 %v7627_v4, %v7626_v53 }
 0x57c   :  { %v7020_v40 = vmax.f32 %v6970_v15, 0.0  ;;  %v7025_v32 = vmax.f32 %v6995_v54, 0.0 }
 0x57e   :  { %v7040_v14 = vsel %vm7029_vm14, %v7020_v40, -inf  ;;  %v7628_v40 = vld [vmem:[%s14098_s7 + $0x20] sm:$0xff]  ;;  %v7048_v63 = vsel %vm7029_vm14, %v7025_v32, -inf }
 0x57f   :  { %v7041_v24 = vmax.f32 %v7039_v39, %v7040_v14  ;;  %v7880_v50 = vpack.c.bf16 %v7629_v27, %v7628_v40 }
 0x581   :  { %v7113_v45 = vcombine.high %v7041_v24, %v7041_v24  ;;  %v7120_v0 = vrot.slane %v7041_v24, %v15105_v30 }
 0x583   :  { %v7127_v52 = vrot.slane %v7113_v45, %v15105_v30  ;;  %v7128_v22 = vcombine.high %v7120_v0, %v7120_v0  ;;  %v7315_v56 = vsel %vm7230_vm9, %v7120_v0, -inf }
 0x584   :  { %v7316_v55 = vrot.slane %v7315_v56, 4 }
 0x585   :  { %v7129_v2 = vcombine.high %v7127_v52, %v7127_v52  ;;  %v7322_v35 = vsel %vm7230_vm9, %v7128_v22, -inf  ;;  %v7329_v17 = vsel %vm7230_vm9, %v7127_v52, -inf }
 0x586   :  { %v7317_v43 = vmax.f32 %v7315_v56, %v7316_v55  ;;  %v7323_v60 = vrot.slane %v7322_v35, 4  ;;  %v7330_v51 = vrot.slane %v7329_v17, 4 }
 0x587   :  { %v7336_v12 = vsel %vm7230_vm9, %v7129_v2, -inf }
 0x588   :  { %v7318_v57 = vrot.slane %v7317_v43, 2  ;;  %v7324_v23 = vmax.f32 %v7322_v35, %v7323_v60  ;;  %v7331_v34 = vmax.f32 %v7329_v17, %v7330_v51  ;;  %v7337_v48 = vrot.slane %v7336_v12, 4 }
 0x58a   :  { %v7319_v3 = vmax.f32 %v7317_v43, %v7318_v57  ;;  %v7325_v33 = vrot.slane %v7324_v23, 2  ;;  %v7332_v19 = vrot.slane %v7331_v34, 2  ;;  %v7338_v13 = vmax.f32 %v7336_v12, %v7337_v48 }
 0x58b   :  { %v6990_v48 = vadd.f32 %v13903_v37, %v13952_v61 }
 0x58c   :  { %v7320_v1 = vrot.slane %v7319_v3, 1  ;;  %v7326_v10 = vmax.f32 %v7324_v23, %v7325_v33  ;;  %v7333_v49 = vmax.f32 %v7331_v34, %v7332_v19  ;;  %v7339_v25 = vrot.slane %v7338_v13, 2 }
 0x58e   :  { %v7321_v8 = vmax.f32 %v7319_v3, %v7320_v1  ;;  %v7327_v28 = vrot.slane %v7326_v10, 1  ;;  %v7334_v36 = vrot.slane %v7333_v49, 1  ;;  %v7340_v16 = vmax.f32 %v7338_v13, %v7339_v25 }
 0x590   :  { %v7328_v5 = vmax.f32 %v7326_v10, %v7327_v28  ;;  %v7335_v38 = vmax.f32 %v7333_v49, %v7334_v36  ;;  %v7341_v7 = vrot.slane %v7340_v16, 1  ;;  %v7505_v31 = vsel %vm15414_vm8, %v7321_v8, %v7504_v6 }
 0x591   :  { %v7024_v28 = vmax.f32 %v6990_v48, 0.0 }
 0x592   :  { %v7342_v58 = vmax.f32 %v7340_v16, %v7341_v7  ;;  %v7506_v15 = vsel %vm15415_vm13, %v7328_v5, %v7505_v31 }
 0x593   :  { %v7507_v44 = vsel %vm6066_vm10, %v7335_v38, %v7506_v15  ;;  %v7046_v53 = vsel %vm7029_vm14, %v7024_v28, -inf }
 0x594   :  { %v7508_v59 = vsel %vm6068_vm11, %v7342_v58, %v7507_v44 }
 0x595   :  { %7818 = vmatmul.mubr.msk.f32.vlgmr.msra.gmra.mrb[10].mxu1 %vm7029_vm14, %v7508_v59 }
 0x596   :  { %7875 = vmatpush3.bf16.msra.mxu1 %v13946_v26 }
 0x597   :  { %7877 = vmatprep.subr.bf16.mxu1 %v7876_v9 }
 0x59a   :  { %7879 = vmatpush3.bf16.msra.mxu1 %v7876_v9 }
 0x59b   :  { %7881 = vmatprep.subr.bf16.mxu1 %v7880_v50 }
 0x59e   :  { %7883 = vmatpush3.bf16.msra.mxu1 %v7880_v50 }
 0x5a3   :  { %v6974_v39 = vpop.f32.mrb[16].mxu0  ;;  %v6999_v14 = vpop.f32.mrb[4].mxu1 }
 0x5a4   :  { %v7000_v24 = vadd.f32 %v13903_v37, %v6999_v14  ;;  %v6976_v20 = vpop.f32.mrb[17].mxu0  ;;  %v7001_v45 = vpop.f32.mrb[5].mxu1  ;;  %v6975_v12 = vadd.f32 %v13903_v37, %v6974_v39 }
 0x5a6   :  { %v7026_v0 = vmax.f32 %v7000_v24, 0.0  ;;  %v7021_v13 = vmax.f32 %v6975_v12, 0.0 }
 0x5a8   :  { %v7049_v26 = vsel %vm7029_vm14, %v7026_v0, -inf  ;;  %v7042_v16 = vsel %vm7029_vm14, %v7021_v13, -inf }
 0x5a9   :  { %v7050_v29 = vmax.f32 %v7048_v63, %v7049_v26 }
 0x5ab   :  { %v7164_v46 = vcombine.high %v7050_v29, %v7050_v29  ;;  %v7171_v52 = vrot.slane %v7050_v29, %v15105_v30 }
 0x5ad   :  { %v7178_v22 = vrot.slane %v7164_v46, %v15105_v30  ;;  %v7179_v62 = vcombine.high %v7171_v52, %v7171_v52  ;;  %v7399_v56 = vsel %vm7230_vm9, %v7171_v52, -inf }
 0x5ae   :  { %v7400_v55 = vrot.slane %v7399_v56, 4 }
 0x5af   :  { %v7180_v18 = vcombine.high %v7178_v22, %v7178_v22  ;;  %v7406_v2 = vsel %vm7230_vm9, %v7179_v62, -inf  ;;  %v7413_v35 = vsel %vm7230_vm9, %v7178_v22, -inf }
 0x5b0   :  { %v7407_v17 = vrot.slane %v7406_v2, 4  ;;  %v7414_v43 = vrot.slane %v7413_v35, 4  ;;  %v7401_v60 = vmax.f32 %v7399_v56, %v7400_v55 }
 0x5b1   :  { %v7420_v41 = vsel %vm7230_vm9, %v7180_v18, -inf }
 0x5b2   :  { %v7408_v51 = vmax.f32 %v7406_v2, %v7407_v17  ;;  %v7415_v21 = vmax.f32 %v7413_v35, %v7414_v43  ;;  %v7421_v47 = vrot.slane %v7420_v41, 4  ;;  %v7402_v57 = vrot.slane %v7401_v60, 2 }
 0x5b4   :  { %v7409_v23 = vrot.slane %v7408_v51, 2  ;;  %v7416_v34 = vrot.slane %v7415_v21, 2  ;;  %v7422_v3 = vmax.f32 %v7420_v41, %v7421_v47  ;;  %v7403_v11 = vmax.f32 %v7401_v60, %v7402_v57 }
 0x5b6   :  { %v7410_v42 = vmax.f32 %v7408_v51, %v7409_v23  ;;  %v7417_v25 = vmax.f32 %v7415_v21, %v7416_v34  ;;  %v7423_v36 = vrot.slane %v7422_v3, 2  ;;  %v7404_v6 = vrot.slane %v7403_v11, 1 }
 0x5b8   :  { %v7411_v5 = vrot.slane %v7410_v42, 1  ;;  %v7418_v31 = vrot.slane %v7417_v25, 1  ;;  %v14009_v4 = vmax.f32 %v7422_v3, %v7423_v36  ;;  %v7405_v59 = vmax.f32 %v7403_v11, %v7404_v6 }
 0x5b9   :  { %v6979_v33 = vpop.f32.mrb[18].mxu0  ;;  %v7004_v19 = vpop.f32.mrb[6].mxu1 }
 0x5ba   :  { %v6980_v1 = vadd.f32 %v13903_v37, %v6979_v33  ;;  %v6981_v10 = vpop.f32.mrb[19].mxu0  ;;  %v7006_v49 = vpop.f32.mrb[7].mxu1  ;;  %v7005_v7 = vadd.f32 %v13903_v37, %v7004_v19  ;;  %v7412_v40 = vmax.f32 %v7410_v42, %v7411_v5  ;;  %v14016_v45 = vmax.f32 %v7417_v25, %v7418_v31 }
 0x5bb   :  { %v7425_v29 = vrot.slane %v14009_v4, 1 }
 0x5bc   :  { %v7022_v8 = vmax.f32 %v6980_v1, 0.0  ;;  %v7027_v20 = vmax.f32 %v7005_v7, 0.0  ;;  %v14027_v57 = vsel %vm6056_vm5, %v7412_v40, %v7405_v59 }
 0x5be   :  { %v7043_v61 = vsel %vm7029_vm14, %v7022_v8, -inf  ;;  %v7051_v2 = vsel %vm7029_vm14, %v7027_v20, -inf }
 0x5bf   :  { %v7044_v38 = vmax.f32 %v7042_v16, %v7043_v61 }
 0x5c1   :  { %v7130_v58 = vcombine.high %v7044_v38, %v7044_v38  ;;  %v7137_v15 = vrot.slane %v7044_v38, %v15105_v30  ;;  %v6984_v44 = vpop.f32.mrb[20].mxu0  ;;  %v7009_v9 = vpop.f32.mrb[8].mxu1 }
 0x5c2   :  { %v6985_v27 = vadd.f32 %v13903_v37, %v6984_v44  ;;  %v7010_v50 = vadd.f32 %v13903_v37, %v7009_v9  ;;  %v6986_v54 = vpop.f32.mrb[21].mxu0  ;;  %v7011_v39 = vpop.f32.mrb[9].mxu1 }
 0x5c3   :  { %v7144_v14 = vrot.slane %v7130_v58, %v15105_v30  ;;  %v7145_v32 = vcombine.high %v7137_v15, %v7137_v15  ;;  %v7343_v24 = vsel %vm7230_vm9, %v7137_v15, -inf }
 0x5c4   :  { %v7344_v0 = vrot.slane %v7343_v24, 4  ;;  %v7023_v63 = vmax.f32 %v6985_v27, 0.0  ;;  %v7028_v26 = vmax.f32 %v7010_v50, 0.0 }
 0x5c5   :  { %v7146_v46 = vcombine.high %v7144_v14, %v7144_v14  ;;  %v7350_v52 = vsel %vm7230_vm9, %v7145_v32, -inf  ;;  %v7357_v37 = vsel %vm7230_vm9, %v7144_v14, -inf }
 0x5c6   :  { %v7345_v22 = vmax.f32 %v7343_v24, %v7344_v0  ;;  %v7351_v62 = vrot.slane %v7350_v52, 4  ;;  %v7358_v56 = vrot.slane %v7357_v37, 4  ;;  %v7045_v55 = vsel %vm7029_vm14, %v7023_v63, -inf }
 0x5c7   :  { %v7364_v18 = vsel %vm7230_vm9, %v7146_v46, -inf  ;;  %v7047_v35 = vmax.f32 %v7045_v55, %v7046_v53  ;;  %v7052_v17 = vsel %vm7029_vm14, %v7028_v26, -inf }
 0x5c8   :  { %v7346_v43 = vrot.slane %v7345_v22, 2  ;;  %v7352_v60 = vmax.f32 %v7350_v52, %v7351_v62  ;;  %v7359_v51 = vmax.f32 %v7357_v37, %v7358_v56  ;;  %v7365_v41 = vrot.slane %v7364_v18, 4 }
 0x5c9   :  { %v7147_v21 = vcombine.high %v7047_v35, %v7047_v35  ;;  %v7154_v47 = vrot.slane %v7047_v35, %v15105_v30  ;;  %v7053_v12 = vmax.f32 %v7051_v2, %v7052_v17 }
 0x5ca   :  { %v7347_v23 = vmax.f32 %v7345_v22, %v7346_v43  ;;  %v7353_v34 = vrot.slane %v7352_v60, 2  ;;  %v7360_v48 = vrot.slane %v7359_v51, 2  ;;  %v7366_v3 = vmax.f32 %v7364_v18, %v7365_v41 }
 0x5cb   :  { %v7161_v33 = vrot.slane %v7147_v21, %v15105_v30  ;;  %v7162_v19 = vcombine.high %v7154_v47, %v7154_v47  ;;  %v7371_v13 = vsel %vm7230_vm9, %v7154_v47, -inf  ;;  %v7181_v11 = vcombine.high %v7053_v12, %v7053_v12 }
 0x5cc   :  { %v7348_v42 = vrot.slane %v7347_v23, 1  ;;  %v7354_v1 = vmax.f32 %v7352_v60, %v7353_v34  ;;  %v7361_v10 = vmax.f32 %v7359_v51, %v7360_v48  ;;  %v7367_v49 = vrot.slane %v7366_v3, 2 }
 0x5cd   :  { %v7163_v25 = vcombine.high %v7161_v33, %v7161_v33  ;;  %v7372_v8 = vrot.slane %v7371_v13, 4  ;;  %v7378_v28 = vsel %vm7230_vm9, %v7162_v19, -inf  ;;  %v7385_v36 = vsel %vm7230_vm9, %v7161_v33, -inf }
 0x5ce   :  { %v7349_v16 = vmax.f32 %v7347_v23, %v7348_v42  ;;  %v7355_v6 = vrot.slane %v7354_v1, 1  ;;  %v7362_v5 = vrot.slane %v7361_v10, 1  ;;  %v7368_v61 = vmax.f32 %v7366_v3, %v7367_v49 }
 0x5cf   :  { %v7373_v38 = vmax.f32 %v7371_v13, %v7372_v8  ;;  %v7379_v7 = vrot.slane %v7378_v28, 4  ;;  %v7386_v31 = vrot.slane %v7385_v36, 4  ;;  %v7392_v53 = vsel %vm7230_vm9, %v7163_v25, -inf }
 0x5d0   :  { %v7356_v58 = vmax.f32 %v7354_v1, %v7355_v6  ;;  %v7363_v15 = vmax.f32 %v7361_v10, %v7362_v5  ;;  %v7369_v44 = vrot.slane %v7368_v61, 1  ;;  %v7393_v9 = vrot.slane %v7392_v53, 4 }
 0x5d1   :  { %v7374_v59 = vrot.slane %v7373_v38, 2  ;;  %v7380_v40 = vmax.f32 %v7378_v28, %v7379_v7  ;;  %v7387_v27 = vmax.f32 %v7385_v36, %v7386_v31  ;;  %v7188_v50 = vrot.slane %v7053_v12, %v15105_v30 }
 0x5d2   :  { %v7195_v54 = vrot.slane %v7181_v11, %v15105_v30  ;;  %v7370_v39 = vmax.f32 %v7368_v61, %v7369_v44  ;;  %v7394_v14 = vmax.f32 %v7392_v53, %v7393_v9  ;;  %v7509_v32 = vsel %vm6056_vm5, %v7356_v58, %v7349_v16  ;;  %vm15416_vm5 = vmmov %vm15412_vm1 }
 0x5d3   :  { %v7375_v24 = vmax.f32 %v7373_v38, %v7374_v59  ;;  %v7381_v20 = vrot.slane %v7380_v40, 2  ;;  %v7388_v0 = vrot.slane %v7387_v27, 2  ;;  %v7196_v63 = vcombine.high %v7188_v50, %v7188_v50 }
 0x5d4   :  { %v7197_v26 = vcombine.high %v7195_v54, %v7195_v54  ;;  %v7427_v46 = vsel %vm7230_vm9, %v7188_v50, -inf  ;;  %v7441_v52 = vsel %vm7230_vm9, %v7195_v54, -inf  ;;  %v7395_v37 = vrot.slane %v7394_v14, 2  ;;  %v7631_v50 = vld [vmem:[%s14098_s7 + $0x38] sm:$0xff] }
 0x5d5   :  { %v7376_v22 = vrot.slane %v7375_v24, 1  ;;  %v7382_v62 = vmax.f32 %v7380_v40, %v7381_v20  ;;  %v7428_v56 = vrot.slane %v7427_v46, 4  ;;  %v7434_v55 = vsel %vm7230_vm9, %v7196_v63, -inf }
 0x5d6   :  { %v7435_v30 = vrot.slane %v7434_v55, 4  ;;  %v7442_v18 = vrot.slane %v7441_v52, 4  ;;  %v7448_v2 = vsel %vm7230_vm9, %v7197_v26, -inf  ;;  %v7389_v35 = vmax.f32 %v7387_v27, %v7388_v0  ;;  %v7630_v27 = vld [vmem:[%s14098_s7 + $0x30] sm:$0xff] }
 0x5d7   :  { %v7377_v17 = vmax.f32 %v7375_v24, %v7376_v22  ;;  %v7429_v43 = vmax.f32 %v7427_v46, %v7428_v56  ;;  %v7449_v60 = vrot.slane %v7448_v2, 4  ;;  %v7383_v51 = vrot.slane %v7382_v62, 1  ;;  %v7793_v56 = vld [vmem:[%s14100_s8] ss:$0 sm:$0xff] }
 0x5d8   :  { %v7436_v41 = vmax.f32 %v7434_v55, %v7435_v30  ;;  %v7443_v21 = vmax.f32 %v7441_v52, %v7442_v18  ;;  %v7390_v47 = vrot.slane %v7389_v35, 1  ;;  %v7396_v12 = vmax.f32 %v7394_v14, %v7395_v37 }
 0x5d9   :  { %v7430_v23 = vrot.slane %v7429_v43, 2  ;;  %v7384_v34 = vmax.f32 %v7382_v62, %v7383_v51  ;;  %v7510_v48 = vsel %vm6058_vm6, %v7363_v15, %v7509_v32  ;;  %v7450_v3 = vmax.f32 %v7448_v2, %v7449_v60 }
 0x5da   :  { %v7437_v33 = vrot.slane %v7436_v41, 2  ;;  %v7444_v19 = vrot.slane %v7443_v21, 2  ;;  %v7391_v13 = vmax.f32 %v7389_v35, %v7390_v47  ;;  %v7397_v11 = vrot.slane %v7396_v12, 1 }
 0x5db   :  { %v7431_v42 = vmax.f32 %v7429_v43, %v7430_v23  ;;  %v7511_v1 = vsel %vm6060_vm7, %v7370_v39, %v7510_v48  ;;  %v7426_v10 = vmax.f32 %v14009_v4, %v7425_v29  ;;  %v7451_v49 = vrot.slane %v7450_v3, 2  ;;  %v7787_v39 = vld [vmem:[%s14099_s6] ss:$0 sm:$0xff] }
 0x5dc   :  { %v7438_v25 = vmax.f32 %v7436_v41, %v7437_v33  ;;  %v7398_v8 = vmax.f32 %v7396_v12, %v7397_v11  ;;  %v7512_v28 = vsel %vm15416_vm5, %v7377_v17, %v7511_v1  ;;  %v7445_v36 = vmax.f32 %v7443_v21, %v7444_v19 }
 0x5dd   :  { %v7432_v16 = vrot.slane %v7431_v42, 1  ;;  %v7513_v6 = vsel %vm15417_vm4, %v7384_v34, %v7512_v28  ;;  %v7452_v5 = vmax.f32 %v7450_v3, %v7451_v49  ;;  %v7517_v61 = vsel %vm6058_vm6, %v14016_v45, %v14027_v57 }
 0x5de   :  { %v7514_v38 = vsel %vm6066_vm10, %v7391_v13, %v7513_v6  ;;  %v7439_v7 = vrot.slane %v7438_v25, 1  ;;  %v7446_v31 = vrot.slane %v7445_v36, 1  ;;  %v7518_v44 = vsel %vm6060_vm7, %v7426_v10, %v7517_v61 }
 0x5df   :  { %v7433_v53 = vmax.f32 %v7431_v42, %v7432_v16  ;;  %v7515_v4 = vsel %vm6068_vm11, %v7398_v8, %v7514_v38  ;;  %v7453_v29 = vrot.slane %v7452_v5, 1  ;;  %v7884_v54 = vpack.c.bf16 %v7631_v50, %v7630_v27 }
 0x5e0   :  { %7820 = vmatprep.mubr.msk.f32.mxu1 %vm7029_vm14, %v7515_v4  ;;  %v7440_v58 = vmax.f32 %v7438_v25, %v7439_v7  ;;  %v7447_v15 = vmax.f32 %v7445_v36, %v7446_v31  ;;  %vm15420_vm6 = vcmask 523264  }
 0x5e1   :  { %v7454_v9 = vmax.f32 %v7452_v5, %v7453_v29  ;;  %v7519_v59 = vsel %vm15418_vm12, %v7433_v53, %v7518_v44  ;;  %7885 = vmatprep.subr.bf16.mxu1 %v7884_v54  ;;  %vm15421_vm7 = vmmov %vm15420_vm6 }
 0x5e2   :  { %v7520_v40 = vsel %vm15419_vm0, %v7440_v58, %v7519_v59  ;;  %7887 = vmatpush3.bf16.msra.mxu1 %v7884_v54 }
 0x5e3   :  { %v7521_v45 = vsel %vm6066_vm10, %v7447_v15, %v7520_v40  ;;  %vm15422_vm10 = vmmov %vm15420_vm6 }
 0x5e4   :  { %v7522_v57 = vsel %vm6068_vm11, %v7454_v9, %v7521_v45  ;;  %vm15423_vm11 = vmmov %vm15420_vm6 }
 0x5e5   :  { %7821 = vmatmul.mubr.msk.f32.gmra.mrb[12].mxu1 %vm7029_vm14, %v7522_v57 }
 0x668   :  { %v7819_v14 = vpop.f32.mrb[10].mxu1 }
 0x669   :  { %v7607_v32 = vadd.f32 %v7819_v14, %v7787_v39  ;;  %v7601_v24 = vpop.f32.mrb[11].mxu1 }
 0x66a   :  { %v7602_v20 = vadd.f32 %v7787_v39, %v7601_v24 }
 0x66b   :  { %v7621_v63 = vmax.f32 %v7607_v32, 0.0 }
 0x66c   :  { %v7620_v0 = vmax.f32 %v7602_v20, 0.0 }
 0x66e   :  { %7839 = vmatprep.mubr.msk.f32.mxu1 %vm15420_vm6, %v7620_v0 }
 0x66f   :  { %7840 = vmatmul.mubr.msk.f32.vlgmr.msra.gmra.mrb[14].mxu1 %vm15421_vm7, %v7621_v63 }
 0x6b8   :  { %v7822_v26 = vpop.f32.mrb[12].mxu1 }
 0x6b9   :  { %v7617_v46 = vadd.f32 %v7822_v26, %v7787_v39  ;;  %v7611_v52 = vpop.f32.mrb[13].mxu1 }
 0x6ba   :  { %v7612_v37 = vadd.f32 %v7787_v39, %v7611_v52 }
 0x6bb   :  { %v7623_v62 = vmax.f32 %v7617_v46, 0.0 }
 0x6bc   :  { %v7622_v22 = vmax.f32 %v7612_v37, 0.0 }
 0x6be   :  { %7842 = vmatprep.mubr.msk.f32.mxu1 %vm15422_vm10, %v7622_v22 }
 0x6bf   :  { %7843 = vmatmul.mubr.msk.f32.gmra.mrb[16].mxu1 %vm15423_vm11, %v7623_v62 }
 0x742   :  { %v7841_v55 = vpop.f32.mrb[14].mxu1 }
 0x743   :  { %v7723_v30 = vadd.f32 %v7841_v55, %v7793_v56  ;;  %v7717_v18 = vpop.f32.mrb[15].mxu1 }
 0x744   :  { %v7718_v2 = vadd.f32 %v7793_v56, %v7717_v18 }
 0x745   :  { %v7737_v35 = vsub.f32 0.0, %v7723_v30 }
 0x746   :  { %v7736_v17 = vsub.f32 0.0, %v7718_v2 }
 0x747   :  { %v7742_v43 = vmul.f32 1.442695, %v7737_v35 }
 0x748   :  { %v7740_v60 = vmul.f32 1.442695, %v7736_v17 }
 0x749   :  { %8184 = vpow2.f32 %v7742_v43 }
 0x74a   :  { %8186 = vpow2.f32 %v7740_v60 }
 0x753   :  { %v8185_v51 = vpop.eup %8184 }
 0x754   :  { %v8187_v41 = vpop.eup %8186  ;;  %v7749_v21 = vadd.f32 1.0, %v8185_v51 }
 0x755   :  { %v7748_v47 = vadd.f32 1.0, %v8187_v41 }
 0x756   :  { %8188 = vrcp.f32 %v7749_v21 }
 0x757   :  { %8190 = vrcp.f32 %v7748_v47 }
 0x760   :  { %v8189_v12 = vpop.eup %8188 }
 0x761   :  { %v8191_v23 = vpop.eup %8190  ;;  %7761 = vst.msk [vmem:[%s14101_s9 + $0x8] sm:$0xff] %vm4230_vm3, %v8189_v12 }
 0x762   :  { %7760 = vst.msk [vmem:[%s14101_s9] sm:$0xff] %vm4230_vm3, %v8191_v23 }
 0x792   :  { %v7844_v34 = vpop.f32.mrb[16].mxu1 }
 0x793   :  { %v7733_v48 = vadd.f32 %v7844_v34, %v7793_v56  ;;  %v7727_v3 = vpop.f32.mrb[17].mxu1 }
 0x794   :  { %v7728_v33 = vadd.f32 %v7793_v56, %v7727_v3 }
 0x795   :  { %v7739_v19 = vsub.f32 0.0, %v7733_v48 }
 0x796   :  { %v7738_v13 = vsub.f32 0.0, %v7728_v33 }
 0x797   :  { %v7746_v11 = vmul.f32 1.442695, %v7739_v19 }
 0x798   :  { %v7744_v42 = vmul.f32 1.442695, %v7738_v13 }
 0x799   :  { %8192 = vpow2.f32 %v7746_v11 }
 0x79a   :  { %8194 = vpow2.f32 %v7744_v42 }
 0x7a3   :  { %v8193_v1 = vpop.eup %8192 }
 0x7a4   :  { %v8195_v10 = vpop.eup %8194  ;;  %v7751_v49 = vadd.f32 1.0, %v8193_v1 }
 0x7a5   :  { %v7750_v25 = vadd.f32 1.0, %v8195_v10 }
 0x7a6   :  { %8196 = vrcp.f32 %v7751_v49 }
 0x7a7   :  { %8198 = vrcp.f32 %v7750_v25 }
 0x7b0   :  { %v8197_v8 = vpop.eup %8196 }
 0x7b1   :  { %v8199_v28 = vpop.eup %8198  ;;  %7763 = vst.msk [vmem:[%s14101_s9 + $0x18] sm:$0xff] %vm4230_vm3, %v8197_v8 }
 0x7b2   :  { %7762 = vst.msk [vmem:[%s14101_s9 + $0x10] sm:$0xff] %vm4230_vm3, %v8199_v28 }

</bundles_post_ra>
